<compile_context>
chip_gen: v5e
topology: v5e:2x2
jax: 0.10.0
libtpu: 0.0.40
codegen_flags: <defaults>
</compile_context>

<pallas_src>
import math
import functools

import jax
import jax.numpy as jnp
from jax import lax
from jax.experimental import pallas as pl
from jax.experimental.pallas import tpu as pltpu

ACT_DTYPE = jnp.bfloat16            # inter-kernel activations / MXU operands
VMEM_LIMIT = 32 * 1024 * 1024       # explicit scoped-VMEM limit (safe on v5e/v6e/v7x)


def _round_up(v, m):
    return ((v + m - 1) // m) * m


def _cparams(n_axes=1):
    return pltpu.CompilerParams(dimension_semantics=("parallel",) * n_axes,
                                vmem_limit_bytes=VMEM_LIMIT)


def _group_tile(g):
    """Coarsest batch/group tile that still yields two parallel grid steps
    (keeps both v7x TensorCores busy) when the group count allows it."""
    if g >= 2 and g % 2 == 0:
        return g // 2
    return g


def _pick_m_tiling(m):
    """Row tiling for GEMMs: single big block when small, 256-row tiles (>=2
    parallel steps) when large."""
    mp = _round_up(m, 8)
    if mp <= 256:
        return mp, mp
    mp = _round_up(m, 256)
    return mp, 256


# --------------------------- in-kernel helpers ------------------------------

def _erf_approx(x):
    # Abramowitz & Stegun 7.1.26, |err| <= 1.5e-7 — exact-GELU semantics without
    # relying on a lax.erf lowering inside Mosaic (only exp / mul / add / where).
    a1, a2, a3, a4, a5 = 0.254829592, -0.284496736, 1.421413741, -1.453152027, 1.061405429
    p = 0.3275911
    ax = jnp.abs(x)
    t = 1.0 / (1.0 + p * ax)
    poly = ((((a5 * t + a4) * t + a3) * t + a2) * t + a1) * t
    y = 1.0 - poly * jnp.exp(-(ax * ax))
    return jnp.where(x >= 0, y, -y)


def _gelu_exact(x):
    return 0.5 * x * (1.0 + _erf_approx(x * 0.7071067811865476))


# ----------------------------- Pallas kernels -------------------------------

def _gemm_epilogue_kernel(x_ref, w_ref, s_ref, b_ref, o_ref, *, activation):
    """y = act((x @ w) * scale + shift).  Used for stem conv GEMMs (BN+GELU
    fused) and the classifier Linear+ReLU."""
    y = jnp.dot(x_ref[...], w_ref[...], preferred_element_type=jnp.float32)
    y = y * s_ref[...] + b_ref[...]
    if activation == "relu":
        y = jnp.maximum(y, 0.0)
    elif activation == "gelu":
        y = _gelu_exact(y)
    o_ref[...] = y.astype(o_ref.dtype)


def pallas_gemm_epilogue(x, w, scale, shift, activation="none", out_dtype=ACT_DTYPE):
    """x:(M,K) @ w:(K,N), fused scale/shift/activation epilogue.  Output is
    written at true N (no lane padding, no post-slice along N)."""
    m, k = x.shape
    n = w.shape[1]
    mp, tm = _pick_m_tiling(m)
    xb = x.astype(ACT_DTYPE)
    if mp != m:
        xb = jnp.pad(xb, ((0, mp - m), (0, 0)))
    out = pl.pallas_call(
        functools.partial(_gemm_epilogue_kernel, activation=activation),
        out_shape=jax.ShapeDtypeStruct((mp, n), out_dtype),
        grid=(mp // tm,),
        in_specs=[
            pl.BlockSpec((tm, k), lambda i: (i, 0)),
            pl.BlockSpec((k, n), lambda i: (0, 0)),
            pl.BlockSpec((1, n), lambda i: (0, 0)),
            pl.BlockSpec((1, n), lambda i: (0, 0)),
        ],
        out_specs=pl.BlockSpec((tm, n), lambda i: (i, 0)),
        compiler_params=_cparams(1),
    )(xb, w.astype(ACT_DTYPE),
      scale.reshape(1, n).astype(jnp.float32),
      shift.reshape(1, n).astype(jnp.float32))
    return out if mp == m else out[:m]


def _fused_mha_kernel(q_ref, kv_ref, wq_ref, wk_ref, wv_ref, wo_ref,
                      bq_ref, bk_ref, bv_ref, bo_ref, o_ref, *, num_heads):
    """Full nn.MultiheadAttention (eval) for one group:  merged lane-dense
    Q/K/V GEMMs -> per-head scaled-dot-product softmax (f32) -> single
    output-projection GEMM on the concatenated heads."""
    _, l_q, e = q_ref.shape
    hd = e // num_heads
    q2 = q_ref[0]                                             # (L, E) bf16
    kv2 = kv_ref[0]                                           # (S, E) bf16
    # Merged projections (1/sqrt(hd) pre-folded into wq / bq by prepare_params).
    qh = jnp.dot(q2, wq_ref[...], preferred_element_type=jnp.float32) + bq_ref[...]
    kh = jnp.dot(kv2, wk_ref[...], preferred_element_type=jnp.float32) + bk_ref[...]
    vh = jnp.dot(kv2, wv_ref[...], preferred_element_type=jnp.float32) + bv_ref[...]
    outs = []
    for h in range(num_heads):                                # static unrolled
        lo, hi = h * hd, (h + 1) * hd
        q_h = qh[:, lo:hi].astype(ACT_DTYPE)
        k_h = kh[:, lo:hi].astype(ACT_DTYPE)
        v_h = vh[:, lo:hi].astype(ACT_DTYPE)
        s = jnp.einsum('ld,sd->ls', q_h, k_h, preferred_element_type=jnp.float32)
        s = s - jnp.max(s, axis=-1, keepdims=True)
        p = jnp.exp(s)
        p = p * pl.reciprocal(jnp.sum(p, axis=-1, keepdims=True), approx=True)
        outs.append(jnp.dot(p.astype(ACT_DTYPE), v_h,
                            preferred_element_type=jnp.float32))
    o_cat = jnp.concatenate(outs, axis=-1).astype(ACT_DTYPE)  # (L, E)
    out = jnp.dot(o_cat, wo_ref[...], preferred_element_type=jnp.float32) + bo_ref[...]
    o_ref[0] = out.astype(o_ref.dtype)


def pallas_mha(q, kv, p, num_heads):
    """nn.MultiheadAttention semantics.  q:(G,L,E), kv:(G,S,E), bf16 in/out.
    One group per grid step (G==2 here -> both v7x TensorCores busy)."""
    g, l_q, e = q.shape
    s_kv = kv.shape[1]
    rep = lambda shape: pl.BlockSpec(shape, lambda i: (0, 0))
    return pl.pallas_call(
        functools.partial(_fused_mha_kernel, num_heads=num_heads),
        out_shape=jax.ShapeDtypeStruct((g, l_q, e), ACT_DTYPE),
        grid=(g,),
        in_specs=[
            pl.BlockSpec((1, l_q, e), lambda i: (i, 0, 0)),
            pl.BlockSpec((1, s_kv, e), lambda i: (i, 0, 0)),
            rep((e, e)), rep((e, e)), rep((e, e)), rep((e, e)),
            rep((1, e)), rep((1, e)), rep((1, e)), rep((1, e)),
        ],
        out_specs=pl.BlockSpec((1, l_q, e), lambda i: (i, 0, 0)),
        compiler_params=_cparams(1),
    )(q.astype(ACT_DTYPE), kv.astype(ACT_DTYPE),
      p["wq"], p["wk"], p["wv"], p["wo"], p["bq"], p["bk"], p["bv"], p["bo"])


def _attn_epilogue_kernel(ha_ref, va_ref, x_ref, w_ref, b_ref, o_ref):
    """concat(hfc(ha), vfc(va)) as ONE block-diagonal GEMM + residual +
    LayerNorm(C,H,W) (no affine, matching functional layer_norm)."""
    bt, l_q, c = ha_ref.shape
    ha = ha_ref[...].reshape(bt * l_q, c)
    va = va_ref[...].reshape(bt * l_q, c)
    cat = jnp.concatenate([ha, va], axis=-1)                  # (rows, 2C) bf16
    attn = jnp.dot(cat, w_ref[...], preferred_element_type=jnp.float32) + b_ref[...]
    y = attn.reshape(bt, l_q, c) + x_ref[...].astype(jnp.float32)
    mean = jnp.mean(y, axis=(1, 2), keepdims=True)
    cen = y - mean
    var = jnp.mean(cen * cen, axis=(1, 2), keepdims=True)
    o_ref[...] = (cen * lax.rsqrt(var + 1e-5)).astype(o_ref.dtype)


def pallas_attn_epilogue(ha, va, x, w_cat, b_cat):
    b, l_q, c = ha.shape
    bt = _group_tile(b)
    return pl.pallas_call(
        _attn_epilogue_kernel,
        out_shape=jax.ShapeDtypeStruct((b, l_q, c), ACT_DTYPE),
        grid=(b // bt,),
        in_specs=[
            pl.BlockSpec((bt, l_q, c), lambda i: (i, 0, 0)),
            pl.BlockSpec((bt, l_q, c), lambda i: (i, 0, 0)),
            pl.BlockSpec((bt, l_q, c), lambda i: (i, 0, 0)),
            pl.BlockSpec((2 * c, c), lambda i: (0, 0)),
            pl.BlockSpec((1, c), lambda i: (0, 0)),
        ],
        out_specs=pl.BlockSpec((bt, l_q, c), lambda i: (i, 0, 0)),
        compiler_params=_cparams(1),
    )(ha.astype(ACT_DTYPE), va.astype(ACT_DTYPE), x.astype(ACT_DTYPE), w_cat, b_cat)


def _ffn_kernel(x_ref, w1_ref, b1_ref, w2_ref, b2_ref, o_ref):
    """Conv1d(k=1)+ReLU+Conv1d(k=1) + residual + LayerNorm(C,H,W); the hidden
    (rows, 4C) activation never leaves VMEM.  Dropout = identity (eval)."""
    bt, l_q, c = x_ref.shape
    x2 = x_ref[...].reshape(bt * l_q, c)                                  # bf16
    h = jnp.dot(x2, w1_ref[...], preferred_element_type=jnp.float32) + b1_ref[...]
    h = jnp.maximum(h, 0.0)
    y = jnp.dot(h.astype(ACT_DTYPE), w2_ref[...],
                preferred_element_type=jnp.float32) + b2_ref[...]
    y = y.reshape(bt, l_q, c) + x_ref[...].astype(jnp.float32)
    mean = jnp.mean(y, axis=(1, 2), keepdims=True)
    cen = y - mean
    var = jnp.mean(cen * cen, axis=(1, 2), keepdims=True)
    o_ref[...] = (cen * lax.rsqrt(var + 1e-5)).astype(o_ref.dtype)


def pallas_ffn(x, w1, b1, w2, b2):
    b, l_q, c = x.shape
    h1 = w1.shape[1]
    bt = _group_tile(b)
    return pl.pallas_call(
        _ffn_kernel,
        out_shape=jax.ShapeDtypeStruct((b, l_q, c), ACT_DTYPE),
        grid=(b // bt,),
        in_specs=[
            pl.BlockSpec((bt, l_q, c), lambda i: (i, 0, 0)),
            pl.BlockSpec((c, h1), lambda i: (0, 0)),
            pl.BlockSpec((1, h1), lambda i: (0, 0)),
            pl.BlockSpec((h1, c), lambda i: (0, 0)),
            pl.BlockSpec((1, c), lambda i: (0, 0)),
        ],
        out_specs=pl.BlockSpec((bt, l_q, c), lambda i: (i, 0, 0)),
        compiler_params=_cparams(1),
    )(x.astype(ACT_DTYPE), w1, b1, w2, b2)


# ------------------------------- JAX glue ------------------------------------

def conv2d_bn_gelu(x, w_flat, scale, shift, stride, pad):
    """Conv2d(no bias) + BatchNorm(eval, folded) + GELU, channels-last.
    im2col stays bf16; BN/GELU are fused into the Pallas GEMM kernel."""
    # TODO(synk): the kh*kw shifted-window gather could move in-kernel (manual
    # DMA / index_map) to avoid materializing the im2col matrix in HBM.
    b, h, w, cin = x.shape
    cout = w_flat.shape[1]
    k = math.isqrt(w_flat.shape[0] // cin)
    ho = (h + 2 * pad - k) // stride + 1
    wo = (w + 2 * pad - k) // stride + 1
    xp = jnp.pad(x, ((0, 0), (pad, pad), (pad, pad), (0, 0))) if pad else x
    cols = [xp[:, i:i + stride * ho:stride, j:j + stride * wo:stride, :]
            for i in range(k) for j in range(k)]
    col = cols[0] if len(cols) == 1 else jnp.concatenate(cols, axis=-1)
    col = col.reshape(b * ho * wo, k * k * cin)
    y = pallas_gemm_epilogue(col, w_flat, scale, shift, activation="gelu",
                             out_dtype=ACT_DTYPE)
    return y.reshape(b, ho, wo, cout)


def avg_pool_nhwc(x, pool):
    ph, pw = pool
    b, h, w, c = x.shape
    ho, wo = h // ph, w // pw
    y = x[:, :ho * ph, :wo * pw, :].astype(jnp.float32)
    y = y.reshape(b, ho, ph, wo, pw, c).mean(axis=(2, 4))
    return y.astype(ACT_DTYPE)


def sinusoidal_pe(seq, d):
    pos = jnp.arange(seq, dtype=jnp.float32)[:, None]
    div = jnp.exp(jnp.arange(0, d, 2, dtype=jnp.float32) * (-math.log(10000.0) / d))
    pe = jnp.zeros((seq, d), jnp.float32)
    pe = pe.at[:, 0::2].set(jnp.sin(pos * div))
    pe = pe.at[:, 1::2].set(jnp.cos(pos * div))
    return pe


# ------------------------------- modules -------------------------------------

def stem_forward(x, sp):
    strides = (2, 2, 2, 1)
    pads = (1, 1, 1, 0)
    for li, lp in enumerate(sp):
        x = conv2d_bn_gelu(x, lp["w"], lp["scale"], lp["shift"], strides[li], pads[li])
    return x


def pre_forward(x, window):
    # TODO(synk): PositionalEncoding class is not defined in the source file;
    # standard sinusoidal PE (eval mode, no dropout) is assumed.
    b, h, w0, c = x.shape
    exceed = w0 % window
    if exceed:
        x = jnp.pad(x, ((0, 0), (0, 0), (0, window - exceed), (0, 0)))
    b, h, w, c = x.shape
    seq = h * w
    xs = x.reshape(b, seq, c).astype(jnp.float32) + sinusoidal_pe(seq, c)[None]
    return xs.astype(ACT_DTYPE).reshape(b, h, w, c)


def hv_attention_forward(x, ap, heads, pool_stride, window):
    """x: (B, H, W, C) channels-last, bf16.  channels2 > 0 path (module defaults)."""
    b, h, w, c = x.shape
    l_seq = h * w
    q = x.reshape(b, l_seq, c)
    # horizontal attention: q = x, k = v = AvgPool2d(pool_stride)(x)
    kpool = avg_pool_nhwc(x, pool_stride)
    kv = kpool.reshape(b, -1, c)
    ha = pallas_mha(q, kv, ap["h_attn"], heads)                       # (B, L, C)
    # vertical attention: windows along W folded into the group axis -> 1 launch
    nw = w // window
    xv = x.reshape(b, h, nw, window, c).transpose(0, 2, 1, 3, 4)
    xv = xv.reshape(b * nw, h * window, c)
    va = pallas_mha(xv, xv, ap["v_attn"], heads)
    va = va.reshape(b, nw, h, window, c).transpose(0, 2, 1, 3, 4).reshape(b, l_seq, c)
    # fused block-diagonal hfc/vfc GEMM + residual + LayerNorm epilogue
    y = pallas_attn_epilogue(ha, va, q, ap["w_cat"], ap["b_cat"])
    return y.reshape(b, h, w, c)


def ffn_forward(x, fp):
    b, h, w, c = x.shape
    y = pallas_ffn(x.reshape(b, h * w, c), fp["w1"], fp["b1"], fp["w2"], fp["b2"])
    return y.reshape(b, h, w, c)


def cvt_forward(x_nchw, pp, cfg):
    x = x_nchw.transpose(0, 2, 3, 1).astype(ACT_DTYPE)                # NCHW -> NHWC once
    x = stem_forward(x, pp["stem"])
    x = pre_forward(x, cfg["window"])
    for lp in pp["layers"]:
        x = hv_attention_forward(x, lp["attn"], cfg["heads"], cfg["pool_stride"],
                                 cfg["window"])
        x = ffn_forward(x, lp["ffn"])
    b, h, w, c = x.shape
    pooled = x.astype(jnp.float32).mean(axis=(1, 2))                  # AdaptiveAvgPool2d(1)
    y = pallas_gemm_epilogue(pooled, pp["fc_w"], pp["fc_scale"], pp["fc_b"],
                             activation="relu", out_dtype=jnp.float32)
    x_out = x.reshape(b, h * w, c).astype(jnp.float32)                # view(b,c,-1).permute(0,2,1)
    return x_out, y


# ------------------------------ parameters -----------------------------------

def _normal(key, shape, scale=0.02):
    return scale * jax.random.normal(key, shape, dtype=jnp.float32)


def init_params(key, cfg):
    """Parameters in PyTorch layout (as nn.Module would hold them)."""
    in_ch, sc, tc = cfg["in_channels"], cfg["stem_channel"], cfg["transformer_channel"]
    c1, c2 = cfg["channels1"], cfg["channels2"]
    hdim0 = int(tc * cfg["R"])
    keys = iter(jax.random.split(key, 256))
    nk = lambda: next(keys)

    stem = {}
    chans = [in_ch, sc, sc * 2, sc * 4, sc * 8]
    kernels = [3, 3, 3, 1]
    for li in range(4):
        cin, cout, kk = chans[li], chans[li + 1], kernels[li]
        stem[f"w{li+1}"] = _normal(nk(), (cout, cin, kk, kk))
        stem[f"g{li+1}"] = jnp.ones((cout,), jnp.float32)
        stem[f"b{li+1}"] = jnp.zeros((cout,), jnp.float32)
        stem[f"m{li+1}"] = jnp.zeros((cout,), jnp.float32)
        stem[f"v{li+1}"] = jnp.ones((cout,), jnp.float32)

    def mha_params():
        return {"in_w": _normal(nk(), (3 * tc, tc)),
                "in_b": jnp.zeros((3 * tc,), jnp.float32),
                "out_w": _normal(nk(), (tc, tc)),
                "out_b": jnp.zeros((tc,), jnp.float32)}

    layers = []
    for _ in range(cfg["block_layer"]):
        attn = {"h_attn": mha_params(), "v_attn": mha_params(),
                "hfc_w": _normal(nk(), (c1, tc)), "hfc_b": jnp.zeros((c1,), jnp.float32),
                "vfc_w": _normal(nk(), (c2, tc)), "vfc_b": jnp.zeros((c2,), jnp.float32)}
        ffn = {"w1": _normal(nk(), (hdim0, tc)), "b1": jnp.zeros((hdim0,), jnp.float32),
               "w2": _normal(nk(), (tc, hdim0)), "b2": jnp.zeros((tc,), jnp.float32)}
        layers.append({"attn": attn, "ffn": ffn})

    return {"stem": stem, "layers": layers,
            "fc_w": _normal(nk(), (tc, tc)), "fc_b": jnp.zeros((tc,), jnp.float32)}


def prepare_params(params, cfg, eps=1e-5):
    """One-time weight re-layout (transposes, BN fold, block-diag pack, bf16
    casts) so the jitted forward does zero per-call weight preprocessing."""
    tc = cfg["transformer_channel"]
    c1 = cfg["channels1"]
    hd = tc // cfg["heads"]
    scale_q = 1.0 / math.sqrt(hd)

    sp = params["stem"]
    stem = []
    for li in range(4):
        w = sp[f"w{li+1}"]                                   # (Cout, Cin, k, k)
        cout, cin, k, _ = w.shape
        w_flat = w.transpose(2, 3, 1, 0).reshape(k * k * cin, cout)
        s = sp[f"g{li+1}"] * lax.rsqrt(sp[f"v{li+1}"] + eps)
        stem.append({"w": w_flat.astype(ACT_DTYPE),
                     "scale": s.astype(jnp.float32),
                     "shift": (sp[f"b{li+1}"] - sp[f"m{li+1}"] * s).astype(jnp.float32)})

    def mha_prep(p):
        e = tc
        in_w, in_b = p["in_w"], p["in_b"]
        return {"wq": (in_w[:e].T * scale_q).astype(ACT_DTYPE),
                "wk": in_w[e:2 * e].T.astype(ACT_DTYPE),
                "wv": in_w[2 * e:].T.astype(ACT_DTYPE),
                "wo": p["out_w"].T.astype(ACT_DTYPE),
                "bq": (in_b[:e] * scale_q).reshape(1, e).astype(jnp.float32),
                "bk": in_b[e:2 * e].reshape(1, e).astype(jnp.float32),
                "bv": in_b[2 * e:].reshape(1, e).astype(jnp.float32),
                "bo": p["out_b"].reshape(1, e).astype(jnp.float32)}

    layers = []
    for lp in params["layers"]:
        a = lp["attn"]
        w_cat = jnp.zeros((2 * tc, tc), jnp.float32)
        w_cat = w_cat.at[:tc, :c1].set(a["hfc_w"].T)         # hfc -> cols [0:c1]
        w_cat = w_cat.at[tc:, c1:].set(a["vfc_w"].T)         # vfc -> cols [c1:C]
        b_cat = jnp.concatenate([a["hfc_b"], a["vfc_b"]]).reshape(1, tc)
        attn = {"h_attn": mha_prep(a["h_attn"]), "v_attn": mha_prep(a["v_attn"]),
                "w_cat": w_cat.astype(ACT_DTYPE), "b_cat": b_cat.astype(jnp.float32)}
        f = lp["ffn"]
        ffn = {"w1": f["w1"].T.astype(ACT_DTYPE),
               "b1": f["b1"].reshape(1, -1).astype(jnp.float32),
               "w2": f["w2"].T.astype(ACT_DTYPE),
               "b2": f["b2"].reshape(1, -1).astype(jnp.float32)}
        layers.append({"attn": attn, "ffn": ffn})

    return {"stem": stem, "layers": layers,
            "fc_w": params["fc_w"].T.astype(ACT_DTYPE),
            "fc_scale": jnp.ones((tc,), jnp.float32),
            "fc_b": params["fc_b"].astype(jnp.float32)}


# --------------------------------- main ---------------------------------------

if __name__ == "__main__":
    # Small config consistent with the module: stem_channel*8 == transformer_channel.
    cfg = dict(in_channels=3, stem_channel=4, transformer_channel=32, block_layer=2,
               R=4.0, heads=4, alpha=0.75, window=4, pool_stride=(4, 1))
    cfg["channels1"] = int(cfg["transformer_channel"] * cfg["alpha"])   # 24
    cfg["channels2"] = cfg["transformer_channel"] - cfg["channels1"]    # 8

    key = jax.random.PRNGKey(0)
    pkey, xkey = jax.random.split(key)
    params = init_params(pkey, cfg)
    pparams = prepare_params(params, cfg)        # hoisted one-time weight re-layout

    # Input image (B=2, C=3, H=32, W=32) -> stem -> (2, 4, 4, 32) channels-last.
    x = jax.random.normal(xkey, (2, 3, 32, 32), dtype=jnp.float32)

    fwd = jax.jit(lambda inp, prm: cvt_forward(inp, prm, cfg))
    x_out, y_out = fwd(x, pparams)
    jax.block_until_ready((x_out, y_out))
    assert x_out.shape == (2, 16, 32) and y_out.shape == (2, 32)
    assert bool(jnp.isfinite(x_out).all()) and bool(jnp.isfinite(y_out).all())
    print("KERNEL_OK")
</pallas_src>

<mosaic_0001>
module attributes {stable_mosaic.version = 11 : i64} {
  func.func @_gemm_epilogue_kernel(%arg0: i32, %arg1: memref<256x27xbf16, #tpu.memory_space<vmem>>, %arg2: memref<27x4xbf16, #tpu.memory_space<vmem>>, %arg3: memref<1x4xf32, #tpu.memory_space<vmem>>, %arg4: memref<1x4xf32, #tpu.memory_space<vmem>>, %arg5: memref<256x4xbf16, #tpu.memory_space<vmem>>) attributes {dimension_semantics = [#tpu.dimension_semantics<parallel>], iteration_bounds = array<i64: 2>, scalar_prefetch = 0 : i64, scratch_operands = 0 : i64, tpu.core_type = #tpu.core_type<tc>, window_params = [{transform_indices = @transform_0, window_bounds = array<i64: 256, 27>}, {pipeline_mode = #tpu.pipeline_mode<synchronous>, transform_indices = @transform_1, window_bounds = array<i64: 27, 4>}, {pipeline_mode = #tpu.pipeline_mode<synchronous>, transform_indices = @transform_2, window_bounds = array<i64: 1, 4>}, {pipeline_mode = #tpu.pipeline_mode<synchronous>, transform_indices = @transform_3, window_bounds = array<i64: 1, 4>}, {transform_indices = @transform_4, window_bounds = array<i64: 256, 4>}]} {
    %c0 = arith.constant 0 : index
    %c0_0 = arith.constant 0 : index
    %0 = vector.load %arg1[%c0, %c0_0] : memref<256x27xbf16, #tpu.memory_space<vmem>>, vector<256x27xbf16>
    %c0_1 = arith.constant 0 : index
    %c0_2 = arith.constant 0 : index
    %1 = vector.load %arg2[%c0_1, %c0_2] : memref<27x4xbf16, #tpu.memory_space<vmem>>, vector<27x4xbf16>
    %cst = arith.constant dense<0.000000e+00> : vector<256x4xf32>
    %2 = tpu.matmul %0, %1, %cst {dimension_numbers = #tpu.dot_dimension_numbers<[1], [0], [0], [1], [0, 0, 1, 1], [], []>} : vector<256x27xbf16>, vector<27x4xbf16>, vector<256x4xf32> -> vector<256x4xf32>
    %c0_3 = arith.constant 0 : index
    %c0_4 = arith.constant 0 : index
    %3 = vector.load %arg3[%c0_3, %c0_4] : memref<1x4xf32, #tpu.memory_space<vmem>>, vector<1x4xf32>
    %4 = vector.broadcast %3 : vector<1x4xf32> to vector<256x4xf32>
    %5 = arith.mulf %2, %4 : vector<256x4xf32>
    %c0_5 = arith.constant 0 : index
    %c0_6 = arith.constant 0 : index
    %6 = vector.load %arg4[%c0_5, %c0_6] : memref<1x4xf32, #tpu.memory_space<vmem>>, vector<1x4xf32>
    %7 = vector.broadcast %6 : vector<1x4xf32> to vector<256x4xf32>
    %8 = arith.addf %5, %7 : vector<256x4xf32>
    %cst_7 = arith.constant 5.000000e-01 : f32
    %9 = vector.broadcast %cst_7 : f32 to vector<256x4xf32>
    %10 = arith.mulf %9, %8 : vector<256x4xf32>
    %cst_8 = arith.constant 0.707106769 : f32
    %11 = vector.broadcast %cst_8 : f32 to vector<256x4xf32>
    %12 = arith.mulf %8, %11 : vector<256x4xf32>
    %13 = math.absf %12 : vector<256x4xf32>
    %cst_9 = arith.constant 0.327591091 : f32
    %14 = vector.broadcast %cst_9 : f32 to vector<256x4xf32>
    %15 = arith.mulf %14, %13 : vector<256x4xf32>
    %cst_10 = arith.constant 1.000000e+00 : f32
    %16 = vector.broadcast %cst_10 : f32 to vector<256x4xf32>
    %17 = arith.addf %16, %15 : vector<256x4xf32>
    %cst_11 = arith.constant 1.000000e+00 : f32
    %18 = vector.broadcast %cst_11 : f32 to vector<256x4xf32>
    %19 = arith.divf %18, %17 : vector<256x4xf32>
    %cst_12 = arith.constant 1.06140542 : f32
    %20 = vector.broadcast %cst_12 : f32 to vector<256x4xf32>
    %21 = arith.mulf %20, %19 : vector<256x4xf32>
    %cst_13 = arith.constant -1.45315206 : f32
    %22 = vector.broadcast %cst_13 : f32 to vector<256x4xf32>
    %23 = arith.addf %21, %22 : vector<256x4xf32>
    %24 = arith.mulf %23, %19 : vector<256x4xf32>
    %cst_14 = arith.constant 1.42141378 : f32
    %25 = vector.broadcast %cst_14 : f32 to vector<256x4xf32>
    %26 = arith.addf %24, %25 : vector<256x4xf32>
    %27 = arith.mulf %26, %19 : vector<256x4xf32>
    %cst_15 = arith.constant -0.284496725 : f32
    %28 = vector.broadcast %cst_15 : f32 to vector<256x4xf32>
    %29 = arith.addf %27, %28 : vector<256x4xf32>
    %30 = arith.mulf %29, %19 : vector<256x4xf32>
    %cst_16 = arith.constant 0.254829586 : f32
    %31 = vector.broadcast %cst_16 : f32 to vector<256x4xf32>
    %32 = arith.addf %30, %31 : vector<256x4xf32>
    %33 = arith.mulf %32, %19 : vector<256x4xf32>
    %34 = arith.mulf %13, %13 : vector<256x4xf32>
    %cst_17 = arith.constant 0.000000e+00 : f32
    %35 = vector.broadcast %cst_17 : f32 to vector<256x4xf32>
    %36 = arith.subf %35, %34 : vector<256x4xf32>
    %37 = math.exp %36 : vector<256x4xf32>
    %38 = arith.mulf %33, %37 : vector<256x4xf32>
    %cst_18 = arith.constant 1.000000e+00 : f32
    %39 = vector.broadcast %cst_18 : f32 to vector<256x4xf32>
    %40 = arith.subf %39, %38 : vector<256x4xf32>
    %cst_19 = arith.constant 0.000000e+00 : f32
    %41 = vector.broadcast %cst_19 : f32 to vector<256x4xf32>
    %42 = arith.cmpf oge, %12, %41 : vector<256x4xf32>
    %cst_20 = arith.constant 0.000000e+00 : f32
    %43 = vector.broadcast %cst_20 : f32 to vector<256x4xf32>
    %44 = arith.subf %43, %40 : vector<256x4xf32>
    %45 = arith.select %42, %40, %44 : vector<256x4xi1>, vector<256x4xf32>
    %cst_21 = arith.constant 1.000000e+00 : f32
    %46 = vector.broadcast %cst_21 : f32 to vector<256x4xf32>
    %47 = arith.addf %46, %45 : vector<256x4xf32>
    %48 = arith.mulf %10, %47 : vector<256x4xf32>
    %49 = arith.truncf %48 : vector<256x4xf32> to vector<256x4xbf16>
    %c0_22 = arith.constant 0 : index
    %c0_23 = arith.constant 0 : index
    %50 = vector.load %arg5[%c0_22, %c0_23] : memref<256x4xbf16, #tpu.memory_space<vmem>>, vector<256x4xbf16>
    tpu.vector_store %arg5[%c0_22, %c0_23], %49 {strides = array<i32>} : memref<256x4xbf16, #tpu.memory_space<vmem>>, vector<256x4xbf16>,
    return
  }
  func.func @transform_0(%arg0: i32) -> (i32, i32) {
    %c0_i32 = arith.constant 0 : i32
    %c0_i32_0 = arith.constant 0 : i32
    return %arg0, %c0_i32 : i32, i32
  }
  func.func @transform_1(%arg0: i32) -> (i32, i32) {
    %c0_i32 = arith.constant 0 : i32
    %c0_i32_0 = arith.constant 0 : i32
    %c0_i32_1 = arith.constant 0 : i32
    return %c0_i32, %c0_i32_0 : i32, i32
  }
  func.func @transform_2(%arg0: i32) -> (i32, i32) {
    %c0_i32 = arith.constant 0 : i32
    %c0_i32_0 = arith.constant 0 : i32
    %c0_i32_1 = arith.constant 0 : i32
    return %c0_i32, %c0_i32_0 : i32, i32
  }
  func.func @transform_3(%arg0: i32) -> (i32, i32) {
    %c0_i32 = arith.constant 0 : i32
    %c0_i32_0 = arith.constant 0 : i32
    %c0_i32_1 = arith.constant 0 : i32
    return %c0_i32, %c0_i32_0 : i32, i32
  }
  func.func @transform_4(%arg0: i32) -> (i32, i32) {
    %c0_i32 = arith.constant 0 : i32
    %c0_i32_0 = arith.constant 0 : i32
    return %arg0, %c0_i32 : i32, i32
  }
}

module attributes {stable_mosaic.version = 11 : i64} {
  func.func @_gemm_epilogue_kernel(%arg0: i32, %arg1: memref<128x36xbf16, #tpu.memory_space<vmem>>, %arg2: memref<36x8xbf16, #tpu.memory_space<vmem>>, %arg3: memref<1x8xf32, #tpu.memory_space<vmem>>, %arg4: memref<1x8xf32, #tpu.memory_space<vmem>>, %arg5: memref<128x8xbf16, #tpu.memory_space<vmem>>) attributes {dimension_semantics = [#tpu.dimension_semantics<parallel>], iteration_bounds = array<i64: 1>, scalar_prefetch = 0 : i64, scratch_operands = 0 : i64, tpu.core_type = #tpu.core_type<tc>, window_params = [{transform_indices = @transform_0, window_bounds = array<i64: 128, 36>}, {pipeline_mode = #tpu.pipeline_mode<synchronous>, transform_indices = @transform_1, window_bounds = array<i64: 36, 8>}, {pipeline_mode = #tpu.pipeline_mode<synchronous>, transform_indices = @transform_2, window_bounds = array<i64: 1, 8>}, {pipeline_mode = #tpu.pipeline_mode<synchronous>, transform_indices = @transform_3, window_bounds = array<i64: 1, 8>}, {transform_indices = @transform_4, window_bounds = array<i64: 128, 8>}]} {
    %c0 = arith.constant 0 : index
    %c0_0 = arith.constant 0 : index
    %0 = vector.load %arg1[%c0, %c0_0] : memref<128x36xbf16, #tpu.memory_space<vmem>>, vector<128x36xbf16>
    %c0_1 = arith.constant 0 : index
    %c0_2 = arith.constant 0 : index
    %1 = vector.load %arg2[%c0_1, %c0_2] : memref<36x8xbf16, #tpu.memory_space<vmem>>, vector<36x8xbf16>
    %cst = arith.constant dense<0.000000e+00> : vector<128x8xf32>
    %2 = tpu.matmul %0, %1, %cst {dimension_numbers = #tpu.dot_dimension_numbers<[1], [0], [0], [1], [0, 0, 1, 1], [], []>} : vector<128x36xbf16>, vector<36x8xbf16>, vector<128x8xf32> -> vector<128x8xf32>
    %c0_3 = arith.constant 0 : index
    %c0_4 = arith.constant 0 : index
    %3 = vector.load %arg3[%c0_3, %c0_4] : memref<1x8xf32, #tpu.memory_space<vmem>>, vector<1x8xf32>
    %4 = vector.broadcast %3 : vector<1x8xf32> to vector<128x8xf32>
    %5 = arith.mulf %2, %4 : vector<128x8xf32>
    %c0_5 = arith.constant 0 : index
    %c0_6 = arith.constant 0 : index
    %6 = vector.load %arg4[%c0_5, %c0_6] : memref<1x8xf32, #tpu.memory_space<vmem>>, vector<1x8xf32>
    %7 = vector.broadcast %6 : vector<1x8xf32> to vector<128x8xf32>
    %8 = arith.addf %5, %7 : vector<128x8xf32>
    %cst_7 = arith.constant 5.000000e-01 : f32
    %9 = vector.broadcast %cst_7 : f32 to vector<128x8xf32>
    %10 = arith.mulf %9, %8 : vector<128x8xf32>
    %cst_8 = arith.constant 0.707106769 : f32
    %11 = vector.broadcast %cst_8 : f32 to vector<128x8xf32>
    %12 = arith.mulf %8, %11 : vector<128x8xf32>
    %13 = math.absf %12 : vector<128x8xf32>
    %cst_9 = arith.constant 0.327591091 : f32
    %14 = vector.broadcast %cst_9 : f32 to vector<128x8xf32>
    %15 = arith.mulf %14, %13 : vector<128x8xf32>
    %cst_10 = arith.constant 1.000000e+00 : f32
    %16 = vector.broadcast %cst_10 : f32 to vector<128x8xf32>
    %17 = arith.addf %16, %15 : vector<128x8xf32>
    %cst_11 = arith.constant 1.000000e+00 : f32
    %18 = vector.broadcast %cst_11 : f32 to vector<128x8xf32>
    %19 = arith.divf %18, %17 : vector<128x8xf32>
    %cst_12 = arith.constant 1.06140542 : f32
    %20 = vector.broadcast %cst_12 : f32 to vector<128x8xf32>
    %21 = arith.mulf %20, %19 : vector<128x8xf32>
    %cst_13 = arith.constant -1.45315206 : f32
    %22 = vector.broadcast %cst_13 : f32 to vector<128x8xf32>
    %23 = arith.addf %21, %22 : vector<128x8xf32>
    %24 = arith.mulf %23, %19 : vector<128x8xf32>
    %cst_14 = arith.constant 1.42141378 : f32
    %25 = vector.broadcast %cst_14 : f32 to vector<128x8xf32>
    %26 = arith.addf %24, %25 : vector<128x8xf32>
    %27 = arith.mulf %26, %19 : vector<128x8xf32>
    %cst_15 = arith.constant -0.284496725 : f32
    %28 = vector.broadcast %cst_15 : f32 to vector<128x8xf32>
    %29 = arith.addf %27, %28 : vector<128x8xf32>
    %30 = arith.mulf %29, %19 : vector<128x8xf32>
    %cst_16 = arith.constant 0.254829586 : f32
    %31 = vector.broadcast %cst_16 : f32 to vector<128x8xf32>
    %32 = arith.addf %30, %31 : vector<128x8xf32>
    %33 = arith.mulf %32, %19 : vector<128x8xf32>
    %34 = arith.mulf %13, %13 : vector<128x8xf32>
    %cst_17 = arith.constant 0.000000e+00 : f32
    %35 = vector.broadcast %cst_17 : f32 to vector<128x8xf32>
    %36 = arith.subf %35, %34 : vector<128x8xf32>
    %37 = math.exp %36 : vector<128x8xf32>
    %38 = arith.mulf %33, %37 : vector<128x8xf32>
    %cst_18 = arith.constant 1.000000e+00 : f32
    %39 = vector.broadcast %cst_18 : f32 to vector<128x8xf32>
    %40 = arith.subf %39, %38 : vector<128x8xf32>
    %cst_19 = arith.constant 0.000000e+00 : f32
    %41 = vector.broadcast %cst_19 : f32 to vector<128x8xf32>
    %42 = arith.cmpf oge, %12, %41 : vector<128x8xf32>
    %cst_20 = arith.constant 0.000000e+00 : f32
    %43 = vector.broadcast %cst_20 : f32 to vector<128x8xf32>
    %44 = arith.subf %43, %40 : vector<128x8xf32>
    %45 = arith.select %42, %40, %44 : vector<128x8xi1>, vector<128x8xf32>
    %cst_21 = arith.constant 1.000000e+00 : f32
    %46 = vector.broadcast %cst_21 : f32 to vector<128x8xf32>
    %47 = arith.addf %46, %45 : vector<128x8xf32>
    %48 = arith.mulf %10, %47 : vector<128x8xf32>
    %49 = arith.truncf %48 : vector<128x8xf32> to vector<128x8xbf16>
    %c0_22 = arith.constant 0 : index
    %c0_23 = arith.constant 0 : index
    %50 = vector.load %arg5[%c0_22, %c0_23] : memref<128x8xbf16, #tpu.memory_space<vmem>>, vector<128x8xbf16>
    tpu.vector_store %arg5[%c0_22, %c0_23], %49 {strides = array<i32>} : memref<128x8xbf16, #tpu.memory_space<vmem>>, vector<128x8xbf16>,
    return
  }
  func.func @transform_0(%arg0: i32) -> (i32, i32) {
    %c0_i32 = arith.constant 0 : i32
    %c0_i32_0 = arith.constant 0 : i32
    return %arg0, %c0_i32 : i32, i32
  }
  func.func @transform_1(%arg0: i32) -> (i32, i32) {
    %c0_i32 = arith.constant 0 : i32
    %c0_i32_0 = arith.constant 0 : i32
    %c0_i32_1 = arith.constant 0 : i32
    return %c0_i32, %c0_i32_0 : i32, i32
  }
  func.func @transform_2(%arg0: i32) -> (i32, i32) {
    %c0_i32 = arith.constant 0 : i32
    %c0_i32_0 = arith.constant 0 : i32
    %c0_i32_1 = arith.constant 0 : i32
    return %c0_i32, %c0_i32_0 : i32, i32
  }
  func.func @transform_3(%arg0: i32) -> (i32, i32) {
    %c0_i32 = arith.constant 0 : i32
    %c0_i32_0 = arith.constant 0 : i32
    %c0_i32_1 = arith.constant 0 : i32
    return %c0_i32, %c0_i32_0 : i32, i32
  }
  func.func @transform_4(%arg0: i32) -> (i32, i32) {
    %c0_i32 = arith.constant 0 : i32
    %c0_i32_0 = arith.constant 0 : i32
    return %arg0, %c0_i32 : i32, i32
  }
}

module attributes {stable_mosaic.version = 11 : i64} {
  func.func @_gemm_epilogue_kernel(%arg0: i32, %arg1: memref<32x72xbf16, #tpu.memory_space<vmem>>, %arg2: memref<72x16xbf16, #tpu.memory_space<vmem>>, %arg3: memref<1x16xf32, #tpu.memory_space<vmem>>, %arg4: memref<1x16xf32, #tpu.memory_space<vmem>>, %arg5: memref<32x16xbf16, #tpu.memory_space<vmem>>) attributes {dimension_semantics = [#tpu.dimension_semantics<parallel>], iteration_bounds = array<i64: 1>, scalar_prefetch = 0 : i64, scratch_operands = 0 : i64, tpu.core_type = #tpu.core_type<tc>, window_params = [{transform_indices = @transform_0, window_bounds = array<i64: 32, 72>}, {pipeline_mode = #tpu.pipeline_mode<synchronous>, transform_indices = @transform_1, window_bounds = array<i64: 72, 16>}, {pipeline_mode = #tpu.pipeline_mode<synchronous>, transform_indices = @transform_2, window_bounds = array<i64: 1, 16>}, {pipeline_mode = #tpu.pipeline_mode<synchronous>, transform_indices = @transform_3, window_bounds = array<i64: 1, 16>}, {transform_indices = @transform_4, window_bounds = array<i64: 32, 16>}]} {
    %c0 = arith.constant 0 : index
    %c0_0 = arith.constant 0 : index
    %0 = vector.load %arg1[%c0, %c0_0] : memref<32x72xbf16, #tpu.memory_space<vmem>>, vector<32x72xbf16>
    %c0_1 = arith.constant 0 : index
    %c0_2 = arith.constant 0 : index
    %1 = vector.load %arg2[%c0_1, %c0_2] : memref<72x16xbf16, #tpu.memory_space<vmem>>, vector<72x16xbf16>
    %cst = arith.constant dense<0.000000e+00> : vector<32x16xf32>
    %2 = tpu.matmul %0, %1, %cst {dimension_numbers = #tpu.dot_dimension_numbers<[1], [0], [0], [1], [0, 0, 1, 1], [], []>} : vector<32x72xbf16>, vector<72x16xbf16>, vector<32x16xf32> -> vector<32x16xf32>
    %c0_3 = arith.constant 0 : index
    %c0_4 = arith.constant 0 : index
    %3 = vector.load %arg3[%c0_3, %c0_4] : memref<1x16xf32, #tpu.memory_space<vmem>>, vector<1x16xf32>
    %4 = vector.broadcast %3 : vector<1x16xf32> to vector<32x16xf32>
    %5 = arith.mulf %2, %4 : vector<32x16xf32>
    %c0_5 = arith.constant 0 : index
    %c0_6 = arith.constant 0 : index
    %6 = vector.load %arg4[%c0_5, %c0_6] : memref<1x16xf32, #tpu.memory_space<vmem>>, vector<1x16xf32>
    %7 = vector.broadcast %6 : vector<1x16xf32> to vector<32x16xf32>
    %8 = arith.addf %5, %7 : vector<32x16xf32>
    %cst_7 = arith.constant 5.000000e-01 : f32
    %9 = vector.broadcast %cst_7 : f32 to vector<32x16xf32>
    %10 = arith.mulf %9, %8 : vector<32x16xf32>
    %cst_8 = arith.constant 0.707106769 : f32
    %11 = vector.broadcast %cst_8 : f32 to vector<32x16xf32>
    %12 = arith.mulf %8, %11 : vector<32x16xf32>
    %13 = math.absf %12 : vector<32x16xf32>
    %cst_9 = arith.constant 0.327591091 : f32
    %14 = vector.broadcast %cst_9 : f32 to vector<32x16xf32>
    %15 = arith.mulf %14, %13 : vector<32x16xf32>
    %cst_10 = arith.constant 1.000000e+00 : f32
    %16 = vector.broadcast %cst_10 : f32 to vector<32x16xf32>
    %17 = arith.addf %16, %15 : vector<32x16xf32>
    %cst_11 = arith.constant 1.000000e+00 : f32
    %18 = vector.broadcast %cst_11 : f32 to vector<32x16xf32>
    %19 = arith.divf %18, %17 : vector<32x16xf32>
    %cst_12 = arith.constant 1.06140542 : f32
    %20 = vector.broadcast %cst_12 : f32 to vector<32x16xf32>
    %21 = arith.mulf %20, %19 : vector<32x16xf32>
    %cst_13 = arith.constant -1.45315206 : f32
    %22 = vector.broadcast %cst_13 : f32 to vector<32x16xf32>
    %23 = arith.addf %21, %22 : vector<32x16xf32>
    %24 = arith.mulf %23, %19 : vector<32x16xf32>
    %cst_14 = arith.constant 1.42141378 : f32
    %25 = vector.broadcast %cst_14 : f32 to vector<32x16xf32>
    %26 = arith.addf %24, %25 : vector<32x16xf32>
    %27 = arith.mulf %26, %19 : vector<32x16xf32>
    %cst_15 = arith.constant -0.284496725 : f32
    %28 = vector.broadcast %cst_15 : f32 to vector<32x16xf32>
    %29 = arith.addf %27, %28 : vector<32x16xf32>
    %30 = arith.mulf %29, %19 : vector<32x16xf32>
    %cst_16 = arith.constant 0.254829586 : f32
    %31 = vector.broadcast %cst_16 : f32 to vector<32x16xf32>
    %32 = arith.addf %30, %31 : vector<32x16xf32>
    %33 = arith.mulf %32, %19 : vector<32x16xf32>
    %34 = arith.mulf %13, %13 : vector<32x16xf32>
    %cst_17 = arith.constant 0.000000e+00 : f32
    %35 = vector.broadcast %cst_17 : f32 to vector<32x16xf32>
    %36 = arith.subf %35, %34 : vector<32x16xf32>
    %37 = math.exp %36 : vector<32x16xf32>
    %38 = arith.mulf %33, %37 : vector<32x16xf32>
    %cst_18 = arith.constant 1.000000e+00 : f32
    %39 = vector.broadcast %cst_18 : f32 to vector<32x16xf32>
    %40 = arith.subf %39, %38 : vector<32x16xf32>
    %cst_19 = arith.constant 0.000000e+00 : f32
    %41 = vector.broadcast %cst_19 : f32 to vector<32x16xf32>
    %42 = arith.cmpf oge, %12, %41 : vector<32x16xf32>
    %cst_20 = arith.constant 0.000000e+00 : f32
    %43 = vector.broadcast %cst_20 : f32 to vector<32x16xf32>
    %44 = arith.subf %43, %40 : vector<32x16xf32>
    %45 = arith.select %42, %40, %44 : vector<32x16xi1>, vector<32x16xf32>
    %cst_21 = arith.constant 1.000000e+00 : f32
    %46 = vector.broadcast %cst_21 : f32 to vector<32x16xf32>
    %47 = arith.addf %46, %45 : vector<32x16xf32>
    %48 = arith.mulf %10, %47 : vector<32x16xf32>
    %49 = arith.truncf %48 : vector<32x16xf32> to vector<32x16xbf16>
    %c0_22 = arith.constant 0 : index
    %c0_23 = arith.constant 0 : index
    %50 = vector.load %arg5[%c0_22, %c0_23] : memref<32x16xbf16, #tpu.memory_space<vmem>>, vector<32x16xbf16>
    tpu.vector_store %arg5[%c0_22, %c0_23], %49 {strides = array<i32>} : memref<32x16xbf16, #tpu.memory_space<vmem>>, vector<32x16xbf16>,
    return
  }
  func.func @transform_0(%arg0: i32) -> (i32, i32) {
    %c0_i32 = arith.constant 0 : i32
    %c0_i32_0 = arith.constant 0 : i32
    return %arg0, %c0_i32 : i32, i32
  }
  func.func @transform_1(%arg0: i32) -> (i32, i32) {
    %c0_i32 = arith.constant 0 : i32
    %c0_i32_0 = arith.constant 0 : i32
    %c0_i32_1 = arith.constant 0 : i32
    return %c0_i32, %c0_i32_0 : i32, i32
  }
  func.func @transform_2(%arg0: i32) -> (i32, i32) {
    %c0_i32 = arith.constant 0 : i32
    %c0_i32_0 = arith.constant 0 : i32
    %c0_i32_1 = arith.constant 0 : i32
    return %c0_i32, %c0_i32_0 : i32, i32
  }
  func.func @transform_3(%arg0: i32) -> (i32, i32) {
    %c0_i32 = arith.constant 0 : i32
    %c0_i32_0 = arith.constant 0 : i32
    %c0_i32_1 = arith.constant 0 : i32
    return %c0_i32, %c0_i32_0 : i32, i32
  }
  func.func @transform_4(%arg0: i32) -> (i32, i32) {
    %c0_i32 = arith.constant 0 : i32
    %c0_i32_0 = arith.constant 0 : i32
    return %arg0, %c0_i32 : i32, i32
  }
}

module attributes {stable_mosaic.version = 11 : i64} {
  func.func @_gemm_epilogue_kernel(%arg0: i32, %arg1: memref<32x16xbf16, #tpu.memory_space<vmem>>, %arg2: memref<16x32xbf16, #tpu.memory_space<vmem>>, %arg3: memref<1x32xf32, #tpu.memory_space<vmem>>, %arg4: memref<1x32xf32, #tpu.memory_space<vmem>>, %arg5: memref<32x32xbf16, #tpu.memory_space<vmem>>) attributes {dimension_semantics = [#tpu.dimension_semantics<parallel>], iteration_bounds = array<i64: 1>, scalar_prefetch = 0 : i64, scratch_operands = 0 : i64, tpu.core_type = #tpu.core_type<tc>, window_params = [{transform_indices = @transform_0, window_bounds = array<i64: 32, 16>}, {pipeline_mode = #tpu.pipeline_mode<synchronous>, transform_indices = @transform_1, window_bounds = array<i64: 16, 32>}, {pipeline_mode = #tpu.pipeline_mode<synchronous>, transform_indices = @transform_2, window_bounds = array<i64: 1, 32>}, {pipeline_mode = #tpu.pipeline_mode<synchronous>, transform_indices = @transform_3, window_bounds = array<i64: 1, 32>}, {transform_indices = @transform_4, window_bounds = array<i64: 32, 32>}]} {
    %c0 = arith.constant 0 : index
    %c0_0 = arith.constant 0 : index
    %0 = vector.load %arg1[%c0, %c0_0] : memref<32x16xbf16, #tpu.memory_space<vmem>>, vector<32x16xbf16>
    %c0_1 = arith.constant 0 : index
    %c0_2 = arith.constant 0 : index
    %1 = vector.load %arg2[%c0_1, %c0_2] : memref<16x32xbf16, #tpu.memory_space<vmem>>, vector<16x32xbf16>
    %cst = arith.constant dense<0.000000e+00> : vector<32x32xf32>
    %2 = tpu.matmul %0, %1, %cst {dimension_numbers = #tpu.dot_dimension_numbers<[1], [0], [0], [1], [0, 0, 1, 1], [], []>} : vector<32x16xbf16>, vector<16x32xbf16>, vector<32x32xf32> -> vector<32x32xf32>
    %c0_3 = arith.constant 0 : index
    %c0_4 = arith.constant 0 : index
    %3 = vector.load %arg3[%c0_3, %c0_4] : memref<1x32xf32, #tpu.memory_space<vmem>>, vector<1x32xf32>
    %4 = vector.broadcast %3 : vector<1x32xf32> to vector<32x32xf32>
    %5 = arith.mulf %2, %4 : vector<32x32xf32>
    %c0_5 = arith.constant 0 : index
    %c0_6 = arith.constant 0 : index
    %6 = vector.load %arg4[%c0_5, %c0_6] : memref<1x32xf32, #tpu.memory_space<vmem>>, vector<1x32xf32>
    %7 = vector.broadcast %6 : vector<1x32xf32> to vector<32x32xf32>
    %8 = arith.addf %5, %7 : vector<32x32xf32>
    %cst_7 = arith.constant 5.000000e-01 : f32
    %9 = vector.broadcast %cst_7 : f32 to vector<32x32xf32>
    %10 = arith.mulf %9, %8 : vector<32x32xf32>
    %cst_8 = arith.constant 0.707106769 : f32
    %11 = vector.broadcast %cst_8 : f32 to vector<32x32xf32>
    %12 = arith.mulf %8, %11 : vector<32x32xf32>
    %13 = math.absf %12 : vector<32x32xf32>
    %cst_9 = arith.constant 0.327591091 : f32
    %14 = vector.broadcast %cst_9 : f32 to vector<32x32xf32>
    %15 = arith.mulf %14, %13 : vector<32x32xf32>
    %cst_10 = arith.constant 1.000000e+00 : f32
    %16 = vector.broadcast %cst_10 : f32 to vector<32x32xf32>
    %17 = arith.addf %16, %15 : vector<32x32xf32>
    %cst_11 = arith.constant 1.000000e+00 : f32
    %18 = vector.broadcast %cst_11 : f32 to vector<32x32xf32>
    %19 = arith.divf %18, %17 : vector<32x32xf32>
    %cst_12 = arith.constant 1.06140542 : f32
    %20 = vector.broadcast %cst_12 : f32 to vector<32x32xf32>
    %21 = arith.mulf %20, %19 : vector<32x32xf32>
    %cst_13 = arith.constant -1.45315206 : f32
    %22 = vector.broadcast %cst_13 : f32 to vector<32x32xf32>
    %23 = arith.addf %21, %22 : vector<32x32xf32>
    %24 = arith.mulf %23, %19 : vector<32x32xf32>
    %cst_14 = arith.constant 1.42141378 : f32
    %25 = vector.broadcast %cst_14 : f32 to vector<32x32xf32>
    %26 = arith.addf %24, %25 : vector<32x32xf32>
    %27 = arith.mulf %26, %19 : vector<32x32xf32>
    %cst_15 = arith.constant -0.284496725 : f32
    %28 = vector.broadcast %cst_15 : f32 to vector<32x32xf32>
    %29 = arith.addf %27, %28 : vector<32x32xf32>
    %30 = arith.mulf %29, %19 : vector<32x32xf32>
    %cst_16 = arith.constant 0.254829586 : f32
    %31 = vector.broadcast %cst_16 : f32 to vector<32x32xf32>
    %32 = arith.addf %30, %31 : vector<32x32xf32>
    %33 = arith.mulf %32, %19 : vector<32x32xf32>
    %34 = arith.mulf %13, %13 : vector<32x32xf32>
    %cst_17 = arith.constant 0.000000e+00 : f32
    %35 = vector.broadcast %cst_17 : f32 to vector<32x32xf32>
    %36 = arith.subf %35, %34 : vector<32x32xf32>
    %37 = math.exp %36 : vector<32x32xf32>
    %38 = arith.mulf %33, %37 : vector<32x32xf32>
    %cst_18 = arith.constant 1.000000e+00 : f32
    %39 = vector.broadcast %cst_18 : f32 to vector<32x32xf32>
    %40 = arith.subf %39, %38 : vector<32x32xf32>
    %cst_19 = arith.constant 0.000000e+00 : f32
    %41 = vector.broadcast %cst_19 : f32 to vector<32x32xf32>
    %42 = arith.cmpf oge, %12, %41 : vector<32x32xf32>
    %cst_20 = arith.constant 0.000000e+00 : f32
    %43 = vector.broadcast %cst_20 : f32 to vector<32x32xf32>
    %44 = arith.subf %43, %40 : vector<32x32xf32>
    %45 = arith.select %42, %40, %44 : vector<32x32xi1>, vector<32x32xf32>
    %cst_21 = arith.constant 1.000000e+00 : f32
    %46 = vector.broadcast %cst_21 : f32 to vector<32x32xf32>
    %47 = arith.addf %46, %45 : vector<32x32xf32>
    %48 = arith.mulf %10, %47 : vector<32x32xf32>
    %49 = arith.truncf %48 : vector<32x32xf32> to vector<32x32xbf16>
    %c0_22 = arith.constant 0 : index
    %c0_23 = arith.constant 0 : index
    %50 = vector.load %arg5[%c0_22, %c0_23] : memref<32x32xbf16, #tpu.memory_space<vmem>>, vector<32x32xbf16>
    tpu.vector_store %arg5[%c0_22, %c0_23], %49 {strides = array<i32>} : memref<32x32xbf16, #tpu.memory_space<vmem>>, vector<32x32xbf16>,
    return
  }
  func.func @transform_0(%arg0: i32) -> (i32, i32) {
    %c0_i32 = arith.constant 0 : i32
    %c0_i32_0 = arith.constant 0 : i32
    return %arg0, %c0_i32 : i32, i32
  }
  func.func @transform_1(%arg0: i32) -> (i32, i32) {
    %c0_i32 = arith.constant 0 : i32
    %c0_i32_0 = arith.constant 0 : i32
    %c0_i32_1 = arith.constant 0 : i32
    return %c0_i32, %c0_i32_0 : i32, i32
  }
  func.func @transform_2(%arg0: i32) -> (i32, i32) {
    %c0_i32 = arith.constant 0 : i32
    %c0_i32_0 = arith.constant 0 : i32
    %c0_i32_1 = arith.constant 0 : i32
    return %c0_i32, %c0_i32_0 : i32, i32
  }
  func.func @transform_3(%arg0: i32) -> (i32, i32) {
    %c0_i32 = arith.constant 0 : i32
    %c0_i32_0 = arith.constant 0 : i32
    %c0_i32_1 = arith.constant 0 : i32
    return %c0_i32, %c0_i32_0 : i32, i32
  }
  func.func @transform_4(%arg0: i32) -> (i32, i32) {
    %c0_i32 = arith.constant 0 : i32
    %c0_i32_0 = arith.constant 0 : i32
    return %arg0, %c0_i32 : i32, i32
  }
}

module attributes {stable_mosaic.version = 11 : i64} {
  func.func @_fused_mha_kernel(%arg0: i32, %arg1: memref<1x16x32xbf16, #tpu.memory_space<vmem>>, %arg2: memref<1x16x32xbf16, #tpu.memory_space<vmem>>, %arg3: memref<32x32xbf16, #tpu.memory_space<vmem>>, %arg4: memref<32x32xbf16, #tpu.memory_space<vmem>>, %arg5: memref<32x32xbf16, #tpu.memory_space<vmem>>, %arg6: memref<32x32xbf16, #tpu.memory_space<vmem>>, %arg7: memref<1x32xf32, #tpu.memory_space<vmem>>, %arg8: memref<1x32xf32, #tpu.memory_space<vmem>>, %arg9: memref<1x32xf32, #tpu.memory_space<vmem>>, %arg10: memref<1x32xf32, #tpu.memory_space<vmem>>, %arg11: memref<1x16x32xbf16, #tpu.memory_space<vmem>>) attributes {dimension_semantics = [#tpu.dimension_semantics<parallel>], iteration_bounds = array<i64: 2>, scalar_prefetch = 0 : i64, scratch_operands = 0 : i64, tpu.core_type = #tpu.core_type<tc>, window_params = [{transform_indices = @transform_0, window_bounds = array<i64: 1, 16, 32>}, {transform_indices = @transform_1, window_bounds = array<i64: 1, 16, 32>}, {pipeline_mode = #tpu.pipeline_mode<synchronous>, transform_indices = @transform_2, window_bounds = array<i64: 32, 32>}, {pipeline_mode = #tpu.pipeline_mode<synchronous>, transform_indices = @transform_3, window_bounds = array<i64: 32, 32>}, {pipeline_mode = #tpu.pipeline_mode<synchronous>, transform_indices = @transform_4, window_bounds = array<i64: 32, 32>}, {pipeline_mode = #tpu.pipeline_mode<synchronous>, transform_indices = @transform_5, window_bounds = array<i64: 32, 32>}, {pipeline_mode = #tpu.pipeline_mode<synchronous>, transform_indices = @transform_6, window_bounds = array<i64: 1, 32>}, {pipeline_mode = #tpu.pipeline_mode<synchronous>, transform_indices = @transform_7, window_bounds = array<i64: 1, 32>}, {pipeline_mode = #tpu.pipeline_mode<synchronous>, transform_indices = @transform_8, window_bounds = array<i64: 1, 32>}, {pipeline_mode = #tpu.pipeline_mode<synchronous>, transform_indices = @transform_9, window_bounds = array<i64: 1, 32>}, {transform_indices = @transform_10, window_bounds = array<i64: 1, 16, 32>}]} {
    %c0 = arith.constant 0 : index
    %c0_0 = arith.constant 0 : index
    %c0_1 = arith.constant 0 : index
    %0 = vector.load %arg1[%c0, %c0_0, %c0_1] : memref<1x16x32xbf16, #tpu.memory_space<vmem>>, vector<1x16x32xbf16>
    %1 = vector.shape_cast %0 : vector<1x16x32xbf16> to vector<16x32xbf16>
    %c0_2 = arith.constant 0 : index
    %c0_3 = arith.constant 0 : index
    %c0_4 = arith.constant 0 : index
    %2 = vector.load %arg2[%c0_2, %c0_3, %c0_4] : memref<1x16x32xbf16, #tpu.memory_space<vmem>>, vector<1x16x32xbf16>
    %3 = vector.shape_cast %2 : vector<1x16x32xbf16> to vector<16x32xbf16>
    %c0_5 = arith.constant 0 : index
    %c0_6 = arith.constant 0 : index
    %4 = vector.load %arg3[%c0_5, %c0_6] : memref<32x32xbf16, #tpu.memory_space<vmem>>, vector<32x32xbf16>
    %cst = arith.constant dense<0.000000e+00> : vector<16x32xf32>
    %5 = tpu.matmul %1, %4, %cst {dimension_numbers = #tpu.dot_dimension_numbers<[1], [0], [0], [1], [0, 0, 1, 1], [], []>} : vector<16x32xbf16>, vector<32x32xbf16>, vector<16x32xf32> -> vector<16x32xf32>
    %c0_7 = arith.constant 0 : index
    %c0_8 = arith.constant 0 : index
    %6 = vector.load %arg7[%c0_7, %c0_8] : memref<1x32xf32, #tpu.memory_space<vmem>>, vector<1x32xf32>
    %7 = vector.broadcast %6 : vector<1x32xf32> to vector<16x32xf32>
    %8 = arith.addf %5, %7 : vector<16x32xf32>
    %c0_9 = arith.constant 0 : index
    %c0_10 = arith.constant 0 : index
    %9 = vector.load %arg4[%c0_9, %c0_10] : memref<32x32xbf16, #tpu.memory_space<vmem>>, vector<32x32xbf16>
    %cst_11 = arith.constant dense<0.000000e+00> : vector<16x32xf32>
    %10 = tpu.matmul %3, %9, %cst_11 {dimension_numbers = #tpu.dot_dimension_numbers<[1], [0], [0], [1], [0, 0, 1, 1], [], []>} : vector<16x32xbf16>, vector<32x32xbf16>, vector<16x32xf32> -> vector<16x32xf32>
    %c0_12 = arith.constant 0 : index
    %c0_13 = arith.constant 0 : index
    %11 = vector.load %arg8[%c0_12, %c0_13] : memref<1x32xf32, #tpu.memory_space<vmem>>, vector<1x32xf32>
    %12 = vector.broadcast %11 : vector<1x32xf32> to vector<16x32xf32>
    %13 = arith.addf %10, %12 : vector<16x32xf32>
    %c0_14 = arith.constant 0 : index
    %c0_15 = arith.constant 0 : index
    %14 = vector.load %arg5[%c0_14, %c0_15] : memref<32x32xbf16, #tpu.memory_space<vmem>>, vector<32x32xbf16>
    %cst_16 = arith.constant dense<0.000000e+00> : vector<16x32xf32>
    %15 = tpu.matmul %3, %14, %cst_16 {dimension_numbers = #tpu.dot_dimension_numbers<[1], [0], [0], [1], [0, 0, 1, 1], [], []>} : vector<16x32xbf16>, vector<32x32xbf16>, vector<16x32xf32> -> vector<16x32xf32>
    %c0_17 = arith.constant 0 : index
    %c0_18 = arith.constant 0 : index
    %16 = vector.load %arg9[%c0_17, %c0_18] : memref<1x32xf32, #tpu.memory_space<vmem>>, vector<1x32xf32>
    %17 = vector.broadcast %16 : vector<1x32xf32> to vector<16x32xf32>
    %18 = arith.addf %15, %17 : vector<16x32xf32>
    %19 = vector.extract_strided_slice %8 {offsets = [0, 0], sizes = [16, 8], strides = [1, 1]} : vector<16x32xf32> to vector<16x8xf32>
    %20 = arith.truncf %19 : vector<16x8xf32> to vector<16x8xbf16>
    %21 = vector.extract_strided_slice %13 {offsets = [0, 0], sizes = [16, 8], strides = [1, 1]} : vector<16x32xf32> to vector<16x8xf32>
    %22 = arith.truncf %21 : vector<16x8xf32> to vector<16x8xbf16>
    %23 = vector.extract_strided_slice %18 {offsets = [0, 0], sizes = [16, 8], strides = [1, 1]} : vector<16x32xf32> to vector<16x8xf32>
    %24 = arith.truncf %23 : vector<16x8xf32> to vector<16x8xbf16>
    "tpu.trace_start"() <{level = 10 : i32, message = "ld,sd->ls"}> : () -> ()
    %cst_19 = arith.constant dense<0.000000e+00> : vector<16x16xf32>
    %25 = tpu.matmul %20, %22, %cst_19 {dimension_numbers = #tpu.dot_dimension_numbers<[1], [1], [0], [0], [0, 0, 1, 0], [], []>} : vector<16x8xbf16>, vector<16x8xbf16>, vector<16x16xf32> -> vector<16x16xf32>
    "tpu.trace_stop"() : () -> ()
    %cst_20 = arith.constant dense<0xFF800000> : vector<16xf32>
    %26 = vector.multi_reduction <maximumf>, %25, %cst_20 [1] : vector<16x16xf32> to vector<16xf32>
    %27 = vector.shape_cast %26 : vector<16xf32> to vector<16x1xf32>
    %28 = vector.broadcast %27 : vector<16x1xf32> to vector<16x16xf32>
    %29 = arith.subf %25, %28 : vector<16x16xf32>
    %30 = math.exp %29 : vector<16x16xf32>
    %cst_21 = arith.constant dense<0.000000e+00> : vector<16xf32>
    %31 = vector.multi_reduction <add>, %30, %cst_21 [1] : vector<16x16xf32> to vector<16xf32>
    %32 = vector.shape_cast %31 : vector<16xf32> to vector<16x1xf32>
    %33 = tpu.reciprocal %32 {approx = true} : vector<16x1xf32> -> vector<16x1xf32>
    %34 = vector.broadcast %33 : vector<16x1xf32> to vector<16x16xf32>
    %35 = arith.mulf %30, %34 : vector<16x16xf32>
    %36 = arith.truncf %35 : vector<16x16xf32> to vector<16x16xbf16>
    %cst_22 = arith.constant dense<0.000000e+00> : vector<16x8xf32>
    %37 = tpu.matmul %36, %24, %cst_22 {dimension_numbers = #tpu.dot_dimension_numbers<[1], [0], [0], [1], [0, 0, 1, 1], [], []>} : vector<16x16xbf16>, vector<16x8xbf16>, vector<16x8xf32> -> vector<16x8xf32>
    %38 = vector.extract_strided_slice %8 {offsets = [0, 8], sizes = [16, 8], strides = [1, 1]} : vector<16x32xf32> to vector<16x8xf32>
    %39 = arith.truncf %38 : vector<16x8xf32> to vector<16x8xbf16>
    %40 = vector.extract_strided_slice %13 {offsets = [0, 8], sizes = [16, 8], strides = [1, 1]} : vector<16x32xf32> to vector<16x8xf32>
    %41 = arith.truncf %40 : vector<16x8xf32> to vector<16x8xbf16>
    %42 = vector.extract_strided_slice %18 {offsets = [0, 8], sizes = [16, 8], strides = [1, 1]} : vector<16x32xf32> to vector<16x8xf32>
    %43 = arith.truncf %42 : vector<16x8xf32> to vector<16x8xbf16>
    "tpu.trace_start"() <{level = 10 : i32, message = "ld,sd->ls"}> : () -> ()
    %cst_23 = arith.constant dense<0.000000e+00> : vector<16x16xf32>
    %44 = tpu.matmul %39, %41, %cst_23 {dimension_numbers = #tpu.dot_dimension_numbers<[1], [1], [0], [0], [0, 0, 1, 0], [], []>} : vector<16x8xbf16>, vector<16x8xbf16>, vector<16x16xf32> -> vector<16x16xf32>
    "tpu.trace_stop"() : () -> ()
    %cst_24 = arith.constant dense<0xFF800000> : vector<16xf32>
    %45 = vector.multi_reduction <maximumf>, %44, %cst_24 [1] : vector<16x16xf32> to vector<16xf32>
    %46 = vector.shape_cast %45 : vector<16xf32> to vector<16x1xf32>
    %47 = vector.broadcast %46 : vector<16x1xf32> to vector<16x16xf32>
    %48 = arith.subf %44, %47 : vector<16x16xf32>
    %49 = math.exp %48 : vector<16x16xf32>
    %cst_25 = arith.constant dense<0.000000e+00> : vector<16xf32>
    %50 = vector.multi_reduction <add>, %49, %cst_25 [1] : vector<16x16xf32> to vector<16xf32>
    %51 = vector.shape_cast %50 : vector<16xf32> to vector<16x1xf32>
    %52 = tpu.reciprocal %51 {approx = true} : vector<16x1xf32> -> vector<16x1xf32>
    %53 = vector.broadcast %52 : vector<16x1xf32> to vector<16x16xf32>
    %54 = arith.mulf %49, %53 : vector<16x16xf32>
    %55 = arith.truncf %54 : vector<16x16xf32> to vector<16x16xbf16>
    %cst_26 = arith.constant dense<0.000000e+00> : vector<16x8xf32>
    %56 = tpu.matmul %55, %43, %cst_26 {dimension_numbers = #tpu.dot_dimension_numbers<[1], [0], [0], [1], [0, 0, 1, 1], [], []>} : vector<16x16xbf16>, vector<16x8xbf16>, vector<16x8xf32> -> vector<16x8xf32>
    %57 = vector.extract_strided_slice %8 {offsets = [0, 16], sizes = [16, 8], strides = [1, 1]} : vector<16x32xf32> to vector<16x8xf32>
    %58 = arith.truncf %57 : vector<16x8xf32> to vector<16x8xbf16>
    %59 = vector.extract_strided_slice %13 {offsets = [0, 16], sizes = [16, 8], strides = [1, 1]} : vector<16x32xf32> to vector<16x8xf32>
    %60 = arith.truncf %59 : vector<16x8xf32> to vector<16x8xbf16>
    %61 = vector.extract_strided_slice %18 {offsets = [0, 16], sizes = [16, 8], strides = [1, 1]} : vector<16x32xf32> to vector<16x8xf32>
    %62 = arith.truncf %61 : vector<16x8xf32> to vector<16x8xbf16>
    "tpu.trace_start"() <{level = 10 : i32, message = "ld,sd->ls"}> : () -> ()
    %cst_27 = arith.constant dense<0.000000e+00> : vector<16x16xf32>
    %63 = tpu.matmul %58, %60, %cst_27 {dimension_numbers = #tpu.dot_dimension_numbers<[1], [1], [0], [0], [0, 0, 1, 0], [], []>} : vector<16x8xbf16>, vector<16x8xbf16>, vector<16x16xf32> -> vector<16x16xf32>
    "tpu.trace_stop"() : () -> ()
    %cst_28 = arith.constant dense<0xFF800000> : vector<16xf32>
    %64 = vector.multi_reduction <maximumf>, %63, %cst_28 [1] : vector<16x16xf32> to vector<16xf32>
    %65 = vector.shape_cast %64 : vector<16xf32> to vector<16x1xf32>
    %66 = vector.broadcast %65 : vector<16x1xf32> to vector<16x16xf32>
    %67 = arith.subf %63, %66 : vector<16x16xf32>
    %68 = math.exp %67 : vector<16x16xf32>
    %cst_29 = arith.constant dense<0.000000e+00> : vector<16xf32>
    %69 = vector.multi_reduction <add>, %68, %cst_29 [1] : vector<16x16xf32> to vector<16xf32>
    %70 = vector.shape_cast %69 : vector<16xf32> to vector<16x1xf32>
    %71 = tpu.reciprocal %70 {approx = true} : vector<16x1xf32> -> vector<16x1xf32>
    %72 = vector.broadcast %71 : vector<16x1xf32> to vector<16x16xf32>
    %73 = arith.mulf %68, %72 : vector<16x16xf32>
    %74 = arith.truncf %73 : vector<16x16xf32> to vector<16x16xbf16>
    %cst_30 = arith.constant dense<0.000000e+00> : vector<16x8xf32>
    %75 = tpu.matmul %74, %62, %cst_30 {dimension_numbers = #tpu.dot_dimension_numbers<[1], [0], [0], [1], [0, 0, 1, 1], [], []>} : vector<16x16xbf16>, vector<16x8xbf16>, vector<16x8xf32> -> vector<16x8xf32>
    %76 = vector.extract_strided_slice %8 {offsets = [0, 24], sizes = [16, 8], strides = [1, 1]} : vector<16x32xf32> to vector<16x8xf32>
    %77 = arith.truncf %76 : vector<16x8xf32> to vector<16x8xbf16>
    %78 = vector.extract_strided_slice %13 {offsets = [0, 24], sizes = [16, 8], strides = [1, 1]} : vector<16x32xf32> to vector<16x8xf32>
    %79 = arith.truncf %78 : vector<16x8xf32> to vector<16x8xbf16>
    %80 = vector.extract_strided_slice %18 {offsets = [0, 24], sizes = [16, 8], strides = [1, 1]} : vector<16x32xf32> to vector<16x8xf32>
    %81 = arith.truncf %80 : vector<16x8xf32> to vector<16x8xbf16>
    "tpu.trace_start"() <{level = 10 : i32, message = "ld,sd->ls"}> : () -> ()
    %cst_31 = arith.constant dense<0.000000e+00> : vector<16x16xf32>
    %82 = tpu.matmul %77, %79, %cst_31 {dimension_numbers = #tpu.dot_dimension_numbers<[1], [1], [0], [0], [0, 0, 1, 0], [], []>} : vector<16x8xbf16>, vector<16x8xbf16>, vector<16x16xf32> -> vector<16x16xf32>
    "tpu.trace_stop"() : () -> ()
    %cst_32 = arith.constant dense<0xFF800000> : vector<16xf32>
    %83 = vector.multi_reduction <maximumf>, %82, %cst_32 [1] : vector<16x16xf32> to vector<16xf32>
    %84 = vector.shape_cast %83 : vector<16xf32> to vector<16x1xf32>
    %85 = vector.broadcast %84 : vector<16x1xf32> to vector<16x16xf32>
    %86 = arith.subf %82, %85 : vector<16x16xf32>
    %87 = math.exp %86 : vector<16x16xf32>
    %cst_33 = arith.constant dense<0.000000e+00> : vector<16xf32>
    %88 = vector.multi_reduction <add>, %87, %cst_33 [1] : vector<16x16xf32> to vector<16xf32>
    %89 = vector.shape_cast %88 : vector<16xf32> to vector<16x1xf32>
    %90 = tpu.reciprocal %89 {approx = true} : vector<16x1xf32> -> vector<16x1xf32>
    %91 = vector.broadcast %90 : vector<16x1xf32> to vector<16x16xf32>
    %92 = arith.mulf %87, %91 : vector<16x16xf32>
    %93 = arith.truncf %92 : vector<16x16xf32> to vector<16x16xbf16>
    %cst_34 = arith.constant dense<0.000000e+00> : vector<16x8xf32>
    %94 = tpu.matmul %93, %81, %cst_34 {dimension_numbers = #tpu.dot_dimension_numbers<[1], [0], [0], [1], [0, 0, 1, 1], [], []>} : vector<16x16xbf16>, vector<16x8xbf16>, vector<16x8xf32> -> vector<16x8xf32>
    %95 = tpu.concatenate %37, %56, %75, %94 in 1 : vector<16x8xf32>, vector<16x8xf32>, vector<16x8xf32>, vector<16x8xf32> -> vector<16x32xf32>
    %96 = arith.truncf %95 : vector<16x32xf32> to vector<16x32xbf16>
    %c0_35 = arith.constant 0 : index
    %c0_36 = arith.constant 0 : index
    %97 = vector.load %arg6[%c0_35, %c0_36] : memref<32x32xbf16, #tpu.memory_space<vmem>>, vector<32x32xbf16>
    %cst_37 = arith.constant dense<0.000000e+00> : vector<16x32xf32>
    %98 = tpu.matmul %96, %97, %cst_37 {dimension_numbers = #tpu.dot_dimension_numbers<[1], [0], [0], [1], [0, 0, 1, 1], [], []>} : vector<16x32xbf16>, vector<32x32xbf16>, vector<16x32xf32> -> vector<16x32xf32>
    %c0_38 = arith.constant 0 : index
    %c0_39 = arith.constant 0 : index
    %99 = vector.load %arg10[%c0_38, %c0_39] : memref<1x32xf32, #tpu.memory_space<vmem>>, vector<1x32xf32>
    %100 = vector.broadcast %99 : vector<1x32xf32> to vector<16x32xf32>
    %101 = arith.addf %98, %100 : vector<16x32xf32>
    %102 = arith.truncf %101 : vector<16x32xf32> to vector<16x32xbf16>
    %c0_40 = arith.constant 0 : index
    %c0_41 = arith.constant 0 : index
    %c0_42 = arith.constant 0 : index
    %103 = vector.load %arg11[%c0_40, %c0_41, %c0_42] : memref<1x16x32xbf16, #tpu.memory_space<vmem>>, vector<1x16x32xbf16>
    %104 = vector.shape_cast %103 : vector<1x16x32xbf16> to vector<16x32xbf16>
    %105 = vector.shape_cast %102 : vector<16x32xbf16> to vector<1x16x32xbf16>
    tpu.vector_store %arg11[%c0_40, %c0_41, %c0_42], %105 {strides = array<i32>} : memref<1x16x32xbf16, #tpu.memory_space<vmem>>, vector<1x16x32xbf16>,
    return
  }
  func.func @transform_0(%arg0: i32) -> (i32, i32, i32) {
    %c0_i32 = arith.constant 0 : i32
    %c0_i32_0 = arith.constant 0 : i32
    %c0_i32_1 = arith.constant 0 : i32
    return %arg0, %c0_i32, %c0_i32_0 : i32, i32, i32
  }
  func.func @transform_1(%arg0: i32) -> (i32, i32, i32) {
    %c0_i32 = arith.constant 0 : i32
    %c0_i32_0 = arith.constant 0 : i32
    %c0_i32_1 = arith.constant 0 : i32
    return %arg0, %c0_i32, %c0_i32_0 : i32, i32, i32
  }
  func.func @transform_2(%arg0: i32) -> (i32, i32) {
    %c0_i32 = arith.constant 0 : i32
    %c0_i32_0 = arith.constant 0 : i32
    %c0_i32_1 = arith.constant 0 : i32
    return %c0_i32, %c0_i32_0 : i32, i32
  }
  func.func @transform_3(%arg0: i32) -> (i32, i32) {
    %c0_i32 = arith.constant 0 : i32
    %c0_i32_0 = arith.constant 0 : i32
    %c0_i32_1 = arith.constant 0 : i32
    return %c0_i32, %c0_i32_0 : i32, i32
  }
  func.func @transform_4(%arg0: i32) -> (i32, i32) {
    %c0_i32 = arith.constant 0 : i32
    %c0_i32_0 = arith.constant 0 : i32
    %c0_i32_1 = arith.constant 0 : i32
    return %c0_i32, %c0_i32_0 : i32, i32
  }
  func.func @transform_5(%arg0: i32) -> (i32, i32) {
    %c0_i32 = arith.constant 0 : i32
    %c0_i32_0 = arith.constant 0 : i32
    %c0_i32_1 = arith.constant 0 : i32
    return %c0_i32, %c0_i32_0 : i32, i32
  }
  func.func @transform_6(%arg0: i32) -> (i32, i32) {
    %c0_i32 = arith.constant 0 : i32
    %c0_i32_0 = arith.constant 0 : i32
    %c0_i32_1 = arith.constant 0 : i32
    return %c0_i32, %c0_i32_0 : i32, i32
  }
  func.func @transform_7(%arg0: i32) -> (i32, i32) {
    %c0_i32 = arith.constant 0 : i32
    %c0_i32_0 = arith.constant 0 : i32
    %c0_i32_1 = arith.constant 0 : i32
    return %c0_i32, %c0_i32_0 : i32, i32
  }
  func.func @transform_8(%arg0: i32) -> (i32, i32) {
    %c0_i32 = arith.constant 0 : i32
    %c0_i32_0 = arith.constant 0 : i32
    %c0_i32_1 = arith.constant 0 : i32
    return %c0_i32, %c0_i32_0 : i32, i32
  }
  func.func @transform_9(%arg0: i32) -> (i32, i32) {
    %c0_i32 = arith.constant 0 : i32
    %c0_i32_0 = arith.constant 0 : i32
    %c0_i32_1 = arith.constant 0 : i32
    return %c0_i32, %c0_i32_0 : i32, i32
  }
  func.func @transform_10(%arg0: i32) -> (i32, i32, i32) {
    %c0_i32 = arith.constant 0 : i32
    %c0_i32_0 = arith.constant 0 : i32
    %c0_i32_1 = arith.constant 0 : i32
    return %arg0, %c0_i32, %c0_i32_0 : i32, i32, i32
  }
}

module attributes {stable_mosaic.version = 11 : i64} {
  func.func @_fused_mha_kernel(%arg0: i32, %arg1: memref<1x16x32xbf16, #tpu.memory_space<vmem>>, %arg2: memref<1x4x32xbf16, #tpu.memory_space<vmem>>, %arg3: memref<32x32xbf16, #tpu.memory_space<vmem>>, %arg4: memref<32x32xbf16, #tpu.memory_space<vmem>>, %arg5: memref<32x32xbf16, #tpu.memory_space<vmem>>, %arg6: memref<32x32xbf16, #tpu.memory_space<vmem>>, %arg7: memref<1x32xf32, #tpu.memory_space<vmem>>, %arg8: memref<1x32xf32, #tpu.memory_space<vmem>>, %arg9: memref<1x32xf32, #tpu.memory_space<vmem>>, %arg10: memref<1x32xf32, #tpu.memory_space<vmem>>, %arg11: memref<1x16x32xbf16, #tpu.memory_space<vmem>>) attributes {dimension_semantics = [#tpu.dimension_semantics<parallel>], iteration_bounds = array<i64: 2>, scalar_prefetch = 0 : i64, scratch_operands = 0 : i64, tpu.core_type = #tpu.core_type<tc>, window_params = [{transform_indices = @transform_0, window_bounds = array<i64: 1, 16, 32>}, {transform_indices = @transform_1, window_bounds = array<i64: 1, 4, 32>}, {pipeline_mode = #tpu.pipeline_mode<synchronous>, transform_indices = @transform_2, window_bounds = array<i64: 32, 32>}, {pipeline_mode = #tpu.pipeline_mode<synchronous>, transform_indices = @transform_3, window_bounds = array<i64: 32, 32>}, {pipeline_mode = #tpu.pipeline_mode<synchronous>, transform_indices = @transform_4, window_bounds = array<i64: 32, 32>}, {pipeline_mode = #tpu.pipeline_mode<synchronous>, transform_indices = @transform_5, window_bounds = array<i64: 32, 32>}, {pipeline_mode = #tpu.pipeline_mode<synchronous>, transform_indices = @transform_6, window_bounds = array<i64: 1, 32>}, {pipeline_mode = #tpu.pipeline_mode<synchronous>, transform_indices = @transform_7, window_bounds = array<i64: 1, 32>}, {pipeline_mode = #tpu.pipeline_mode<synchronous>, transform_indices = @transform_8, window_bounds = array<i64: 1, 32>}, {pipeline_mode = #tpu.pipeline_mode<synchronous>, transform_indices = @transform_9, window_bounds = array<i64: 1, 32>}, {transform_indices = @transform_10, window_bounds = array<i64: 1, 16, 32>}]} {
    %c0 = arith.constant 0 : index
    %c0_0 = arith.constant 0 : index
    %c0_1 = arith.constant 0 : index
    %0 = vector.load %arg1[%c0, %c0_0, %c0_1] : memref<1x16x32xbf16, #tpu.memory_space<vmem>>, vector<1x16x32xbf16>
    %1 = vector.shape_cast %0 : vector<1x16x32xbf16> to vector<16x32xbf16>
    %c0_2 = arith.constant 0 : index
    %c0_3 = arith.constant 0 : index
    %c0_4 = arith.constant 0 : index
    %2 = vector.load %arg2[%c0_2, %c0_3, %c0_4] : memref<1x4x32xbf16, #tpu.memory_space<vmem>>, vector<1x4x32xbf16>
    %3 = vector.shape_cast %2 : vector<1x4x32xbf16> to vector<4x32xbf16>
    %c0_5 = arith.constant 0 : index
    %c0_6 = arith.constant 0 : index
    %4 = vector.load %arg3[%c0_5, %c0_6] : memref<32x32xbf16, #tpu.memory_space<vmem>>, vector<32x32xbf16>
    %cst = arith.constant dense<0.000000e+00> : vector<16x32xf32>
    %5 = tpu.matmul %1, %4, %cst {dimension_numbers = #tpu.dot_dimension_numbers<[1], [0], [0], [1], [0, 0, 1, 1], [], []>} : vector<16x32xbf16>, vector<32x32xbf16>, vector<16x32xf32> -> vector<16x32xf32>
    %c0_7 = arith.constant 0 : index
    %c0_8 = arith.constant 0 : index
    %6 = vector.load %arg7[%c0_7, %c0_8] : memref<1x32xf32, #tpu.memory_space<vmem>>, vector<1x32xf32>
    %7 = vector.broadcast %6 : vector<1x32xf32> to vector<16x32xf32>
    %8 = arith.addf %5, %7 : vector<16x32xf32>
    %c0_9 = arith.constant 0 : index
    %c0_10 = arith.constant 0 : index
    %9 = vector.load %arg4[%c0_9, %c0_10] : memref<32x32xbf16, #tpu.memory_space<vmem>>, vector<32x32xbf16>
    %cst_11 = arith.constant dense<0.000000e+00> : vector<4x32xf32>
    %10 = tpu.matmul %3, %9, %cst_11 {dimension_numbers = #tpu.dot_dimension_numbers<[1], [0], [0], [1], [0, 0, 1, 1], [], []>} : vector<4x32xbf16>, vector<32x32xbf16>, vector<4x32xf32> -> vector<4x32xf32>
    %c0_12 = arith.constant 0 : index
    %c0_13 = arith.constant 0 : index
    %11 = vector.load %arg8[%c0_12, %c0_13] : memref<1x32xf32, #tpu.memory_space<vmem>>, vector<1x32xf32>
    %12 = vector.broadcast %11 : vector<1x32xf32> to vector<4x32xf32>
    %13 = arith.addf %10, %12 : vector<4x32xf32>
    %c0_14 = arith.constant 0 : index
    %c0_15 = arith.constant 0 : index
    %14 = vector.load %arg5[%c0_14, %c0_15] : memref<32x32xbf16, #tpu.memory_space<vmem>>, vector<32x32xbf16>
    %cst_16 = arith.constant dense<0.000000e+00> : vector<4x32xf32>
    %15 = tpu.matmul %3, %14, %cst_16 {dimension_numbers = #tpu.dot_dimension_numbers<[1], [0], [0], [1], [0, 0, 1, 1], [], []>} : vector<4x32xbf16>, vector<32x32xbf16>, vector<4x32xf32> -> vector<4x32xf32>
    %c0_17 = arith.constant 0 : index
    %c0_18 = arith.constant 0 : index
    %16 = vector.load %arg9[%c0_17, %c0_18] : memref<1x32xf32, #tpu.memory_space<vmem>>, vector<1x32xf32>
    %17 = vector.broadcast %16 : vector<1x32xf32> to vector<4x32xf32>
    %18 = arith.addf %15, %17 : vector<4x32xf32>
    %19 = vector.extract_strided_slice %8 {offsets = [0, 0], sizes = [16, 8], strides = [1, 1]} : vector<16x32xf32> to vector<16x8xf32>
    %20 = arith.truncf %19 : vector<16x8xf32> to vector<16x8xbf16>
    %21 = vector.extract_strided_slice %13 {offsets = [0, 0], sizes = [4, 8], strides = [1, 1]} : vector<4x32xf32> to vector<4x8xf32>
    %22 = arith.truncf %21 : vector<4x8xf32> to vector<4x8xbf16>
    %23 = vector.extract_strided_slice %18 {offsets = [0, 0], sizes = [4, 8], strides = [1, 1]} : vector<4x32xf32> to vector<4x8xf32>
    %24 = arith.truncf %23 : vector<4x8xf32> to vector<4x8xbf16>
    "tpu.trace_start"() <{level = 10 : i32, message = "ld,sd->ls"}> : () -> ()
    %cst_19 = arith.constant dense<0.000000e+00> : vector<16x4xf32>
    %25 = tpu.matmul %20, %22, %cst_19 {dimension_numbers = #tpu.dot_dimension_numbers<[1], [1], [0], [0], [0, 0, 1, 0], [], []>} : vector<16x8xbf16>, vector<4x8xbf16>, vector<16x4xf32> -> vector<16x4xf32>
    "tpu.trace_stop"() : () -> ()
    %cst_20 = arith.constant dense<0xFF800000> : vector<16xf32>
    %26 = vector.multi_reduction <maximumf>, %25, %cst_20 [1] : vector<16x4xf32> to vector<16xf32>
    %27 = vector.shape_cast %26 : vector<16xf32> to vector<16x1xf32>
    %28 = vector.broadcast %27 : vector<16x1xf32> to vector<16x4xf32>
    %29 = arith.subf %25, %28 : vector<16x4xf32>
    %30 = math.exp %29 : vector<16x4xf32>
    %cst_21 = arith.constant dense<0.000000e+00> : vector<16xf32>
    %31 = vector.multi_reduction <add>, %30, %cst_21 [1] : vector<16x4xf32> to vector<16xf32>
    %32 = vector.shape_cast %31 : vector<16xf32> to vector<16x1xf32>
    %33 = tpu.reciprocal %32 {approx = true} : vector<16x1xf32> -> vector<16x1xf32>
    %34 = vector.broadcast %33 : vector<16x1xf32> to vector<16x4xf32>
    %35 = arith.mulf %30, %34 : vector<16x4xf32>
    %36 = arith.truncf %35 : vector<16x4xf32> to vector<16x4xbf16>
    %cst_22 = arith.constant dense<0.000000e+00> : vector<16x8xf32>
    %37 = tpu.matmul %36, %24, %cst_22 {dimension_numbers = #tpu.dot_dimension_numbers<[1], [0], [0], [1], [0, 0, 1, 1], [], []>} : vector<16x4xbf16>, vector<4x8xbf16>, vector<16x8xf32> -> vector<16x8xf32>
    %38 = vector.extract_strided_slice %8 {offsets = [0, 8], sizes = [16, 8], strides = [1, 1]} : vector<16x32xf32> to vector<16x8xf32>
    %39 = arith.truncf %38 : vector<16x8xf32> to vector<16x8xbf16>
    %40 = vector.extract_strided_slice %13 {offsets = [0, 8], sizes = [4, 8], strides = [1, 1]} : vector<4x32xf32> to vector<4x8xf32>
    %41 = arith.truncf %40 : vector<4x8xf32> to vector<4x8xbf16>
    %42 = vector.extract_strided_slice %18 {offsets = [0, 8], sizes = [4, 8], strides = [1, 1]} : vector<4x32xf32> to vector<4x8xf32>
    %43 = arith.truncf %42 : vector<4x8xf32> to vector<4x8xbf16>
    "tpu.trace_start"() <{level = 10 : i32, message = "ld,sd->ls"}> : () -> ()
    %cst_23 = arith.constant dense<0.000000e+00> : vector<16x4xf32>
    %44 = tpu.matmul %39, %41, %cst_23 {dimension_numbers = #tpu.dot_dimension_numbers<[1], [1], [0], [0], [0, 0, 1, 0], [], []>} : vector<16x8xbf16>, vector<4x8xbf16>, vector<16x4xf32> -> vector<16x4xf32>
    "tpu.trace_stop"() : () -> ()
    %cst_24 = arith.constant dense<0xFF800000> : vector<16xf32>
    %45 = vector.multi_reduction <maximumf>, %44, %cst_24 [1] : vector<16x4xf32> to vector<16xf32>
    %46 = vector.shape_cast %45 : vector<16xf32> to vector<16x1xf32>
    %47 = vector.broadcast %46 : vector<16x1xf32> to vector<16x4xf32>
    %48 = arith.subf %44, %47 : vector<16x4xf32>
    %49 = math.exp %48 : vector<16x4xf32>
    %cst_25 = arith.constant dense<0.000000e+00> : vector<16xf32>
    %50 = vector.multi_reduction <add>, %49, %cst_25 [1] : vector<16x4xf32> to vector<16xf32>
    %51 = vector.shape_cast %50 : vector<16xf32> to vector<16x1xf32>
    %52 = tpu.reciprocal %51 {approx = true} : vector<16x1xf32> -> vector<16x1xf32>
    %53 = vector.broadcast %52 : vector<16x1xf32> to vector<16x4xf32>
    %54 = arith.mulf %49, %53 : vector<16x4xf32>
    %55 = arith.truncf %54 : vector<16x4xf32> to vector<16x4xbf16>
    %cst_26 = arith.constant dense<0.000000e+00> : vector<16x8xf32>
    %56 = tpu.matmul %55, %43, %cst_26 {dimension_numbers = #tpu.dot_dimension_numbers<[1], [0], [0], [1], [0, 0, 1, 1], [], []>} : vector<16x4xbf16>, vector<4x8xbf16>, vector<16x8xf32> -> vector<16x8xf32>
    %57 = vector.extract_strided_slice %8 {offsets = [0, 16], sizes = [16, 8], strides = [1, 1]} : vector<16x32xf32> to vector<16x8xf32>
    %58 = arith.truncf %57 : vector<16x8xf32> to vector<16x8xbf16>
    %59 = vector.extract_strided_slice %13 {offsets = [0, 16], sizes = [4, 8], strides = [1, 1]} : vector<4x32xf32> to vector<4x8xf32>
    %60 = arith.truncf %59 : vector<4x8xf32> to vector<4x8xbf16>
    %61 = vector.extract_strided_slice %18 {offsets = [0, 16], sizes = [4, 8], strides = [1, 1]} : vector<4x32xf32> to vector<4x8xf32>
    %62 = arith.truncf %61 : vector<4x8xf32> to vector<4x8xbf16>
    "tpu.trace_start"() <{level = 10 : i32, message = "ld,sd->ls"}> : () -> ()
    %cst_27 = arith.constant dense<0.000000e+00> : vector<16x4xf32>
    %63 = tpu.matmul %58, %60, %cst_27 {dimension_numbers = #tpu.dot_dimension_numbers<[1], [1], [0], [0], [0, 0, 1, 0], [], []>} : vector<16x8xbf16>, vector<4x8xbf16>, vector<16x4xf32> -> vector<16x4xf32>
    "tpu.trace_stop"() : () -> ()
    %cst_28 = arith.constant dense<0xFF800000> : vector<16xf32>
    %64 = vector.multi_reduction <maximumf>, %63, %cst_28 [1] : vector<16x4xf32> to vector<16xf32>
    %65 = vector.shape_cast %64 : vector<16xf32> to vector<16x1xf32>
    %66 = vector.broadcast %65 : vector<16x1xf32> to vector<16x4xf32>
    %67 = arith.subf %63, %66 : vector<16x4xf32>
    %68 = math.exp %67 : vector<16x4xf32>
    %cst_29 = arith.constant dense<0.000000e+00> : vector<16xf32>
    %69 = vector.multi_reduction <add>, %68, %cst_29 [1] : vector<16x4xf32> to vector<16xf32>
    %70 = vector.shape_cast %69 : vector<16xf32> to vector<16x1xf32>
    %71 = tpu.reciprocal %70 {approx = true} : vector<16x1xf32> -> vector<16x1xf32>
    %72 = vector.broadcast %71 : vector<16x1xf32> to vector<16x4xf32>
    %73 = arith.mulf %68, %72 : vector<16x4xf32>
    %74 = arith.truncf %73 : vector<16x4xf32> to vector<16x4xbf16>
    %cst_30 = arith.constant dense<0.000000e+00> : vector<16x8xf32>
    %75 = tpu.matmul %74, %62, %cst_30 {dimension_numbers = #tpu.dot_dimension_numbers<[1], [0], [0], [1], [0, 0, 1, 1], [], []>} : vector<16x4xbf16>, vector<4x8xbf16>, vector<16x8xf32> -> vector<16x8xf32>
    %76 = vector.extract_strided_slice %8 {offsets = [0, 24], sizes = [16, 8], strides = [1, 1]} : vector<16x32xf32> to vector<16x8xf32>
    %77 = arith.truncf %76 : vector<16x8xf32> to vector<16x8xbf16>
    %78 = vector.extract_strided_slice %13 {offsets = [0, 24], sizes = [4, 8], strides = [1, 1]} : vector<4x32xf32> to vector<4x8xf32>
    %79 = arith.truncf %78 : vector<4x8xf32> to vector<4x8xbf16>
    %80 = vector.extract_strided_slice %18 {offsets = [0, 24], sizes = [4, 8], strides = [1, 1]} : vector<4x32xf32> to vector<4x8xf32>
    %81 = arith.truncf %80 : vector<4x8xf32> to vector<4x8xbf16>
    "tpu.trace_start"() <{level = 10 : i32, message = "ld,sd->ls"}> : () -> ()
    %cst_31 = arith.constant dense<0.000000e+00> : vector<16x4xf32>
    %82 = tpu.matmul %77, %79, %cst_31 {dimension_numbers = #tpu.dot_dimension_numbers<[1], [1], [0], [0], [0, 0, 1, 0], [], []>} : vector<16x8xbf16>, vector<4x8xbf16>, vector<16x4xf32> -> vector<16x4xf32>
    "tpu.trace_stop"() : () -> ()
    %cst_32 = arith.constant dense<0xFF800000> : vector<16xf32>
    %83 = vector.multi_reduction <maximumf>, %82, %cst_32 [1] : vector<16x4xf32> to vector<16xf32>
    %84 = vector.shape_cast %83 : vector<16xf32> to vector<16x1xf32>
    %85 = vector.broadcast %84 : vector<16x1xf32> to vector<16x4xf32>
    %86 = arith.subf %82, %85 : vector<16x4xf32>
    %87 = math.exp %86 : vector<16x4xf32>
    %cst_33 = arith.constant dense<0.000000e+00> : vector<16xf32>
    %88 = vector.multi_reduction <add>, %87, %cst_33 [1] : vector<16x4xf32> to vector<16xf32>
    %89 = vector.shape_cast %88 : vector<16xf32> to vector<16x1xf32>
    %90 = tpu.reciprocal %89 {approx = true} : vector<16x1xf32> -> vector<16x1xf32>
    %91 = vector.broadcast %90 : vector<16x1xf32> to vector<16x4xf32>
    %92 = arith.mulf %87, %91 : vector<16x4xf32>
    %93 = arith.truncf %92 : vector<16x4xf32> to vector<16x4xbf16>
    %cst_34 = arith.constant dense<0.000000e+00> : vector<16x8xf32>
    %94 = tpu.matmul %93, %81, %cst_34 {dimension_numbers = #tpu.dot_dimension_numbers<[1], [0], [0], [1], [0, 0, 1, 1], [], []>} : vector<16x4xbf16>, vector<4x8xbf16>, vector<16x8xf32> -> vector<16x8xf32>
    %95 = tpu.concatenate %37, %56, %75, %94 in 1 : vector<16x8xf32>, vector<16x8xf32>, vector<16x8xf32>, vector<16x8xf32> -> vector<16x32xf32>
    %96 = arith.truncf %95 : vector<16x32xf32> to vector<16x32xbf16>
    %c0_35 = arith.constant 0 : index
    %c0_36 = arith.constant 0 : index
    %97 = vector.load %arg6[%c0_35, %c0_36] : memref<32x32xbf16, #tpu.memory_space<vmem>>, vector<32x32xbf16>
    %cst_37 = arith.constant dense<0.000000e+00> : vector<16x32xf32>
    %98 = tpu.matmul %96, %97, %cst_37 {dimension_numbers = #tpu.dot_dimension_numbers<[1], [0], [0], [1], [0, 0, 1, 1], [], []>} : vector<16x32xbf16>, vector<32x32xbf16>, vector<16x32xf32> -> vector<16x32xf32>
    %c0_38 = arith.constant 0 : index
    %c0_39 = arith.constant 0 : index
    %99 = vector.load %arg10[%c0_38, %c0_39] : memref<1x32xf32, #tpu.memory_space<vmem>>, vector<1x32xf32>
    %100 = vector.broadcast %99 : vector<1x32xf32> to vector<16x32xf32>
    %101 = arith.addf %98, %100 : vector<16x32xf32>
    %102 = arith.truncf %101 : vector<16x32xf32> to vector<16x32xbf16>
    %c0_40 = arith.constant 0 : index
    %c0_41 = arith.constant 0 : index
    %c0_42 = arith.constant 0 : index
    %103 = vector.load %arg11[%c0_40, %c0_41, %c0_42] : memref<1x16x32xbf16, #tpu.memory_space<vmem>>, vector<1x16x32xbf16>
    %104 = vector.shape_cast %103 : vector<1x16x32xbf16> to vector<16x32xbf16>
    %105 = vector.shape_cast %102 : vector<16x32xbf16> to vector<1x16x32xbf16>
    tpu.vector_store %arg11[%c0_40, %c0_41, %c0_42], %105 {strides = array<i32>} : memref<1x16x32xbf16, #tpu.memory_space<vmem>>, vector<1x16x32xbf16>,
    return
  }
  func.func @transform_0(%arg0: i32) -> (i32, i32, i32) {
    %c0_i32 = arith.constant 0 : i32
    %c0_i32_0 = arith.constant 0 : i32
    %c0_i32_1 = arith.constant 0 : i32
    return %arg0, %c0_i32, %c0_i32_0 : i32, i32, i32
  }
  func.func @transform_1(%arg0: i32) -> (i32, i32, i32) {
    %c0_i32 = arith.constant 0 : i32
    %c0_i32_0 = arith.constant 0 : i32
    %c0_i32_1 = arith.constant 0 : i32
    return %arg0, %c0_i32, %c0_i32_0 : i32, i32, i32
  }
  func.func @transform_2(%arg0: i32) -> (i32, i32) {
    %c0_i32 = arith.constant 0 : i32
    %c0_i32_0 = arith.constant 0 : i32
    %c0_i32_1 = arith.constant 0 : i32
    return %c0_i32, %c0_i32_0 : i32, i32
  }
  func.func @transform_3(%arg0: i32) -> (i32, i32) {
    %c0_i32 = arith.constant 0 : i32
    %c0_i32_0 = arith.constant 0 : i32
    %c0_i32_1 = arith.constant 0 : i32
    return %c0_i32, %c0_i32_0 : i32, i32
  }
  func.func @transform_4(%arg0: i32) -> (i32, i32) {
    %c0_i32 = arith.constant 0 : i32
    %c0_i32_0 = arith.constant 0 : i32
    %c0_i32_1 = arith.constant 0 : i32
    return %c0_i32, %c0_i32_0 : i32, i32
  }
  func.func @transform_5(%arg0: i32) -> (i32, i32) {
    %c0_i32 = arith.constant 0 : i32
    %c0_i32_0 = arith.constant 0 : i32
    %c0_i32_1 = arith.constant 0 : i32
    return %c0_i32, %c0_i32_0 : i32, i32
  }
  func.func @transform_6(%arg0: i32) -> (i32, i32) {
    %c0_i32 = arith.constant 0 : i32
    %c0_i32_0 = arith.constant 0 : i32
    %c0_i32_1 = arith.constant 0 : i32
    return %c0_i32, %c0_i32_0 : i32, i32
  }
  func.func @transform_7(%arg0: i32) -> (i32, i32) {
    %c0_i32 = arith.constant 0 : i32
    %c0_i32_0 = arith.constant 0 : i32
    %c0_i32_1 = arith.constant 0 : i32
    return %c0_i32, %c0_i32_0 : i32, i32
  }
  func.func @transform_8(%arg0: i32) -> (i32, i32) {
    %c0_i32 = arith.constant 0 : i32
    %c0_i32_0 = arith.constant 0 : i32
    %c0_i32_1 = arith.constant 0 : i32
    return %c0_i32, %c0_i32_0 : i32, i32
  }
  func.func @transform_9(%arg0: i32) -> (i32, i32) {
    %c0_i32 = arith.constant 0 : i32
    %c0_i32_0 = arith.constant 0 : i32
    %c0_i32_1 = arith.constant 0 : i32
    return %c0_i32, %c0_i32_0 : i32, i32
  }
  func.func @transform_10(%arg0: i32) -> (i32, i32, i32) {
    %c0_i32 = arith.constant 0 : i32
    %c0_i32_0 = arith.constant 0 : i32
    %c0_i32_1 = arith.constant 0 : i32
    return %arg0, %c0_i32, %c0_i32_0 : i32, i32, i32
  }
}

module attributes {stable_mosaic.version = 11 : i64} {
  func.func @_ffn_kernel(%arg0: i32, %arg1: memref<1x16x32xbf16, #tpu.memory_space<vmem>>, %arg2: memref<32x128xbf16, #tpu.memory_space<vmem>>, %arg3: memref<1x128xf32, #tpu.memory_space<vmem>>, %arg4: memref<128x32xbf16, #tpu.memory_space<vmem>>, %arg5: memref<1x32xf32, #tpu.memory_space<vmem>>, %arg6: memref<1x16x32xbf16, #tpu.memory_space<vmem>>) attributes {dimension_semantics = [#tpu.dimension_semantics<parallel>], iteration_bounds = array<i64: 2>, scalar_prefetch = 0 : i64, scratch_operands = 0 : i64, tpu.core_type = #tpu.core_type<tc>, window_params = [{transform_indices = @transform_0, window_bounds = array<i64: 1, 16, 32>}, {pipeline_mode = #tpu.pipeline_mode<synchronous>, transform_indices = @transform_1, window_bounds = array<i64: 32, 128>}, {pipeline_mode = #tpu.pipeline_mode<synchronous>, transform_indices = @transform_2, window_bounds = array<i64: 1, 128>}, {pipeline_mode = #tpu.pipeline_mode<synchronous>, transform_indices = @transform_3, window_bounds = array<i64: 128, 32>}, {pipeline_mode = #tpu.pipeline_mode<synchronous>, transform_indices = @transform_4, window_bounds = array<i64: 1, 32>}, {transform_indices = @transform_5, window_bounds = array<i64: 1, 16, 32>}]} {
    %c0 = arith.constant 0 : index
    %c0_0 = arith.constant 0 : index
    %c0_1 = arith.constant 0 : index
    %0 = vector.load %arg1[%c0, %c0_0, %c0_1] : memref<1x16x32xbf16, #tpu.memory_space<vmem>>, vector<1x16x32xbf16>
    %1 = vector.shape_cast %0 : vector<1x16x32xbf16> to vector<16x32xbf16>
    %c0_2 = arith.constant 0 : index
    %c0_3 = arith.constant 0 : index
    %2 = vector.load %arg2[%c0_2, %c0_3] : memref<32x128xbf16, #tpu.memory_space<vmem>>, vector<32x128xbf16>
    %cst = arith.constant dense<0.000000e+00> : vector<16x128xf32>
    %3 = tpu.matmul %1, %2, %cst {dimension_numbers = #tpu.dot_dimension_numbers<[1], [0], [0], [1], [0, 0, 1, 1], [], []>} : vector<16x32xbf16>, vector<32x128xbf16>, vector<16x128xf32> -> vector<16x128xf32>
    %c0_4 = arith.constant 0 : index
    %c0_5 = arith.constant 0 : index
    %4 = vector.load %arg3[%c0_4, %c0_5] : memref<1x128xf32, #tpu.memory_space<vmem>>, vector<1x128xf32>
    %5 = vector.broadcast %4 : vector<1x128xf32> to vector<16x128xf32>
    %6 = arith.addf %3, %5 : vector<16x128xf32>
    %cst_6 = arith.constant 0.000000e+00 : f32
    %7 = vector.broadcast %cst_6 : f32 to vector<16x128xf32>
    %8 = arith.maximumf %6, %7 : vector<16x128xf32>
    %9 = arith.truncf %8 : vector<16x128xf32> to vector<16x128xbf16>
    %c0_7 = arith.constant 0 : index
    %c0_8 = arith.constant 0 : index
    %10 = vector.load %arg4[%c0_7, %c0_8] : memref<128x32xbf16, #tpu.memory_space<vmem>>, vector<128x32xbf16>
    %cst_9 = arith.constant dense<0.000000e+00> : vector<16x32xf32>
    %11 = tpu.matmul %9, %10, %cst_9 {dimension_numbers = #tpu.dot_dimension_numbers<[1], [0], [0], [1], [0, 0, 1, 1], [], []>} : vector<16x128xbf16>, vector<128x32xbf16>, vector<16x32xf32> -> vector<16x32xf32>
    %c0_10 = arith.constant 0 : index
    %c0_11 = arith.constant 0 : index
    %12 = vector.load %arg5[%c0_10, %c0_11] : memref<1x32xf32, #tpu.memory_space<vmem>>, vector<1x32xf32>
    %13 = vector.broadcast %12 : vector<1x32xf32> to vector<16x32xf32>
    %14 = arith.addf %11, %13 : vector<16x32xf32>
    %15 = vector.shape_cast %14 : vector<16x32xf32> to vector<1x16x32xf32>
    %c0_12 = arith.constant 0 : index
    %c0_13 = arith.constant 0 : index
    %c0_14 = arith.constant 0 : index
    %16 = vector.load %arg1[%c0_12, %c0_13, %c0_14] : memref<1x16x32xbf16, #tpu.memory_space<vmem>>, vector<1x16x32xbf16>
    %17 = arith.extf %16 : vector<1x16x32xbf16> to vector<1x16x32xf32>
    %18 = arith.addf %15, %17 : vector<1x16x32xf32>
    %cst_15 = arith.constant dense<0.000000e+00> : vector<1xf32>
    %19 = vector.multi_reduction <add>, %18, %cst_15 [1, 2] : vector<1x16x32xf32> to vector<1xf32>
    %20 = vector.shape_cast %19 : vector<1xf32> to vector<1x1x1xf32>
    %cst_16 = arith.constant 5.120000e+02 : f32
    %21 = vector.broadcast %cst_16 : f32 to vector<1x1x1xf32>
    %22 = arith.divf %20, %21 : vector<1x1x1xf32>
    %23 = vector.broadcast %22 : vector<1x1x1xf32> to vector<1x16x32xf32>
    %24 = arith.subf %18, %23 : vector<1x16x32xf32>
    %25 = arith.mulf %24, %24 : vector<1x16x32xf32>
    %cst_17 = arith.constant dense<0.000000e+00> : vector<1xf32>
    %26 = vector.multi_reduction <add>, %25, %cst_17 [1, 2] : vector<1x16x32xf32> to vector<1xf32>
    %27 = vector.shape_cast %26 : vector<1xf32> to vector<1x1x1xf32>
    %cst_18 = arith.constant 5.120000e+02 : f32
    %28 = vector.broadcast %cst_18 : f32 to vector<1x1x1xf32>
    %29 = arith.divf %27, %28 : vector<1x1x1xf32>
    %cst_19 = arith.constant 9.99999974E-6 : f32
    %30 = vector.broadcast %cst_19 : f32 to vector<1x1x1xf32>
    %31 = arith.addf %29, %30 : vector<1x1x1xf32>
    %32 = math.rsqrt %31 : vector<1x1x1xf32>
    %33 = vector.broadcast %32 : vector<1x1x1xf32> to vector<1x16x32xf32>
    %34 = arith.mulf %24, %33 : vector<1x16x32xf32>
    %35 = arith.truncf %34 : vector<1x16x32xf32> to vector<1x16x32xbf16>
    %c0_20 = arith.constant 0 : index
    %c0_21 = arith.constant 0 : index
    %c0_22 = arith.constant 0 : index
    %36 = vector.load %arg6[%c0_20, %c0_21, %c0_22] : memref<1x16x32xbf16, #tpu.memory_space<vmem>>, vector<1x16x32xbf16>
    tpu.vector_store %arg6[%c0_20, %c0_21, %c0_22], %35 {strides = array<i32>} : memref<1x16x32xbf16, #tpu.memory_space<vmem>>, vector<1x16x32xbf16>,
    return
  }
  func.func @transform_0(%arg0: i32) -> (i32, i32, i32) {
    %c0_i32 = arith.constant 0 : i32
    %c0_i32_0 = arith.constant 0 : i32
    %c0_i32_1 = arith.constant 0 : i32
    return %arg0, %c0_i32, %c0_i32_0 : i32, i32, i32
  }
  func.func @transform_1(%arg0: i32) -> (i32, i32) {
    %c0_i32 = arith.constant 0 : i32
    %c0_i32_0 = arith.constant 0 : i32
    %c0_i32_1 = arith.constant 0 : i32
    return %c0_i32, %c0_i32_0 : i32, i32
  }
  func.func @transform_2(%arg0: i32) -> (i32, i32) {
    %c0_i32 = arith.constant 0 : i32
    %c0_i32_0 = arith.constant 0 : i32
    %c0_i32_1 = arith.constant 0 : i32
    return %c0_i32, %c0_i32_0 : i32, i32
  }
  func.func @transform_3(%arg0: i32) -> (i32, i32) {
    %c0_i32 = arith.constant 0 : i32
    %c0_i32_0 = arith.constant 0 : i32
    %c0_i32_1 = arith.constant 0 : i32
    return %c0_i32, %c0_i32_0 : i32, i32
  }
  func.func @transform_4(%arg0: i32) -> (i32, i32) {
    %c0_i32 = arith.constant 0 : i32
    %c0_i32_0 = arith.constant 0 : i32
    %c0_i32_1 = arith.constant 0 : i32
    return %c0_i32, %c0_i32_0 : i32, i32
  }
  func.func @transform_5(%arg0: i32) -> (i32, i32, i32) {
    %c0_i32 = arith.constant 0 : i32
    %c0_i32_0 = arith.constant 0 : i32
    %c0_i32_1 = arith.constant 0 : i32
    return %arg0, %c0_i32, %c0_i32_0 : i32, i32, i32
  }
}

module attributes {stable_mosaic.version = 11 : i64} {
  func.func @_attn_epilogue_kernel(%arg0: i32, %arg1: memref<1x16x32xbf16, #tpu.memory_space<vmem>>, %arg2: memref<1x16x32xbf16, #tpu.memory_space<vmem>>, %arg3: memref<1x16x32xbf16, #tpu.memory_space<vmem>>, %arg4: memref<64x32xbf16, #tpu.memory_space<vmem>>, %arg5: memref<1x32xf32, #tpu.memory_space<vmem>>, %arg6: memref<1x16x32xbf16, #tpu.memory_space<vmem>>) attributes {dimension_semantics = [#tpu.dimension_semantics<parallel>], iteration_bounds = array<i64: 2>, scalar_prefetch = 0 : i64, scratch_operands = 0 : i64, tpu.core_type = #tpu.core_type<tc>, window_params = [{transform_indices = @transform_0, window_bounds = array<i64: 1, 16, 32>}, {transform_indices = @transform_1, window_bounds = array<i64: 1, 16, 32>}, {transform_indices = @transform_2, window_bounds = array<i64: 1, 16, 32>}, {pipeline_mode = #tpu.pipeline_mode<synchronous>, transform_indices = @transform_3, window_bounds = array<i64: 64, 32>}, {pipeline_mode = #tpu.pipeline_mode<synchronous>, transform_indices = @transform_4, window_bounds = array<i64: 1, 32>}, {transform_indices = @transform_5, window_bounds = array<i64: 1, 16, 32>}]} {
    %c0 = arith.constant 0 : index
    %c0_0 = arith.constant 0 : index
    %c0_1 = arith.constant 0 : index
    %0 = vector.load %arg1[%c0, %c0_0, %c0_1] : memref<1x16x32xbf16, #tpu.memory_space<vmem>>, vector<1x16x32xbf16>
    %1 = vector.shape_cast %0 : vector<1x16x32xbf16> to vector<16x32xbf16>
    %c0_2 = arith.constant 0 : index
    %c0_3 = arith.constant 0 : index
    %c0_4 = arith.constant 0 : index
    %2 = vector.load %arg2[%c0_2, %c0_3, %c0_4] : memref<1x16x32xbf16, #tpu.memory_space<vmem>>, vector<1x16x32xbf16>
    %3 = vector.shape_cast %2 : vector<1x16x32xbf16> to vector<16x32xbf16>
    %4 = tpu.concatenate %1, %3 in 1 : vector<16x32xbf16>, vector<16x32xbf16> -> vector<16x64xbf16>
    %c0_5 = arith.constant 0 : index
    %c0_6 = arith.constant 0 : index
    %5 = vector.load %arg4[%c0_5, %c0_6] : memref<64x32xbf16, #tpu.memory_space<vmem>>, vector<64x32xbf16>
    %cst = arith.constant dense<0.000000e+00> : vector<16x32xf32>
    %6 = tpu.matmul %4, %5, %cst {dimension_numbers = #tpu.dot_dimension_numbers<[1], [0], [0], [1], [0, 0, 1, 1], [], []>} : vector<16x64xbf16>, vector<64x32xbf16>, vector<16x32xf32> -> vector<16x32xf32>
    %c0_7 = arith.constant 0 : index
    %c0_8 = arith.constant 0 : index
    %7 = vector.load %arg5[%c0_7, %c0_8] : memref<1x32xf32, #tpu.memory_space<vmem>>, vector<1x32xf32>
    %8 = vector.broadcast %7 : vector<1x32xf32> to vector<16x32xf32>
    %9 = arith.addf %6, %8 : vector<16x32xf32>
    %10 = vector.shape_cast %9 : vector<16x32xf32> to vector<1x16x32xf32>
    %c0_9 = arith.constant 0 : index
    %c0_10 = arith.constant 0 : index
    %c0_11 = arith.constant 0 : index
    %11 = vector.load %arg3[%c0_9, %c0_10, %c0_11] : memref<1x16x32xbf16, #tpu.memory_space<vmem>>, vector<1x16x32xbf16>
    %12 = arith.extf %11 : vector<1x16x32xbf16> to vector<1x16x32xf32>
    %13 = arith.addf %10, %12 : vector<1x16x32xf32>
    %cst_12 = arith.constant dense<0.000000e+00> : vector<1xf32>
    %14 = vector.multi_reduction <add>, %13, %cst_12 [1, 2] : vector<1x16x32xf32> to vector<1xf32>
    %15 = vector.shape_cast %14 : vector<1xf32> to vector<1x1x1xf32>
    %cst_13 = arith.constant 5.120000e+02 : f32
    %16 = vector.broadcast %cst_13 : f32 to vector<1x1x1xf32>
    %17 = arith.divf %15, %16 : vector<1x1x1xf32>
    %18 = vector.broadcast %17 : vector<1x1x1xf32> to vector<1x16x32xf32>
    %19 = arith.subf %13, %18 : vector<1x16x32xf32>
    %20 = arith.mulf %19, %19 : vector<1x16x32xf32>
    %cst_14 = arith.constant dense<0.000000e+00> : vector<1xf32>
    %21 = vector.multi_reduction <add>, %20, %cst_14 [1, 2] : vector<1x16x32xf32> to vector<1xf32>
    %22 = vector.shape_cast %21 : vector<1xf32> to vector<1x1x1xf32>
    %cst_15 = arith.constant 5.120000e+02 : f32
    %23 = vector.broadcast %cst_15 : f32 to vector<1x1x1xf32>
    %24 = arith.divf %22, %23 : vector<1x1x1xf32>
    %cst_16 = arith.constant 9.99999974E-6 : f32
    %25 = vector.broadcast %cst_16 : f32 to vector<1x1x1xf32>
    %26 = arith.addf %24, %25 : vector<1x1x1xf32>
    %27 = math.rsqrt %26 : vector<1x1x1xf32>
    %28 = vector.broadcast %27 : vector<1x1x1xf32> to vector<1x16x32xf32>
    %29 = arith.mulf %19, %28 : vector<1x16x32xf32>
    %30 = arith.truncf %29 : vector<1x16x32xf32> to vector<1x16x32xbf16>
    %c0_17 = arith.constant 0 : index
    %c0_18 = arith.constant 0 : index
    %c0_19 = arith.constant 0 : index
    %31 = vector.load %arg6[%c0_17, %c0_18, %c0_19] : memref<1x16x32xbf16, #tpu.memory_space<vmem>>, vector<1x16x32xbf16>
    tpu.vector_store %arg6[%c0_17, %c0_18, %c0_19], %30 {strides = array<i32>} : memref<1x16x32xbf16, #tpu.memory_space<vmem>>, vector<1x16x32xbf16>,
    return
  }
  func.func @transform_0(%arg0: i32) -> (i32, i32, i32) {
    %c0_i32 = arith.constant 0 : i32
    %c0_i32_0 = arith.constant 0 : i32
    %c0_i32_1 = arith.constant 0 : i32
    return %arg0, %c0_i32, %c0_i32_0 : i32, i32, i32
  }
  func.func @transform_1(%arg0: i32) -> (i32, i32, i32) {
    %c0_i32 = arith.constant 0 : i32
    %c0_i32_0 = arith.constant 0 : i32
    %c0_i32_1 = arith.constant 0 : i32
    return %arg0, %c0_i32, %c0_i32_0 : i32, i32, i32
  }
  func.func @transform_2(%arg0: i32) -> (i32, i32, i32) {
    %c0_i32 = arith.constant 0 : i32
    %c0_i32_0 = arith.constant 0 : i32
    %c0_i32_1 = arith.constant 0 : i32
    return %arg0, %c0_i32, %c0_i32_0 : i32, i32, i32
  }
  func.func @transform_3(%arg0: i32) -> (i32, i32) {
    %c0_i32 = arith.constant 0 : i32
    %c0_i32_0 = arith.constant 0 : i32
    %c0_i32_1 = arith.constant 0 : i32
    return %c0_i32, %c0_i32_0 : i32, i32
  }
  func.func @transform_4(%arg0: i32) -> (i32, i32) {
    %c0_i32 = arith.constant 0 : i32
    %c0_i32_0 = arith.constant 0 : i32
    %c0_i32_1 = arith.constant 0 : i32
    return %c0_i32, %c0_i32_0 : i32, i32
  }
  func.func @transform_5(%arg0: i32) -> (i32, i32, i32) {
    %c0_i32 = arith.constant 0 : i32
    %c0_i32_0 = arith.constant 0 : i32
    %c0_i32_1 = arith.constant 0 : i32
    return %arg0, %c0_i32, %c0_i32_0 : i32, i32, i32
  }
}

module attributes {stable_mosaic.version = 11 : i64} {
  func.func @_gemm_epilogue_kernel(%arg0: i32, %arg1: memref<8x32xbf16, #tpu.memory_space<vmem>>, %arg2: memref<32x32xbf16, #tpu.memory_space<vmem>>, %arg3: memref<1x32xf32, #tpu.memory_space<vmem>>, %arg4: memref<1x32xf32, #tpu.memory_space<vmem>>, %arg5: memref<8x32xf32, #tpu.memory_space<vmem>>) attributes {dimension_semantics = [#tpu.dimension_semantics<parallel>], iteration_bounds = array<i64: 1>, scalar_prefetch = 0 : i64, scratch_operands = 0 : i64, tpu.core_type = #tpu.core_type<tc>, window_params = [{transform_indices = @transform_0, window_bounds = array<i64: 8, 32>}, {pipeline_mode = #tpu.pipeline_mode<synchronous>, transform_indices = @transform_1, window_bounds = array<i64: 32, 32>}, {pipeline_mode = #tpu.pipeline_mode<synchronous>, transform_indices = @transform_2, window_bounds = array<i64: 1, 32>}, {pipeline_mode = #tpu.pipeline_mode<synchronous>, transform_indices = @transform_3, window_bounds = array<i64: 1, 32>}, {transform_indices = @transform_4, window_bounds = array<i64: 8, 32>}]} {
    %c0 = arith.constant 0 : index
    %c0_0 = arith.constant 0 : index
    %0 = vector.load %arg1[%c0, %c0_0] : memref<8x32xbf16, #tpu.memory_space<vmem>>, vector<8x32xbf16>
    %c0_1 = arith.constant 0 : index
    %c0_2 = arith.constant 0 : index
    %1 = vector.load %arg2[%c0_1, %c0_2] : memref<32x32xbf16, #tpu.memory_space<vmem>>, vector<32x32xbf16>
    %cst = arith.constant dense<0.000000e+00> : vector<8x32xf32>
    %2 = tpu.matmul %0, %1, %cst {dimension_numbers = #tpu.dot_dimension_numbers<[1], [0], [0], [1], [0, 0, 1, 1], [], []>} : vector<8x32xbf16>, vector<32x32xbf16>, vector<8x32xf32> -> vector<8x32xf32>
    %c0_3 = arith.constant 0 : index
    %c0_4 = arith.constant 0 : index
    %3 = vector.load %arg3[%c0_3, %c0_4] : memref<1x32xf32, #tpu.memory_space<vmem>>, vector<1x32xf32>
    %4 = vector.broadcast %3 : vector<1x32xf32> to vector<8x32xf32>
    %5 = arith.mulf %2, %4 : vector<8x32xf32>
    %c0_5 = arith.constant 0 : index
    %c0_6 = arith.constant 0 : index
    %6 = vector.load %arg4[%c0_5, %c0_6] : memref<1x32xf32, #tpu.memory_space<vmem>>, vector<1x32xf32>
    %7 = vector.broadcast %6 : vector<1x32xf32> to vector<8x32xf32>
    %8 = arith.addf %5, %7 : vector<8x32xf32>
    %cst_7 = arith.constant 0.000000e+00 : f32
    %9 = vector.broadcast %cst_7 : f32 to vector<8x32xf32>
    %10 = arith.maximumf %8, %9 : vector<8x32xf32>
    %c0_8 = arith.constant 0 : index
    %c0_9 = arith.constant 0 : index
    %11 = vector.load %arg5[%c0_8, %c0_9] : memref<8x32xf32, #tpu.memory_space<vmem>>, vector<8x32xf32>
    tpu.vector_store %arg5[%c0_8, %c0_9], %10 {strides = array<i32>} : memref<8x32xf32, #tpu.memory_space<vmem>>, vector<8x32xf32>,
    return
  }
  func.func @transform_0(%arg0: i32) -> (i32, i32) {
    %c0_i32 = arith.constant 0 : i32
    %c0_i32_0 = arith.constant 0 : i32
    return %arg0, %c0_i32 : i32, i32
  }
  func.func @transform_1(%arg0: i32) -> (i32, i32) {
    %c0_i32 = arith.constant 0 : i32
    %c0_i32_0 = arith.constant 0 : i32
    %c0_i32_1 = arith.constant 0 : i32
    return %c0_i32, %c0_i32_0 : i32, i32
  }
  func.func @transform_2(%arg0: i32) -> (i32, i32) {
    %c0_i32 = arith.constant 0 : i32
    %c0_i32_0 = arith.constant 0 : i32
    %c0_i32_1 = arith.constant 0 : i32
    return %c0_i32, %c0_i32_0 : i32, i32
  }
  func.func @transform_3(%arg0: i32) -> (i32, i32) {
    %c0_i32 = arith.constant 0 : i32
    %c0_i32_0 = arith.constant 0 : i32
    %c0_i32_1 = arith.constant 0 : i32
    return %c0_i32, %c0_i32_0 : i32, i32
  }
  func.func @transform_4(%arg0: i32) -> (i32, i32) {
    %c0_i32 = arith.constant 0 : i32
    %c0_i32_0 = arith.constant 0 : i32
    return %arg0, %c0_i32 : i32, i32
  }
}

</mosaic_0001>

<bundles_post_ra>
// kernel: _lambda_.13
= control target key start
LH: loop header
LB: loop body
LE: loop exit
PB: predicated region body
PF: predicated region fallthrough
CT: control target
= control target key end

     0   :  { %s2247_s15 = smov 0   ;;  %s3433_s0 = inlined_call_operand.vmem [shape: bf16[512,27], index: 0, kind: input, shape index: {}]   ;;  %s3434_s1 = inlined_call_operand.vmem [shape: bf16[27,4], index: 1, kind: input, shape index: {}]   ;;  %s3435_s2 = inlined_call_operand.vmem [shape: f32[1,4], index: 2, kind: input, shape index: {}]   ;;  %s3436_s3 = inlined_call_operand.vmem [shape: f32[1,4], index: 3, kind: input, shape index: {}]   ;;  %s3437_s4 = inlined_call_operand.vmem [shape: bf16[512,4], index: 4, kind: output, shape index: {}]  }
   0x1 LB: > { %s1947_s16 = sadd.s32 4294967295, %s2219_s15   ;;  %p1951_p0 = scmp.ge.s32.totalorder %s2219_s15, 1  ;;  %s2219_s15 = sphi %s2247_s15, %s14_s15  }
   0x2   : > { %p163_p1 = scmp.lt.s32.totalorder %s2219_s15, 3 }
   0x4   : > { %p164_p2 = pnand %p1951_p0, %p163_p1 }
   0x5   : > { %s1952_s21 = sshll.u32 (!%p164_p2), %s1947_s16, 5 }
   0x6   : > { %167 = sbr.rel (%p164_p2) target bundleno = 508 (0x1fc), region = 36  ;;  %p190_p3 = scmp.lt.s32.totalorder (!%p164_p2), %s1952_s21, 63 }
   0xb   : > { %v2026_v0 = vld [vmem:[%s3434_s1 + $0x8] sm:$0xf]  ;;  %v2063_v1 = vld [vmem:[%s3434_s1 + $0x8] sm:$0x30]  ;;  %vm378_vm0 = vcmask 1044480   ;;  %vm379_vm1 = vcmask 1045504  }
   0xc   : > { %v2027_v2 = vor.u32 %v2063_v1, %v2026_v0  ;;  %v2221_v3 = vmov 65535   ;;  %s3463_s21 = smov (!%p190_p3, %s1952_s21), 63  ;;  %v2062_v7 = vld [vmem:[%s3434_s1] sm:$0xff]  ;;  %vm329_vm2 = vcmask 220160  }
   0xd   : > { %v380_v4 = vsel %vm378_vm0, 4294967295, %v2221_v3  ;;  %s1953_s24 = sshll.u32 %s3463_s21, 2  ;;  %v2309_v24 = vld [vmem:[%s3435_s2] ss:$0 sm:$0xff] }
   0xe   : > { %v381_v5 = vsel %vm379_vm1, %v380_v4, 0  ;;  %s2272_s27 = scalar_lea.vmem %s3433_s0, %s1953_s24  ;;  %v2314_v25 = vld [vmem:[%s3436_s3] ss:$0 sm:$0xff]  ;;  %s2514_s8 = scalar_lea.vmem %s3437_s4, %s1953_s24 }
   0xf   : > { %v383_v6 = vand.u32 %v2027_v2, %v381_v5  ;;  %v2046_v8 = vld [vmem:[%s2272_s27] sm:$0xff]  ;;  %v2047_v12 = vld [vmem:[%s2272_s27 + $0x8] sm:$0xff]  ;;  %v2048_v16 = vld [vmem:[%s2272_s27 + $0x10] sm:$0xff] }
  0x10   : > { %v2050_v9 = vld [vmem:[%s2272_s27 + $0x20] sm:$0xff]  ;;  %v2051_v13 = vld [vmem:[%s2272_s27 + $0x28] sm:$0xff]  ;;  %v2052_v17 = vld [vmem:[%s2272_s27 + $0x30] sm:$0xff] }
  0x11   : > { %391 = vmatpush.bf16.msra.mxu0 %v383_v6  ;;  %2064 = vmatpush.bf16.msra.mxu1 %v383_v6  ;;  %v2054_v10 = vld [vmem:[%s2272_s27 + $0x40] sm:$0xff]  ;;  %v2055_v14 = vld [vmem:[%s2272_s27 + $0x48] sm:$0xff]  ;;  %v2056_v18 = vld [vmem:[%s2272_s27 + $0x50] sm:$0xff] }
  0x12   : > { %2065 = vmatpush.bf16.msra.mxu2 %v383_v6  ;;  %2066 = vmatpush.bf16.msra.mxu3 %v383_v6  ;;  %v2058_v11 = vld [vmem:[%s2272_s27 + $0x60] sm:$0xff]  ;;  %v2059_v15 = vld [vmem:[%s2272_s27 + $0x68] sm:$0xff]  ;;  %v2060_v19 = vld [vmem:[%s2272_s27 + $0x70] sm:$0xff] }
  0x13   : > { %v2049_v20 = vld [vmem:[%s2272_s27 + $0x18] sm:$0xff] }
  0x14   : > { %v2053_v21 = vld [vmem:[%s2272_s27 + $0x38] sm:$0xff] }
  0x15   : > { %392 = vmatpush.bf16.msra.mxu0 %v2062_v7  ;;  %2067 = vmatpush.bf16.msra.mxu1 %v2062_v7  ;;  %v2057_v22 = vld [vmem:[%s2272_s27 + $0x58] sm:$0xff] }
  0x16   : > { %2068 = vmatpush.bf16.msra.mxu2 %v2062_v7  ;;  %2069 = vmatpush.bf16.msra.mxu3 %v2062_v7  ;;  %v2061_v23 = vld [vmem:[%s2272_s27 + $0x78] sm:$0xff] }
  0x18   : > { %2028 = vmatmul.msk.bf16.vlgmr.msra.gmra.mxu0 %vm329_vm2, %v2046_v8  ;;  %2032 = vmatmul.msk.bf16.vlgmr.msra.gmra.mxu1 %vm329_vm2, %v2050_v9 }
  0x19   : > { %2036 = vmatmul.msk.bf16.vlgmr.msra.gmra.mxu2 %vm329_vm2, %v2054_v10  ;;  %2040 = vmatmul.msk.bf16.vlgmr.msra.gmra.mxu3 %vm329_vm2, %v2058_v11 }
  0x28   : > { %2029 = vmatmul.msk.bf16.gmra.mxu0 %vm329_vm2, %v2047_v12  ;;  %2033 = vmatmul.msk.bf16.gmra.mxu1 %vm329_vm2, %v2051_v13 }
  0x29   : > { %2037 = vmatmul.msk.bf16.gmra.mxu2 %vm329_vm2, %v2055_v14  ;;  %2041 = vmatmul.msk.bf16.gmra.mxu3 %vm329_vm2, %v2059_v15 }
  0x38   : > { %2030 = vmatmul.msk.bf16.gmra.mxu0 %vm329_vm2, %v2048_v16  ;;  %2034 = vmatmul.msk.bf16.gmra.mxu1 %vm329_vm2, %v2052_v17 }
  0x39   : > { %2038 = vmatmul.msk.bf16.gmra.mxu2 %vm329_vm2, %v2056_v18  ;;  %2042 = vmatmul.msk.bf16.gmra.mxu3 %vm329_vm2, %v2060_v19 }
  0x48   : > { %2031 = vmatmul.msk.bf16.gmra.mxu0 %vm329_vm2, %v2049_v20  ;;  %2035 = vmatmul.msk.bf16.gmra.mxu1 %vm329_vm2, %v2053_v21 }
  0x49   : > { %2039 = vmatmul.msk.bf16.gmra.mxu2 %vm329_vm2, %v2057_v22  ;;  %2043 = vmatmul.msk.bf16.gmra.mxu3 %vm329_vm2, %v2061_v23 }
  0x95   : > { %v394_v26 = vpop.f32.mrf.mxu0  ;;  %v414_v27 = vpop.f32.mrf.mxu1 }
  0x96   : > { %v478_v28 = vmul.f32 %v2309_v24, %v394_v26  ;;  %v486_v29 = vmul.f32 %v2309_v24, %v414_v27 }
  0x98   : > { %v514_v30 = vadd.f32 %v2314_v25, %v478_v28  ;;  %v522_v31 = vadd.f32 %v2314_v25, %v486_v29 }
  0x9a   : > { %v2320_v32 = vmul.f32 0.70710677, %v514_v30  ;;  %v2322_v33 = vmul.f32 0.70710677, %v522_v31  ;;  %v2343_v53 = vmul.f32 0.5, %v514_v30  ;;  %v2346_v58 = vmul.f32 0.5, %v522_v31 }
  0x9c   : > { %v610_v34 = vand.u32 2147483647, %v2320_v32  ;;  %v618_v35 = vand.u32 2147483647, %v2322_v33  ;;  %v434_v36 = vpop.f32.mrf.mxu2  ;;  %v454_v37 = vpop.f32.mrf.mxu3 }
  0x9d   : > { %v494_v38 = vmul.f32 %v2309_v24, %v434_v36  ;;  %v502_v39 = vmul.f32 %v2309_v24, %v454_v37  ;;  %v396_v51 = vpop.f32.mrf.mxu0  ;;  %v416_v52 = vpop.f32.mrf.mxu1 }
  0x9e   : > { %v642_v40 = vmul.f32 0.3275911, %v610_v34  ;;  %v1474_v41 = vmul.f32 %v610_v34, %v610_v34  ;;  %v650_v42 = vmul.f32 0.3275911, %v618_v35  ;;  %v1482_v50 = vmul.f32 %v618_v35, %v618_v35 }
  0x9f   : > { %v2329_v43 = vadd.f32 %v2314_v25, %v494_v38  ;;  %v2332_v44 = vadd.f32 %v2314_v25, %v502_v39  ;;  %v479_v62 = vmul.f32 %v2309_v24, %v396_v51  ;;  %v487_v63 = vmul.f32 %v2309_v24, %v416_v52 }
  0xa0   : > { %v674_v45 = vadd.f32 1.0, %v642_v40  ;;  %v2334_v46 = vadd.f32 1.0, %v650_v42  ;;  %v1506_v48 = vsub.f32 0.0, %v1474_v41  ;;  %v1514_v60 = vsub.f32 0.0, %v1482_v50 }
  0xa1   : > { %v2337_v47 = vmul.f32 0.70710677, %v2329_v43  ;;  %v2340_v49 = vmul.f32 0.70710677, %v2332_v44  ;;  %v2368_v16 = vadd.f32 %v2314_v25, %v479_v62  ;;  %v2371_v20 = vadd.f32 %v2314_v25, %v487_v63 }
  0xa2   : > { %2081 = vrcp.f32 %v674_v45  ;;  %v715_v54 = vand.u32 2147483647, %v674_v45  ;;  %v717_v56 = vand.u32 2147483648, %v674_v45  ;;  %v1538_v57 = vmul.f32 1.442695, %v1506_v48 }
  0xa3   : > { %2083 = vrcp.f32 %v2334_v46  ;;  %v626_v55 = vand.u32 2147483647, %v2337_v47  ;;  %v634_v59 = vand.u32 2147483647, %v2340_v49  ;;  %vm711_vm3 = vweird.f32 %v674_v45 }
  0xa4   : > { %vm831_vm4 = vweird.f32 %v2334_v46  ;;  %v835_v1 = vand.u32 2147483647, %v2334_v46  ;;  %vm2353_vm5 = vcmp.eq.f32.partialorder %v715_v54, 8.507059e+37  ;;  %v718_v8 = vor.u32 1.1754944e-38, %v717_v56  ;;  %v436_v17 = vpop.f32.mrf.mxu2 }
  0xa5   : > { %v658_v61 = vmul.f32 0.3275911, %v626_v55  ;;  %v666_v2 = vmul.f32 0.3275911, %v634_v59  ;;  %v1490_v7 = vmul.f32 %v626_v55, %v626_v55  ;;  %2085 = vpow2.f32 %v1538_v57 }
  0xa6   : > { %v837_v12 = vand.u32 2147483648, %v2334_v46  ;;  %v1554_v13 = vmul.f32 1.442695, %v1514_v60  ;;  %v2365_v15 = vmul.f32 %v634_v59, %v634_v59  ;;  %vm2373_vm8 = vcmp.eq.f32.partialorder %v835_v1, 8.507059e+37 }
  0xa7   : > { %v2357_v6 = vadd.f32 1.0, %v658_v61  ;;  %v2360_v10 = vadd.f32 1.0, %v666_v2  ;;  %v1522_v19 = vsub.f32 0.0, %v1490_v7  ;;  %v2379_v28 = vmul.f32 %v2309_v24, %v436_v17 }
  0xa8   : > { %v2082_v0 = vpop.eup %2081  ;;  %v838_v27 = vor.u32 1.1754944e-38, %v837_v12  ;;  %v1530_v31 = vsub.f32 0.0, %v2365_v15  ;;  %v2387_v34 = vmul.f32 0.70710677, %v2368_v16  ;;  %v2394_v39 = vmul.f32 0.70710677, %v2371_v20 }
  0xa9   : > { %v2084_v3 = vpop.eup %2083  ;;  %v707_v4 = vmul.f32 %v2082_v0, %v674_v45  ;;  %2087 = vrcp.f32 %v2357_v6  ;;  %vm712_vm6 = vweird.f32 %v2082_v0  ;;  %v955_v23 = vand.u32 2147483647, %v2357_v6 }
  0xaa   : > { %v827_v9 = vmul.f32 %v2084_v3, %v2334_v46  ;;  %2089 = vrcp.f32 %v2360_v10  ;;  %vm832_vm7 = vweird.f32 %v2084_v3  ;;  %vm713_vm9 = vmor %vm711_vm3, %vm712_vm6  ;;  %vm951_vm10 = vweird.f32 %v2357_v6 }
  0xab   : > { %v708_v11 = vsub.f32 1.0, %v707_v4  ;;  %2091 = vpow2.f32 %v1554_v13  ;;  %v2381_v29 = vpop.eup %2085  ;;  %vm833_vm11 = vmor %vm831_vm4, %vm832_vm7  ;;  %v957_v37 = vand.u32 2147483648, %v2357_v6  ;;  %v1570_v38 = vmul.f32 1.442695, %v1522_v19 }
  0xac   : > { %v828_v14 = vsub.f32 1.0, %v827_v9  ;;  %vm2401_vm12 = vcmp.eq.f32.partialorder %v955_v23, 8.507059e+37  ;;  %v1075_v52 = vand.u32 2147483647, %v2360_v10  ;;  %vm1071_vm13 = vweird.f32 %v2360_v10 }
  0xad   : > { %v709_v18 = vmul.f32 %v2082_v0, %v708_v11  ;;  %v611_v56 = vand.u32 2147483647, %v2387_v34  ;;  %v1077_v61 = vand.u32 2147483648, %v2360_v10  ;;  %v619_v62 = vand.u32 2147483647, %v2394_v39 }
  0xae   : > { %v829_v21 = vmul.f32 %v2084_v3, %v828_v14  ;;  %vm1076_vm1 = vcmp.eq.f32.partialorder %v1075_v52, 8.507059e+37  ;;  %vm1674_vm7 = vcmp.ge.f32.partialorder %v2322_v33, 0.0 }
  0xaf   : > { %v710_v26 = vadd.f32 %v2082_v0, %v709_v18  ;;  %v2088_v35 = vpop.eup %2087  ;;  %v643_v1 = vmul.f32 0.3275911, %v611_v56  ;;  %v651_v4 = vmul.f32 0.3275911, %v619_v62  ;;  %v1078_v17 = vor.u32 1.1754944e-38, %v1077_v61 }
  0xb0   : > { %v830_v30 = vadd.f32 %v2084_v3, %v829_v21  ;;  %v2090_v40 = vpop.eup %2089  ;;  %v947_v45 = vmul.f32 %v2088_v35, %v2357_v6  ;;  %vm952_vm14 = vweird.f32 %v2088_v35  ;;  %v1586_v21 = vmul.f32 1.442695, %v1530_v31 }
  0xb1   : > { %v714_v36 = vsel %vm713_vm9, %v2082_v0, %v710_v26  ;;  %v1067_v51 = vmul.f32 %v2090_v40, %v2360_v10  ;;  %v2415_v57 = vpop.eup %2091  ;;  %vm1072_vm15 = vweird.f32 %v2090_v40  ;;  %v2421_v9 = vadd.f32 1.0, %v643_v1  ;;  %vm953_vm0 = vmor %vm951_vm10, %vm952_vm14 }
  0xb2   : > { %v2398_v41 = vsel %vm2353_vm5, %v718_v8, %v714_v36  ;;  %v834_v42 = vsel %vm833_vm11, %v2084_v3, %v830_v30  ;;  %v948_v55 = vsub.f32 1.0, %v947_v45  ;;  %v958_v8 = vor.u32 1.1754944e-38, %v957_v37  ;;  %vm1073_vm2 = vmor %vm1071_vm13, %vm1072_vm15 }
  0xb3   : > { %v1186_v46 = vmul.f32 1.0614054, %v2398_v41  ;;  %v2408_v50 = vsel %vm2373_vm8, %v838_v27, %v834_v42  ;;  %v1068_v60 = vsub.f32 1.0, %v1067_v51  ;;  %v2425_v13 = vadd.f32 1.0, %v651_v4 }
  0xb4   : > { %v1194_v54 = vmul.f32 1.0614054, %v2408_v50  ;;  %v949_v0 = vmul.f32 %v2088_v35, %v948_v55  ;;  %2093 = vrcp.f32 %v2421_v9  ;;  %v2439_v27 = vmul.f32 %v611_v56, %v611_v56 }
  0xb5   : > { %v1218_v59 = vadd.f32 -1.4531521, %v1186_v46  ;;  %v1069_v3 = vmul.f32 %v2090_v40, %v1068_v60  ;;  %2095 = vrcp.f32 %v2425_v13  ;;  %v732_v31 = vand.u32 2147483648, %v2421_v9 }
  0xb6   : > { %v1226_v63 = vadd.f32 -1.4531521, %v1194_v54  ;;  %v950_v7 = vadd.f32 %v2088_v35, %v949_v0  ;;  %2097 = vpow2.f32 %v1570_v38  ;;  %v2446_v45 = vmul.f32 %v619_v62, %v619_v62 }
  0xb7   : > { %v1250_v2 = vmul.f32 %v1218_v59, %v2398_v41  ;;  %v1070_v12 = vadd.f32 %v2090_v40, %v1069_v3  ;;  %2099 = vpow2.f32 %v1586_v21  ;;  %vm726_vm3 = vweird.f32 %v2421_v9 }
  0xb8   : > { %v1258_v5 = vmul.f32 %v1226_v63, %v2408_v50  ;;  %v954_v15 = vsel %vm953_vm0, %v2088_v35, %v950_v7  ;;  %v730_v35 = vand.u32 2147483647, %v2421_v9  ;;  %v1507_v52 = vsub.f32 0.0, %v2439_v27 }
  0xb9   : > { %v1282_v11 = vadd.f32 1.4214138, %v1250_v2  ;;  %v2433_v19 = vsel %vm2401_vm12, %v958_v8, %v954_v15  ;;  %v1074_v6 = vsel %vm1073_vm2, %v2090_v40, %v1070_v12  ;;  %v850_v59 = vand.u32 2147483647, %v2425_v13 }
  0xba   : > { %v1290_v14 = vadd.f32 1.4214138, %v1258_v5  ;;  %v1202_v23 = vmul.f32 1.0614054, %v2433_v19  ;;  %v2437_v26 = vsel %vm1076_vm1, %v1078_v17, %v1074_v6  ;;  %v2094_v48 = vpop.eup %2093  ;;  %vm2454_vm4 = vcmp.eq.f32.partialorder %v730_v35, 8.507059e+37 }
  0xbb   : > { %v1314_v18 = vmul.f32 %v1282_v11, %v2398_v41  ;;  %v1210_v30 = vmul.f32 1.0614054, %v2437_v26  ;;  %v722_v55 = vmul.f32 %v2094_v48, %v2421_v9  ;;  %vm1666_vm5 = vcmp.ge.f32.partialorder %v2320_v32, 0.0  ;;  %v2096_v63 = vpop.eup %2095 }
  0xbc   : > { %v1322_v22 = vmul.f32 %v1290_v14, %v2408_v50  ;;  %v1234_v37 = vadd.f32 -1.4531521, %v1202_v23  ;;  %v733_v62 = vor.u32 1.1754944e-38, %v732_v31  ;;  %vm846_vm6 = vweird.f32 %v2425_v13  ;;  %v2098_v4 = vpop.eup %2097 }
  0xbd   : > { %v1346_v10 = vadd.f32 -0.28449672, %v1314_v18  ;;  %v1242_v42 = vadd.f32 -1.4531521, %v1210_v30  ;;  %v723_v2 = vsub.f32 1.0, %v722_v55  ;;  %v852_v3 = vand.u32 2147483648, %v2425_v13  ;;  %v2100_v11 = vpop.eup %2099 }
  0xbe   : > { %v1354_v36 = vadd.f32 -0.28449672, %v1322_v22  ;;  %v1266_v51 = vmul.f32 %v1234_v37, %v2433_v19  ;;  %vm727_vm8 = vweird.f32 %v2094_v48  ;;  %v842_v8 = vmul.f32 %v2096_v63, %v2425_v13 }
  0xbf   : > { %v1378_v40 = vmul.f32 %v1346_v10, %v2398_v41  ;;  %v1274_v38 = vmul.f32 %v1242_v42, %v2437_v26  ;;  %vm2469_vm9 = vcmp.eq.f32.partialorder %v850_v59, 8.507059e+37  ;;  %v853_v10 = vor.u32 1.1754944e-38, %v852_v3  ;;  %vm728_vm10 = vmor %vm726_vm3, %vm727_vm8 }
  0xc0   : > { %v1386_v46 = vmul.f32 %v1354_v36, %v2408_v50  ;;  %v1298_v61 = vadd.f32 1.4214138, %v1266_v51  ;;  %v843_v6 = vsub.f32 1.0, %v842_v8  ;;  %vm847_vm11 = vweird.f32 %v2096_v63 }
  0xc1   : > { %v1410_v54 = vadd.f32 0.2548296, %v1378_v40  ;;  %v1306_v1 = vadd.f32 1.4214138, %v1274_v38  ;;  %vm848_vm12 = vmor %vm846_vm6, %vm847_vm11  ;;  %vm1858_vm13 = vcmask 27648   ;;  %vm1682_vm14 = vcmp.ge.f32.partialorder %v2337_v47, 0.0 }
  0xc2   : > { %v1418_v60 = vadd.f32 0.2548296, %v1386_v46  ;;  %v1330_v7 = vmul.f32 %v1298_v61, %v2433_v19  ;;  %v844_v35 = vmul.f32 %v2096_v63, %v843_v6  ;;  %vm1690_vm15 = vcmp.ge.f32.partialorder %v2340_v49, 0.0 }
  0xc3   : > { %v1442_v0 = vmul.f32 %v1410_v54, %v2398_v41  ;;  %v1338_v14 = vmul.f32 %v1306_v1, %v2437_v26  ;;  %v724_v41 = vmul.f32 %v2094_v48, %v723_v2 }
  0xc4   : > { %v1450_v5 = vmul.f32 %v1418_v60, %v2408_v50  ;;  %v1362_v18 = vadd.f32 -0.28449672, %v1330_v7  ;;  %v2476_v50 = vadd.f32 %v2314_v25, %v2379_v28  ;;  %v845_v46 = vadd.f32 %v2096_v63, %v844_v35 }
  0xc5   : > { %v1602_v12 = vmul.f32 %v2381_v29, %v1442_v0  ;;  %v1370_v22 = vadd.f32 -0.28449672, %v1338_v14  ;;  %v725_v23 = vadd.f32 %v2094_v48, %v724_v41  ;;  %v1515_v14 = vsub.f32 0.0, %v2446_v45 }
  0xc6   : > { %v1610_v17 = vmul.f32 %v2415_v57, %v1450_v5  ;;  %v1394_v30 = vmul.f32 %v1362_v18, %v2433_v19  ;;  %v2484_v28 = vmul.f32 0.70710677, %v2476_v50  ;;  %v849_v59 = vsel %vm848_vm12, %v2096_v63, %v845_v46  ;;  %v456_v5 = vpop.f32.mrf.mxu3 }
  0xc7   : > { %v1634_v21 = vsub.f32 1.0, %v1602_v12  ;;  %v1402_v36 = vmul.f32 %v1370_v22, %v2437_v26  ;;  %v729_v37 = vsel %vm728_vm10, %v2094_v48, %v725_v23  ;;  %v503_v18 = vmul.f32 %v2309_v24, %v456_v5 }
  0xc8   : > { %v1642_v29 = vsub.f32 1.0, %v1610_v17  ;;  %v1426_v40 = vadd.f32 0.2548296, %v1394_v30  ;;  %v2488_v42 = vsel %vm2454_vm4, %v733_v62, %v729_v37  ;;  %v2496_v48 = vand.u32 2147483647, %v2484_v28 }
  0xc9   : > { %v1698_v57 = vsub.f32 0.0, %v1634_v21  ;;  %v1434_v51 = vadd.f32 0.2548296, %v1402_v36  ;;  %v1187_v54 = vmul.f32 1.0614054, %v2488_v42  ;;  %v2504_v62 = vsel %vm2469_vm9, %v853_v10, %v849_v59 }
  0xca   : > { %v1706_v31 = vsub.f32 0.0, %v1642_v29  ;;  %v1458_v56 = vmul.f32 %v1426_v40, %v2433_v19  ;;  %v1195_v1 = vmul.f32 1.0614054, %v2504_v62  ;;  %v659_v2 = vmul.f32 0.3275911, %v2496_v48 }
  0xcb   : > { %v1730_v9 = vsel %vm1666_vm5, %v1634_v21, %v1698_v57  ;;  %v1466_v32 = vmul.f32 %v1434_v51, %v2437_v26  ;;  %v1219_v61 = vadd.f32 -1.4531521, %v1187_v54  ;;  %v562_v45 = vmul.f32 0.5, %v2329_v43 }
  0xcc   : > { %v1762_v38 = vadd.f32 1.0, %v1730_v9  ;;  %v1738_v55 = vsel %vm1674_vm7, %v1642_v29, %v1706_v31  ;;  %v1618_v0 = vmul.f32 %v2098_v4, %v1458_v56  ;;  %v1227_v3 = vadd.f32 -1.4531521, %v1195_v1  ;;  %v419_v29 = vpop.f32.mrf.mxu1 }
  0xcd   : > { %v1770_v60 = vadd.f32 1.0, %v1738_v55  ;;  %v1626_v19 = vmul.f32 %v2100_v11, %v1466_v32  ;;  %v1251_v26 = vmul.f32 %v1219_v61, %v2488_v42  ;;  %v2518_v4 = vadd.f32 1.0, %v659_v2 }
  0xce   : > { %v1794_v13 = vmul.f32 %v1762_v38, %v2343_v53  ;;  %v1650_v63 = vsub.f32 1.0, %v1618_v0  ;;  %v1259_v11 = vmul.f32 %v1227_v3, %v2504_v62  ;;  %v1556_v10 = vmul.f32 1.442695, %v1515_v14 }
  0xcf   : > { %v1802_v33 = vmul.f32 %v1770_v60, %v2346_v58  ;;  %v1658_v8 = vsub.f32 1.0, %v1626_v19  ;;  %v1283_v12 = vadd.f32 1.4214138, %v1251_v26  ;;  %v1540_v58 = vmul.f32 1.442695, %v1507_v52  ;;  %v399_v52 = vpop.f32.mrf.mxu0 }
  0xd0   : > { %v1826_v53 = vpack.c.bf16 %v1794_v13, %v1794_v13  ;;  %v1714_v41 = vsub.f32 0.0, %v1650_v63  ;;  %2101 = vrcp.f32 %v2518_v4  ;;  %v1291_v27 = vadd.f32 1.4214138, %v1259_v11 }
  0xd1   : > { %v1834_v7 = vpack.c.bf16 %v1802_v33, %v1802_v33  ;;  %v1722_v15 = vsub.f32 0.0, %v1658_v8  ;;  %v1315_v17 = vmul.f32 %v1283_v12, %v2488_v42  ;;  %v570_v30 = vmul.f32 0.5, %v2332_v44 }
  0xd2   : > { %1859 = vst.msk [vmem:[%s2514_s8] sm:$0xf] %vm1858_vm13, %v1826_v53  ;;  %v1746_v6 = vsel %vm1682_vm14, %v1650_v63, %v1714_v41  ;;  %2103 = vpow2.f32 %v1540_v58  ;;  %v1323_v35 = vmul.f32 %v1291_v27, %v2504_v62  ;;  %v2538_v36 = vadd.f32 %v2314_v25, %v503_v18 }
  0xd3   : > { %1867 = vst.msk [vmem:[%s2514_s8 + $0x20] sm:$0xf] %vm1858_vm13, %v1834_v7  ;;  %v1778_v21 = vadd.f32 1.0, %v1746_v6  ;;  %v1754_v22 = vsel %vm1690_vm15, %v1658_v8, %v1722_v15  ;;  %v1347_v23 = vadd.f32 -0.28449672, %v1315_v17  ;;  %v480_v49 = vmul.f32 %v2309_v24, %v399_v52 }
  0xd4   : > { %v1786_v47 = vadd.f32 1.0, %v1754_v22  ;;  %v1355_v40 = vadd.f32 -0.28449672, %v1323_v35  ;;  %v488_v46 = vmul.f32 %v2309_v24, %v419_v29  ;;  %2105 = vpow2.f32 %v1556_v10 }
  0xd5   : > { %v1810_v57 = vmul.f32 %v1778_v21, %v562_v45  ;;  %v1379_v43 = vmul.f32 %v1347_v23, %v2488_v42  ;;  %v972_v55 = vand.u32 2147483648, %v2518_v4  ;;  %v2546_v56 = vmul.f32 0.70710677, %v2538_v36  ;;  %v439_v23 = vpop.f32.mrf.mxu2 }
  0xd6   : > { %v2102_v37 = vpop.eup %2101  ;;  %v1818_v31 = vmul.f32 %v1786_v47, %v570_v30  ;;  %v1387_v38 = vmul.f32 %v1355_v40, %v2504_v62  ;;  %v2552_v32 = vadd.f32 %v2314_v25, %v480_v49  ;;  %v2555_v61 = vadd.f32 %v2314_v25, %v488_v46 }
  0xd7   : > { %v1842_v44 = vpack.c.bf16 %v1810_v57, %v1810_v57  ;;  %v1411_v9 = vadd.f32 0.2548296, %v1379_v43  ;;  %v962_v51 = vmul.f32 %v2102_v37, %v2518_v4  ;;  %v1491_v1 = vmul.f32 %v2496_v48, %v2496_v48 }
  0xd8   : > { %v1850_v54 = vpack.c.bf16 %v1818_v31, %v1818_v31  ;;  %v2104_v13 = vpop.eup %2103  ;;  %v1419_v0 = vadd.f32 0.2548296, %v1387_v38  ;;  %v635_v2 = vand.u32 2147483647, %v2546_v56  ;;  %vm967_vm0 = vweird.f32 %v2102_v37 }
  0xd9   : > { %1875 = vst.msk [vmem:[%s2514_s8 + $0x40] sm:$0xf] %vm1858_vm13, %v1842_v44  ;;  %v1443_v59 = vmul.f32 %v1411_v9, %v2488_v42  ;;  %v963_v60 = vsub.f32 1.0, %v962_v51  ;;  %v970_v42 = vand.u32 2147483647, %v2518_v4  ;;  %vm966_vm1 = vweird.f32 %v2518_v4  ;;  %v459_v44 = vpop.f32.mrf.mxu3 }
  0xda   : > { %1883 = vst.msk [vmem:[%s2514_s8 + $0x60] sm:$0xf] %vm1858_vm13, %v1850_v54  ;;  %v1451_v26 = vmul.f32 %v1419_v0, %v2504_v62  ;;  %v667_v53 = vmul.f32 0.3275911, %v635_v2  ;;  %v2565_v63 = vmul.f32 0.70710677, %v2552_v32  ;;  %v2106_v3 = vpop.eup %2105  ;;  %vm968_vm2 = vmor %vm966_vm1, %vm967_vm0  ;;  %v1499_v30 = vmul.f32 %v635_v2, %v635_v2 }
  0xdb   : > { %v1603_v33 = vmul.f32 %v2104_v13, %v1443_v59  ;;  %v964_v19 = vmul.f32 %v2102_v37, %v963_v60  ;;  %v2569_v48 = vmul.f32 0.70710677, %v2555_v61  ;;  %v973_v12 = vor.u32 1.1754944e-38, %v972_v55 }
  0xdc   : > { %v1611_v8 = vmul.f32 %v2106_v3, %v1451_v26  ;;  %v2571_v14 = vadd.f32 1.0, %v667_v53  ;;  %v612_v41 = vand.u32 2147483647, %v2565_v63  ;;  %vm971_vm3 = vcmp.eq.f32.partialorder %v970_v42, 8.507059e+37 }
  0xdd   : > { %v1635_v5 = vsub.f32 1.0, %v1603_v33  ;;  %v965_v7 = vadd.f32 %v2102_v37, %v964_v19  ;;  %v1523_v11 = vsub.f32 0.0, %v1491_v1  ;;  %vm1667_vm4 = vcmp.ge.f32.partialorder %v2387_v34, 0.0 }
  0xde   : > { %v1643_v15 = vsub.f32 1.0, %v1611_v8  ;;  %2107 = vrcp.f32 %v2571_v14  ;;  %v2580_v45 = vand.u32 2147483647, %v2569_v48  ;;  %v547_v6 = vmul.f32 0.5, %v2368_v16 }
  0xdf   : > { %v1699_v62 = vsub.f32 0.0, %v1635_v5  ;;  %v969_v58 = vsel %vm968_vm2, %v2102_v37, %v965_v7  ;;  %v644_v21 = vmul.f32 0.3275911, %v612_v41  ;;  %vm1675_vm5 = vcmp.ge.f32.partialorder %v2394_v39, 0.0 }
  0xe0   : > { %v2575_v17 = vsel %vm971_vm3, %v973_v12, %v969_v58  ;;  %v1707_v52 = vsub.f32 0.0, %v1643_v15  ;;  %v1572_v34 = vmul.f32 1.442695, %v1523_v11  ;;  %v555_v35 = vmul.f32 0.5, %v2371_v20 }
  0xe1   : > { %v1731_v4 = vsel %vm1667_vm4, %v1635_v5, %v1699_v62  ;;  %v1203_v18 = vmul.f32 1.0614054, %v2575_v17  ;;  %v2584_v47 = vadd.f32 1.0, %v644_v21  ;;  %v652_v16 = vmul.f32 0.3275911, %v2580_v45 }
  0xe2   : > { %v1763_v27 = vadd.f32 1.0, %v1731_v4  ;;  %v1739_v29 = vsel %vm1675_vm5, %v1643_v15, %v1707_v52  ;;  %v2590_v39 = vmul.f32 0.5, %v2476_v50  ;;  %v496_v31 = vmul.f32 %v2309_v24, %v439_v23 }
  0xe3   : > { %v1235_v22 = vadd.f32 -1.4531521, %v1203_v18  ;;  %v1771_v57 = vadd.f32 1.0, %v1739_v29  ;;  %2109 = vrcp.f32 %v2584_v47  ;;  %v1090_v9 = vand.u32 2147483647, %v2571_v14 }
  0xe4   : > { %v1795_v10 = vmul.f32 %v1763_v27, %v547_v6  ;;  %v2108_v49 = vpop.eup %2107  ;;  %2111 = vpow2.f32 %v1572_v34  ;;  %v1092_v51 = vand.u32 2147483648, %v2571_v14  ;;  %v1531_v54 = vsub.f32 0.0, %v1499_v30 }
  0xe5   : > { %v1267_v43 = vmul.f32 %v1235_v22, %v2575_v17  ;;  %v1803_v40 = vmul.f32 %v1771_v57, %v555_v35  ;;  %v1082_v20 = vmul.f32 %v2108_v49, %v2571_v14  ;;  %v1476_v50 = vmul.f32 %v612_v41, %v612_v41 }
  0xe6   : > { %v1827_v37 = vpack.c.bf16 %v1795_v10, %v1795_v10  ;;  %v2600_v60 = vadd.f32 1.0, %v652_v16  ;;  %v2603_v13 = vmul.f32 0.5, %v2538_v36  ;;  %v745_v0 = vand.u32 2147483647, %v2584_v47 }
  0xe7   : > { %v1299_v46 = vadd.f32 1.4214138, %v1267_v43  ;;  %v1835_v38 = vpack.c.bf16 %v1803_v40, %v1803_v40  ;;  %v1083_v59 = vsub.f32 1.0, %v1082_v20  ;;  %v2607_v1 = vadd.f32 %v2314_v25, %v496_v31 }
  0xe8   : > { %1860 = vst.msk [vmem:[%s2514_s8 + $0x4] sm:$0xf] %vm1858_vm13, %v1827_v37  ;;  %v504_v2 = vmul.f32 %v2309_v24, %v459_v44  ;;  %vm1087_vm6 = vweird.f32 %v2108_v49  ;;  %2113 = vrcp.f32 %v2600_v60  ;;  %vm1086_vm7 = vweird.f32 %v2571_v14 }
  0xe9   : > { %v1331_v55 = vmul.f32 %v1299_v46, %v2575_v17  ;;  %1868 = vst.msk [vmem:[%s2514_s8 + $0x24] sm:$0xf] %vm1858_vm13, %v1835_v38  ;;  %v1084_v19 = vmul.f32 %v2108_v49, %v1083_v59  ;;  %v2110_v42 = vpop.eup %2109  ;;  %vm2614_vm8 = vcmp.eq.f32.partialorder %v1090_v9, 8.507059e+37  ;;  %v1588_v26 = vmul.f32 1.442695, %v1531_v54  ;;  %vm1088_vm9 = vmor %vm1086_vm7, %vm1087_vm6 }
  0xea   : > { %v1508_v53 = vsub.f32 0.0, %v1476_v50  ;;  %v2112_v3 = vpop.eup %2111  ;;  %v1093_v8 = vor.u32 1.1754944e-38, %v1092_v51  ;;  %v737_v12 = vmul.f32 %v2110_v42, %v2584_v47  ;;  %vm741_vm10 = vweird.f32 %v2584_v47  ;;  %v401_v50 = vpop.f32.mrf.mxu0 }
  0xeb   : > { %v1363_v33 = vadd.f32 -0.28449672, %v1331_v55  ;;  %v1085_v7 = vadd.f32 %v2108_v49, %v1084_v19  ;;  %vm2621_vm11 = vcmp.eq.f32.partialorder %v745_v0, 8.507059e+37  ;;  %v747_v14 = vand.u32 2147483648, %v2584_v47 }
  0xec   : > { %v2627_v62 = vmul.f32 0.70710677, %v2607_v1  ;;  %v738_v15 = vsub.f32 1.0, %v737_v12  ;;  %v2630_v4 = vadd.f32 %v2314_v25, %v504_v2  ;;  %vm1683_vm12 = vcmp.ge.f32.partialorder %v2484_v28, 0.0 }
  0xed   : > { %v1395_v5 = vmul.f32 %v1363_v33, %v2575_v17  ;;  %v1089_v11 = vsel %vm1088_vm9, %v2108_v49, %v1085_v7  ;;  %v1542_v6 = vmul.f32 1.442695, %v1508_v53  ;;  %v1484_v27 = vmul.f32 %v2580_v45, %v2580_v45 }
  0xee   : > { %v2635_v18 = vsel %vm2614_vm8, %v1093_v8, %v1089_v11  ;;  %v628_v52 = vand.u32 2147483647, %v2627_v62  ;;  %v2114_v21 = vpop.eup %2113  ;;  %v739_v23 = vmul.f32 %v2110_v42, %v738_v15  ;;  %vm742_vm14 = vweird.f32 %v2110_v42 }
  0xef   : > { %v1427_v58 = vadd.f32 0.2548296, %v1395_v5  ;;  %v1211_v34 = vmul.f32 1.0614054, %v2635_v18  ;;  %v748_v10 = vor.u32 1.1754944e-38, %v747_v14  ;;  %v857_v29 = vmul.f32 %v2114_v21, %v2600_v60  ;;  %vm743_vm0 = vmor %vm741_vm10, %vm742_vm14 }
  0xf0   : > { %vm861_vm15 = vweird.f32 %v2600_v60  ;;  %v660_v30 = vmul.f32 0.3275911, %v628_v52  ;;  %v740_v43 = vadd.f32 %v2110_v42, %v739_v23  ;;  %v2645_v45 = vmul.f32 0.70710677, %v2630_v4 }
  0xf1   : > { %v1459_v22 = vmul.f32 %v1427_v58, %v2575_v17  ;;  %v1243_v57 = vadd.f32 -1.4531521, %v1211_v34  ;;  %v858_v17 = vsub.f32 1.0, %v857_v29  ;;  %v865_v16 = vand.u32 2147483647, %v2600_v60 }
  0xf2   : > { %v867_v49 = vand.u32 2147483648, %v2600_v60  ;;  %v2651_v37 = vadd.f32 1.0, %v660_v30  ;;  %v744_v46 = vsel %vm743_vm0, %v2110_v42, %v740_v43  ;;  %v2655_v20 = vand.u32 2147483647, %v2645_v45 }
  0xf3   : > { %v1619_v35 = vmul.f32 %v2112_v3, %v1459_v22  ;;  %v1275_v40 = vmul.f32 %v1243_v57, %v2635_v18  ;;  %v2659_v44 = vsel %vm2621_vm11, %v748_v10, %v744_v46  ;;  %v859_v47 = vmul.f32 %v2114_v21, %v858_v17 }
  0xf4   : > { %vm862_vm1 = vweird.f32 %v2114_v21  ;;  %2115 = vrcp.f32 %v2651_v37  ;;  %v1188_v54 = vmul.f32 1.0614054, %v2659_v44  ;;  %v868_v55 = vor.u32 1.1754944e-38, %v867_v49 }
  0xf5   : > { %v1651_v31 = vsub.f32 1.0, %v1619_v35  ;;  %v1307_v51 = vadd.f32 1.4214138, %v1275_v40  ;;  %2117 = vpow2.f32 %v1588_v26  ;;  %v860_v38 = vadd.f32 %v2114_v21, %v859_v47  ;;  %vm863_vm2 = vmor %vm861_vm15, %vm862_vm1 }
  0xf6   : > { %v1516_v59 = vsub.f32 0.0, %v1484_v27  ;;  %v668_v0 = vmul.f32 0.3275911, %v2655_v20  ;;  %v1220_v19 = vadd.f32 -1.4531521, %v1188_v54  ;;  %v1492_v42 = vmul.f32 %v628_v52, %v628_v52 }
  0xf7   : > { %v1715_v9 = vsub.f32 0.0, %v1651_v31  ;;  %v1339_v33 = vmul.f32 %v1307_v51, %v2635_v18  ;;  %v864_v26 = vsel %vm863_vm2, %v2114_v21, %v860_v38  ;;  %vm866_vm3 = vcmp.eq.f32.partialorder %v865_v16, 8.507059e+37 }
  0xf8   : > { %v481_v53 = vmul.f32 %v2309_v24, %v401_v50  ;;  %v1252_v5 = vmul.f32 %v1220_v19, %v2659_v44  ;;  %v2671_v7 = vsel %vm866_vm3, %v868_v55, %v864_v26  ;;  %v2673_v8 = vadd.f32 1.0, %v668_v0  ;;  %v421_v26 = vpop.f32.mrf.mxu1 }
  0xf9   : > { %v1747_v2 = vsel %vm1683_vm12, %v1651_v31, %v1715_v9  ;;  %v1371_v3 = vadd.f32 -0.28449672, %v1339_v33  ;;  %2119 = vpow2.f32 %v1542_v6  ;;  %v1196_v60 = vmul.f32 1.0614054, %v2671_v7 }
  0xfa   : > { %v1779_v36 = vadd.f32 1.0, %v1747_v2  ;;  %v2116_v28 = vpop.eup %2115  ;;  %v1558_v41 = vmul.f32 1.442695, %v1516_v59  ;;  %v1284_v11 = vadd.f32 1.4214138, %v1252_v5  ;;  %v1524_v27 = vsub.f32 0.0, %v1492_v42 }
  0xfb   : > { %v2118_v14 = vpop.eup %2117  ;;  %v1403_v58 = vmul.f32 %v1371_v3, %v2635_v18  ;;  %v977_v15 = vmul.f32 %v2116_v28, %v2651_v37  ;;  %v1228_v21 = vadd.f32 -1.4531521, %v1196_v60  ;;  %v987_v22 = vand.u32 2147483648, %v2651_v37 }
  0xfc   : > { %v1811_v12 = vmul.f32 %v1779_v36, %v2590_v39  ;;  %2121 = vrcp.f32 %v2673_v8  ;;  %v1316_v39 = vmul.f32 %v1284_v11, %v2659_v44  ;;  %v2683_v23 = vadd.f32 %v2314_v25, %v481_v53 }
  0xfd   : > { %v1435_v34 = vadd.f32 0.2548296, %v1403_v58  ;;  %v978_v6 = vsub.f32 1.0, %v977_v15  ;;  %vm1691_vm4 = vcmp.ge.f32.partialorder %v2546_v56, 0.0  ;;  %v1260_v10 = vmul.f32 %v1228_v21, %v2671_v7 }
  0xfe   : > { %v1843_v52 = vpack.c.bf16 %v1811_v12, %v1811_v12  ;;  %2123 = vpow2.f32 %v1558_v41  ;;  %v985_v29 = vand.u32 2147483647, %v2651_v37  ;;  %v1348_v35 = vadd.f32 -0.28449672, %v1316_v39 }
  0xff   : > { %v1467_v30 = vmul.f32 %v1435_v34, %v2635_v18  ;;  %v979_v57 = vmul.f32 %v2116_v28, %v978_v6  ;;  %vm982_vm5 = vweird.f32 %v2116_v28  ;;  %v2120_v43 = vpop.eup %2119  ;;  %v1292_v17 = vadd.f32 1.4214138, %v1260_v10  ;;  %v441_v10 = vpop.f32.mrf.mxu2 }
 0x100   : > { %1876 = vst.msk [vmem:[%s2514_s8 + $0x44] sm:$0xf] %vm1858_vm13, %v1843_v52  ;;  %vm981_vm6 = vweird.f32 %v2651_v37  ;;  %v988_v16 = vor.u32 1.1754944e-38, %v987_v22  ;;  %v2692_v49 = vmul.f32 1.442695, %v1524_v27  ;;  %v1380_v40 = vmul.f32 %v1348_v35, %v2659_v44 }
 0x101   : > { %v1627_v31 = vmul.f32 %v2118_v14, %v1467_v30  ;;  %v980_v46 = vadd.f32 %v2116_v28, %v979_v57  ;;  %v2696_v47 = vmul.f32 0.70710677, %v2683_v23  ;;  %v1324_v18 = vmul.f32 %v1292_v17, %v2671_v7  ;;  %vm983_vm7 = vmor %vm981_vm6, %vm982_vm5 }
 0x102   : > { %v2122_v9 = vpop.eup %2121  ;;  %vm986_vm8 = vcmp.eq.f32.partialorder %v985_v29, 8.507059e+37  ;;  %vm1101_vm9 = vweird.f32 %v2673_v8  ;;  %v2702_v37 = vmul.f32 %v2655_v20, %v2655_v20  ;;  %v1412_v54 = vadd.f32 0.2548296, %v1380_v40 }
 0x103   : > { %v1659_v51 = vsub.f32 1.0, %v1627_v31  ;;  %v984_v50 = vsel %vm983_vm7, %v2116_v28, %v980_v46  ;;  %v1097_v38 = vmul.f32 %v2122_v9, %v2673_v8  ;;  %vm1668_vm10 = vcmp.ge.f32.partialorder %v2565_v63, 0.0 }
 0x104   : > { %v2124_v55 = vpop.eup %2123  ;;  %v1356_v59 = vadd.f32 -0.28449672, %v1324_v18  ;;  %v2706_v0 = vsel %vm986_vm8, %v988_v16, %v984_v50  ;;  %v1105_v2 = vand.u32 2147483647, %v2673_v8  ;;  %v2710_v33 = vand.u32 2147483647, %v2696_v47 }
 0x105   : > { %v1723_v19 = vsub.f32 0.0, %v1659_v51  ;;  %v1444_v20 = vmul.f32 %v1412_v54, %v2659_v44  ;;  %v1204_v42 = vmul.f32 1.0614054, %v2706_v0  ;;  %v1098_v36 = vsub.f32 1.0, %v1097_v38  ;;  %v461_v38 = vpop.f32.mrf.mxu3 }
 0x106   : > { %v1388_v53 = vmul.f32 %v1356_v59, %v2671_v7  ;;  %vm1102_vm11 = vweird.f32 %v2122_v9  ;;  %v1107_v3 = vand.u32 2147483648, %v2673_v8  ;;  %v645_v5 = vmul.f32 0.3275911, %v2710_v33 }
 0x107   : > { %v1755_v28 = vsel %vm1691_vm4, %v1659_v51, %v1723_v19  ;;  %v1604_v12 = vmul.f32 %v2120_v43, %v1444_v20  ;;  %v1236_v60 = vadd.f32 -1.4531521, %v1204_v42  ;;  %v1099_v41 = vmul.f32 %v2122_v9, %v1098_v36  ;;  %vm1103_vm12 = vmor %vm1101_vm9, %vm1102_vm11 }
 0x108   : > { %v1787_v14 = vadd.f32 1.0, %v1755_v28  ;;  %v1420_v58 = vadd.f32 0.2548296, %v1388_v53  ;;  %v2719_v44 = vadd.f32 1.0, %v645_v5  ;;  %v489_v11 = vmul.f32 %v2309_v24, %v421_v26 }
 0x109   : > { %v1636_v15 = vsub.f32 1.0, %v1604_v12  ;;  %v1268_v27 = vmul.f32 %v1236_v60, %v2706_v0  ;;  %v1100_v52 = vadd.f32 %v2122_v9, %v1099_v41  ;;  %v1532_v21 = vsub.f32 0.0, %v2702_v37 }
 0x10a   : > { %v1819_v22 = vmul.f32 %v1787_v14, %v2603_v13  ;;  %v1452_v56 = vmul.f32 %v1420_v58, %v2671_v7  ;;  %v1108_v34 = vor.u32 1.1754944e-38, %v1107_v3  ;;  %2125 = vrcp.f32 %v2719_v44 }
 0x10b   : > { %v1700_v39 = vsub.f32 0.0, %v1636_v15  ;;  %v1300_v24 = vadd.f32 1.4214138, %v1268_v27  ;;  %v1104_v6 = vsel %vm1103_vm12, %v2122_v9, %v1100_v52  ;;  %vm1106_vm14 = vcmp.eq.f32.partialorder %v1105_v2, 8.507059e+37  ;;  %v2762_v2 = vld [vmem:[%s3436_s3] ss:$0 sm:$0xff] }
 0x10c   : > { %v1851_v29 = vpack.c.bf16 %v1819_v22, %v1819_v22  ;;  %v1612_v30 = vmul.f32 %v2124_v55, %v1452_v56  ;;  %v2730_v35 = vsel %vm1106_vm14, %v1108_v34, %v1104_v6  ;;  %v2733_v13 = vadd.f32 %v2314_v25, %v489_v11  ;;  %v2746_v25 = vld [vmem:[%s3435_s2] ss:$0 sm:$0xff] }
 0x10d   : > { %v548_v7 = vmul.f32 0.5, %v2552_v32  ;;  %v1732_v8 = vsel %vm1668_vm10, %v1636_v15, %v1700_v39  ;;  %v1332_v57 = vmul.f32 %v1300_v24, %v2706_v0  ;;  %v1212_v43 = vmul.f32 1.0614054, %v2730_v35 }
 0x10e   : > { %1884 = vst.msk [vmem:[%s2514_s8 + $0x64] sm:$0xf] %vm1858_vm13, %v1851_v29  ;;  %v1764_v17 = vadd.f32 1.0, %v1732_v8  ;;  %v556_v16 = vmul.f32 0.5, %v2555_v61  ;;  %v1644_v31 = vsub.f32 1.0, %v1612_v30  ;;  %v497_v32 = vmul.f32 %v2746_v25, %v441_v10 }
 0x10f   : > { %vm1676_vm15 = vcmp.ge.f32.partialorder %v2569_v48, 0.0  ;;  %v1364_v63 = vadd.f32 -0.28449672, %v1332_v57  ;;  %2127 = vpow2.f32 %v2692_v49  ;;  %v1244_v40 = vadd.f32 -1.4531521, %v1212_v43 }
 0x110   : > { %v2126_v46 = vpop.eup %2125  ;;  %v1796_v9 = vmul.f32 %v1764_v17, %v548_v7  ;;  %v1708_v18 = vsub.f32 0.0, %v1644_v31  ;;  %v1590_v37 = vmul.f32 1.442695, %v1532_v21  ;;  %v2752_v61 = vmul.f32 0.70710677, %v2733_v13 }
 0x111   : > { %v1396_v51 = vmul.f32 %v1364_v63, %v2706_v0  ;;  %v1276_v54 = vmul.f32 %v1244_v40, %v2730_v35  ;;  %v752_v50 = vmul.f32 %v2126_v46, %v2719_v44  ;;  %v760_v48 = vand.u32 2147483647, %v2719_v44 }
 0x112   : > { %v1828_v55 = vpack.c.bf16 %v1796_v9, %v1796_v9  ;;  %v1740_v49 = vsel %vm1676_vm15, %v1644_v31, %v1708_v18  ;;  %v621_v59 = vand.u32 2147483647, %v2752_v61  ;;  %v2765_v19 = vadd.f32 %v2762_v2, %v497_v32 }
 0x113   : > { %v1772_v20 = vadd.f32 1.0, %v1740_v49  ;;  %v1428_v42 = vadd.f32 0.2548296, %v1396_v51  ;;  %v1308_v36 = vadd.f32 1.4214138, %v1276_v54  ;;  %v753_v26 = vsub.f32 1.0, %v752_v50  ;;  %v404_v51 = vpop.f32.mrf.mxu0 }
 0x114   : > { %1861 = vst.msk [vmem:[%s2514_s8 + $0x8] sm:$0xf] %vm1858_vm13, %v1828_v55  ;;  %vm757_vm0 = vweird.f32 %v2126_v46  ;;  %v762_v53 = vand.u32 2147483648, %v2719_v44  ;;  %v653_v3 = vmul.f32 0.3275911, %v621_v59  ;;  %v505_v5 = vmul.f32 %v2746_v25, %v461_v38 }
 0x115   : > { %v2128_v28 = vpop.eup %2127  ;;  %v1804_v12 = vmul.f32 %v1772_v20, %v556_v16  ;;  %v1460_v60 = vmul.f32 %v1428_v42, %v2706_v0  ;;  %v1340_v41 = vmul.f32 %v1308_v36, %v2730_v35  ;;  %v754_v14 = vmul.f32 %v2126_v46, %v753_v26 }
 0x116   : > { %2129 = vpow2.f32 %v1590_v37  ;;  %vm756_vm1 = vweird.f32 %v2719_v44  ;;  %v2774_v58 = vadd.f32 1.0, %v653_v3  ;;  %v2777_v11 = vmul.f32 0.70710677, %v2765_v19 }
 0x117   : > { %v1836_v15 = vpack.c.bf16 %v1804_v12, %v1804_v12  ;;  %v1620_v27 = vmul.f32 %v2128_v28, %v1460_v60  ;;  %v1372_v52 = vadd.f32 -0.28449672, %v1340_v41  ;;  %v755_v21 = vadd.f32 %v2126_v46, %v754_v14  ;;  %vm758_vm2 = vmor %vm756_vm1, %vm757_vm0 }
 0x118   : > { %v763_v22 = vor.u32 1.1754944e-38, %v762_v53  ;;  %v1477_v0 = vmul.f32 %v2710_v33, %v2710_v33  ;;  %2131 = vrcp.f32 %v2774_v58  ;;  %v2784_v56 = vadd.f32 %v2762_v2, %v505_v5 }
 0x119   : > { %1869 = vst.msk [vmem:[%s2514_s8 + $0x28] sm:$0xf] %vm1858_vm13, %v1836_v15  ;;  %v1652_v44 = vsub.f32 1.0, %v1620_v27  ;;  %v1404_v34 = vmul.f32 %v1372_v52, %v2730_v35  ;;  %v759_v39 = vsel %vm758_vm2, %v2126_v46, %v755_v21  ;;  %vm761_vm3 = vcmp.eq.f32.partialorder %v760_v48, 8.507059e+37 }
 0x11a   : > { %v564_v24 = vmul.f32 0.5, %v2607_v1  ;;  %v2790_v6 = vsel %vm761_vm3, %v763_v22, %v759_v39  ;;  %v629_v10 = vand.u32 2147483647, %v2777_v11  ;;  %vm1684_vm4 = vcmp.ge.f32.partialorder %v2627_v62, 0.0 }
 0x11b   : > { %v1716_v33 = vsub.f32 0.0, %v1652_v44  ;;  %v1436_v29 = vadd.f32 0.2548296, %v1404_v34  ;;  %v1189_v30 = vmul.f32 1.0614054, %v2790_v6  ;;  %v1509_v8 = vsub.f32 0.0, %v1477_v0 }
 0x11c   : > { %v2130_v7 = vpop.eup %2129  ;;  %v1485_v57 = vmul.f32 %v621_v59, %v621_v59  ;;  %v661_v43 = vmul.f32 0.3275911, %v629_v10  ;;  %v2796_v17 = vmul.f32 0.70710677, %v2784_v56  ;;  %v572_v1 = vmul.f32 0.5, %v2630_v4 }
 0x11d   : > { %v1748_v16 = vsel %vm1684_vm4, %v1652_v44, %v1716_v33  ;;  %v1468_v31 = vmul.f32 %v1436_v29, %v2730_v35  ;;  %v1221_v32 = vadd.f32 -1.4531521, %v1189_v30  ;;  %vm1692_vm5 = vcmp.ge.f32.partialorder %v2645_v45, 0.0 }
 0x11e   : > { %v2132_v63 = vpop.eup %2131  ;;  %v1780_v40 = vadd.f32 1.0, %v1748_v16  ;;  %v2801_v62 = vadd.f32 1.0, %v661_v43  ;;  %v2804_v46 = vand.u32 2147483647, %v2796_v17  ;;  %v2807_v18 = vmul.f32 0.5, %v2683_v23  ;;  %v424_v16 = vpop.f32.mrf.mxu1 }
 0x11f   : > { %v1628_v9 = vmul.f32 %v2130_v7, %v1468_v31  ;;  %v1253_v37 = vmul.f32 %v1221_v32, %v2790_v6  ;;  %v872_v4 = vmul.f32 %v2132_v63, %v2774_v58  ;;  %v1544_v54 = vmul.f32 1.442695, %v1509_v8 }
 0x120   : > { %v1812_v35 = vmul.f32 %v1780_v40, %v564_v24  ;;  %v1517_v50 = vsub.f32 0.0, %v1485_v57  ;;  %2133 = vrcp.f32 %v2801_v62  ;;  %v882_v49 = vand.u32 2147483648, %v2774_v58 }
 0x121   : > { %v1660_v48 = vsub.f32 1.0, %v1628_v9  ;;  %v1285_v38 = vadd.f32 1.4214138, %v1253_v37  ;;  %v873_v55 = vsub.f32 1.0, %v872_v4  ;;  %v880_v23 = vand.u32 2147483647, %v2774_v58 }
 0x122   : > { %v1844_v59 = vpack.c.bf16 %v1812_v35, %v1812_v35  ;;  %v669_v20 = vmul.f32 0.3275911, %v2804_v46  ;;  %v482_v42 = vmul.f32 %v2746_v25, %v404_v51  ;;  %vm877_vm6 = vweird.f32 %v2132_v63 }
 0x123   : > { %v1724_v36 = vsub.f32 0.0, %v1660_v48  ;;  %v1317_v26 = vmul.f32 %v1285_v38, %v2790_v6  ;;  %v874_v53 = vmul.f32 %v2132_v63, %v873_v55  ;;  %2135 = vpow2.f32 %v1544_v54 }
 0x124   : > { %1877 = vst.msk [vmem:[%s2514_s8 + $0x48] sm:$0xf] %vm1858_vm13, %v1844_v59  ;;  %vm876_vm7 = vweird.f32 %v2774_v58  ;;  %v1560_v3 = vmul.f32 1.442695, %v1517_v50  ;;  %v2820_v5 = vadd.f32 1.0, %v669_v20  ;;  %v883_v41 = vor.u32 1.1754944e-38, %v882_v49 }
 0x125   : > { %v1756_v28 = vsel %vm1692_vm5, %v1660_v48, %v1724_v36  ;;  %v1349_v12 = vadd.f32 -0.28449672, %v1317_v26  ;;  %v875_v60 = vadd.f32 %v2132_v63, %v874_v53  ;;  %vm878_vm8 = vmor %vm876_vm7, %vm877_vm6  ;;  %v1493_v27 = vmul.f32 %v629_v10, %v629_v10  ;;  %v444_v53 = vpop.f32.mrf.mxu2 }
 0x126   : > { %v2134_v14 = vpop.eup %2133  ;;  %v1788_v15 = vadd.f32 1.0, %v1756_v28  ;;  %2137 = vrcp.f32 %v2820_v5  ;;  %v2826_v52 = vadd.f32 %v2762_v2, %v482_v42  ;;  %vm881_vm9 = vcmp.eq.f32.partialorder %v880_v23, 8.507059e+37 }
 0x127   : > { %v1381_v58 = vmul.f32 %v1349_v12, %v2790_v6  ;;  %v879_v21 = vsel %vm878_vm8, %v2132_v63, %v875_v60  ;;  %v992_v22 = vmul.f32 %v2134_v14, %v2801_v62  ;;  %v1000_v44 = vand.u32 2147483647, %v2801_v62 }
 0x128   : > { %v1820_v45 = vmul.f32 %v1788_v15, %v572_v1  ;;  %v2830_v0 = vsel %vm881_vm9, %v883_v41, %v879_v21  ;;  %v1002_v34 = vand.u32 2147483648, %v2801_v62  ;;  %2139 = vpow2.f32 %v1560_v3 }
 0x129   : > { %v1413_v39 = vadd.f32 0.2548296, %v1381_v58  ;;  %v1197_v24 = vmul.f32 1.0614054, %v2830_v0  ;;  %v993_v10 = vsub.f32 1.0, %v992_v22  ;;  %v2136_v33 = vpop.eup %2135  ;;  %vm1669_vm10 = vcmp.ge.f32.partialorder %v2696_v47, 0.0 }
 0x12a   : > { %v1852_v29 = vpack.c.bf16 %v1820_v45, %v1820_v45  ;;  %vm996_vm11 = vweird.f32 %v2801_v62  ;;  %v1525_v30 = vsub.f32 0.0, %v1493_v27  ;;  %v2838_v7 = vmul.f32 0.70710677, %v2826_v52 }
 0x12b   : > { %v1445_v8 = vmul.f32 %v1413_v39, %v2790_v6  ;;  %v1229_v57 = vadd.f32 -1.4531521, %v1197_v24  ;;  %v994_v43 = vmul.f32 %v2134_v14, %v993_v10  ;;  %vm997_vm12 = vweird.f32 %v2134_v14 }
 0x12c   : > { %v2138_v1 = vpop.eup %2137  ;;  %1885 = vst.msk [vmem:[%s2514_s8 + $0x68] sm:$0xf] %vm1858_vm13, %v1852_v29  ;;  %vm2843_vm14 = vcmp.eq.f32.partialorder %v1000_v44, 8.507059e+37  ;;  %v1003_v32 = vor.u32 1.1754944e-38, %v1002_v34  ;;  %v1501_v63 = vmul.f32 %v2804_v46, %v2804_v46  ;;  %v614_v40 = vand.u32 2147483647, %v2838_v7  ;;  %vm998_vm15 = vmor %vm996_vm11, %vm997_vm12 }
 0x12d   : > { %v1605_v9 = vmul.f32 %v2136_v33, %v1445_v8  ;;  %v1261_v6 = vmul.f32 %v1229_v57, %v2830_v0  ;;  %v995_v37 = vadd.f32 %v2134_v14, %v994_v43  ;;  %v1112_v4 = vmul.f32 %v2138_v1, %v2820_v5 }
 0x12e   : > { %v1120_v51 = vand.u32 2147483647, %v2820_v5  ;;  %v1122_v35 = vand.u32 2147483648, %v2820_v5  ;;  %v646_v54 = vmul.f32 0.3275911, %v614_v40  ;;  %v490_v50 = vmul.f32 %v2746_v25, %v424_v16  ;;  %v2140_v48 = vpop.eup %2139 }
 0x12f   : > { %v1637_v46 = vsub.f32 1.0, %v1605_v9  ;;  %v1293_v38 = vadd.f32 1.4214138, %v1261_v6  ;;  %v999_v55 = vsel %vm998_vm15, %v2134_v14, %v995_v37  ;;  %v1113_v49 = vsub.f32 1.0, %v1112_v4 }
 0x130   : > { %v2859_v59 = vsel %vm2843_vm14, %v1003_v32, %v999_v55  ;;  %vm1117_vm0 = vweird.f32 %v2138_v1  ;;  %v1533_v23 = vsub.f32 0.0, %v1501_v63  ;;  %v2861_v62 = vadd.f32 1.0, %v646_v54 }
 0x131   : > { %v1701_v20 = vsub.f32 0.0, %v1637_v46  ;;  %v1325_v42 = vmul.f32 %v1293_v38, %v2830_v0  ;;  %v1205_v36 = vmul.f32 1.0614054, %v2859_v59  ;;  %v1114_v26 = vmul.f32 %v2138_v1, %v1113_v49 }
 0x132   : > { %v1576_v3 = vmul.f32 1.442695, %v1525_v30  ;;  %vm1116_vm1 = vweird.f32 %v2820_v5  ;;  %2141 = vrcp.f32 %v2861_v62  ;;  %v2868_v28 = vadd.f32 %v2762_v2, %v490_v50 }
 0x133   : > { %v1733_v12 = vsel %vm1669_vm10, %v1637_v46, %v1701_v20  ;;  %v1357_v60 = vadd.f32 -0.28449672, %v1325_v42  ;;  %v1237_v41 = vadd.f32 -1.4531521, %v1205_v36  ;;  %v1115_v14 = vadd.f32 %v2138_v1, %v1114_v26  ;;  %vm1118_vm2 = vmor %vm1116_vm1, %vm1117_vm0  ;;  %v464_v36 = vpop.f32.mrf.mxu3 }
 0x134   : > { %v1765_v15 = vadd.f32 1.0, %v1733_v12  ;;  %v1123_v27 = vor.u32 1.1754944e-38, %v1122_v35  ;;  %v1592_v58 = vmul.f32 1.442695, %v1533_v23  ;;  %v498_v21 = vmul.f32 %v2746_v25, %v444_v53 }
 0x135   : > { %v1389_v5 = vmul.f32 %v1357_v60, %v2830_v0  ;;  %v1269_v22 = vmul.f32 %v1237_v41, %v2859_v59  ;;  %v1119_v45 = vsel %vm1118_vm2, %v2138_v1, %v1115_v14  ;;  %vm1121_vm3 = vcmp.eq.f32.partialorder %v1120_v51, 8.507059e+37 }
 0x136   : > { %v1797_v44 = vmul.f32 %v1765_v15, %v2807_v18  ;;  %v557_v47 = vmul.f32 0.5, %v2733_v13  ;;  %v2878_v34 = vsel %vm1121_vm3, %v1123_v27, %v1119_v45  ;;  %v2881_v39 = vmul.f32 0.70710677, %v2868_v28 }
 0x137   : > { %v1421_v24 = vadd.f32 0.2548296, %v1389_v5  ;;  %v1301_v10 = vadd.f32 1.4214138, %v1269_v22  ;;  %2143 = vpow2.f32 %v1576_v3  ;;  %v1213_v33 = vmul.f32 1.0614054, %v2878_v34 }
 0x138   : > { %v2142_v29 = vpop.eup %2141  ;;  %v1829_v30 = vpack.c.bf16 %v1797_v44, %v1797_v44  ;;  %2145 = vpow2.f32 %v1592_v58  ;;  %v622_v8 = vand.u32 2147483647, %v2881_v39  ;;  %v2886_v18 = vadd.f32 %v2762_v2, %v498_v21 }
 0x139   : > { %v1453_v13 = vmul.f32 %v1421_v24, %v2830_v0  ;;  %v1333_v57 = vmul.f32 %v1301_v10, %v2859_v59  ;;  %v1245_v43 = vadd.f32 -1.4531521, %v1213_v33  ;;  %v767_v16 = vmul.f32 %v2142_v29, %v2861_v62 }
 0x13a   : > { %1862 = vst.msk [vmem:[%s2514_s8 + $0xc] sm:$0xf] %vm1858_vm13, %v1829_v30  ;;  %vm771_vm4 = vweird.f32 %v2861_v62  ;;  %v775_v1 = vand.u32 2147483647, %v2861_v62  ;;  %v1478_v31 = vmul.f32 %v614_v40, %v614_v40  ;;  %v654_v32 = vmul.f32 0.3275911, %v622_v8 }
 0x13b   : > { %v1613_v63 = vmul.f32 %v2140_v48, %v1453_v13  ;;  %v1365_v9 = vadd.f32 -0.28449672, %v1333_v57  ;;  %v1277_v6 = vmul.f32 %v1245_v43, %v2878_v34  ;;  %v768_v37 = vsub.f32 1.0, %v767_v16 }
 0x13c   : > { %vm772_vm5 = vweird.f32 %v2142_v29  ;;  %v777_v0 = vand.u32 2147483648, %v2861_v62  ;;  %v2897_v4 = vadd.f32 1.0, %v654_v32  ;;  %v2900_v51 = vmul.f32 0.70710677, %v2886_v18 }
 0x13d   : > { %v2144_v35 = vpop.eup %2143  ;;  %v1645_v54 = vsub.f32 1.0, %v1613_v63  ;;  %v1397_v50 = vmul.f32 %v1365_v9, %v2859_v59  ;;  %v1309_v46 = vadd.f32 1.4214138, %v1277_v6  ;;  %v769_v40 = vmul.f32 %v2142_v29, %v768_v37  ;;  %vm773_vm7 = vmor %vm771_vm4, %vm772_vm5  ;;  %v406_v9 = vpop.f32.mrf.mxu0 }
 0x13e   : > { %v2146_v38 = vpop.eup %2145  ;;  %vm1677_vm6 = vcmp.ge.f32.partialorder %v2752_v61, 0.0  ;;  %v565_v48 = vmul.f32 0.5, %v2765_v19  ;;  %v2906_v55 = vmul.f32 0.5, %v2784_v56  ;;  %2147 = vrcp.f32 %v2897_v4 }
 0x13f   : > { %v1709_v49 = vsub.f32 0.0, %v1645_v54  ;;  %v1429_v23 = vadd.f32 0.2548296, %v1397_v50  ;;  %v1341_v20 = vmul.f32 %v1309_v46, %v2878_v34  ;;  %v770_v42 = vadd.f32 %v2142_v29, %v769_v40 }
 0x140   : > { %vm776_vm8 = vcmp.eq.f32.partialorder %v775_v1, 8.507059e+37  ;;  %v778_v26 = vor.u32 1.1754944e-38, %v777_v0  ;;  %v1510_v61 = vsub.f32 0.0, %v1478_v31  ;;  %v2914_v19 = vand.u32 2147483647, %v2900_v51 }
 0x141   : > { %v1741_v56 = vsel %vm1677_vm6, %v1645_v54, %v1709_v49  ;;  %v1461_v53 = vmul.f32 %v1429_v23, %v2859_v59  ;;  %v1373_v3 = vadd.f32 -0.28449672, %v1341_v20  ;;  %v774_v12 = vsel %vm773_vm7, %v2142_v29, %v770_v42 }
 0x142   : > { %v1773_v60 = vadd.f32 1.0, %v1741_v56  ;;  %v2917_v41 = vsel %vm776_vm8, %v778_v26, %v774_v12  ;;  %v662_v14 = vmul.f32 0.3275911, %v2914_v19  ;;  %v506_v15 = vmul.f32 %v2746_v25, %v464_v36  ;;  %v426_v26 = vpop.f32.mrf.mxu1 }
 0x143   : > { %v1621_v62 = vmul.f32 %v2144_v35, %v1461_v53  ;;  %vm1685_vm9 = vcmp.ge.f32.partialorder %v2777_v11, 0.0  ;;  %v1405_v27 = vmul.f32 %v1373_v3, %v2878_v34  ;;  %v1190_v58 = vmul.f32 1.0614054, %v2917_v41 }
 0x144   : > { %v2148_v21 = vpop.eup %2147  ;;  %v1805_v5 = vmul.f32 %v1773_v60, %v557_v47  ;;  %v1546_v59 = vmul.f32 1.442695, %v1510_v61  ;;  %v2924_v22 = vmul.f32 %v622_v8, %v622_v8  ;;  %v2926_v45 = vadd.f32 1.0, %v662_v14 }
 0x145   : > { %v1653_v44 = vsub.f32 1.0, %v1621_v62  ;;  %v1437_v24 = vadd.f32 0.2548296, %v1405_v27  ;;  %v1222_v10 = vadd.f32 -1.4531521, %v1190_v58  ;;  %v887_v33 = vmul.f32 %v2148_v21, %v2897_v4 }
 0x146   : > { %v1837_v29 = vpack.c.bf16 %v1805_v5, %v1805_v5  ;;  %v895_v30 = vand.u32 2147483647, %v2897_v4  ;;  %2149 = vrcp.f32 %v2926_v45  ;;  %v2932_v13 = vadd.f32 %v2762_v2, %v506_v15 }
 0x147   : > { %v1717_v47 = vsub.f32 0.0, %v1653_v44  ;;  %v1469_v57 = vmul.f32 %v1437_v24, %v2878_v34  ;;  %v1254_v8 = vmul.f32 %v1222_v10, %v2917_v41  ;;  %v888_v43 = vsub.f32 1.0, %v887_v33 }
 0x148   : > { %1870 = vst.msk [vmem:[%s2514_s8 + $0x2c] sm:$0xf] %vm1858_vm13, %v1837_v29  ;;  %vm1693_vm10 = vcmp.ge.f32.partialorder %v2796_v17, 0.0  ;;  %vm891_vm11 = vweird.f32 %v2897_v4  ;;  %vm892_vm12 = vweird.f32 %v2148_v21  ;;  %v897_v16 = vand.u32 2147483648, %v2897_v4 }
 0x149   : > { %v1749_v1 = vsel %vm1685_vm9, %v1653_v44, %v1717_v47  ;;  %v1629_v31 = vmul.f32 %v2146_v38, %v1469_v57  ;;  %v1286_v32 = vadd.f32 1.4214138, %v1254_v8  ;;  %v889_v63 = vmul.f32 %v2148_v21, %v888_v43  ;;  %vm893_vm15 = vmor %vm891_vm11, %vm892_vm12 }
 0x14a   : > { %v1781_v34 = vadd.f32 1.0, %v1749_v1  ;;  %2151 = vpow2.f32 %v1546_v59  ;;  %vm2943_vm14 = vcmp.eq.f32.partialorder %v895_v30, 8.507059e+37  ;;  %v1518_v37 = vsub.f32 0.0, %v2924_v22 }
 0x14b   : > { %v1661_v0 = vsub.f32 1.0, %v1629_v31  ;;  %v1318_v35 = vmul.f32 %v1286_v32, %v2917_v41  ;;  %v890_v54 = vadd.f32 %v2148_v21, %v889_v63  ;;  %v2950_v50 = vmul.f32 0.70710677, %v2932_v13 }
 0x14c   : > { %v2150_v11 = vpop.eup %2149  ;;  %v1813_v46 = vmul.f32 %v1781_v34, %v565_v48  ;;  %v898_v40 = vor.u32 1.1754944e-38, %v897_v16  ;;  %v1015_v38 = vand.u32 2147483647, %v2926_v45  ;;  %v483_v49 = vmul.f32 %v2746_v25, %v406_v9 }
 0x14d   : > { %v1725_v23 = vsub.f32 0.0, %v1661_v0  ;;  %v1350_v20 = vadd.f32 -0.28449672, %v1318_v35  ;;  %v894_v42 = vsel %vm893_vm15, %v2148_v21, %v890_v54  ;;  %v1007_v36 = vmul.f32 %v2150_v11, %v2926_v45 }
 0x14e   : > { %v1845_v61 = vpack.c.bf16 %v1813_v46, %v1813_v46  ;;  %v2960_v48 = vsel %vm2943_vm14, %v898_v40, %v894_v42  ;;  %v1017_v4 = vand.u32 2147483648, %v2926_v45  ;;  %v638_v56 = vand.u32 2147483647, %v2950_v50 }
 0x14f   : > { %v1757_v53 = vsel %vm1693_vm10, %v1661_v0, %v1725_v23  ;;  %v1382_v3 = vmul.f32 %v1350_v20, %v2917_v41  ;;  %v1198_v12 = vmul.f32 1.0614054, %v2960_v48  ;;  %v1008_v60 = vsub.f32 1.0, %v1007_v36 }
 0x150   : > { %v2152_v14 = vpop.eup %2151  ;;  %1878 = vst.msk [vmem:[%s2514_s8 + $0x4c] sm:$0xf] %vm1858_vm13, %v1845_v61  ;;  %v1789_v15 = vadd.f32 1.0, %v1757_v53  ;;  %v670_v62 = vmul.f32 0.3275911, %v638_v56  ;;  %v2971_v27 = vadd.f32 %v2762_v2, %v483_v49  ;;  %v491_v58 = vmul.f32 %v2746_v25, %v426_v26  ;;  %v446_v61 = vpop.f32.mrf.mxu2 }
 0x151   : > { %v1414_v21 = vadd.f32 0.2548296, %v1382_v3  ;;  %v1230_v5 = vadd.f32 -1.4531521, %v1198_v12  ;;  %v1009_v59 = vmul.f32 %v2150_v11, %v1008_v60  ;;  %vm1012_vm0 = vweird.f32 %v2150_v11 }
 0x152   : > { %v1821_v17 = vmul.f32 %v1789_v15, %v2906_v55  ;;  %vm1011_vm1 = vweird.f32 %v2926_v45  ;;  %v1494_v22 = vmul.f32 %v2914_v19, %v2914_v19  ;;  %v2978_v44 = vadd.f32 1.0, %v670_v62 }
 0x153   : > { %v1446_v24 = vmul.f32 %v1414_v21, %v2917_v41  ;;  %v1262_v10 = vmul.f32 %v1230_v5, %v2960_v48  ;;  %v1010_v33 = vadd.f32 %v2150_v11, %v1009_v59  ;;  %v1018_v29 = vor.u32 1.1754944e-38, %v1017_v4  ;;  %vm1013_vm2 = vmor %vm1011_vm1, %vm1012_vm0 }
 0x154   : > { %v1853_v30 = vpack.c.bf16 %v1821_v17, %v1821_v17  ;;  %2153 = vrcp.f32 %v2978_v44  ;;  %v2984_v55 = vmul.f32 0.70710677, %v2971_v27  ;;  %v2987_v45 = vadd.f32 %v2762_v2, %v491_v58 }
 0x155   : > { %v1606_v47 = vmul.f32 %v2152_v14, %v1446_v24  ;;  %v1294_v19 = vadd.f32 1.4214138, %v1262_v10  ;;  %v1014_v57 = vsel %vm1013_vm2, %v2150_v11, %v1010_v33  ;;  %vm1016_vm3 = vcmp.eq.f32.partialorder %v1015_v38, 8.507059e+37 }
 0x156   : > { %1886 = vst.msk [vmem:[%s2514_s8 + $0x6c] sm:$0xf] %vm1858_vm13, %v1853_v30  ;;  %v1562_v41 = vmul.f32 1.442695, %v1518_v37  ;;  %v2991_v8 = vsel %vm1016_vm3, %v1018_v29, %v1014_v57  ;;  %v550_v43 = vmul.f32 0.5, %v2826_v52  ;;  %vm1670_vm4 = vcmp.ge.f32.partialorder %v2838_v7, 0.0 }
 0x157   : > { %v1638_v16 = vsub.f32 1.0, %v1606_v47  ;;  %v1326_v1 = vmul.f32 %v1294_v19, %v2960_v48  ;;  %v1206_v31 = vmul.f32 1.0614054, %v2991_v8  ;;  %v1526_v32 = vsub.f32 0.0, %v1494_v22 }
 0x158   : > { %v615_v63 = vand.u32 2147483647, %v2984_v55  ;;  %v2999_v9 = vmul.f32 0.70710677, %v2987_v45  ;;  %v1502_v0 = vmul.f32 %v638_v56, %v638_v56  ;;  %v3002_v52 = vmul.f32 0.5, %v2868_v28 }
 0x159   : > { %v1702_v34 = vsub.f32 0.0, %v1638_v16  ;;  %v1358_v6 = vadd.f32 -0.28449672, %v1326_v1  ;;  %v1238_v37 = vadd.f32 -1.4531521, %v1206_v31  ;;  %2155 = vpow2.f32 %v1562_v41  ;;  %v466_v1 = vpop.f32.mrf.mxu3 }
 0x15a   : > { %v2154_v35 = vpop.eup %2153  ;;  %v3005_v54 = vmul.f32 0.5, %v2886_v18  ;;  %v647_v11 = vmul.f32 0.3275911, %v615_v63  ;;  %v1578_v23 = vmul.f32 1.442695, %v1526_v32  ;;  %v1534_v18 = vsub.f32 0.0, %v1502_v0 }
 0x15b   : > { %v1734_v7 = vsel %vm1670_vm4, %v1638_v16, %v1702_v34  ;;  %v1390_v46 = vmul.f32 %v1358_v6, %v2960_v48  ;;  %v1270_v40 = vmul.f32 %v1238_v37, %v2991_v8  ;;  %v1127_v38 = vmul.f32 %v2154_v35, %v2978_v44 }
 0x15c   : > { %v1766_v49 = vadd.f32 1.0, %v1734_v7  ;;  %v3010_v20 = vadd.f32 1.0, %v647_v11  ;;  %v3013_v42 = vand.u32 2147483647, %v2999_v9  ;;  %vm1678_vm5 = vcmp.ge.f32.partialorder %v2881_v39, 0.0 }
 0x15d   : > { %v1422_v28 = vadd.f32 0.2548296, %v1390_v46  ;;  %v1302_v36 = vadd.f32 1.4214138, %v1270_v40  ;;  %v1128_v26 = vsub.f32 1.0, %v1127_v38  ;;  %v1137_v53 = vand.u32 2147483648, %v2978_v44 }
 0x15e   : > { %v1798_v4 = vmul.f32 %v1766_v49, %v550_v43  ;;  %v1135_v56 = vand.u32 2147483647, %v2978_v44  ;;  %2157 = vrcp.f32 %v3010_v20  ;;  %vm1132_vm6 = vweird.f32 %v2154_v35 }
 0x15f   : > { %v1454_v3 = vmul.f32 %v1422_v28, %v2960_v48  ;;  %v1334_v12 = vmul.f32 %v1302_v36, %v2991_v8  ;;  %v1129_v60 = vmul.f32 %v2154_v35, %v1128_v26  ;;  %v2156_v14 = vpop.eup %2155  ;;  %2159 = vpow2.f32 %v1578_v23 }
 0x160   : > { %v1830_v15 = vpack.c.bf16 %v1798_v4, %v1798_v4  ;;  %v655_v62 = vmul.f32 0.3275911, %v3013_v42  ;;  %v499_v58 = vmul.f32 %v2746_v25, %v446_v61  ;;  %vm1131_vm7 = vweird.f32 %v2978_v44  ;;  %v409_v4 = vpop.f32.mrf.mxu0 }
 0x161   : > { %v1614_v21 = vmul.f32 %v2156_v14, %v1454_v3  ;;  %v1366_v5 = vadd.f32 -0.28449672, %v1334_v12  ;;  %v1130_v59 = vadd.f32 %v2154_v35, %v1129_v60  ;;  %vm1133_vm8 = vmor %vm1131_vm7, %vm1132_vm6  ;;  %v1138_v48 = vor.u32 1.1754944e-38, %v1137_v53 }
 0x162   : > { %1863 = vst.msk [vmem:[%s2514_s8 + $0x10] sm:$0xf] %vm1858_vm13, %v1830_v15  ;;  %v1594_v17 = vmul.f32 1.442695, %v1534_v18  ;;  %v3026_v22 = vmul.f32 %v615_v63, %v615_v63  ;;  %v3028_v24 = vadd.f32 1.0, %v655_v62  ;;  %vm1136_vm9 = vcmp.eq.f32.partialorder %v1135_v56, 8.507059e+37 }
 0x163   : > { %v1646_v10 = vsub.f32 1.0, %v1614_v21  ;;  %v1398_v33 = vmul.f32 %v1366_v5, %v2991_v8  ;;  %v1134_v29 = vsel %vm1133_vm8, %v2154_v35, %v1130_v59  ;;  %v3032_v47 = vmul.f32 0.5, %v2932_v13 }
 0x164   : > { %v2158_v30 = vpop.eup %2157  ;;  %v3034_v19 = vsel %vm1136_vm9, %v1138_v48, %v1134_v29  ;;  %2161 = vrcp.f32 %v3028_v24  ;;  %v3038_v44 = vadd.f32 %v2762_v2, %v499_v58  ;;  %vm1686_vm10 = vcmp.ge.f32.partialorder %v2900_v51, 0.0 }
 0x165   : > { %v1710_v57 = vsub.f32 0.0, %v1646_v10  ;;  %v1430_v41 = vadd.f32 0.2548296, %v1398_v33  ;;  %v1214_v43 = vmul.f32 1.0614054, %v3034_v19  ;;  %v782_v16 = vmul.f32 %v2158_v30, %v3010_v20  ;;  %v2160_v31 = vpop.eup %2159 }
 0x166   : > { %2163 = vpow2.f32 %v1594_v17  ;;  %v790_v13 = vand.u32 2147483647, %v3010_v20  ;;  %v792_v32 = vand.u32 2147483648, %v3010_v20  ;;  %v1511_v63 = vsub.f32 0.0, %v3026_v22 }
 0x167   : > { %v1742_v34 = vsel %vm1678_vm5, %v1646_v10, %v1710_v57  ;;  %v1462_v6 = vmul.f32 %v1430_v41, %v2991_v8  ;;  %v1246_v37 = vadd.f32 -1.4531521, %v1214_v43  ;;  %v783_v0 = vsub.f32 1.0, %v782_v16 }
 0x168   : > { %v1774_v35 = vadd.f32 1.0, %v1742_v34  ;;  %vm786_vm11 = vweird.f32 %v3010_v20  ;;  %vm787_vm12 = vweird.f32 %v2158_v30  ;;  %v507_v11 = vmul.f32 %v2746_v25, %v466_v1 }
 0x169   : > { %v1622_v7 = vmul.f32 %v2160_v31, %v1462_v6  ;;  %v1278_v46 = vmul.f32 %v1246_v37, %v3034_v19  ;;  %v784_v40 = vmul.f32 %v2158_v30, %v783_v0  ;;  %v3053_v38 = vmul.f32 0.70710677, %v3038_v44  ;;  %vm788_vm15 = vmor %vm786_vm11, %vm787_vm12 }
 0x16a   : > { %v2162_v49 = vpop.eup %2161  ;;  %v1806_v39 = vmul.f32 %v1774_v35, %v3002_v52  ;;  %vm3056_vm14 = vcmp.eq.f32.partialorder %v790_v13, 8.507059e+37  ;;  %v793_v23 = vor.u32 1.1754944e-38, %v792_v32  ;;  %v910_v28 = vand.u32 2147483647, %v3028_v24 }
 0x16b   : > { %v1654_v36 = vsub.f32 1.0, %v1622_v7  ;;  %v1310_v26 = vadd.f32 1.4214138, %v1278_v46  ;;  %v785_v18 = vadd.f32 %v2158_v30, %v784_v40  ;;  %v902_v61 = vmul.f32 %v2162_v49, %v3028_v24 }
 0x16c   : > { %v2164_v56 = vpop.eup %2163  ;;  %v1838_v53 = vpack.c.bf16 %v1806_v39, %v1806_v39  ;;  %v912_v52 = vand.u32 2147483648, %v3028_v24  ;;  %v631_v3 = vand.u32 2147483647, %v3053_v38  ;;  %v3068_v12 = vadd.f32 %v2762_v2, %v507_v11 }
 0x16d   : > { %v1718_v60 = vsub.f32 0.0, %v1654_v36  ;;  %v1342_v14 = vmul.f32 %v1310_v26, %v3034_v19  ;;  %v789_v15 = vsel %vm788_vm15, %v2158_v30, %v785_v18  ;;  %v903_v62 = vsub.f32 1.0, %v902_v61 }
 0x16e   : > { %1871 = vst.msk [vmem:[%s2514_s8 + $0x30] sm:$0xf] %vm1858_vm13, %v1838_v53  ;;  %v3075_v58 = vsel %vm3056_vm14, %v793_v23, %v789_v15  ;;  %vm907_vm0 = vweird.f32 %v2162_v49  ;;  %v663_v20 = vmul.f32 0.3275911, %v631_v3  ;;  %v484_v21 = vmul.f32 %v2746_v25, %v409_v4 }
 0x16f   : > { %v1750_v5 = vsel %vm1686_vm10, %v1654_v36, %v1718_v60  ;;  %v1374_v59 = vadd.f32 -0.28449672, %v1342_v14  ;;  %v1191_v48 = vmul.f32 1.0614054, %v3075_v58  ;;  %v904_v17 = vmul.f32 %v2162_v49, %v903_v62 }
 0x170   : > { %v1782_v10 = vadd.f32 1.0, %v1750_v5  ;;  %vm906_vm1 = vweird.f32 %v3028_v24  ;;  %v1487_v33 = vmul.f32 %v3013_v42, %v3013_v42  ;;  %v3084_v29 = vadd.f32 1.0, %v663_v20 }
 0x171   : > { %v1406_v30 = vmul.f32 %v1374_v59, %v3034_v19  ;;  %v1223_v57 = vadd.f32 -1.4531521, %v1191_v48  ;;  %v905_v41 = vadd.f32 %v2162_v49, %v904_v17  ;;  %vm911_vm2 = vcmp.eq.f32.partialorder %v910_v28, 8.507059e+37  ;;  %vm908_vm3 = vmor %vm906_vm1, %vm907_vm0 }
 0x172   : > { %v1814_v51 = vmul.f32 %v1782_v10, %v3005_v54  ;;  %v913_v43 = vor.u32 1.1754944e-38, %v912_v52  ;;  %2165 = vrcp.f32 %v3084_v29  ;;  %v3091_v24 = vmul.f32 0.70710677, %v3068_v12 }
 0x173   : > { %v1438_v16 = vadd.f32 0.2548296, %v1406_v30  ;;  %v1255_v42 = vmul.f32 %v1223_v57, %v3075_v58  ;;  %v909_v1 = vsel %vm908_vm3, %v2162_v49, %v905_v41  ;;  %v3095_v31 = vadd.f32 %v2762_v2, %v484_v21 }
 0x174   : > { %v1846_v13 = vpack.c.bf16 %v1814_v51, %v1814_v51  ;;  %vm1694_vm4 = vcmp.ge.f32.partialorder %v2950_v50, 0.0  ;;  %v3098_v54 = vsel %vm911_vm2, %v913_v43, %v909_v1  ;;  %v1519_v32 = vsub.f32 0.0, %v1487_v33 }
 0x175   : > { %v1495_v34 = vmul.f32 %v631_v3, %v631_v3  ;;  %v1470_v6 = vmul.f32 %v1438_v16, %v3034_v19  ;;  %v3102_v37 = vmul.f32 0.5, %v2971_v27  ;;  %v1287_v0 = vadd.f32 1.4214138, %v1255_v42  ;;  %v429_v3 = vpop.f32.mrf.mxu1 }
 0x176   : > { %v1199_v35 = vmul.f32 1.0614054, %v3098_v54  ;;  %1879 = vst.msk [vmem:[%s2514_s8 + $0x50] sm:$0xf] %vm1858_vm13, %v1846_v13  ;;  %v1548_v11 = vmul.f32 1.442695, %v1511_v63  ;;  %vm1026_vm7 = vweird.f32 %v3084_v29  ;;  %v492_v59 = vmul.f32 %v2746_v25, %v429_v3 }
 0x177   : > { %v639_v7 = vand.u32 2147483647, %v3091_v24  ;;  %v1630_v46 = vmul.f32 %v2164_v56, %v1470_v6  ;;  %v1319_v40 = vmul.f32 %v1287_v0, %v3075_v58  ;;  %v3112_v39 = vmul.f32 0.70710677, %v3095_v31  ;;  %v449_v6 = vpop.f32.mrf.mxu2 }
 0x178   : > { %v1231_v49 = vadd.f32 -1.4531521, %v1199_v35  ;;  %v2166_v19 = vpop.eup %2165  ;;  %v3115_v27 = vmul.f32 0.5, %v2987_v45  ;;  %v1564_v8 = vmul.f32 1.442695, %v1519_v32  ;;  %v1527_v23 = vsub.f32 0.0, %v1495_v34 }
 0x179   : > { %v671_v28 = vmul.f32 0.3275911, %v639_v7  ;;  %v1662_v36 = vsub.f32 1.0, %v1630_v46  ;;  %v1351_v26 = vadd.f32 -0.28449672, %v1319_v40  ;;  %v1022_v63 = vmul.f32 %v2166_v19, %v3084_v29 }
 0x17a   : > { %v1263_v22 = vmul.f32 %v1231_v49, %v3098_v54  ;;  %2167 = vpow2.f32 %v1548_v11  ;;  %v1030_v18 = vand.u32 2147483647, %v3084_v29  ;;  %v3123_v4 = vand.u32 2147483647, %v3112_v39 }
 0x17b   : > { %v3120_v61 = vadd.f32 1.0, %v671_v28  ;;  %v1726_v56 = vsub.f32 0.0, %v1662_v36  ;;  %v1383_v45 = vmul.f32 %v1351_v26, %v3075_v58  ;;  %v1023_v52 = vsub.f32 1.0, %v1022_v63 }
 0x17c   : > { %v1295_v53 = vadd.f32 1.4214138, %v1263_v22  ;;  %vm1027_vm5 = vweird.f32 %v2166_v19  ;;  %v1032_v60 = vand.u32 2147483648, %v3084_v29  ;;  %v1580_v14 = vmul.f32 1.442695, %v1527_v23 }
 0x17d   : > { %2169 = vrcp.f32 %v3120_v61  ;;  %v1758_v15 = vsel %vm1694_vm4, %v1662_v36, %v1726_v56  ;;  %v1415_v62 = vadd.f32 0.2548296, %v1383_v45  ;;  %v1024_v21 = vmul.f32 %v2166_v19, %v1023_v52  ;;  %vm1028_vm8 = vmor %vm1026_vm7, %vm1027_vm5  ;;  %v3163_v23 = vld [vmem:[%s3435_s2] ss:$0 sm:$0xff] }
 0x17e   : > { %v1327_v20 = vmul.f32 %v1295_v53, %v3098_v54  ;;  %v1790_v5 = vadd.f32 1.0, %v1758_v15  ;;  %vm1671_vm6 = vcmp.ge.f32.partialorder %v2984_v55, 0.0  ;;  %2171 = vpow2.f32 %v1564_v8 }
 0x17f   : > { %v1447_v48 = vmul.f32 %v1415_v62, %v3075_v58  ;;  %v1025_v10 = vadd.f32 %v2166_v19, %v1024_v21  ;;  %v648_v33 = vmul.f32 0.3275911, %v3123_v4  ;;  %vm1031_vm9 = vcmp.eq.f32.partialorder %v1030_v18, 8.507059e+37 }
 0x180   : > { %v1359_v17 = vadd.f32 -0.28449672, %v1327_v20  ;;  %v2168_v50 = vpop.eup %2167  ;;  %v1822_v30 = vmul.f32 %v1790_v5, %v3032_v47  ;;  %v1033_v57 = vor.u32 1.1754944e-38, %v1032_v60  ;;  %2173 = vpow2.f32 %v1580_v14 }
 0x181   : > { %v1607_v41 = vmul.f32 %v2168_v50, %v1447_v48  ;;  %v1029_v51 = vsel %vm1028_vm8, %v2166_v19, %v1025_v10  ;;  %v3139_v25 = vadd.f32 1.0, %v648_v33  ;;  %v1503_v42 = vmul.f32 %v639_v7, %v639_v7 }
 0x182   : > { %v1391_v29 = vmul.f32 %v1359_v17, %v3098_v54  ;;  %v1854_v43 = vpack.c.bf16 %v1822_v30, %v1822_v30  ;;  %v3141_v16 = vsel %vm1031_vm9, %v1033_v57, %v1029_v51  ;;  %v3144_v1 = vadd.f32 %v2762_v2, %v492_v59 }
 0x183   : > { %v2170_v58 = vpop.eup %2169  ;;  %v1639_v47 = vsub.f32 1.0, %v1607_v41  ;;  %v1207_v32 = vmul.f32 1.0614054, %v3141_v16  ;;  %vm1679_vm10 = vcmp.ge.f32.partialorder %v2999_v9, 0.0  ;;  %v1150_v35 = vand.u32 2147483647, %v3120_v61 }
 0x184   : > { %v1423_v13 = vadd.f32 0.2548296, %v1391_v29  ;;  %v1142_v34 = vmul.f32 %v2170_v58, %v3120_v61  ;;  %v2172_v0 = vpop.eup %2171  ;;  %1887 = vst.msk [vmem:[%s2514_s8 + $0x70] sm:$0xf] %vm1858_vm13, %v1854_v43  ;;  %v1152_v11 = vand.u32 2147483648, %v3120_v61  ;;  %2175 = vrcp.f32 %v3139_v25  ;;  %v469_v43 = vpop.f32.mrf.mxu3 }
 0x185   : > { %v1703_v2 = vsub.f32 0.0, %v1639_v47  ;;  %v1239_v46 = vadd.f32 -1.4531521, %v1207_v32  ;;  %vm1147_vm11 = vweird.f32 %v2170_v58  ;;  %v1535_v19 = vsub.f32 0.0, %v1503_v42  ;;  %v3197_v41 = vld [vmem:[%s3436_s3] ss:$0 sm:$0xff] }
 0x186   : > { %v1455_v7 = vmul.f32 %v1423_v13, %v3098_v54  ;;  %v1143_v40 = vsub.f32 1.0, %v1142_v34  ;;  %v3155_v49 = vpop.eup %2173  ;;  %v3158_v8 = vmul.f32 0.70710677, %v3144_v1  ;;  %v500_v28 = vmul.f32 %v3163_v23, %v449_v6 }
 0x187   : > { %v1735_v36 = vsel %vm1671_vm6, %v1639_v47, %v1703_v2  ;;  %v1271_v26 = vmul.f32 %v1239_v46, %v3141_v16  ;;  %vm1146_vm12 = vweird.f32 %v3120_v61  ;;  %vm3170_vm14 = vcmp.eq.f32.partialorder %v1150_v35, 8.507059e+37 }
 0x188   : > { %v1615_v54 = vmul.f32 %v2172_v0, %v1455_v7  ;;  %v1144_v22 = vmul.f32 %v2170_v58, %v1143_v40  ;;  %v1767_v63 = vadd.f32 1.0, %v1735_v36  ;;  %v624_v56 = vand.u32 2147483647, %v3158_v8  ;;  %vm1148_vm15 = vmor %vm1146_vm12, %vm1147_vm11 }
 0x189   : > { %v1303_v53 = vadd.f32 1.4214138, %v1271_v26  ;;  %v1153_v3 = vor.u32 1.1754944e-38, %v1152_v11  ;;  %v1596_v14 = vmul.f32 1.442695, %v1535_v19  ;;  %vm801_vm0 = vweird.f32 %v3139_v25 }
 0x18a   : > { %v1647_v45 = vsub.f32 1.0, %v1615_v54  ;;  %v1145_v52 = vadd.f32 %v2170_v58, %v1144_v22  ;;  %v2176_v60 = vpop.eup %2175  ;;  %v1799_v55 = vmul.f32 %v1767_v63, %v3102_v37  ;;  %v656_v61 = vmul.f32 0.3275911, %v624_v56 }
 0x18b   : > { %v1335_v62 = vmul.f32 %v1303_v53, %v3141_v16  ;;  %v797_v21 = vmul.f32 %v2176_v60, %v3139_v25  ;;  %v805_v37 = vand.u32 2147483647, %v3139_v25  ;;  %v807_v57 = vand.u32 2147483648, %v3139_v25 }
 0x18c   : > { %v1711_v15 = vsub.f32 0.0, %v1647_v45  ;;  %v1149_v20 = vsel %vm1148_vm15, %v2170_v58, %v1145_v52  ;;  %v1831_v5 = vpack.c.bf16 %v1799_v55, %v1799_v55  ;;  %v3185_v48 = vadd.f32 1.0, %v656_v61 }
 0x18d   : > { %v3182_v59 = vsel %vm3170_vm14, %v1153_v3, %v1149_v20  ;;  %v1367_v10 = vadd.f32 -0.28449672, %v1335_v62  ;;  %v798_v50 = vsub.f32 1.0, %v797_v21  ;;  %v3200_v29 = vadd.f32 %v3197_v41, %v500_v28 }
 0x18e   : > { %v1743_v17 = vsel %vm1679_vm10, %v1647_v45, %v1711_v15  ;;  %v1215_v33 = vmul.f32 1.0614054, %v3182_v59  ;;  %1864 = vst.msk [vmem:[%s2514_s8 + $0x14] sm:$0xf] %vm1858_vm13, %v1831_v5  ;;  %2177 = vrcp.f32 %v3185_v48  ;;  %vm802_vm1 = vweird.f32 %v2176_v60 }
 0x18f   : > { %v1775_v30 = vadd.f32 1.0, %v1743_v17  ;;  %v1399_v9 = vmul.f32 %v1367_v10, %v3141_v16  ;;  %v799_v58 = vmul.f32 %v2176_v60, %v798_v50  ;;  %v1480_v47 = vmul.f32 %v3123_v4, %v3123_v4  ;;  %vm803_vm2 = vmor %vm801_vm0, %vm802_vm1  ;;  %v411_v10 = vpop.f32.mrf.mxu0 }
 0x190   : > { %v1247_v51 = vadd.f32 -1.4531521, %v1215_v33  ;;  %2179 = vpow2.f32 %v1596_v14  ;;  %v808_v0 = vor.u32 1.1754944e-38, %v807_v57  ;;  %v3210_v35 = vmul.f32 0.70710677, %v3200_v29 }
 0x191   : > { %v1807_v42 = vmul.f32 %v1775_v30, %v3115_v27  ;;  %v1431_v13 = vadd.f32 0.2548296, %v1399_v9  ;;  %v800_v34 = vadd.f32 %v2176_v60, %v799_v58  ;;  %v508_v11 = vmul.f32 %v3163_v23, %v469_v43 }
 0x192   : > { %v1279_v32 = vmul.f32 %v1247_v51, %v3182_v59  ;;  %vm806_vm3 = vcmp.eq.f32.partialorder %v805_v37, 8.507059e+37  ;;  %v1512_v40 = vsub.f32 0.0, %v1480_v47  ;;  %v1488_v19 = vmul.f32 %v624_v56, %v624_v56 }
 0x193   : > { %v1839_v6 = vpack.c.bf16 %v1807_v42, %v1807_v42  ;;  %v1463_v27 = vmul.f32 %v1431_v13, %v3141_v16  ;;  %v804_v7 = vsel %vm803_vm2, %v2176_v60, %v800_v34  ;;  %v3219_v25 = vand.u32 2147483647, %v3210_v35 }
 0x194   : > { %v1311_v2 = vadd.f32 1.4214138, %v1279_v32  ;;  %v2178_v4 = vpop.eup %2177  ;;  %v3216_v46 = vsel %vm806_vm3, %v808_v0, %v804_v7  ;;  %vm921_vm4 = vweird.f32 %v3185_v48  ;;  %v925_v26 = vand.u32 2147483647, %v3185_v48 }
 0x195   : > { %1872 = vst.msk [vmem:[%s2514_s8 + $0x34] sm:$0xf] %vm1858_vm13, %v1839_v6  ;;  %v1623_v28 = vmul.f32 %v3155_v49, %v1463_v27  ;;  %v1192_v54 = vmul.f32 1.0614054, %v3216_v46  ;;  %v917_v16 = vmul.f32 %v2178_v4, %v3185_v48  ;;  %v664_v22 = vmul.f32 0.3275911, %v3219_v25 }
 0x196   : > { %v1343_v36 = vmul.f32 %v1311_v2, %v3182_v59  ;;  %v3229_v63 = vadd.f32 %v3197_v41, %v508_v11  ;;  %v2180_v18 = vpop.eup %2179  ;;  %vm922_vm5 = vweird.f32 %v2178_v4  ;;  %v927_v52 = vand.u32 2147483648, %v3185_v48  ;;  %v431_v2 = vpop.f32.mrf.mxu1 }
 0x197   : > { %v1655_v56 = vsub.f32 1.0, %v1623_v28  ;;  %v1224_v53 = vadd.f32 -1.4531521, %v1192_v54  ;;  %v918_v49 = vsub.f32 1.0, %v917_v16  ;;  %v3232_v3 = vadd.f32 1.0, %v664_v22  ;;  %vm923_vm7 = vmor %vm921_vm4, %vm922_vm5 }
 0x198   : > { %v1375_v45 = vadd.f32 -0.28449672, %v1343_v36  ;;  %v3235_v60 = vmul.f32 0.70710677, %v3229_v63  ;;  %v567_v62 = vmul.f32 0.5, %v3038_v44  ;;  %vm1687_vm6 = vcmp.ge.f32.partialorder %v3053_v38, 0.0 }
 0x199   : > { %v1719_v55 = vsub.f32 0.0, %v1655_v56  ;;  %v1256_v61 = vmul.f32 %v1224_v53, %v3216_v46  ;;  %v919_v15 = vmul.f32 %v2178_v4, %v918_v49  ;;  %v1550_v20 = vmul.f32 1.442695, %v1512_v40 }
 0x19a   : > { %v1407_v14 = vmul.f32 %v1375_v45, %v3182_v59  ;;  %2181 = vrcp.f32 %v3232_v3  ;;  %vm926_vm8 = vcmp.eq.f32.partialorder %v925_v26, 8.507059e+37  ;;  %v928_v50 = vor.u32 1.1754944e-38, %v927_v52 }
 0x19b   : > { %v1751_v21 = vsel %vm1687_vm6, %v1655_v56, %v1719_v55  ;;  %v1288_v37 = vadd.f32 1.4214138, %v1256_v61  ;;  %v920_v17 = vadd.f32 %v2178_v4, %v919_v15  ;;  %v1520_v30 = vsub.f32 0.0, %v1488_v19 }
 0x19c   : > { %v1439_v5 = vadd.f32 0.2548296, %v1407_v14  ;;  %v1783_v33 = vadd.f32 1.0, %v1751_v21  ;;  %v3248_v9 = vand.u32 2147483647, %v3235_v60  ;;  %v575_v58 = vmul.f32 0.5, %v3068_v12 }
 0x19d   : > { %v1320_v38 = vmul.f32 %v1288_v37, %v3216_v46  ;;  %v924_v57 = vsel %vm923_vm7, %v2178_v4, %v920_v17  ;;  %v485_v48 = vmul.f32 %v3163_v23, %v411_v10  ;;  %vm1695_vm9 = vcmp.ge.f32.partialorder %v3091_v24, 0.0 }
 0x19e   : > { %v1471_v44 = vmul.f32 %v1439_v5, %v3182_v59  ;;  %v1815_v51 = vmul.f32 %v1783_v33, %v567_v62  ;;  %v3251_v43 = vsel %vm926_vm8, %v928_v50, %v924_v57  ;;  %v672_v59 = vmul.f32 0.3275911, %v3248_v9 }
 0x19f   : > { %v1352_v47 = vadd.f32 -0.28449672, %v1320_v38  ;;  %v1200_v13 = vmul.f32 1.0614054, %v3251_v43  ;;  %2183 = vpow2.f32 %v1550_v20  ;;  %v1566_v6 = vmul.f32 1.442695, %v1520_v30 }
 0x1a0   : > { %v1631_v42 = vmul.f32 %v2180_v18, %v1471_v44  ;;  %v2182_v32 = vpop.eup %2181  ;;  %v1847_v34 = vpack.c.bf16 %v1815_v51, %v1815_v51  ;;  %v552_v7 = vmul.f32 0.5, %v3095_v31  ;;  %v1045_v4 = vand.u32 2147483647, %v3232_v3 }
 0x1a1   : > { %v1384_v12 = vmul.f32 %v1352_v47, %v3216_v46  ;;  %v1232_v11 = vadd.f32 -1.4531521, %v1200_v13  ;;  %v1037_v27 = vmul.f32 %v2182_v32, %v3232_v3  ;;  %v3263_v40 = vadd.f32 1.0, %v672_v59 }
 0x1a2   : > { %v1663_v0 = vsub.f32 1.0, %v1631_v42  ;;  %1880 = vst.msk [vmem:[%s2514_s8 + $0x54] sm:$0xf] %vm1858_vm13, %v1847_v34  ;;  %v3266_v19 = vadd.f32 %v3197_v41, %v485_v48  ;;  %vm1672_vm10 = vcmp.ge.f32.partialorder %v3112_v39, 0.0  ;;  %vm1042_vm11 = vweird.f32 %v2182_v32 }
 0x1a3   : > { %v1416_v36 = vadd.f32 0.2548296, %v1384_v12  ;;  %v1264_v54 = vmul.f32 %v1232_v11, %v3251_v43  ;;  %v1038_v16 = vsub.f32 1.0, %v1037_v27  ;;  %v1047_v26 = vand.u32 2147483648, %v3232_v3  ;;  %v451_v27 = vpop.f32.mrf.mxu2 }
 0x1a4   : > { %v1727_v28 = vsub.f32 0.0, %v1663_v0  ;;  %2185 = vrcp.f32 %v3263_v40  ;;  %v493_v31 = vmul.f32 %v3163_v23, %v431_v2  ;;  %vm1041_vm12 = vweird.f32 %v3232_v3 }
 0x1a5   : > { %v1448_v18 = vmul.f32 %v1416_v36, %v3216_v46  ;;  %v1296_v56 = vadd.f32 1.4214138, %v1264_v54  ;;  %v1039_v45 = vmul.f32 %v2182_v32, %v1038_v16  ;;  %v2184_v53 = vpop.eup %2183  ;;  %2187 = vpow2.f32 %v1566_v6  ;;  %vm1043_vm14 = vmor %vm1041_vm12, %vm1042_vm11 }
 0x1a6   : > { %v1759_v22 = vsel %vm1695_vm9, %v1663_v0, %v1727_v28  ;;  %v1496_v52 = vmul.f32 %v3219_v25, %v3219_v25  ;;  %v3281_v15 = vmul.f32 0.70710677, %v3266_v19  ;;  %vm1046_vm15 = vcmp.eq.f32.partialorder %v1045_v4, 8.507059e+37 }
 0x1a7   : > { %v1791_v49 = vadd.f32 1.0, %v1759_v22  ;;  %v1608_v55 = vmul.f32 %v2184_v53, %v1448_v18  ;;  %v1328_v14 = vmul.f32 %v1296_v56, %v3251_v43  ;;  %v1040_v61 = vadd.f32 %v2182_v32, %v1039_v45 }
 0x1a8   : > { %v1048_v46 = vor.u32 1.1754944e-38, %v1047_v26  ;;  %v3285_v62 = vadd.f32 %v3197_v41, %v493_v31  ;;  %v3288_v25 = vand.u32 2147483647, %v3281_v15  ;;  %v1528_v10 = vsub.f32 0.0, %v1496_v52 }
 0x1a9   : > { %v1823_v24 = vmul.f32 %v1791_v49, %v575_v58  ;;  %v1640_v3 = vsub.f32 1.0, %v1608_v55  ;;  %v1360_v20 = vadd.f32 -0.28449672, %v1328_v14  ;;  %v1044_v21 = vsel %vm1043_vm14, %v2182_v32, %v1040_v61 }
 0x1aa   : > { %v2186_v5 = vpop.eup %2185  ;;  %v3290_v17 = vsel %vm1046_vm15, %v1048_v46, %v1044_v21  ;;  %v1165_v33 = vand.u32 2147483647, %v3263_v40  ;;  %v1504_v51 = vmul.f32 %v3248_v9, %v3248_v9  ;;  %v649_v58 = vmul.f32 0.3275911, %v3288_v25 }
 0x1ab   : > { %v1855_v37 = vpack.c.bf16 %v1823_v24, %v1823_v24  ;;  %v1704_v50 = vsub.f32 0.0, %v1640_v3  ;;  %v1392_v30 = vmul.f32 %v1360_v20, %v3251_v43  ;;  %v1208_v44 = vmul.f32 1.0614054, %v3290_v17  ;;  %v2188_v57 = vpop.eup %2187 }
 0x1ac   : > { %v1157_v38 = vmul.f32 %v2186_v5, %v3263_v40  ;;  %v3302_v48 = vmul.f32 0.70710677, %v3285_v62  ;;  %v1167_v34 = vand.u32 2147483648, %v3263_v40  ;;  %v3307_v6 = vadd.f32 1.0, %v649_v58 }
 0x1ad   : > { %1888 = vst.msk [vmem:[%s2514_s8 + $0x74] sm:$0xf] %vm1858_vm13, %v1855_v37  ;;  %v1736_v42 = vsel %vm1672_vm10, %v1640_v3, %v1704_v50  ;;  %v1424_v47 = vadd.f32 0.2548296, %v1392_v30  ;;  %v1240_v13 = vadd.f32 -1.4531521, %v1208_v44  ;;  %vm1162_vm0 = vweird.f32 %v2186_v5 }
 0x1ae   : > { %v1158_v59 = vsub.f32 1.0, %v1157_v38  ;;  %v1768_v32 = vadd.f32 1.0, %v1736_v42  ;;  %v3310_v0 = vand.u32 2147483647, %v3302_v48  ;;  %v1582_v2 = vmul.f32 1.442695, %v1528_v10 }
 0x1af   : > { %v1456_v9 = vmul.f32 %v1424_v47, %v3251_v43  ;;  %v1272_v12 = vmul.f32 %v1240_v13, %v3290_v17  ;;  %v1536_v4 = vsub.f32 0.0, %v1504_v51  ;;  %2189 = vrcp.f32 %v3307_v6 }
 0x1b0   : > { %v1159_v11 = vmul.f32 %v2186_v5, %v1158_v59  ;;  %v1800_v39 = vmul.f32 %v1768_v32, %v552_v7  ;;  %vm1161_vm1 = vweird.f32 %v3263_v40  ;;  %v1168_v26 = vor.u32 1.1754944e-38, %v1167_v34 }
 0x1b1   : > { %v1616_v28 = vmul.f32 %v2188_v57, %v1456_v9  ;;  %v1304_v36 = vadd.f32 1.4214138, %v1272_v12  ;;  %vm1163_vm2 = vmor %vm1161_vm1, %vm1162_vm0  ;;  %v657_v43 = vmul.f32 0.3275911, %v3310_v0  ;;  %v501_v31 = vmul.f32 %v3163_v23, %v451_v27 }
 0x1b2   : > { %v1160_v54 = vadd.f32 %v2186_v5, %v1159_v11  ;;  %v1832_v16 = vpack.c.bf16 %v1800_v39, %v1800_v39  ;;  %vm1166_vm3 = vcmp.eq.f32.partialorder %v1165_v33, 8.507059e+37  ;;  %v1598_v45 = vmul.f32 1.442695, %v1536_v4  ;;  %v471_v33 = vpop.f32.mrf.mxu3 }
 0x1b3   : > { %v1648_v22 = vsub.f32 1.0, %v1616_v28  ;;  %v1336_v7 = vmul.f32 %v1304_v36, %v3290_v17  ;;  %v3323_v53 = vadd.f32 1.0, %v657_v43  ;;  %2191 = vpow2.f32 %v1582_v2 }
 0x1b4   : > { %v1164_v18 = vsel %vm1163_vm2, %v2186_v5, %v1160_v54  ;;  %1865 = vst.msk [vmem:[%s2514_s8 + $0x18] sm:$0xf] %vm1858_vm13, %v1832_v16  ;;  %vm1680_vm4 = vcmp.ge.f32.partialorder %v3158_v8, 0.0  ;;  %v820_v14 = vand.u32 2147483647, %v3307_v6  ;;  %v3330_v61 = vadd.f32 %v3197_v41, %v501_v31 }
 0x1b5   : > { %v3321_v56 = vsel %vm1166_vm3, %v1168_v26, %v1164_v18  ;;  %v1712_v40 = vsub.f32 0.0, %v1648_v22  ;;  %v1368_v49 = vadd.f32 -0.28449672, %v1336_v7  ;;  %v2190_v55 = vpop.eup %2189  ;;  %2193 = vrcp.f32 %v3323_v53 }
 0x1b6   : > { %v1216_v52 = vmul.f32 1.0614054, %v3321_v56  ;;  %v812_v20 = vmul.f32 %v2190_v55, %v3307_v6  ;;  %v560_v21 = vmul.f32 0.5, %v3144_v1  ;;  %2195 = vpow2.f32 %v1598_v45 }
 0x1b7   : > { %v1744_v24 = vsel %vm1680_vm4, %v1648_v22, %v1712_v40  ;;  %v1400_v46 = vmul.f32 %v1368_v49, %v3290_v17  ;;  %vm816_vm5 = vweird.f32 %v3307_v6  ;;  %vm3337_vm6 = vcmp.eq.f32.partialorder %v820_v14, 8.507059e+37 }
 0x1b8   : > { %v1248_v3 = vadd.f32 -1.4531521, %v1216_v52  ;;  %v1776_v5 = vadd.f32 1.0, %v1744_v24  ;;  %v813_v10 = vsub.f32 1.0, %v812_v20  ;;  %v822_v44 = vand.u32 2147483648, %v3307_v6 }
 0x1b9   : > { %v1432_v37 = vadd.f32 0.2548296, %v1400_v46  ;;  %v3343_v38 = vmul.f32 0.70710677, %v3330_v61  ;;  %v2192_v1 = vpop.eup %2191  ;;  %vm817_vm7 = vweird.f32 %v2190_v55  ;;  %v940_v13 = vand.u32 2147483647, %v3323_v53 }
 0x1ba   : > { %v1280_v8 = vmul.f32 %v1248_v3, %v3321_v56  ;;  %v1808_v50 = vmul.f32 %v1776_v5, %v560_v21  ;;  %v814_v58 = vmul.f32 %v2190_v55, %v813_v10  ;;  %v509_v32 = vmul.f32 %v3163_v23, %v471_v33  ;;  %vm818_vm8 = vmor %vm816_vm5, %vm817_vm7 }
 0x1bb   : > { %v1464_v57 = vmul.f32 %v1432_v37, %v3290_v17  ;;  %v2194_v42 = vpop.eup %2193  ;;  %v3348_v59 = vand.u32 2147483647, %v3343_v38  ;;  %v823_v17 = vor.u32 1.1754944e-38, %v822_v44  ;;  %v1481_v39 = vmul.f32 %v3288_v25, %v3288_v25 }
 0x1bc   : > { %v1312_v51 = vadd.f32 1.4214138, %v1280_v8  ;;  %v1840_v47 = vpack.c.bf16 %v1808_v50, %v1808_v50  ;;  %v815_v12 = vadd.f32 %v2190_v55, %v814_v58  ;;  %v932_v11 = vmul.f32 %v2194_v42, %v3323_v53  ;;  %v2196_v27 = vpop.eup %2195 }
 0x1bd   : > { %v1624_v34 = vmul.f32 %v2192_v1, %v1464_v57  ;;  %v942_v2 = vand.u32 2147483648, %v3323_v53  ;;  %v665_v23 = vmul.f32 0.3275911, %v3348_v59  ;;  %vm937_vm9 = vweird.f32 %v2194_v42 }
 0x1be   : > { %v1344_v9 = vmul.f32 %v1312_v51, %v3321_v56  ;;  %1873 = vst.msk [vmem:[%s2514_s8 + $0x38] sm:$0xf] %vm1858_vm13, %v1840_v47  ;;  %v819_v36 = vsel %vm818_vm8, %v2190_v55, %v815_v12  ;;  %v933_v54 = vsub.f32 1.0, %v932_v11  ;;  %v3368_v6 = vadd.f32 %v3197_v41, %v509_v32 }
 0x1bf   : > { %v1656_v4 = vsub.f32 1.0, %v1624_v34  ;;  %v3363_v16 = vsel %vm3337_vm6, %v823_v17, %v819_v36  ;;  %v3365_v26 = vadd.f32 1.0, %v665_v23  ;;  %vm1688_vm10 = vcmp.ge.f32.partialorder %v3210_v35, 0.0 }
 0x1c0   : > { %v1376_v28 = vadd.f32 -0.28449672, %v1344_v9  ;;  %v1193_v31 = vmul.f32 1.0614054, %v3363_v16  ;;  %v934_v22 = vmul.f32 %v2194_v42, %v933_v54  ;;  %v1513_v7 = vsub.f32 0.0, %v1481_v39 }
 0x1c1   : > { %v1720_v43 = vsub.f32 0.0, %v1656_v4  ;;  %vm936_vm11 = vweird.f32 %v3323_v53  ;;  %2197 = vrcp.f32 %v3365_v26  ;;  %v568_v41 = vmul.f32 0.5, %v3200_v29 }
 0x1c2   : > { %v1408_v25 = vmul.f32 %v1376_v28, %v3321_v56  ;;  %v1225_v40 = vadd.f32 -1.4531521, %v1193_v31  ;;  %v935_v49 = vadd.f32 %v2194_v42, %v934_v22  ;;  %vm938_vm12 = vmor %vm936_vm11, %vm937_vm9  ;;  %vm941_vm14 = vcmp.eq.f32.partialorder %v940_v13, 8.507059e+37 }
 0x1c3   : > { %v1752_v18 = vsel %vm1688_vm10, %v1656_v4, %v1720_v43  ;;  %v943_v55 = vor.u32 1.1754944e-38, %v942_v2  ;;  %v3380_v53 = vmul.f32 0.70710677, %v3368_v6  ;;  %v1552_v3 = vmul.f32 1.442695, %v1513_v7 }
 0x1c4   : > { %v1440_v45 = vadd.f32 0.2548296, %v1408_v25  ;;  %v1784_v52 = vadd.f32 1.0, %v1752_v18  ;;  %v1257_v35 = vmul.f32 %v1225_v40, %v3363_v16  ;;  %v939_v24 = vsel %vm938_vm12, %v2194_v42, %v935_v49 }
 0x1c5   : > { %v944_v20 = vsel %vm941_vm14, %v943_v55, %v939_v24  ;;  %v1489_v29 = vmul.f32 %v3310_v0, %v3310_v0  ;;  %v3385_v8 = vand.u32 2147483647, %v3380_v53  ;;  %vm1696_vm15 = vcmp.ge.f32.partialorder %v3235_v60, 0.0 }
 0x1c6   : > { %v1472_v14 = vmul.f32 %v1440_v45, %v3321_v56  ;;  %v1816_v46 = vmul.f32 %v1784_v52, %v568_v41  ;;  %v1289_v5 = vadd.f32 1.4214138, %v1257_v35  ;;  %v1201_v37 = vmul.f32 1.0614054, %v944_v20 }
 0x1c7   : > { %v2198_v56 = vpop.eup %2197  ;;  %2199 = vpow2.f32 %v1552_v3  ;;  %v1521_v0 = vsub.f32 0.0, %v1489_v29  ;;  %v673_v1 = vmul.f32 0.3275911, %v3385_v8  ;;  %v1060_v47 = vand.u32 2147483647, %v3365_v26 }
 0x1c8   : > { %v1632_v21 = vmul.f32 %v2196_v27, %v1472_v14  ;;  %v1848_v10 = vpack.c.bf16 %v1816_v46, %v1816_v46  ;;  %v1321_v50 = vmul.f32 %v1289_v5, %v3363_v16  ;;  %v1233_v30 = vadd.f32 -1.4531521, %v1201_v37 }
 0x1c9   : > { %v1052_v44 = vmul.f32 %v2198_v56, %v3365_v26  ;;  %vm1057_vm0 = vweird.f32 %v2198_v56  ;;  %v1062_v13 = vand.u32 2147483648, %v3365_v26  ;;  %v3395_v32 = vadd.f32 1.0, %v673_v1 }
 0x1ca   : > { %v1664_v33 = vsub.f32 1.0, %v1632_v21  ;;  %1881 = vst.msk [vmem:[%s2514_s8 + $0x58] sm:$0xf] %vm1858_vm13, %v1848_v10  ;;  %v1353_v51 = vadd.f32 -0.28449672, %v1321_v50  ;;  %v1265_v58 = vmul.f32 %v1233_v30, %v944_v20  ;;  %v576_v11 = vmul.f32 0.5, %v3229_v63 }
 0x1cb   : > { %v1053_v42 = vsub.f32 1.0, %v1052_v44  ;;  %v1568_v17 = vmul.f32 1.442695, %v1521_v0  ;;  %2201 = vrcp.f32 %v3395_v32  ;;  %vm1056_vm1 = vweird.f32 %v3365_v26 }
 0x1cc   : > { %v1728_v57 = vsub.f32 0.0, %v1664_v33  ;;  %v1385_v9 = vmul.f32 %v1353_v51, %v3363_v16  ;;  %v1297_v12 = vadd.f32 1.4214138, %v1265_v58  ;;  %vm1058_vm2 = vmor %vm1056_vm1, %vm1057_vm0  ;;  %v1063_v36 = vor.u32 1.1754944e-38, %v1062_v13 }
 0x1cd   : > { %v1054_v60 = vmul.f32 %v2198_v56, %v1053_v42  ;;  %v2200_v4 = vpop.eup %2199  ;;  %vm1061_vm3 = vcmp.eq.f32.partialorder %v1060_v47, 8.507059e+37  ;;  %2203 = vpow2.f32 %v1568_v17  ;;  %v1497_v22 = vmul.f32 %v3348_v59, %v3348_v59 }
 0x1ce   : > { %v1760_v34 = vsel %vm1696_vm15, %v1664_v33, %v1728_v57  ;;  %v1417_v39 = vadd.f32 0.2548296, %v1385_v9  ;;  %v1329_v2 = vmul.f32 %v1297_v12, %v944_v20  ;;  %vm1673_vm4 = vcmp.ge.f32.partialorder %v3281_v15, 0.0 }
 0x1cf   : > { %v1792_v27 = vadd.f32 1.0, %v1760_v34  ;;  %v1055_v23 = vadd.f32 %v2198_v56, %v1054_v60  ;;  %v1529_v52 = vsub.f32 0.0, %v1497_v22  ;;  %v1180_v59 = vand.u32 2147483647, %v3395_v32 }
 0x1d0   : > { %v1449_v54 = vmul.f32 %v1417_v39, %v3363_v16  ;;  %v1361_v43 = vadd.f32 -0.28449672, %v1329_v2  ;;  %v1182_v3 = vand.u32 2147483648, %v3395_v32  ;;  %vm1176_vm6 = vweird.f32 %v3395_v32 }
 0x1d1   : > { %v1824_v28 = vmul.f32 %v1792_v27, %v576_v11  ;;  %v1059_v25 = vsel %vm1058_vm2, %v2198_v56, %v1055_v23  ;;  %v2202_v45 = vpop.eup %2201  ;;  %v553_v56 = vmul.f32 0.5, %v3266_v19  ;;  %v1584_v33 = vmul.f32 1.442695, %v1529_v52 }
 0x1d2   : > { %v1064_v31 = vsel %vm1061_vm3, %v1063_v36, %v1059_v25  ;;  %v1609_v7 = vmul.f32 %v2200_v4, %v1449_v54  ;;  %v1393_v18 = vmul.f32 %v1361_v43, %v944_v20  ;;  %v1172_v16 = vmul.f32 %v2202_v45, %v3395_v32 }
 0x1d3   : > { %v1856_v63 = vpack.c.bf16 %v1824_v28, %v1824_v28  ;;  %v1209_v26 = vmul.f32 1.0614054, %v1064_v31  ;;  %v2204_v46 = vpop.eup %2203  ;;  %vm1177_vm5 = vweird.f32 %v2202_v45  ;;  %vm1681_vm7 = vcmp.ge.f32.partialorder %v3302_v48, 0.0 }
 0x1d4   : > { %v1641_v40 = vsub.f32 1.0, %v1609_v7  ;;  %v1425_v49 = vadd.f32 0.2548296, %v1393_v18  ;;  %v1173_v24 = vsub.f32 1.0, %v1172_v16  ;;  %vm1178_vm8 = vmor %vm1176_vm6, %vm1177_vm5  ;;  %v1183_v44 = vor.u32 1.1754944e-38, %v1182_v3 }
 0x1d5   : > { %1889 = vst.msk [vmem:[%s2514_s8 + $0x78] sm:$0xf] %vm1858_vm13, %v1856_v63  ;;  %v1241_v41 = vadd.f32 -1.4531521, %v1209_v26  ;;  %vm1181_vm9 = vcmp.eq.f32.partialorder %v1180_v59, 8.507059e+37  ;;  %2205 = vpow2.f32 %v1584_v33  ;;  %v1505_v58 = vmul.f32 %v3385_v8, %v3385_v8 }
 0x1d6   : > { %v1705_v55 = vsub.f32 0.0, %v1641_v40  ;;  %v1457_v14 = vmul.f32 %v1425_v49, %v944_v20  ;;  %v1174_v37 = vmul.f32 %v2202_v45, %v1173_v24  ;;  %v561_v48 = vmul.f32 0.5, %v3285_v62 }
 0x1d7   : > { %v1273_v35 = vmul.f32 %v1241_v41, %v1064_v31  ;;  %v1537_v60 = vsub.f32 0.0, %v1505_v58  ;;  %vm1689_vm10 = vcmp.ge.f32.partialorder %v3343_v38, 0.0  ;;  %v569_v25 = vmul.f32 0.5, %v3330_v61 }
 0x1d8   : > { %v1737_v29 = vsel %vm1673_vm4, %v1641_v40, %v1705_v55  ;;  %v1617_v21 = vmul.f32 %v2204_v46, %v1457_v14  ;;  %v1175_v30 = vadd.f32 %v2202_v45, %v1174_v37  ;;  %vm1697_vm11 = vcmp.ge.f32.partialorder %v3380_v53, 0.0 }
 0x1d9   : > { %v1305_v5 = vadd.f32 1.4214138, %v1273_v35  ;;  %v1769_v10 = vadd.f32 1.0, %v1737_v29  ;;  %v1600_v8 = vmul.f32 1.442695, %v1537_v60  ;;  %v577_v41 = vmul.f32 0.5, %v3368_v6 }
 0x1da   : > { %v1649_v50 = vsub.f32 1.0, %v1617_v21  ;;  %v1179_v57 = vsel %vm1178_vm8, %v2202_v45, %v1175_v30 }
 0x1db   : > { %v1337_v20 = vmul.f32 %v1305_v5, %v1064_v31  ;;  %v1801_v15 = vmul.f32 %v1769_v10, %v553_v56  ;;  %v1184_v19 = vsel %vm1181_vm9, %v1183_v44, %v1179_v57  ;;  %v2206_v17 = vpop.eup %2205  ;;  %2207 = vpow2.f32 %v1600_v8 }
 0x1dc   : > { %v1713_v0 = vsub.f32 0.0, %v1649_v50  ;;  %v1217_v13 = vmul.f32 1.0614054, %v1184_v19 }
 0x1dd   : > { %v1369_v1 = vadd.f32 -0.28449672, %v1337_v20  ;;  %v1833_v51 = vpack.c.bf16 %v1801_v15, %v1801_v15 }
 0x1de   : > { %v1745_v42 = vsel %vm1681_vm7, %v1649_v50, %v1713_v0  ;;  %v1249_v9 = vadd.f32 -1.4531521, %v1217_v13 }
 0x1df   : > { %v1401_v47 = vmul.f32 %v1369_v1, %v1064_v31  ;;  %1866 = vst.msk [vmem:[%s2514_s8 + $0x1c] sm:$0xf] %vm1858_vm13, %v1833_v51  ;;  %v1777_v32 = vadd.f32 1.0, %v1745_v42 }
 0x1e0   : > { %v1281_v27 = vmul.f32 %v1249_v9, %v1184_v19 }
 0x1e1   : > { %v1433_v34 = vadd.f32 0.2548296, %v1401_v47  ;;  %v1809_v12 = vmul.f32 %v1777_v32, %v561_v48  ;;  %v2208_v18 = vpop.eup %2207 }
 0x1e2   : > { %v1313_v23 = vadd.f32 1.4214138, %v1281_v27 }
 0x1e3   : > { %v1465_v11 = vmul.f32 %v1433_v34, %v1064_v31  ;;  %v1841_v39 = vpack.c.bf16 %v1809_v12, %v1809_v12 }
 0x1e4   : > { %v1345_v28 = vmul.f32 %v1313_v23, %v1184_v19 }
 0x1e5   : > { %v1625_v2 = vmul.f32 %v2206_v17, %v1465_v11  ;;  %1874 = vst.msk [vmem:[%s2514_s8 + $0x3c] sm:$0xf] %vm1858_vm13, %v1841_v39 }
 0x1e6   : > { %v1377_v54 = vadd.f32 -0.28449672, %v1345_v28 }
 0x1e7   : > { %v1657_v4 = vsub.f32 1.0, %v1625_v2 }
 0x1e8   : > { %v1409_v43 = vmul.f32 %v1377_v54, %v1184_v19 }
 0x1e9   : > { %v1721_v36 = vsub.f32 0.0, %v1657_v4 }
 0x1ea   : > { %v1441_v31 = vadd.f32 0.2548296, %v1409_v43 }
 0x1eb   : > { %v1753_v62 = vsel %vm1689_vm10, %v1657_v4, %v1721_v36 }
 0x1ec   : > { %v1785_v63 = vadd.f32 1.0, %v1753_v62  ;;  %v1473_v7 = vmul.f32 %v1441_v31, %v1184_v19 }
 0x1ee   : > { %v1817_v22 = vmul.f32 %v1785_v63, %v569_v25  ;;  %v1633_v45 = vmul.f32 %v2208_v18, %v1473_v7 }
 0x1f0   : > { %v1849_v26 = vpack.c.bf16 %v1817_v22, %v1817_v22  ;;  %v1665_v40 = vsub.f32 1.0, %v1633_v45 }
 0x1f2   : > { %1882 = vst.msk [vmem:[%s2514_s8 + $0x5c] sm:$0xf] %vm1858_vm13, %v1849_v26  ;;  %v1729_v49 = vsub.f32 0.0, %v1665_v40 }
 0x1f4   : > { %v1761_v38 = vsel %vm1697_vm11, %v1665_v40, %v1729_v49 }
 0x1f5   : > { %v1793_v16 = vadd.f32 1.0, %v1761_v38 }
 0x1f7   : > { %v1825_v52 = vmul.f32 %v1793_v16, %v577_v41 }
 0x1f9   : > { %v1857_v61 = vpack.c.bf16 %v1825_v52, %v1825_v52 }
 0x1fb   : > { %1890 = vst.msk [vmem:[%s2514_s8 + $0x7c] sm:$0xf] %vm1858_vm13, %v1857_v61 }
 0x1fc PF: > { %s14_s15 = sadd.s32 1, %s2219_s15  }
 0x1fd   : > { %p11_p4 = scmp.ge.s32.totalorder %s14_s15, 4  }
 0x1ff   :  { %13 = sbr.rel (!%p11_p4) target bundleno = 1 (0x1), region = 66 }

// kernel: _lambda_.14
= control target key start
LH: loop header
LB: loop body
LE: loop exit
PB: predicated region body
PF: predicated region fallthrough
CT: control target
= control target key end

     0   :  { %vm119_vm0 = vcmask 1041408   ;;  %vm94_vm1 = vcmask 293888   ;;  %s1654_s1 = inlined_call_operand.vmem [shape: bf16[36,8], index: 1, kind: input, shape index: {}]   ;;  %s1655_s2 = inlined_call_operand.vmem [shape: f32[1,8], index: 2, kind: input, shape index: {}]   ;;  %s1656_s3 = inlined_call_operand.vmem [shape: f32[1,8], index: 3, kind: input, shape index: {}]   ;;  %s1657_s0 = inlined_call_operand.vmem [shape: bf16[128,36], index: 0, kind: input, shape index: {}]   ;;  %s1658_s4 = inlined_call_operand.vmem [shape: bf16[128,8], index: 4, kind: output, shape index: {}]  }
   0x1   :  { %v38_v0 = vld [vmem:[%s1654_s1 + $0x10] sm:$0x3]  ;;  %v946_v4 = vld [vmem:[%s1654_s1 + $0x8] sm:$0xff]  ;;  %v945_v5 = vld [vmem:[%s1654_s1] sm:$0xff] }
   0x2   :  { %v88_v1 = vunpack.c.l.b16 %v38_v0  ;;  %v937_v6 = vld [vmem:[%s1657_s0] sm:$0xff]  ;;  %v939_v7 = vld [vmem:[%s1657_s0 + $0x10] sm:$0xff]  ;;  %v938_v10 = vld [vmem:[%s1657_s0 + $0x8] sm:$0xff] }
   0x3   :  { %v941_v8 = vld [vmem:[%s1657_s0 + $0x20] sm:$0xff]  ;;  %v943_v9 = vld [vmem:[%s1657_s0 + $0x30] sm:$0xff]  ;;  %v940_v11 = vld [vmem:[%s1657_s0 + $0x18] sm:$0xff] }
   0x4   :  { %v91_v2 = vpack.c.b16 %v88_v1, %v88_v1  ;;  %v942_v12 = vld [vmem:[%s1657_s0 + $0x28] sm:$0xff]  ;;  %v944_v13 = vld [vmem:[%s1657_s0 + $0x38] sm:$0xff]  ;;  %v1093_v14 = vld [vmem:[%s1655_s2] ss:$0 sm:$0xff] }
   0x5   :  { %v1098_v15 = vld [vmem:[%s1656_s3] ss:$0 sm:$0xff] }
   0x6   :  { %v121_v3 = vsel %vm119_vm0, %v91_v2, 0 }
   0x7   :  { %128 = vmatpush.bf16.msra.mxu0 %v121_v3  ;;  %947 = vmatpush.bf16.msra.mxu1 %v121_v3 }
   0x8   :  { %948 = vmatpush.bf16.msra.mxu2 %v121_v3  ;;  %949 = vmatpush.bf16.msra.mxu3 %v121_v3 }
   0xb   :  { %129 = vmatpush.bf16.msra.mxu0 %v946_v4  ;;  %950 = vmatpush.bf16.msra.mxu1 %v946_v4 }
   0xc   :  { %951 = vmatpush.bf16.msra.mxu2 %v946_v4  ;;  %952 = vmatpush.bf16.msra.mxu3 %v946_v4 }
   0xf   :  { %130 = vmatpush.bf16.msra.mxu0 %v945_v5  ;;  %953 = vmatpush.bf16.msra.mxu1 %v945_v5 }
  0x10   :  { %954 = vmatpush.bf16.msra.mxu2 %v945_v5  ;;  %955 = vmatpush.bf16.msra.mxu3 %v945_v5 }
  0x12   :  { %929 = vmatmul.msk.bf16.vlgmr.msra.gmra.mxu0 %vm94_vm1, %v937_v6  ;;  %931 = vmatmul.msk.bf16.vlgmr.msra.gmra.mxu1 %vm94_vm1, %v939_v7 }
  0x13   :  { %933 = vmatmul.msk.bf16.vlgmr.msra.gmra.mxu2 %vm94_vm1, %v941_v8  ;;  %935 = vmatmul.msk.bf16.vlgmr.msra.gmra.mxu3 %vm94_vm1, %v943_v9 }
  0x22   :  { %930 = vmatmul.msk.bf16.gmra.mxu0 %vm94_vm1, %v938_v10  ;;  %932 = vmatmul.msk.bf16.gmra.mxu1 %vm94_vm1, %v940_v11 }
  0x23   :  { %934 = vmatmul.msk.bf16.gmra.mxu2 %vm94_vm1, %v942_v12  ;;  %936 = vmatmul.msk.bf16.gmra.mxu3 %vm94_vm1, %v944_v13 }
  0x8f   :  { %v132_v16 = vpop.f32.mrf.mxu0  ;;  %v142_v17 = vpop.f32.mrf.mxu1 }
  0x90   :  { %v176_v18 = vmul.f32 %v1093_v14, %v132_v16  ;;  %v180_v19 = vmul.f32 %v1093_v14, %v142_v17 }
  0x92   :  { %v196_v20 = vadd.f32 %v1098_v15, %v176_v18  ;;  %v200_v21 = vadd.f32 %v1098_v15, %v180_v19 }
  0x94   :  { %v1104_v22 = vmul.f32 0.70710677, %v196_v20  ;;  %v1106_v23 = vmul.f32 0.70710677, %v200_v21  ;;  %v1127_v43 = vmul.f32 0.5, %v196_v20  ;;  %v1130_v48 = vmul.f32 0.5, %v200_v21 }
  0x96   :  { %v244_v24 = vand.u32 2147483647, %v1104_v22  ;;  %v248_v25 = vand.u32 2147483647, %v1106_v23  ;;  %v152_v26 = vpop.f32.mrf.mxu2  ;;  %v162_v27 = vpop.f32.mrf.mxu3 }
  0x97   :  { %v184_v28 = vmul.f32 %v1093_v14, %v152_v26  ;;  %v188_v29 = vmul.f32 %v1093_v14, %v162_v27  ;;  %v134_v41 = vpop.f32.mrf.mxu0  ;;  %v144_v42 = vpop.f32.mrf.mxu1 }
  0x98   :  { %v260_v30 = vmul.f32 0.3275911, %v244_v24  ;;  %v676_v31 = vmul.f32 %v244_v24, %v244_v24  ;;  %v264_v32 = vmul.f32 0.3275911, %v248_v25  ;;  %v680_v40 = vmul.f32 %v248_v25, %v248_v25 }
  0x99   :  { %v1113_v33 = vadd.f32 %v1098_v15, %v184_v28  ;;  %v1116_v34 = vadd.f32 %v1098_v15, %v188_v29  ;;  %v177_v52 = vmul.f32 %v1093_v14, %v134_v41  ;;  %v181_v53 = vmul.f32 %v1093_v14, %v144_v42 }
  0x9a   :  { %v276_v35 = vadd.f32 1.0, %v260_v30  ;;  %v1118_v36 = vadd.f32 1.0, %v264_v32  ;;  %v692_v38 = vsub.f32 0.0, %v676_v31  ;;  %v696_v50 = vsub.f32 0.0, %v680_v40 }
  0x9b   :  { %v1121_v37 = vmul.f32 0.70710677, %v1113_v33  ;;  %v1124_v39 = vmul.f32 0.70710677, %v1116_v34  ;;  %v1152_v6 = vadd.f32 %v1098_v15, %v177_v52  ;;  %v1155_v10 = vadd.f32 %v1098_v15, %v181_v53 }
  0x9c   :  { %958 = vrcp.f32 %v276_v35  ;;  %v301_v44 = vand.u32 2147483647, %v276_v35  ;;  %v303_v46 = vand.u32 2147483648, %v276_v35  ;;  %v708_v47 = vmul.f32 1.442695, %v692_v38 }
  0x9d   :  { %960 = vrcp.f32 %v1118_v36  ;;  %v252_v45 = vand.u32 2147483647, %v1121_v37  ;;  %v256_v49 = vand.u32 2147483647, %v1124_v39  ;;  %vm297_vm2 = vweird.f32 %v276_v35 }
  0x9e   :  { %vm357_vm3 = vweird.f32 %v1118_v36  ;;  %v361_v55 = vand.u32 2147483647, %v1118_v36  ;;  %vm1137_vm4 = vcmp.eq.f32.partialorder %v301_v44, 8.507059e+37  ;;  %v304_v62 = vor.u32 1.1754944e-38, %v303_v46  ;;  %v154_v7 = vpop.f32.mrf.mxu2 }
  0x9f   :  { %v268_v51 = vmul.f32 0.3275911, %v252_v45  ;;  %v272_v56 = vmul.f32 0.3275911, %v256_v49  ;;  %v684_v61 = vmul.f32 %v252_v45, %v252_v45  ;;  %962 = vpow2.f32 %v708_v47 }
  0xa0   :  { %v363_v2 = vand.u32 2147483648, %v1118_v36  ;;  %v716_v3 = vmul.f32 1.442695, %v696_v50  ;;  %v1149_v5 = vmul.f32 %v256_v49, %v256_v49  ;;  %vm1157_vm7 = vcmp.eq.f32.partialorder %v361_v55, 8.507059e+37 }
  0xa1   :  { %v1141_v60 = vadd.f32 1.0, %v268_v51  ;;  %v1144_v0 = vadd.f32 1.0, %v272_v56  ;;  %v700_v9 = vsub.f32 0.0, %v684_v61  ;;  %v1163_v18 = vmul.f32 %v1093_v14, %v154_v7 }
  0xa2   :  { %v959_v54 = vpop.eup %958  ;;  %v364_v17 = vor.u32 1.1754944e-38, %v363_v2  ;;  %v704_v21 = vsub.f32 0.0, %v1149_v5  ;;  %v1171_v24 = vmul.f32 0.70710677, %v1152_v6  ;;  %v1178_v29 = vmul.f32 0.70710677, %v1155_v10 }
  0xa3   :  { %v961_v57 = vpop.eup %960  ;;  %v293_v58 = vmul.f32 %v959_v54, %v276_v35  ;;  %964 = vrcp.f32 %v1141_v60  ;;  %vm298_vm5 = vweird.f32 %v959_v54  ;;  %v421_v13 = vand.u32 2147483647, %v1141_v60 }
  0xa4   :  { %v353_v63 = vmul.f32 %v961_v57, %v1118_v36  ;;  %966 = vrcp.f32 %v1144_v0  ;;  %vm358_vm6 = vweird.f32 %v961_v57  ;;  %vm299_vm8 = vmor %vm297_vm2, %vm298_vm5  ;;  %vm417_vm9 = vweird.f32 %v1141_v60 }
  0xa5   :  { %v294_v1 = vsub.f32 1.0, %v293_v58  ;;  %968 = vpow2.f32 %v716_v3  ;;  %v1165_v19 = vpop.eup %962  ;;  %vm359_vm10 = vmor %vm357_vm3, %vm358_vm6  ;;  %v423_v27 = vand.u32 2147483648, %v1141_v60  ;;  %v724_v28 = vmul.f32 1.442695, %v700_v9 }
  0xa6   :  { %v354_v4 = vsub.f32 1.0, %v353_v63  ;;  %vm1185_vm11 = vcmp.eq.f32.partialorder %v421_v13, 8.507059e+37  ;;  %v481_v42 = vand.u32 2147483647, %v1144_v0  ;;  %vm477_vm12 = vweird.f32 %v1144_v0 }
  0xa7   :  { %v295_v8 = vmul.f32 %v959_v54, %v294_v1  ;;  %v245_v46 = vand.u32 2147483647, %v1171_v24  ;;  %v483_v51 = vand.u32 2147483648, %v1144_v0  ;;  %v249_v52 = vand.u32 2147483647, %v1178_v29 }
  0xa8   :  { %v355_v11 = vmul.f32 %v961_v57, %v354_v4  ;;  %vm482_vm0 = vcmp.eq.f32.partialorder %v481_v42, 8.507059e+37  ;;  %vm776_vm6 = vcmp.ge.f32.partialorder %v1106_v23, 0.0 }
  0xa9   :  { %v296_v16 = vadd.f32 %v959_v54, %v295_v8  ;;  %v965_v25 = vpop.eup %964  ;;  %v261_v55 = vmul.f32 0.3275911, %v245_v46  ;;  %v265_v58 = vmul.f32 0.3275911, %v249_v52  ;;  %v484_v7 = vor.u32 1.1754944e-38, %v483_v51 }
  0xaa   :  { %v356_v20 = vadd.f32 %v961_v57, %v355_v11  ;;  %v967_v30 = vpop.eup %966  ;;  %v413_v35 = vmul.f32 %v965_v25, %v1141_v60  ;;  %vm418_vm13 = vweird.f32 %v965_v25  ;;  %v732_v11 = vmul.f32 1.442695, %v704_v21 }
  0xab   :  { %v300_v26 = vsel %vm299_vm8, %v959_v54, %v296_v16  ;;  %v473_v41 = vmul.f32 %v967_v30, %v1144_v0  ;;  %v1199_v47 = vpop.eup %968  ;;  %vm478_vm14 = vweird.f32 %v967_v30  ;;  %v1205_v63 = vadd.f32 1.0, %v261_v55  ;;  %vm419_vm15 = vmor %vm417_vm9, %vm418_vm13 }
  0xac   :  { %v1182_v31 = vsel %vm1137_vm4, %v304_v62, %v300_v26  ;;  %v360_v32 = vsel %vm359_vm10, %v961_v57, %v356_v20  ;;  %v414_v45 = vsub.f32 1.0, %v413_v35  ;;  %v424_v62 = vor.u32 1.1754944e-38, %v423_v27  ;;  %vm479_vm1 = vmor %vm477_vm12, %vm478_vm14 }
  0xad   :  { %v532_v36 = vmul.f32 1.0614054, %v1182_v31  ;;  %v1192_v40 = vsel %vm1157_vm7, %v364_v17, %v360_v32  ;;  %v474_v50 = vsub.f32 1.0, %v473_v41  ;;  %v1209_v3 = vadd.f32 1.0, %v265_v58 }
  0xae   :  { %v536_v44 = vmul.f32 1.0614054, %v1192_v40  ;;  %v415_v54 = vmul.f32 %v965_v25, %v414_v45  ;;  %970 = vrcp.f32 %v1205_v63  ;;  %v1223_v17 = vmul.f32 %v245_v46, %v245_v46 }
  0xaf   :  { %v548_v49 = vadd.f32 -1.4531521, %v532_v36  ;;  %v475_v57 = vmul.f32 %v967_v30, %v474_v50  ;;  %972 = vrcp.f32 %v1209_v3  ;;  %v318_v21 = vand.u32 2147483648, %v1205_v63 }
  0xb0   :  { %v552_v53 = vadd.f32 -1.4531521, %v536_v44  ;;  %v416_v61 = vadd.f32 %v965_v25, %v415_v54  ;;  %974 = vpow2.f32 %v724_v28  ;;  %v1230_v35 = vmul.f32 %v249_v52, %v249_v52 }
  0xb1   :  { %v564_v56 = vmul.f32 %v548_v49, %v1182_v31  ;;  %v476_v2 = vadd.f32 %v967_v30, %v475_v57  ;;  %976 = vpow2.f32 %v732_v11  ;;  %vm312_vm2 = vweird.f32 %v1205_v63 }
  0xb2   :  { %v568_v59 = vmul.f32 %v552_v53, %v1192_v40  ;;  %v420_v5 = vsel %vm419_vm15, %v965_v25, %v416_v61  ;;  %v316_v25 = vand.u32 2147483647, %v1205_v63  ;;  %v693_v42 = vsub.f32 0.0, %v1223_v17 }
  0xb3   :  { %v580_v1 = vadd.f32 1.4214138, %v564_v56  ;;  %v1217_v9 = vsel %vm1185_vm11, %v424_v62, %v420_v5  ;;  %v480_v60 = vsel %vm479_vm1, %v967_v30, %v476_v2  ;;  %v376_v49 = vand.u32 2147483647, %v1209_v3 }
  0xb4   :  { %v584_v4 = vadd.f32 1.4214138, %v568_v59  ;;  %v540_v13 = vmul.f32 1.0614054, %v1217_v9  ;;  %v1221_v16 = vsel %vm482_vm0, %v484_v7, %v480_v60  ;;  %v971_v38 = vpop.eup %970  ;;  %vm1238_vm3 = vcmp.eq.f32.partialorder %v316_v25, 8.507059e+37 }
  0xb5   :  { %v596_v8 = vmul.f32 %v580_v1, %v1182_v31  ;;  %v544_v20 = vmul.f32 1.0614054, %v1221_v16  ;;  %v308_v45 = vmul.f32 %v971_v38, %v1205_v63  ;;  %vm772_vm4 = vcmp.ge.f32.partialorder %v1104_v22, 0.0  ;;  %v973_v53 = vpop.eup %972 }
  0xb6   :  { %v600_v12 = vmul.f32 %v584_v4, %v1192_v40  ;;  %v556_v27 = vadd.f32 -1.4531521, %v540_v13  ;;  %v319_v52 = vor.u32 1.1754944e-38, %v318_v21  ;;  %vm372_vm5 = vweird.f32 %v1209_v3  ;;  %v975_v58 = vpop.eup %974 }
  0xb7   :  { %v612_v0 = vadd.f32 -0.28449672, %v596_v8  ;;  %v560_v32 = vadd.f32 -1.4531521, %v544_v20  ;;  %v309_v56 = vsub.f32 1.0, %v308_v45  ;;  %v378_v57 = vand.u32 2147483648, %v1209_v3  ;;  %v977_v1 = vpop.eup %976 }
  0xb8   :  { %v616_v26 = vadd.f32 -0.28449672, %v600_v12  ;;  %v572_v41 = vmul.f32 %v556_v27, %v1217_v9  ;;  %vm313_vm7 = vweird.f32 %v971_v38  ;;  %v368_v62 = vmul.f32 %v973_v53, %v1209_v3 }
  0xb9   :  { %v628_v30 = vmul.f32 %v612_v0, %v1182_v31  ;;  %v576_v28 = vmul.f32 %v560_v32, %v1221_v16  ;;  %vm1253_vm8 = vcmp.eq.f32.partialorder %v376_v49, 8.507059e+37  ;;  %v379_v0 = vor.u32 1.1754944e-38, %v378_v57  ;;  %vm314_vm9 = vmor %vm312_vm2, %vm313_vm7 }
  0xba   :  { %v632_v36 = vmul.f32 %v616_v26, %v1192_v40  ;;  %v588_v51 = vadd.f32 1.4214138, %v572_v41  ;;  %v369_v60 = vsub.f32 1.0, %v368_v62  ;;  %vm373_vm10 = vweird.f32 %v973_v53  ;;  %v164_v62 = vpop.f32.mrf.mxu3 }
  0xbb   :  { %v644_v44 = vadd.f32 0.2548296, %v628_v30  ;;  %v592_v55 = vadd.f32 1.4214138, %v576_v28  ;;  %vm374_vm11 = vmor %vm372_vm5, %vm373_vm10  ;;  %vm868_vm12 = vcmask 60416   ;;  %vm780_vm13 = vcmp.ge.f32.partialorder %v1121_v37, 0.0 }
  0xbc   :  { %v648_v50 = vadd.f32 0.2548296, %v632_v36  ;;  %v604_v61 = vmul.f32 %v588_v51, %v1217_v9  ;;  %v370_v25 = vmul.f32 %v973_v53, %v369_v60  ;;  %vm784_vm14 = vcmp.ge.f32.partialorder %v1124_v39, 0.0  ;;  %v137_v60 = vpop.f32.mrf.mxu0 }
  0xbd   :  { %v660_v54 = vmul.f32 %v644_v44, %v1182_v31  ;;  %v608_v4 = vmul.f32 %v592_v55, %v1221_v16  ;;  %v310_v31 = vmul.f32 %v971_v38, %v309_v56  ;;  %v178_v39 = vmul.f32 %v1093_v14, %v137_v60 }
  0xbe   :  { %v664_v59 = vmul.f32 %v648_v50, %v1192_v40  ;;  %v620_v8 = vadd.f32 -0.28449672, %v604_v61  ;;  %v1260_v40 = vadd.f32 %v1098_v15, %v1163_v18  ;;  %v371_v36 = vadd.f32 %v973_v53, %v370_v25 }
  0xbf   :  { %v740_v2 = vmul.f32 %v1165_v19, %v660_v54  ;;  %v624_v12 = vadd.f32 -0.28449672, %v608_v4  ;;  %v311_v13 = vadd.f32 %v971_v38, %v310_v31 }
  0xc0   :  { %v744_v7 = vmul.f32 %v1199_v47, %v664_v59  ;;  %v636_v20 = vmul.f32 %v620_v8, %v1217_v9  ;;  %v1268_v18 = vmul.f32 0.70710677, %v1260_v40  ;;  %v375_v49 = vsel %vm374_vm11, %v973_v53, %v371_v36 }
  0xc1   :  { %v756_v11 = vsub.f32 1.0, %v740_v2  ;;  %v640_v26 = vmul.f32 %v624_v12, %v1221_v16  ;;  %v315_v27 = vsel %vm314_vm9, %v971_v38, %v311_v13  ;;  %v220_v8 = vmul.f32 0.5, %v1113_v33 }
  0xc2   :  { %v760_v19 = vsub.f32 1.0, %v744_v7  ;;  %v652_v30 = vadd.f32 0.2548296, %v636_v20  ;;  %v1272_v32 = vsel %vm1238_vm3, %v319_v52, %v315_v27  ;;  %v1280_v38 = vand.u32 2147483647, %v1268_v18 }
  0xc3   :  { %v788_v47 = vsub.f32 0.0, %v756_v11  ;;  %v656_v41 = vadd.f32 0.2548296, %v640_v26  ;;  %v533_v44 = vmul.f32 1.0614054, %v1272_v32  ;;  %v1288_v52 = vsel %vm1253_vm8, %v379_v0, %v375_v49 }
  0xc4   :  { %v792_v21 = vsub.f32 0.0, %v760_v19  ;;  %v668_v46 = vmul.f32 %v652_v30, %v1217_v9  ;;  %v537_v55 = vmul.f32 1.0614054, %v1288_v52  ;;  %v269_v56 = vmul.f32 0.3275911, %v1280_v38 }
  0xc5   :  { %v804_v63 = vsel %vm772_vm4, %v756_v11, %v788_v47  ;;  %v672_v22 = vmul.f32 %v656_v41, %v1221_v16  ;;  %v549_v51 = vadd.f32 -1.4531521, %v533_v44  ;;  %v189_v7 = vmul.f32 %v1093_v14, %v164_v62 }
  0xc6   :  { %v820_v28 = vadd.f32 1.0, %v804_v63  ;;  %v808_v45 = vsel %vm776_vm6, %v760_v19, %v792_v21  ;;  %v748_v54 = vmul.f32 %v975_v58, %v668_v46  ;;  %v553_v59 = vadd.f32 -1.4531521, %v537_v55  ;;  %v147_v19 = vpop.f32.mrf.mxu1 }
  0xc7   :  { %v824_v50 = vadd.f32 1.0, %v808_v45  ;;  %v752_v9 = vmul.f32 %v977_v1, %v672_v22  ;;  %v565_v53 = vmul.f32 %v549_v51, %v1272_v32  ;;  %v1295_v61 = vadd.f32 1.0, %v269_v56 }
  0xc8   :  { %v836_v3 = vmul.f32 %v820_v28, %v1127_v43  ;;  %v764_v16 = vsub.f32 1.0, %v748_v54  ;;  %v697_v58 = vsub.f32 0.0, %v1230_v35  ;;  %v710_v1 = vmul.f32 1.442695, %v693_v42 }
  0xc9   :  { %v840_v23 = vmul.f32 %v824_v50, %v1130_v48  ;;  %v768_v4 = vsub.f32 1.0, %v752_v9  ;;  %v581_v43 = vadd.f32 1.4214138, %v565_v53  ;;  %v569_v31 = vmul.f32 %v553_v59, %v1288_v52 }
  0xca   :  { %v852_v57 = vpack.c.bf16 %v836_v3, %v836_v3  ;;  %v796_v48 = vsub.f32 0.0, %v764_v16  ;;  %978 = vrcp.f32 %v1295_v61  ;;  %v718_v0 = vmul.f32 1.442695, %v697_v58 }
  0xcb   :  { %v856_v2 = vpack.c.bf16 %v840_v23, %v840_v23  ;;  %v800_v35 = vsub.f32 0.0, %v768_v4  ;;  %v597_v5 = vmul.f32 %v581_v43, %v1272_v32  ;;  %v585_v42 = vadd.f32 1.4214138, %v569_v31 }
  0xcc   :  { %869 = vst.msk [vmem:[%s1658_s4] sm:$0xf] %vm868_vm12, %v852_v57  ;;  %v812_v17 = vsel %vm780_vm13, %v764_v16, %v796_v48  ;;  %v224_v20 = vmul.f32 0.5, %v1116_v34  ;;  %980 = vpow2.f32 %v710_v1  ;;  %v1319_v33 = vadd.f32 %v1098_v15, %v189_v7 }
  0xcd   :  { %873 = vst.msk [vmem:[%s1658_s4 + $0x10] sm:$0xf] %vm868_vm12, %v856_v2  ;;  %v828_v11 = vadd.f32 1.0, %v812_v17  ;;  %v816_v12 = vsel %vm784_vm14, %v768_v4, %v800_v35  ;;  %v613_v13 = vadd.f32 -0.28449672, %v597_v5  ;;  %v601_v25 = vmul.f32 %v585_v42, %v1288_v52 }
  0xce   :  { %v832_v37 = vadd.f32 1.0, %v816_v12  ;;  %v182_v36 = vmul.f32 %v1093_v14, %v147_v19  ;;  %982 = vpow2.f32 %v718_v0  ;;  %v438_v45 = vand.u32 2147483648, %v1295_v61 }
  0xcf   :  { %v844_v47 = vmul.f32 %v828_v11, %v220_v8  ;;  %v629_v26 = vmul.f32 %v613_v13, %v1272_v32  ;;  %v617_v30 = vadd.f32 -0.28449672, %v601_v25  ;;  %v1327_v46 = vmul.f32 0.70710677, %v1319_v33  ;;  %v157_v13 = vpop.f32.mrf.mxu2 }
  0xd0   :  { %v979_v27 = vpop.eup %978  ;;  %v848_v21 = vmul.f32 %v832_v37, %v224_v20  ;;  %v1335_v22 = vadd.f32 %v1098_v15, %v178_v39  ;;  %v1338_v51 = vadd.f32 %v1098_v15, %v182_v36  ;;  %v685_v55 = vmul.f32 %v1280_v38, %v1280_v38 }
  0xd1   :  { %v860_v63 = vpack.c.bf16 %v844_v47, %v844_v47  ;;  %v645_v41 = vadd.f32 0.2548296, %v629_v26  ;;  %v428_v34 = vmul.f32 %v979_v27, %v1295_v61  ;;  %v633_v28 = vmul.f32 %v617_v30, %v1288_v52 }
  0xd2   :  { %v864_v44 = vpack.c.bf16 %v848_v21, %v848_v21  ;;  %v981_v3 = vpop.eup %980  ;;  %v257_v56 = vand.u32 2147483647, %v1327_v46  ;;  %vm433_vm15 = vweird.f32 %v979_v27  ;;  %v436_v9 = vand.u32 2147483647, %v1295_v61 }
  0xd3   :  { %877 = vst.msk [vmem:[%s1658_s4 + $0x20] sm:$0xf] %vm868_vm12, %v860_v63  ;;  %v661_v49 = vmul.f32 %v645_v41, %v1272_v32  ;;  %v429_v50 = vsub.f32 1.0, %v428_v34  ;;  %v649_v54 = vadd.f32 0.2548296, %v633_v28  ;;  %vm432_vm0 = vweird.f32 %v1295_v61 }
  0xd4   :  { %881 = vst.msk [vmem:[%s1658_s4 + $0x30] sm:$0xf] %vm868_vm12, %v864_v44  ;;  %v273_v57 = vmul.f32 0.3275911, %v257_v56  ;;  %v1350_v16 = vmul.f32 0.70710677, %v1335_v22  ;;  %v983_v59 = vpop.eup %982  ;;  %vm434_vm1 = vmor %vm432_vm0, %vm433_vm15  ;;  %v689_v20 = vmul.f32 %v257_v56, %v257_v56 }
  0xd5   :  { %v741_v32 = vmul.f32 %v981_v3, %v661_v49  ;;  %v430_v23 = vmul.f32 %v979_v27, %v429_v50  ;;  %v665_v53 = vmul.f32 %v649_v54, %v1288_v52  ;;  %v1354_v38 = vmul.f32 0.70710677, %v1338_v51 }
  0xd6   :  { %v439_v43 = vor.u32 1.1754944e-38, %v438_v45  ;;  %v1356_v58 = vadd.f32 1.0, %v273_v57  ;;  %v246_v48 = vand.u32 2147483647, %v1350_v16  ;;  %vm437_vm2 = vcmp.eq.f32.partialorder %v436_v9, 8.507059e+37 }
  0xd7   :  { %v757_v62 = vsub.f32 1.0, %v741_v32  ;;  %v431_v2 = vadd.f32 %v979_v27, %v430_v23  ;;  %v745_v4 = vmul.f32 %v983_v59, %v665_v53  ;;  %v701_v31 = vsub.f32 0.0, %v685_v55 }
  0xd8   :  { %vm773_vm3 = vcmp.ge.f32.partialorder %v1171_v24, 0.0  ;;  %984 = vrcp.f32 %v1356_v58  ;;  %v1365_v8 = vand.u32 2147483647, %v1354_v38  ;;  %v213_v17 = vmul.f32 0.5, %v1152_v6 }
  0xd9   :  { %v789_v52 = vsub.f32 0.0, %v757_v62  ;;  %v435_v1 = vsel %vm434_vm1, %v979_v27, %v431_v2  ;;  %v761_v35 = vsub.f32 1.0, %v745_v4  ;;  %v262_v11 = vmul.f32 0.3275911, %v246_v48 }
  0xda   :  { %v1360_v5 = vsel %vm437_vm2, %v439_v43, %v435_v1  ;;  %vm777_vm4 = vcmp.ge.f32.partialorder %v1178_v29, 0.0  ;;  %v726_v24 = vmul.f32 1.442695, %v701_v31  ;;  %v217_v25 = vmul.f32 0.5, %v1155_v10  ;;  %v167_v10 = vpop.f32.mrf.mxu3 }
  0xdb   :  { %v805_v61 = vsel %vm773_vm3, %v757_v62, %v789_v52  ;;  %v541_v7 = vmul.f32 1.0614054, %v1360_v5  ;;  %v793_v60 = vsub.f32 0.0, %v761_v35  ;;  %v1369_v37 = vadd.f32 1.0, %v262_v11 }
  0xdc   :  { %v821_v42 = vadd.f32 1.0, %v805_v61  ;;  %v266_v6 = vmul.f32 0.3275911, %v1365_v8  ;;  %v1375_v21 = vmul.f32 0.5, %v1260_v40  ;;  %v186_v29 = vmul.f32 %v1093_v14, %v157_v13 }
  0xdd   :  { %v557_v12 = vadd.f32 -1.4531521, %v541_v7  ;;  %v809_v19 = vsel %vm777_vm4, %v761_v35, %v793_v60  ;;  %986 = vrcp.f32 %v1369_v37  ;;  %v496_v41 = vand.u32 2147483647, %v1356_v58 }
  0xde   :  { %v837_v0 = vmul.f32 %v821_v42, %v213_v17  ;;  %v825_v47 = vadd.f32 1.0, %v809_v19  ;;  %v985_v39 = vpop.eup %984  ;;  %988 = vpow2.f32 %v726_v24  ;;  %v498_v40 = vand.u32 2147483648, %v1356_v58 }
  0xdf   :  { %v573_v26 = vmul.f32 %v557_v12, %v1360_v5  ;;  %v488_v63 = vmul.f32 %v985_v39, %v1356_v58  ;;  %v705_v34 = vsub.f32 0.0, %v689_v20  ;;  %v678_v44 = vmul.f32 %v246_v48, %v246_v48 }
  0xe0   :  { %v853_v27 = vpack.c.bf16 %v837_v0, %v837_v0  ;;  %v841_v30 = vmul.f32 %v825_v47, %v217_v25  ;;  %v1387_v50 = vadd.f32 1.0, %v266_v6  ;;  %v1390_v3 = vmul.f32 0.5, %v1319_v33 }
  0xe1   :  { %v589_v36 = vadd.f32 1.4214138, %v573_v26  ;;  %v489_v49 = vsub.f32 1.0, %v488_v63  ;;  %v331_v54 = vand.u32 2147483647, %v1369_v37  ;;  %v1394_v55 = vadd.f32 %v1098_v15, %v186_v29 }
  0xe2   :  { %870 = vst.msk [vmem:[%s1658_s4 + $0x4] sm:$0xf] %vm868_vm12, %v853_v27  ;;  %v857_v28 = vpack.c.bf16 %v841_v30, %v841_v30  ;;  %v190_v56 = vmul.f32 %v1093_v14, %v167_v10  ;;  %vm493_vm5 = vweird.f32 %v985_v39  ;;  %990 = vrcp.f32 %v1387_v50 }
  0xe3   :  { %v605_v45 = vmul.f32 %v589_v36, %v1360_v5  ;;  %v490_v23 = vmul.f32 %v985_v39, %v489_v49  ;;  %v987_v9 = vpop.eup %986  ;;  %vm492_vm6 = vweird.f32 %v1356_v58  ;;  %vm1403_vm7 = vcmp.eq.f32.partialorder %v496_v41, 8.507059e+37 }
  0xe4   :  { %874 = vst.msk [vmem:[%s1658_s4 + $0x14] sm:$0xf] %vm868_vm12, %v857_v28  ;;  %v734_v53 = vmul.f32 1.442695, %v705_v34  ;;  %v694_v57 = vsub.f32 0.0, %v678_v44  ;;  %v989_v59 = vpop.eup %988  ;;  %v499_v4 = vor.u32 1.1754944e-38, %v498_v40  ;;  %v323_v43 = vmul.f32 %v987_v9, %v1369_v37  ;;  %vm494_vm8 = vmor %vm492_vm6, %vm493_vm5  ;;  %v139_v44 = vpop.f32.mrf.mxu0 }
  0xe5   :  { %v621_v32 = vadd.f32 -0.28449672, %v605_v45  ;;  %v491_v2 = vadd.f32 %v985_v39, %v490_v23  ;;  %vm327_vm9 = vweird.f32 %v1369_v37  ;;  %vm1410_vm10 = vcmp.eq.f32.partialorder %v331_v54, 8.507059e+37 }
  0xe6   :  { %v333_v58 = vand.u32 2147483648, %v1369_v37  ;;  %v1416_v52 = vmul.f32 0.70710677, %v1394_v55  ;;  %v324_v35 = vsub.f32 1.0, %v323_v43  ;;  %v1419_v61 = vadd.f32 %v1098_v15, %v190_v56 }
  0xe7   :  { %v637_v62 = vmul.f32 %v621_v32, %v1360_v5  ;;  %v495_v31 = vsel %vm494_vm8, %v985_v39, %v491_v2  ;;  %vm781_vm11 = vcmp.ge.f32.partialorder %v1268_v18, 0.0  ;;  %v712_v17 = vmul.f32 1.442695, %v694_v57 }
  0xe8   :  { %v1424_v7 = vsel %vm1403_vm7, %v499_v4, %v495_v31  ;;  %v682_v42 = vmul.f32 %v1365_v8, %v1365_v8  ;;  %v254_v60 = vand.u32 2147483647, %v1416_v52  ;;  %v991_v11 = vpop.eup %990  ;;  %v325_v13 = vmul.f32 %v987_v9, %v324_v35 }
  0xe9   :  { %v653_v1 = vadd.f32 0.2548296, %v637_v62  ;;  %v545_v24 = vmul.f32 1.0614054, %v1424_v7  ;;  %vm328_vm13 = vweird.f32 %v987_v9  ;;  %v334_v0 = vor.u32 1.1754944e-38, %v333_v58 }
  0xea   :  { %v383_v19 = vmul.f32 %v991_v11, %v1387_v50  ;;  %vm387_vm14 = vweird.f32 %v1387_v50  ;;  %v270_v20 = vmul.f32 0.3275911, %v254_v60  ;;  %v326_v26 = vadd.f32 %v987_v9, %v325_v13  ;;  %vm329_vm15 = vmor %vm327_vm9, %vm328_vm13 }
  0xeb   :  { %v669_v12 = vmul.f32 %v653_v1, %v1360_v5  ;;  %v561_v47 = vadd.f32 -1.4531521, %v545_v24  ;;  %v1434_v8 = vmul.f32 0.70710677, %v1419_v61  ;;  %v391_v6 = vand.u32 2147483647, %v1387_v50 }
  0xec   :  { %v384_v5 = vsub.f32 1.0, %v383_v19  ;;  %v393_v39 = vand.u32 2147483648, %v1387_v50  ;;  %v1440_v27 = vadd.f32 1.0, %v270_v20  ;;  %v330_v36 = vsel %vm329_vm15, %v987_v9, %v326_v26 }
  0xed   :  { %v749_v25 = vmul.f32 %v989_v59, %v669_v12  ;;  %v577_v30 = vmul.f32 %v561_v47, %v1424_v7  ;;  %v1444_v63 = vand.u32 2147483647, %v1434_v8  ;;  %v1448_v10 = vsel %vm1410_vm10, %v334_v0, %v330_v36 }
  0xee   :  { %v385_v37 = vmul.f32 %v991_v11, %v384_v5  ;;  %vm388_vm0 = vweird.f32 %v991_v11  ;;  %992 = vrcp.f32 %v1440_v27  ;;  %v534_v34 = vmul.f32 1.0614054, %v1448_v10 }
  0xef   :  { %v765_v29 = vsub.f32 1.0, %v749_v25  ;;  %v593_v40 = vadd.f32 1.4214138, %v577_v30  ;;  %994 = vpow2.f32 %v734_v53  ;;  %v394_v45 = vor.u32 1.1754944e-38, %v393_v39  ;;  %vm389_vm1 = vmor %vm387_vm14, %vm388_vm0 }
  0xf0   :  { %v386_v28 = vadd.f32 %v991_v11, %v385_v37  ;;  %v698_v49 = vsub.f32 0.0, %v682_v42  ;;  %v274_v54 = vmul.f32 0.3275911, %v1444_v63  ;;  %v550_v23 = vadd.f32 -1.4531521, %v534_v34 }
  0xf1   :  { %v797_v41 = vsub.f32 0.0, %v765_v29  ;;  %v609_v32 = vmul.f32 %v593_v40, %v1424_v7  ;;  %v686_v9 = vmul.f32 %v254_v60, %v254_v60  ;;  %vm392_vm2 = vcmp.eq.f32.partialorder %v391_v6, 8.507059e+37 }
  0xf2   :  { %v390_v53 = vsel %vm389_vm1, %v991_v11, %v386_v28  ;;  %v179_v57 = vmul.f32 %v1093_v14, %v139_v44  ;;  %v566_v62 = vmul.f32 %v550_v23, %v1448_v10  ;;  %v1462_v4 = vadd.f32 1.0, %v274_v54 }
  0xf3   :  { %v813_v56 = vsel %vm781_vm11, %v765_v29, %v797_v41  ;;  %v625_v59 = vadd.f32 -0.28449672, %v609_v32  ;;  %v1460_v2 = vsel %vm392_vm2, %v394_v45, %v390_v53  ;;  %996 = vpow2.f32 %v712_v17  ;;  %v149_v53 = vpop.f32.mrf.mxu1 }
  0xf4   :  { %v829_v33 = vadd.f32 1.0, %v813_v56  ;;  %v993_v18 = vpop.eup %992  ;;  %v538_v50 = vmul.f32 1.0614054, %v1460_v2  ;;  %v720_v48 = vmul.f32 1.442695, %v698_v49  ;;  %v702_v42 = vsub.f32 0.0, %v686_v9 }
  0xf5   :  { %v995_v58 = vpop.eup %994  ;;  %v641_v1 = vmul.f32 %v625_v59, %v1424_v7  ;;  %v582_v31 = vadd.f32 1.4214138, %v566_v62  ;;  %v443_v35 = vmul.f32 %v993_v18, %v1440_v27  ;;  %v453_v12 = vand.u32 2147483648, %v1440_v27 }
  0xf6   :  { %v845_v43 = vmul.f32 %v829_v33, %v1375_v21  ;;  %v554_v11 = vadd.f32 -1.4531521, %v538_v50  ;;  %998 = vrcp.f32 %v1462_v4  ;;  %v1472_v13 = vadd.f32 %v1098_v15, %v179_v57 }
  0xf7   :  { %v657_v24 = vadd.f32 0.2548296, %v641_v1  ;;  %v598_v21 = vmul.f32 %v582_v31, %v1448_v10  ;;  %v444_v17 = vsub.f32 1.0, %v443_v35  ;;  %vm785_vm3 = vcmp.ge.f32.partialorder %v1327_v46, 0.0 }
  0xf8   :  { %v861_v60 = vpack.c.bf16 %v845_v43, %v845_v43  ;;  %v570_v0 = vmul.f32 %v554_v11, %v1460_v2  ;;  %1000 = vpow2.f32 %v720_v48  ;;  %v451_v19 = vand.u32 2147483647, %v1440_v27 }
  0xf9   :  { %v673_v20 = vmul.f32 %v657_v24, %v1424_v7  ;;  %v614_v25 = vadd.f32 -0.28449672, %v598_v21  ;;  %v445_v47 = vmul.f32 %v993_v18, %v444_v17  ;;  %vm448_vm4 = vweird.f32 %v993_v18  ;;  %v997_v26 = vpop.eup %996 }
  0xfa   :  { %878 = vst.msk [vmem:[%s1658_s4 + $0x24] sm:$0xf] %vm868_vm12, %v861_v60  ;;  %v586_v5 = vadd.f32 1.4214138, %v570_v0  ;;  %vm447_vm5 = vweird.f32 %v1440_v27  ;;  %v454_v6 = vor.u32 1.1754944e-38, %v453_v12  ;;  %vm452_vm7 = vcmp.eq.f32.partialorder %v451_v19, 8.507059e+37  ;;  %v159_v0 = vpop.f32.mrf.mxu2 }
  0xfb   :  { %v1483_v39 = vmul.f32 1.442695, %v702_v42  ;;  %v753_v29 = vmul.f32 %v995_v58, %v673_v20  ;;  %v630_v30 = vmul.f32 %v614_v25, %v1448_v10  ;;  %v446_v36 = vadd.f32 %v993_v18, %v445_v47  ;;  %vm449_vm6 = vmor %vm447_vm5, %vm448_vm4 }
  0xfc   :  { %v1487_v37 = vmul.f32 0.70710677, %v1472_v13  ;;  %v999_v41 = vpop.eup %998  ;;  %v602_v7 = vmul.f32 %v586_v5, %v1460_v2  ;;  %vm507_vm8 = vweird.f32 %v1462_v4  ;;  %v1493_v27 = vmul.f32 %v1444_v63, %v1444_v63 }
  0xfd   :  { %v769_v40 = vsub.f32 1.0, %v753_v29  ;;  %v646_v34 = vadd.f32 0.2548296, %v630_v30  ;;  %v450_v44 = vsel %vm449_vm6, %v993_v18, %v446_v36  ;;  %v503_v28 = vmul.f32 %v999_v41, %v1462_v4 }
  0xfe   :  { %v1001_v45 = vpop.eup %1000  ;;  %vm774_vm9 = vcmp.ge.f32.partialorder %v1350_v16, 0.0  ;;  %v618_v49 = vadd.f32 -0.28449672, %v602_v7  ;;  %v1497_v54 = vsel %vm452_vm7, %v454_v6, %v450_v44  ;;  %v511_v56 = vand.u32 2147483647, %v1462_v4 }
  0xff   :  { %v1501_v32 = vand.u32 2147483647, %v1487_v37  ;;  %v801_v23 = vsub.f32 0.0, %v769_v40  ;;  %v662_v63 = vmul.f32 %v646_v34, %v1448_v10  ;;  %v542_v9 = vmul.f32 1.0614054, %v1497_v54 }
 0x100   :  { %v504_v33 = vsub.f32 1.0, %v503_v28  ;;  %v634_v57 = vmul.f32 %v618_v49, %v1460_v2  ;;  %vm508_vm10 = vweird.f32 %v999_v41  ;;  %v513_v59 = vand.u32 2147483648, %v1462_v4 }
 0x101   :  { %v263_v62 = vmul.f32 0.3275911, %v1501_v32  ;;  %v817_v18 = vsel %vm785_vm3, %v769_v40, %v801_v23  ;;  %v742_v43 = vmul.f32 %v997_v26, %v662_v63  ;;  %v558_v50 = vadd.f32 -1.4531521, %v542_v9  ;;  %vm509_vm11 = vmor %vm507_vm8, %vm508_vm10 }
 0x102   :  { %v505_v48 = vmul.f32 %v999_v41, %v504_v33  ;;  %v833_v58 = vadd.f32 1.0, %v817_v18  ;;  %v650_v1 = vadd.f32 0.2548296, %v634_v57  ;;  %v183_v31 = vmul.f32 %v1093_v14, %v149_v53 }
 0x103   :  { %v1510_v10 = vadd.f32 1.0, %v263_v62  ;;  %v758_v35 = vsub.f32 1.0, %v742_v43  ;;  %v574_v42 = vmul.f32 %v558_v50, %v1497_v54  ;;  %v706_v11 = vsub.f32 0.0, %v1493_v27 }
 0x104   :  { %v506_v60 = vadd.f32 %v999_v41, %v505_v48  ;;  %v849_v12 = vmul.f32 %v833_v58, %v1390_v3  ;;  %v666_v46 = vmul.f32 %v650_v1, %v1460_v2  ;;  %v514_v24 = vor.u32 1.1754944e-38, %v513_v59 }
 0x105   :  { %1002 = vrcp.f32 %v1510_v10  ;;  %v790_v21 = vsub.f32 0.0, %v758_v35  ;;  %v590_v17 = vadd.f32 1.4214138, %v574_v42  ;;  %vm512_vm13 = vcmp.eq.f32.partialorder %v511_v56, 8.507059e+37  ;;  %v1023_v56 = vld [vmem:[%s1656_s3] ss:$0 sm:$0xff] }
 0x106   :  { %v510_v14 = vsel %vm509_vm11, %v999_v41, %v506_v60  ;;  %v865_v19 = vpack.c.bf16 %v849_v12, %v849_v12  ;;  %v746_v20 = vmul.f32 %v1001_v45, %v666_v46  ;;  %v1524_v3 = vadd.f32 %v1098_v15, %v183_v31  ;;  %v1022_v15 = vld [vmem:[%s1655_s2] ss:$0 sm:$0xff] }
 0x107   :  { %v1521_v25 = vsel %vm512_vm13, %v514_v24, %v510_v14  ;;  %v214_v2 = vmul.f32 0.5, %v1335_v22  ;;  %v806_v4 = vsel %vm774_vm9, %v758_v35, %v790_v21  ;;  %v606_v47 = vmul.f32 %v590_v17, %v1497_v54 }
 0x108   :  { %v546_v26 = vmul.f32 1.0614054, %v1521_v25  ;;  %882 = vst.msk [vmem:[%s1658_s4 + $0x34] sm:$0xf] %vm868_vm12, %v865_v19  ;;  %v822_v5 = vadd.f32 1.0, %v806_v4  ;;  %v218_v6 = vmul.f32 0.5, %v1338_v51  ;;  %v187_v22 = vmul.f32 %v1022_v15, %v159_v0 }
 0x109   :  { %v762_v29 = vsub.f32 1.0, %v746_v20  ;;  %vm778_vm14 = vcmp.ge.f32.partialorder %v1354_v38, 0.0  ;;  %v622_v16 = vadd.f32 -0.28449672, %v606_v47  ;;  %1004 = vpow2.f32 %v1483_v39  ;;  %v169_v38 = vpop.f32.mrf.mxu3 }
 0x10a   :  { %v562_v30 = vadd.f32 -1.4531521, %v546_v26  ;;  %v838_v41 = vmul.f32 %v822_v5, %v214_v2  ;;  %v736_v27 = vmul.f32 1.442695, %v706_v11  ;;  %v1542_v40 = vmul.f32 0.70710677, %v1524_v3 }
 0x10b   :  { %v1003_v36 = vpop.eup %1002  ;;  %v794_v7 = vsub.f32 0.0, %v762_v29  ;;  %v638_v51 = vmul.f32 %v622_v16, %v1497_v54  ;;  %v346_v28 = vand.u32 2147483647, %v1510_v10  ;;  %v1554_v23 = vadd.f32 %v1023_v56, %v187_v22 }
 0x10c   :  { %v578_v34 = vmul.f32 %v562_v30, %v1521_v25  ;;  %v338_v44 = vmul.f32 %v1003_v36, %v1510_v10  ;;  %v854_v45 = vpack.c.bf16 %v838_v41, %v838_v41  ;;  %v1549_v39 = vand.u32 2147483647, %v1542_v40 }
 0x10d   :  { %v810_v49 = vsel %vm778_vm14, %v762_v29, %v794_v7  ;;  %v654_v9 = vadd.f32 0.2548296, %v638_v51  ;;  %vm343_vm15 = vweird.f32 %v1003_v36  ;;  %v348_v57 = vand.u32 2147483648, %v1510_v10 }
 0x10e   :  { %v826_v63 = vadd.f32 1.0, %v810_v49  ;;  %v594_v33 = vadd.f32 1.4214138, %v578_v34  ;;  %v339_v53 = vsub.f32 1.0, %v338_v44  ;;  %871 = vst.msk [vmem:[%s1658_s4 + $0x8] sm:$0xf] %vm868_vm12, %v854_v45  ;;  %v191_v62 = vmul.f32 %v1022_v15, %v169_v38 }
 0x10f   :  { %v267_v59 = vmul.f32 0.3275911, %v1549_v39  ;;  %v1005_v18 = vpop.eup %1004  ;;  %v670_v50 = vmul.f32 %v654_v9, %v1497_v54  ;;  %1006 = vpow2.f32 %v736_v27  ;;  %vm342_vm0 = vweird.f32 %v1510_v10 }
 0x110   :  { %v842_v43 = vmul.f32 %v826_v63, %v218_v6  ;;  %v610_v48 = vmul.f32 %v594_v33, %v1521_v25  ;;  %v340_v58 = vmul.f32 %v1003_v36, %v339_v53  ;;  %v1568_v31 = vmul.f32 0.70710677, %v1554_v23  ;;  %vm344_vm1 = vmor %vm342_vm0, %vm343_vm15 }
 0x111   :  { %v1565_v1 = vadd.f32 1.0, %v267_v59  ;;  %v750_v42 = vmul.f32 %v1005_v18, %v670_v50  ;;  %v349_v12 = vor.u32 1.1754944e-38, %v348_v57  ;;  %v679_v54 = vmul.f32 %v1501_v32, %v1501_v32 }
 0x112   :  { %v858_v35 = vpack.c.bf16 %v842_v43, %v842_v43  ;;  %v626_v60 = vadd.f32 -0.28449672, %v610_v48  ;;  %v341_v11 = vadd.f32 %v1003_v36, %v340_v58  ;;  %v1574_v46 = vadd.f32 %v1023_v56, %v191_v62 }
 0x113   :  { %1008 = vrcp.f32 %v1565_v1  ;;  %v766_v10 = vsub.f32 1.0, %v750_v42  ;;  %vm347_vm2 = vcmp.eq.f32.partialorder %v346_v28, 8.507059e+37  ;;  %v1584_v14 = vand.u32 2147483647, %v1568_v31 }
 0x114   :  { %875 = vst.msk [vmem:[%s1658_s4 + $0x18] sm:$0xf] %vm868_vm12, %v858_v35  ;;  %v642_v24 = vmul.f32 %v626_v60, %v1521_v25  ;;  %v345_v21 = vsel %vm344_vm1, %v1003_v36, %v341_v11  ;;  %vm782_vm3 = vcmp.ge.f32.partialorder %v1416_v52, 0.0  ;;  %v695_v2 = vsub.f32 0.0, %v679_v54 }
 0x115   :  { %v1581_v17 = vsel %vm347_vm2, %v349_v12, %v345_v21  ;;  %v798_v32 = vsub.f32 0.0, %v766_v10  ;;  %v1007_v20 = vpop.eup %1006  ;;  %v271_v4 = vmul.f32 0.3275911, %v1584_v14  ;;  %v1590_v47 = vmul.f32 0.70710677, %v1574_v46 }
 0x116   :  { %v658_v0 = vadd.f32 0.2548296, %v642_v24  ;;  %v535_v19 = vmul.f32 1.0614054, %v1581_v17  ;;  %v222_v15 = vmul.f32 0.5, %v1394_v55  ;;  %v408_v55 = vand.u32 2147483648, %v1565_v1 }
 0x117   :  { %v814_v26 = vsel %vm782_vm3, %v766_v10, %v798_v32  ;;  %v287_v16 = vadd.f32 1.0, %v271_v4  ;;  %v1595_v30 = vand.u32 2147483647, %v1590_v47  ;;  %v714_v27 = vmul.f32 1.442695, %v695_v2 }
 0x118   :  { %v674_v5 = vmul.f32 %v658_v0, %v1521_v25  ;;  %v551_v6 = vadd.f32 -1.4531521, %v535_v19  ;;  %v830_v22 = vadd.f32 1.0, %v814_v26  ;;  %v406_v28 = vand.u32 2147483647, %v1565_v1 }
 0x119   :  { %v1009_v29 = vpop.eup %1008  ;;  %1010 = vrcp.f32 %v287_v16  ;;  %v275_v38 = vmul.f32 0.3275911, %v1595_v30  ;;  %v226_v63 = vmul.f32 0.5, %v1419_v61  ;;  %vm786_vm5 = vcmp.ge.f32.partialorder %v1434_v8, 0.0 }
 0x11a   :  { %v754_v36 = vmul.f32 %v1007_v20, %v674_v5  ;;  %v567_v52 = vmul.f32 %v551_v6, %v1581_v17  ;;  %v398_v41 = vmul.f32 %v1009_v29, %v1565_v1  ;;  %v846_v7 = vmul.f32 %v830_v22, %v222_v15 }
 0x11b   :  { %vm403_vm4 = vweird.f32 %v1009_v29  ;;  %1012 = vpow2.f32 %v714_v27  ;;  %v1609_v9 = vadd.f32 1.0, %v275_v38  ;;  %vm402_vm6 = vweird.f32 %v1565_v1 }
 0x11c   :  { %v770_v51 = vsub.f32 1.0, %v754_v36  ;;  %v583_v34 = vadd.f32 1.4214138, %v567_v52  ;;  %v399_v25 = vsub.f32 1.0, %v398_v41  ;;  %v862_v44 = vpack.c.bf16 %v846_v7, %v846_v7  ;;  %vm404_vm7 = vmor %vm402_vm6, %vm403_vm4 }
 0x11d   :  { %v409_v18 = vor.u32 1.1754944e-38, %v408_v55  ;;  %v683_v43 = vmul.f32 %v1549_v39, %v1549_v39  ;;  %1014 = vrcp.f32 %v1609_v9  ;;  %vm407_vm8 = vcmp.eq.f32.partialorder %v406_v28, 8.507059e+37 }
 0x11e   :  { %v802_v45 = vsub.f32 0.0, %v770_v51  ;;  %v599_v49 = vmul.f32 %v583_v34, %v1581_v17  ;;  %v400_v56 = vmul.f32 %v1009_v29, %v399_v25  ;;  %879 = vst.msk [vmem:[%s1658_s4 + $0x28] sm:$0xf] %vm868_vm12, %v862_v44  ;;  %v466_v54 = vand.u32 2147483647, %v287_v16 }
 0x11f   :  { %v1011_v59 = vpop.eup %1010  ;;  %v699_v12 = vsub.f32 0.0, %v683_v43  ;;  %v468_v10 = vand.u32 2147483648, %v287_v16  ;;  %vm462_vm10 = vweird.f32 %v287_v16  ;;  %v528_v36 = vand.u32 2147483648, %v1609_v9 }
 0x120   :  { %v818_v33 = vsel %vm786_vm5, %v770_v51, %v802_v45  ;;  %v615_v53 = vadd.f32 -0.28449672, %v599_v49  ;;  %v401_v57 = vadd.f32 %v1009_v29, %v400_v56  ;;  %v458_v50 = vmul.f32 %v1011_v59, %v287_v16 }
 0x121   :  { %v834_v62 = vadd.f32 1.0, %v818_v33  ;;  %v1013_v1 = vpop.eup %1012  ;;  %vm463_vm9 = vweird.f32 %v1011_v59  ;;  %v722_v4 = vmul.f32 1.442695, %v699_v12  ;;  %vm467_vm13 = vcmp.eq.f32.partialorder %v466_v54, 8.507059e+37 }
 0x122   :  { %v631_v61 = vmul.f32 %v615_v53, %v1581_v17  ;;  %v405_v8 = vsel %vm404_vm7, %v1009_v29, %v401_v57  ;;  %v459_v60 = vsub.f32 1.0, %v458_v50  ;;  %vm464_vm11 = vmor %vm462_vm10, %vm463_vm9  ;;  %v469_v26 = vor.u32 1.1754944e-38, %v468_v10 }
 0x123   :  { %v850_v48 = vmul.f32 %v834_v62, %v226_v63  ;;  %v410_v58 = vsel %vm407_vm8, %v409_v18, %v405_v8  ;;  %v1015_v32 = vpop.eup %1014  ;;  %v526_v16 = vand.u32 2147483647, %v1609_v9  ;;  %v215_v51 = vmul.f32 0.5, %v1472_v13 }
 0x124   :  { %v647_v35 = vadd.f32 0.2548296, %v631_v61  ;;  %v539_v42 = vmul.f32 1.0614054, %v410_v58  ;;  %v460_v21 = vmul.f32 %v1011_v59, %v459_v60  ;;  %v518_v2 = vmul.f32 %v1015_v32, %v1609_v9 }
 0x125   :  { %v866_v11 = vpack.c.bf16 %v850_v48, %v850_v48  ;;  %vm523_vm14 = vweird.f32 %v1015_v32  ;;  %vm775_vm15 = vcmp.ge.f32.partialorder %v1487_v37, 0.0  ;;  %vm522_vm0 = vweird.f32 %v1609_v9 }
 0x126   :  { %v663_v24 = vmul.f32 %v647_v35, %v1581_v17  ;;  %v555_v39 = vadd.f32 -1.4531521, %v539_v42  ;;  %v461_v20 = vadd.f32 %v1011_v59, %v460_v21  ;;  %v687_v17 = vmul.f32 %v1584_v14, %v1584_v14  ;;  %vm524_vm1 = vmor %vm522_vm0, %vm523_vm14 }
 0x127   :  { %883 = vst.msk [vmem:[%s1658_s4 + $0x38] sm:$0xf] %vm868_vm12, %v866_v11  ;;  %v519_v15 = vsub.f32 1.0, %v518_v2  ;;  %1016 = vpow2.f32 %v722_v4  ;;  %v529_v38 = vor.u32 1.1754944e-38, %v528_v36  ;;  %vm527_vm2 = vcmp.eq.f32.partialorder %v526_v16, 8.507059e+37 }
 0x128   :  { %v743_v0 = vmul.f32 %v1013_v1, %v663_v24  ;;  %v571_v19 = vmul.f32 %v555_v39, %v410_v58  ;;  %v465_v29 = vsel %vm464_vm11, %v1011_v59, %v461_v20  ;;  %v703_v55 = vsub.f32 0.0, %v687_v17 }
 0x129   :  { %v470_v22 = vsel %vm467_vm13, %v469_v26, %v465_v29  ;;  %v520_v27 = vmul.f32 %v1015_v32, %v519_v15  ;;  %v691_v37 = vmul.f32 %v1595_v30, %v1595_v30  ;;  %vm779_vm3 = vcmp.ge.f32.partialorder %v1542_v40, 0.0 }
 0x12a   :  { %v759_v5 = vsub.f32 1.0, %v743_v0  ;;  %v587_v6 = vadd.f32 1.4214138, %v571_v19  ;;  %v543_v7 = vmul.f32 1.0614054, %v470_v22  ;;  %v219_v21 = vmul.f32 0.5, %v1524_v3 }
 0x12b   :  { %v521_v44 = vadd.f32 %v1015_v32, %v520_v27  ;;  %v730_v59 = vmul.f32 1.442695, %v703_v55  ;;  %v707_v8 = vsub.f32 0.0, %v691_v37  ;;  %vm783_vm4 = vcmp.ge.f32.partialorder %v1568_v31, 0.0 }
 0x12c   :  { %v791_v52 = vsub.f32 0.0, %v759_v5  ;;  %v603_v41 = vmul.f32 %v587_v6, %v410_v58  ;;  %v559_v25 = vadd.f32 -1.4531521, %v543_v7  ;;  %v223_v29 = vmul.f32 0.5, %v1554_v23 }
 0x12d   :  { %v525_v56 = vsel %vm524_vm1, %v1015_v32, %v521_v44  ;;  %v1017_v61 = vpop.eup %1016  ;;  %1018 = vpow2.f32 %v730_v59  ;;  %v738_v1 = vmul.f32 1.442695, %v707_v8  ;;  %vm787_vm5 = vcmp.ge.f32.partialorder %v1590_v47, 0.0 }
 0x12e   :  { %v807_v14 = vsel %vm775_vm15, %v759_v5, %v791_v52  ;;  %v619_v34 = vadd.f32 -0.28449672, %v603_v41  ;;  %v575_v49 = vmul.f32 %v559_v25, %v470_v22  ;;  %v530_v13 = vsel %vm527_vm2, %v529_v38, %v525_v56 }
 0x12f   :  { %v823_v28 = vadd.f32 1.0, %v807_v14  ;;  %v547_v53 = vmul.f32 1.0614054, %v530_v13  ;;  %1020 = vpow2.f32 %v738_v1  ;;  %v227_v7 = vmul.f32 0.5, %v1574_v46 }
 0x130   :  { %v635_v45 = vmul.f32 %v619_v34, %v410_v58  ;;  %v591_v33 = vadd.f32 1.4214138, %v575_v49 }
 0x131   :  { %v839_v63 = vmul.f32 %v823_v28, %v215_v51  ;;  %v563_v43 = vadd.f32 -1.4531521, %v547_v53 }
 0x132   :  { %v651_v9 = vadd.f32 0.2548296, %v635_v45  ;;  %v607_v18 = vmul.f32 %v591_v33, %v470_v22 }
 0x133   :  { %v855_v57 = vpack.c.bf16 %v839_v63, %v839_v63  ;;  %v579_v35 = vmul.f32 %v563_v43, %v530_v13  ;;  %v1019_v39 = vpop.eup %1018 }
 0x134   :  { %v667_v62 = vmul.f32 %v651_v9, %v410_v58  ;;  %v623_v48 = vadd.f32 -0.28449672, %v607_v18 }
 0x135   :  { %872 = vst.msk [vmem:[%s1658_s4 + $0xc] sm:$0xf] %vm868_vm12, %v855_v57  ;;  %v595_v60 = vadd.f32 1.4214138, %v579_v35  ;;  %v1021_v6 = vpop.eup %1020 }
 0x136   :  { %v747_v50 = vmul.f32 %v1017_v61, %v667_v62  ;;  %v639_v42 = vmul.f32 %v623_v48, %v470_v22 }
 0x137   :  { %v611_v58 = vmul.f32 %v595_v60, %v530_v13 }
 0x138   :  { %v763_v30 = vsub.f32 1.0, %v747_v50  ;;  %v655_v12 = vadd.f32 0.2548296, %v639_v42 }
 0x139   :  { %v627_v24 = vadd.f32 -0.28449672, %v611_v58 }
 0x13a   :  { %v795_v11 = vsub.f32 0.0, %v763_v30  ;;  %v671_v10 = vmul.f32 %v655_v12, %v470_v22 }
 0x13b   :  { %v643_v19 = vmul.f32 %v627_v24, %v530_v13 }
 0x13c   :  { %v811_v54 = vsel %vm779_vm3, %v763_v30, %v795_v11  ;;  %v751_v0 = vmul.f32 %v1019_v39, %v671_v10 }
 0x13d   :  { %v827_v32 = vadd.f32 1.0, %v811_v54  ;;  %v659_v4 = vadd.f32 0.2548296, %v643_v19 }
 0x13e   :  { %v767_v2 = vsub.f32 1.0, %v751_v0 }
 0x13f   :  { %v843_v20 = vmul.f32 %v827_v32, %v219_v21  ;;  %v675_v5 = vmul.f32 %v659_v4, %v530_v13 }
 0x140   :  { %v799_v17 = vsub.f32 0.0, %v767_v2 }
 0x141   :  { %v859_v26 = vpack.c.bf16 %v843_v20, %v843_v20  ;;  %v755_v3 = vmul.f32 %v1021_v6, %v675_v5 }
 0x142   :  { %v815_v40 = vsel %vm783_vm4, %v767_v2, %v799_v17 }
 0x143   :  { %876 = vst.msk [vmem:[%s1658_s4 + $0x1c] sm:$0xf] %vm868_vm12, %v859_v26  ;;  %v831_v15 = vadd.f32 1.0, %v815_v40  ;;  %v771_v22 = vsub.f32 1.0, %v755_v3 }
 0x145   :  { %v847_v16 = vmul.f32 %v831_v15, %v223_v29  ;;  %v803_v36 = vsub.f32 0.0, %v771_v22 }
 0x147   :  { %v863_v52 = vpack.c.bf16 %v847_v16, %v847_v16  ;;  %v819_v41 = vsel %vm787_vm5, %v771_v22, %v803_v36 }
 0x148   :  { %v835_v31 = vadd.f32 1.0, %v819_v41 }
 0x149   :  { %880 = vst.msk [vmem:[%s1658_s4 + $0x2c] sm:$0xf] %vm868_vm12, %v863_v52 }
 0x14a   :  { %v851_v27 = vmul.f32 %v835_v31, %v227_v7 }
 0x14c   :  { %v867_v51 = vpack.c.bf16 %v851_v27, %v851_v27 }
 0x14e   :  { %884 = vst.msk [vmem:[%s1658_s4 + $0x3c] sm:$0xf] %vm868_vm12, %v867_v51 }

// kernel: _lambda_.16
= control target key start
LH: loop header
LB: loop body
LE: loop exit
PB: predicated region body
PF: predicated region fallthrough
CT: control target
= control target key end

     0   :  { %vm40_vm0 = vcmask 130048   ;;  %s404_s1 = inlined_call_operand.vmem [shape: bf16[16,32], index: 1, kind: input, shape index: {}]   ;;  %s405_s0 = inlined_call_operand.vmem [shape: bf16[32,16], index: 0, kind: input, shape index: {}]   ;;  %s406_s2 = inlined_call_operand.vmem [shape: f32[1,32], index: 2, kind: input, shape index: {}]   ;;  %s407_s3 = inlined_call_operand.vmem [shape: f32[1,32], index: 3, kind: input, shape index: {}]   ;;  %s408_s4 = inlined_call_operand.vmem [shape: bf16[32,32], index: 4, kind: output, shape index: {}]  }
   0x1   :  { %v271_v0 = vld [vmem:[%s404_s1] sm:$0xff]  ;;  %v270_v2 = vld [vmem:[%s405_s0 + $0x8] sm:$0xff] }
   0x2   :  { %v269_v1 = vld [vmem:[%s405_s0] sm:$0xff]  ;;  %54 = vmatpush.bf16.msra.mxu0 %v271_v0  ;;  %272 = vmatpush.bf16.msra.mxu1 %v271_v0 }
   0x3   :  { %v273_v3 = vld [vmem:[%s406_s2] ss:$0 sm:$0xff] }
   0x4   :  { %v274_v4 = vld [vmem:[%s407_s3] ss:$0 sm:$0xff] }
   0x5   :  { %267 = vmatmul.msk.bf16.vlgmr.msra.gmra.mxu0 %vm40_vm0, %v269_v1  ;;  %268 = vmatmul.msk.bf16.vlgmr.msra.gmra.mxu1 %vm40_vm0, %v270_v2 }
  0x82   :  { %v56_v5 = vpop.f32.mrf.mxu0  ;;  %v61_v6 = vpop.f32.mrf.mxu1 }
  0x83   :  { %v70_v7 = vmul.f32 %v273_v3, %v56_v5  ;;  %v72_v8 = vmul.f32 %v273_v3, %v61_v6 }
  0x85   :  { %v331_v9 = vadd.f32 %v274_v4, %v70_v7  ;;  %v333_v10 = vadd.f32 %v274_v4, %v72_v8 }
  0x87   :  { %v336_v11 = vmul.f32 0.70710677, %v331_v9  ;;  %v339_v12 = vmul.f32 0.70710677, %v333_v10 }
  0x89   :  { %v90_v13 = vand.u32 2147483647, %v336_v11  ;;  %v92_v14 = vand.u32 2147483647, %v339_v12 }
  0x8a   :  { %v58_v15 = vpop.f32.mrf.mxu0  ;;  %v63_v16 = vpop.f32.mrf.mxu1 }
  0x8b   :  { %v94_v17 = vmul.f32 0.3275911, %v90_v13  ;;  %v96_v18 = vmul.f32 0.3275911, %v92_v14  ;;  %v71_v19 = vmul.f32 %v273_v3, %v58_v15  ;;  %v73_v20 = vmul.f32 %v273_v3, %v63_v16 }
  0x8c   :  { %v198_v27 = vmul.f32 %v90_v13, %v90_v13  ;;  %v200_v38 = vmul.f32 %v92_v14, %v92_v14 }
  0x8d   :  { %v98_v21 = vadd.f32 1.0, %v94_v17  ;;  %v100_v22 = vadd.f32 1.0, %v96_v18  ;;  %v343_v23 = vadd.f32 %v274_v4, %v71_v19  ;;  %v345_v24 = vadd.f32 %v274_v4, %v73_v20 }
  0x8e   :  { %v202_v37 = vsub.f32 0.0, %v198_v27  ;;  %v204_v53 = vsub.f32 0.0, %v200_v38 }
  0x8f   :  { %275 = vrcp.f32 %v98_v21  ;;  %v348_v25 = vmul.f32 0.70710677, %v343_v23  ;;  %v351_v26 = vmul.f32 0.70710677, %v345_v24  ;;  %v111_v40 = vand.u32 2147483647, %v98_v21 }
  0x90   :  { %277 = vrcp.f32 %v100_v22  ;;  %v113_v41 = vand.u32 2147483648, %v98_v21  ;;  %v143_v45 = vand.u32 2147483648, %v100_v22  ;;  %v141_v47 = vand.u32 2147483647, %v100_v22 }
  0x91   :  { %v354_v28 = vand.u32 2147483647, %v348_v25  ;;  %v357_v30 = vand.u32 2147483647, %v351_v26  ;;  %vm107_vm3 = vweird.f32 %v98_v21  ;;  %vm137_vm5 = vweird.f32 %v100_v22 }
  0x92   :  { %v114_v49 = vor.u32 1.1754944e-38, %v113_v41  ;;  %vm112_vm6 = vcmp.eq.f32.partialorder %v111_v40, 8.507059e+37  ;;  %v144_v52 = vor.u32 1.1754944e-38, %v143_v45  ;;  %v206_v55 = vmul.f32 1.442695, %v202_v37 }
  0x93   :  { %v95_v33 = vmul.f32 0.3275911, %v354_v28  ;;  %v97_v35 = vmul.f32 0.3275911, %v357_v30  ;;  %vm142_vm8 = vcmp.eq.f32.partialorder %v141_v47, 8.507059e+37  ;;  %v199_v20 = vmul.f32 %v354_v28, %v354_v28 }
  0x94   :  { %v210_v2 = vmul.f32 1.442695, %v204_v53 }
  0x95   :  { %v276_v29 = vpop.eup %275  ;;  %v361_v39 = vadd.f32 1.0, %v95_v33  ;;  %v363_v43 = vadd.f32 1.0, %v97_v35  ;;  %v203_v45 = vsub.f32 0.0, %v199_v20 }
  0x96   :  { %v278_v31 = vpop.eup %277  ;;  %v103_v32 = vmul.f32 %v276_v29, %v98_v21  ;;  %vm108_vm1 = vweird.f32 %v276_v29 }
  0x97   :  { %v133_v34 = vmul.f32 %v278_v31, %v100_v22  ;;  %279 = vrcp.f32 %v361_v39  ;;  %vm138_vm2 = vweird.f32 %v278_v31  ;;  %vm109_vm4 = vmor %vm107_vm3, %vm108_vm1  ;;  %v126_v5 = vand.u32 2147483647, %v361_v39 }
  0x98   :  { %v104_v36 = vsub.f32 1.0, %v103_v32  ;;  %281 = vrcp.f32 %v363_v43  ;;  %vm139_vm7 = vmor %vm137_vm5, %vm138_vm2  ;;  %v128_v6 = vand.u32 2147483648, %v361_v39  ;;  %v158_v14 = vand.u32 2147483648, %v363_v43 }
  0x99   :  { %v134_v42 = vsub.f32 1.0, %v133_v34  ;;  %283 = vpow2.f32 %v206_v55  ;;  %v156_v17 = vand.u32 2147483647, %v363_v43  ;;  %vm122_vm11 = vweird.f32 %v361_v39 }
  0x9a   :  { %v105_v44 = vmul.f32 %v276_v29, %v104_v36  ;;  %v129_v22 = vor.u32 1.1754944e-38, %v128_v6  ;;  %vm152_vm13 = vweird.f32 %v363_v43  ;;  %vm127_vm14 = vcmp.eq.f32.partialorder %v126_v5, 8.507059e+37 }
  0x9b   :  { %v135_v46 = vmul.f32 %v278_v31, %v134_v42  ;;  %v159_v33 = vor.u32 1.1754944e-38, %v158_v14  ;;  %vm157_vm0 = vcmp.eq.f32.partialorder %v156_v17, 8.507059e+37  ;;  %285 = vpow2.f32 %v210_v2 }
  0x9c   :  { %v106_v48 = vadd.f32 %v276_v29, %v105_v44  ;;  %vm222_vm1 = vcmp.ge.f32.partialorder %v336_v11, 0.0  ;;  %vm224_vm2 = vcmp.ge.f32.partialorder %v339_v12, 0.0  ;;  %v82_v6 = vmul.f32 0.5, %v331_v9 }
  0x9d   :  { %v136_v50 = vadd.f32 %v278_v31, %v135_v46  ;;  %v280_v57 = vpop.eup %279  ;;  %v84_v14 = vmul.f32 0.5, %v333_v10  ;;  %vm246_vm3 = vcmask 257024   ;;  %vm225_vm5 = vcmp.ge.f32.partialorder %v351_v26, 0.0 }
  0x9e   :  { %v110_v51 = vsel %vm109_vm4, %v276_v29, %v106_v48  ;;  %v282_v60 = vpop.eup %281  ;;  %v118_v62 = vmul.f32 %v280_v57, %v361_v39  ;;  %vm123_vm9 = vweird.f32 %v280_v57  ;;  %v201_v39 = vmul.f32 %v357_v30, %v357_v30 }
  0x9f   :  { %v115_v54 = vsel %vm112_vm6, %v114_v49, %v110_v51  ;;  %v140_v56 = vsel %vm139_vm7, %v278_v31, %v136_v50  ;;  %v148_v0 = vmul.f32 %v282_v60, %v363_v43  ;;  %vm153_vm10 = vweird.f32 %v282_v60  ;;  %vm124_vm12 = vmor %vm122_vm11, %vm123_vm9  ;;  %v284_v29 = vpop.eup %283 }
  0xa0   :  { %v162_v58 = vmul.f32 1.0614054, %v115_v54  ;;  %v145_v59 = vsel %vm142_vm8, %v144_v52, %v140_v56  ;;  %v119_v3 = vsub.f32 1.0, %v118_v62  ;;  %vm154_vm15 = vmor %vm152_vm13, %vm153_vm10  ;;  %v205_v49 = vsub.f32 0.0, %v201_v39 }
  0xa1   :  { %v164_v61 = vmul.f32 1.0614054, %v145_v59  ;;  %v149_v7 = vsub.f32 1.0, %v148_v0  ;;  %v286_v55 = vpop.eup %285  ;;  %vm223_vm4 = vcmp.ge.f32.partialorder %v348_v25, 0.0 }
  0xa2   :  { %v166_v63 = vadd.f32 -1.4531521, %v162_v58  ;;  %v120_v13 = vmul.f32 %v280_v57, %v119_v3 }
  0xa3   :  { %v168_v1 = vadd.f32 -1.4531521, %v164_v61  ;;  %v150_v16 = vmul.f32 %v282_v60, %v149_v7  ;;  %v212_v61 = vmul.f32 1.442695, %v205_v49 }
  0xa4   :  { %v170_v4 = vmul.f32 %v166_v63, %v115_v54  ;;  %v121_v19 = vadd.f32 %v280_v57, %v120_v13 }
  0xa5   :  { %v172_v8 = vmul.f32 %v168_v1, %v145_v59  ;;  %v151_v27 = vadd.f32 %v282_v60, %v150_v16 }
  0xa6   :  { %v174_v15 = vadd.f32 1.4214138, %v170_v4  ;;  %v125_v32 = vsel %vm124_vm12, %v280_v57, %v121_v19  ;;  %v208_v57 = vmul.f32 1.442695, %v203_v45 }
  0xa7   :  { %v176_v18 = vadd.f32 1.4214138, %v172_v8  ;;  %v130_v35 = vsel %vm127_vm14, %v129_v22, %v125_v32  ;;  %v155_v36 = vsel %vm154_vm15, %v282_v60, %v151_v27 }
  0xa8   :  { %v178_v21 = vmul.f32 %v174_v15, %v115_v54  ;;  %v163_v38 = vmul.f32 1.0614054, %v130_v35  ;;  %v160_v28 = vsel %vm157_vm0, %v159_v33, %v155_v36  ;;  %287 = vpow2.f32 %v208_v57 }
  0xa9   :  { %v180_v31 = vmul.f32 %v176_v18, %v145_v59  ;;  %v165_v41 = vmul.f32 1.0614054, %v160_v28  ;;  %289 = vpow2.f32 %v212_v61 }
  0xaa   :  { %v182_v34 = vadd.f32 -0.28449672, %v178_v21  ;;  %v167_v43 = vadd.f32 -1.4531521, %v163_v38 }
  0xab   :  { %v184_v37 = vadd.f32 -0.28449672, %v180_v31  ;;  %v169_v46 = vadd.f32 -1.4531521, %v165_v41 }
  0xac   :  { %v186_v40 = vmul.f32 %v182_v34, %v115_v54  ;;  %v171_v48 = vmul.f32 %v167_v43, %v130_v35  ;;  %v83_v34 = vmul.f32 0.5, %v343_v23 }
  0xad   :  { %v188_v42 = vmul.f32 %v184_v37, %v145_v59  ;;  %v173_v51 = vmul.f32 %v169_v46, %v160_v28  ;;  %v85_v37 = vmul.f32 0.5, %v345_v24 }
  0xae   :  { %v190_v44 = vadd.f32 0.2548296, %v186_v40  ;;  %v175_v53 = vadd.f32 1.4214138, %v171_v48  ;;  %v288_v19 = vpop.eup %287 }
  0xaf   :  { %v192_v47 = vadd.f32 0.2548296, %v188_v42  ;;  %v177_v58 = vadd.f32 1.4214138, %v173_v51  ;;  %v290_v21 = vpop.eup %289 }
  0xb0   :  { %v194_v50 = vmul.f32 %v190_v44, %v115_v54  ;;  %v179_v60 = vmul.f32 %v175_v53, %v130_v35 }
  0xb1   :  { %v196_v52 = vmul.f32 %v192_v47, %v145_v59  ;;  %v181_v63 = vmul.f32 %v177_v58, %v160_v28 }
  0xb2   :  { %v214_v56 = vmul.f32 %v284_v29, %v194_v50  ;;  %v183_v1 = vadd.f32 -0.28449672, %v179_v60 }
  0xb3   :  { %v216_v30 = vmul.f32 %v286_v55, %v196_v52  ;;  %v185_v3 = vadd.f32 -0.28449672, %v181_v63 }
  0xb4   :  { %v218_v62 = vsub.f32 1.0, %v214_v56  ;;  %v187_v4 = vmul.f32 %v183_v1, %v130_v35 }
  0xb5   :  { %v220_v0 = vsub.f32 1.0, %v216_v30  ;;  %v189_v5 = vmul.f32 %v185_v3, %v160_v28 }
  0xb6   :  { %v226_v2 = vsub.f32 0.0, %v218_v62  ;;  %v191_v13 = vadd.f32 0.2548296, %v187_v4 }
  0xb7   :  { %v228_v54 = vsub.f32 0.0, %v220_v0  ;;  %v193_v16 = vadd.f32 0.2548296, %v189_v5 }
  0xb8   :  { %v230_v59 = vsel %vm222_vm1, %v218_v62, %v226_v2  ;;  %v195_v18 = vmul.f32 %v191_v13, %v130_v35 }
  0xb9   :  { %v234_v7 = vadd.f32 1.0, %v230_v59  ;;  %v232_v8 = vsel %vm224_vm2, %v220_v0, %v228_v54  ;;  %v197_v20 = vmul.f32 %v193_v16, %v160_v28 }
  0xba   :  { %v236_v15 = vadd.f32 1.0, %v232_v8  ;;  %v215_v27 = vmul.f32 %v288_v19, %v195_v18 }
  0xbb   :  { %v238_v17 = vmul.f32 %v234_v7, %v82_v6  ;;  %v217_v29 = vmul.f32 %v290_v21, %v197_v20 }
  0xbc   :  { %v240_v11 = vmul.f32 %v236_v15, %v84_v14  ;;  %v219_v9 = vsub.f32 1.0, %v215_v27 }
  0xbd   :  { %v242_v22 = vpack.c.bf16 %v238_v17, %v238_v17  ;;  %v221_v10 = vsub.f32 1.0, %v217_v29 }
  0xbe   :  { %v244_v12 = vpack.c.bf16 %v240_v11, %v240_v11  ;;  %v227_v31 = vsub.f32 0.0, %v219_v9 }
  0xbf   :  { %247 = vst.msk [vmem:[%s408_s4] sm:$0xf] %vm246_vm3, %v242_v22  ;;  %v229_v32 = vsub.f32 0.0, %v221_v10 }
  0xc0   :  { %249 = vst.msk [vmem:[%s408_s4 + $0x8] sm:$0xf] %vm246_vm3, %v244_v12  ;;  %v231_v33 = vsel %vm223_vm4, %v219_v9, %v227_v31 }
  0xc1   :  { %v235_v35 = vadd.f32 1.0, %v231_v33  ;;  %v233_v36 = vsel %vm225_vm5, %v221_v10, %v229_v32 }
  0xc2   :  { %v237_v38 = vadd.f32 1.0, %v233_v36 }
  0xc3   :  { %v239_v28 = vmul.f32 %v235_v35, %v83_v34 }
  0xc4   :  { %v241_v39 = vmul.f32 %v237_v38, %v85_v37 }
  0xc5   :  { %v243_v40 = vpack.c.bf16 %v239_v28, %v239_v28 }
  0xc6   :  { %v245_v41 = vpack.c.bf16 %v241_v39, %v241_v39 }
  0xc7   :  { %248 = vst.msk [vmem:[%s408_s4 + $0x4] sm:$0xf] %vm246_vm3, %v243_v40 }
  0xc8   :  { %250 = vst.msk [vmem:[%s408_s4 + $0xc] sm:$0xf] %vm246_vm3, %v245_v41 }

// kernel: _lambda_.15
= control target key start
LH: loop header
LB: loop body
LE: loop exit
PB: predicated region body
PF: predicated region fallthrough
CT: control target
= control target key end

     0   :  { %vm75_vm0 = vcmask 1043456   ;;  %vm68_vm1 = vcmask 588800   ;;  %s467_s1 = inlined_call_operand.vmem [shape: bf16[72,16], index: 1, kind: input, shape index: {}]   ;;  %s468_s2 = inlined_call_operand.vmem [shape: f32[1,16], index: 2, kind: input, shape index: {}]   ;;  %s469_s3 = inlined_call_operand.vmem [shape: f32[1,16], index: 3, kind: input, shape index: {}]   ;;  %s470_s0 = inlined_call_operand.vmem [shape: bf16[32,72], index: 0, kind: input, shape index: {}]   ;;  %s471_s4 = inlined_call_operand.vmem [shape: bf16[32,16], index: 4, kind: output, shape index: {}]  }
   0x1   :  { %v30_v0 = vld [vmem:[%s467_s1 + $0x20] sm:$0xf]  ;;  %v318_v4 = vld [vmem:[%s467_s1 + $0x18] sm:$0xff]  ;;  %v317_v5 = vld [vmem:[%s467_s1 + $0x10] sm:$0xff] }
   0x2   :  { %v58_v1 = vunpack.c.l.b16 %v30_v0  ;;  %v316_v6 = vld [vmem:[%s467_s1 + $0x8] sm:$0xff]  ;;  %v315_v7 = vld [vmem:[%s467_s1] sm:$0xff] }
   0x3   :  { %v313_v8 = vld [vmem:[%s470_s0] sm:$0xff]  ;;  %v314_v9 = vld [vmem:[%s470_s0 + $0x8] sm:$0xff] }
   0x4   :  { %v63_v2 = vpack.c.b16 %v58_v1, %v58_v1  ;;  %v324_v10 = vld [vmem:[%s468_s2] ss:$0 sm:$0xff] }
   0x5   :  { %v325_v11 = vld [vmem:[%s469_s3] ss:$0 sm:$0xff] }
   0x6   :  { %v77_v3 = vsel %vm75_vm0, %v63_v2, 0 }
   0x7   :  { %82 = vmatpush.bf16.msra.mxu0 %v77_v3  ;;  %319 = vmatpush.bf16.msra.mxu1 %v77_v3 }
   0xb   :  { %83 = vmatpush.bf16.msra.mxu0 %v318_v4  ;;  %320 = vmatpush.bf16.msra.mxu1 %v318_v4 }
   0xf   :  { %84 = vmatpush.bf16.msra.mxu0 %v317_v5  ;;  %321 = vmatpush.bf16.msra.mxu1 %v317_v5 }
  0x13   :  { %85 = vmatpush.bf16.msra.mxu0 %v316_v6  ;;  %322 = vmatpush.bf16.msra.mxu1 %v316_v6 }
  0x17   :  { %86 = vmatpush.bf16.msra.mxu0 %v315_v7  ;;  %323 = vmatpush.bf16.msra.mxu1 %v315_v7 }
  0x1a   :  { %311 = vmatmul.msk.bf16.vlgmr.msra.gmra.mxu0 %vm68_vm1, %v313_v8  ;;  %312 = vmatmul.msk.bf16.vlgmr.msra.gmra.mxu1 %vm68_vm1, %v314_v9 }
  0x97   :  { %v88_v12 = vpop.f32.mrf.mxu0  ;;  %v93_v13 = vpop.f32.mrf.mxu1 }
  0x98   :  { %v102_v14 = vmul.f32 %v324_v10, %v88_v12  ;;  %v104_v15 = vmul.f32 %v324_v10, %v93_v13 }
  0x9a   :  { %v394_v16 = vadd.f32 %v325_v11, %v102_v14  ;;  %v396_v17 = vadd.f32 %v325_v11, %v104_v15 }
  0x9c   :  { %v399_v18 = vmul.f32 0.70710677, %v394_v16  ;;  %v402_v19 = vmul.f32 0.70710677, %v396_v17 }
  0x9e   :  { %v122_v20 = vand.u32 2147483647, %v399_v18  ;;  %v124_v21 = vand.u32 2147483647, %v402_v19 }
  0x9f   :  { %v90_v22 = vpop.f32.mrf.mxu0  ;;  %v95_v23 = vpop.f32.mrf.mxu1 }
  0xa0   :  { %v126_v24 = vmul.f32 0.3275911, %v122_v20  ;;  %v128_v25 = vmul.f32 0.3275911, %v124_v21  ;;  %v103_v26 = vmul.f32 %v324_v10, %v90_v22  ;;  %v105_v27 = vmul.f32 %v324_v10, %v95_v23 }
  0xa1   :  { %v230_v34 = vmul.f32 %v122_v20, %v122_v20  ;;  %v232_v45 = vmul.f32 %v124_v21, %v124_v21 }
  0xa2   :  { %v130_v28 = vadd.f32 1.0, %v126_v24  ;;  %v132_v29 = vadd.f32 1.0, %v128_v25  ;;  %v406_v30 = vadd.f32 %v325_v11, %v103_v26  ;;  %v408_v31 = vadd.f32 %v325_v11, %v105_v27 }
  0xa3   :  { %v234_v44 = vsub.f32 0.0, %v230_v34  ;;  %v236_v60 = vsub.f32 0.0, %v232_v45 }
  0xa4   :  { %326 = vrcp.f32 %v130_v28  ;;  %v411_v32 = vmul.f32 0.70710677, %v406_v30  ;;  %v414_v33 = vmul.f32 0.70710677, %v408_v31  ;;  %v143_v47 = vand.u32 2147483647, %v130_v28 }
  0xa5   :  { %328 = vrcp.f32 %v132_v29  ;;  %v145_v48 = vand.u32 2147483648, %v130_v28  ;;  %v175_v52 = vand.u32 2147483648, %v132_v29  ;;  %v173_v54 = vand.u32 2147483647, %v132_v29 }
  0xa6   :  { %v417_v35 = vand.u32 2147483647, %v411_v32  ;;  %v420_v37 = vand.u32 2147483647, %v414_v33  ;;  %vm139_vm4 = vweird.f32 %v130_v28  ;;  %vm169_vm6 = vweird.f32 %v132_v29 }
  0xa7   :  { %v146_v56 = vor.u32 1.1754944e-38, %v145_v48  ;;  %vm144_vm7 = vcmp.eq.f32.partialorder %v143_v47, 8.507059e+37  ;;  %v176_v59 = vor.u32 1.1754944e-38, %v175_v52  ;;  %v238_v62 = vmul.f32 1.442695, %v234_v44 }
  0xa8   :  { %v127_v40 = vmul.f32 0.3275911, %v417_v35  ;;  %v129_v42 = vmul.f32 0.3275911, %v420_v37  ;;  %vm174_vm9 = vcmp.eq.f32.partialorder %v173_v54, 8.507059e+37  ;;  %v231_v27 = vmul.f32 %v417_v35, %v417_v35 }
  0xa9   :  { %v242_v9 = vmul.f32 1.442695, %v236_v60 }
  0xaa   :  { %v327_v36 = vpop.eup %326  ;;  %v424_v46 = vadd.f32 1.0, %v127_v40  ;;  %v426_v50 = vadd.f32 1.0, %v129_v42  ;;  %v235_v52 = vsub.f32 0.0, %v231_v27 }
  0xab   :  { %v329_v38 = vpop.eup %328  ;;  %v135_v39 = vmul.f32 %v327_v36, %v130_v28  ;;  %vm140_vm2 = vweird.f32 %v327_v36 }
  0xac   :  { %v165_v41 = vmul.f32 %v329_v38, %v132_v29  ;;  %330 = vrcp.f32 %v424_v46  ;;  %vm170_vm3 = vweird.f32 %v329_v38  ;;  %vm141_vm5 = vmor %vm139_vm4, %vm140_vm2  ;;  %v158_v12 = vand.u32 2147483647, %v424_v46 }
  0xad   :  { %v136_v43 = vsub.f32 1.0, %v135_v39  ;;  %332 = vrcp.f32 %v426_v50  ;;  %vm171_vm8 = vmor %vm169_vm6, %vm170_vm3  ;;  %v160_v13 = vand.u32 2147483648, %v424_v46  ;;  %v190_v21 = vand.u32 2147483648, %v426_v50 }
  0xae   :  { %v166_v49 = vsub.f32 1.0, %v165_v41  ;;  %334 = vpow2.f32 %v238_v62  ;;  %v188_v24 = vand.u32 2147483647, %v426_v50  ;;  %vm154_vm12 = vweird.f32 %v424_v46 }
  0xaf   :  { %v137_v51 = vmul.f32 %v327_v36, %v136_v43  ;;  %v161_v29 = vor.u32 1.1754944e-38, %v160_v13  ;;  %vm184_vm14 = vweird.f32 %v426_v50  ;;  %vm159_vm15 = vcmp.eq.f32.partialorder %v158_v12, 8.507059e+37 }
  0xb0   :  { %v167_v53 = vmul.f32 %v329_v38, %v166_v49  ;;  %v191_v40 = vor.u32 1.1754944e-38, %v190_v21  ;;  %vm189_vm1 = vcmp.eq.f32.partialorder %v188_v24, 8.507059e+37  ;;  %336 = vpow2.f32 %v242_v9 }
  0xb1   :  { %v138_v55 = vadd.f32 %v327_v36, %v137_v51  ;;  %vm254_vm2 = vcmp.ge.f32.partialorder %v399_v18, 0.0  ;;  %vm256_vm3 = vcmp.ge.f32.partialorder %v402_v19, 0.0  ;;  %v114_v13 = vmul.f32 0.5, %v394_v16 }
  0xb2   :  { %v168_v57 = vadd.f32 %v329_v38, %v167_v53  ;;  %v331_v0 = vpop.eup %330  ;;  %v116_v21 = vmul.f32 0.5, %v396_v17  ;;  %vm278_vm4 = vcmask 125952   ;;  %vm257_vm6 = vcmp.ge.f32.partialorder %v414_v33, 0.0 }
  0xb3   :  { %v142_v58 = vsel %vm141_vm5, %v327_v36, %v138_v55  ;;  %v333_v3 = vpop.eup %332  ;;  %v150_v5 = vmul.f32 %v331_v0, %v424_v46  ;;  %vm155_vm10 = vweird.f32 %v331_v0  ;;  %v233_v46 = vmul.f32 %v420_v37, %v420_v37 }
  0xb4   :  { %v147_v61 = vsel %vm144_vm7, %v146_v56, %v142_v58  ;;  %v172_v63 = vsel %vm171_vm8, %v329_v38, %v168_v57  ;;  %v180_v7 = vmul.f32 %v333_v3, %v426_v50  ;;  %vm185_vm11 = vweird.f32 %v333_v3  ;;  %vm156_vm13 = vmor %vm154_vm12, %vm155_vm10  ;;  %v335_v36 = vpop.eup %334 }
  0xb5   :  { %v194_v1 = vmul.f32 1.0614054, %v147_v61  ;;  %v177_v2 = vsel %vm174_vm9, %v176_v59, %v172_v63  ;;  %v151_v10 = vsub.f32 1.0, %v150_v5  ;;  %vm186_vm0 = vmor %vm184_vm14, %vm185_vm11  ;;  %v237_v56 = vsub.f32 0.0, %v233_v46 }
  0xb6   :  { %v196_v4 = vmul.f32 1.0614054, %v177_v2  ;;  %v181_v14 = vsub.f32 1.0, %v180_v7  ;;  %v337_v62 = vpop.eup %336  ;;  %vm255_vm5 = vcmp.ge.f32.partialorder %v411_v32, 0.0 }
  0xb7   :  { %v198_v6 = vadd.f32 -1.4531521, %v194_v1  ;;  %v152_v20 = vmul.f32 %v331_v0, %v151_v10 }
  0xb8   :  { %v200_v8 = vadd.f32 -1.4531521, %v196_v4  ;;  %v182_v23 = vmul.f32 %v333_v3, %v181_v14  ;;  %v244_v4 = vmul.f32 1.442695, %v237_v56 }
  0xb9   :  { %v202_v11 = vmul.f32 %v198_v6, %v147_v61  ;;  %v153_v26 = vadd.f32 %v331_v0, %v152_v20 }
  0xba   :  { %v204_v15 = vmul.f32 %v200_v8, %v177_v2  ;;  %v183_v34 = vadd.f32 %v333_v3, %v182_v23 }
  0xbb   :  { %v206_v22 = vadd.f32 1.4214138, %v202_v11  ;;  %v157_v39 = vsel %vm156_vm13, %v331_v0, %v153_v26  ;;  %v240_v0 = vmul.f32 1.442695, %v235_v52 }
  0xbc   :  { %v208_v25 = vadd.f32 1.4214138, %v204_v15  ;;  %v162_v42 = vsel %vm159_vm15, %v161_v29, %v157_v39  ;;  %v187_v43 = vsel %vm186_vm0, %v333_v3, %v183_v34 }
  0xbd   :  { %v210_v28 = vmul.f32 %v206_v22, %v147_v61  ;;  %v195_v45 = vmul.f32 1.0614054, %v162_v42  ;;  %v192_v35 = vsel %vm189_vm1, %v191_v40, %v187_v43  ;;  %338 = vpow2.f32 %v240_v0 }
  0xbe   :  { %v212_v38 = vmul.f32 %v208_v25, %v177_v2  ;;  %v197_v48 = vmul.f32 1.0614054, %v192_v35  ;;  %340 = vpow2.f32 %v244_v4 }
  0xbf   :  { %v214_v41 = vadd.f32 -0.28449672, %v210_v28  ;;  %v199_v50 = vadd.f32 -1.4531521, %v195_v45 }
  0xc0   :  { %v216_v44 = vadd.f32 -0.28449672, %v212_v38  ;;  %v201_v53 = vadd.f32 -1.4531521, %v197_v48 }
  0xc1   :  { %v218_v47 = vmul.f32 %v214_v41, %v147_v61  ;;  %v203_v55 = vmul.f32 %v199_v50, %v162_v42  ;;  %v115_v41 = vmul.f32 0.5, %v406_v30 }
  0xc2   :  { %v220_v49 = vmul.f32 %v216_v44, %v177_v2  ;;  %v205_v58 = vmul.f32 %v201_v53, %v192_v35  ;;  %v117_v44 = vmul.f32 0.5, %v408_v31 }
  0xc3   :  { %v222_v51 = vadd.f32 0.2548296, %v218_v47  ;;  %v207_v60 = vadd.f32 1.4214138, %v203_v55  ;;  %v339_v26 = vpop.eup %338 }
  0xc4   :  { %v224_v54 = vadd.f32 0.2548296, %v220_v49  ;;  %v209_v1 = vadd.f32 1.4214138, %v205_v58  ;;  %v341_v28 = vpop.eup %340 }
  0xc5   :  { %v226_v57 = vmul.f32 %v222_v51, %v147_v61  ;;  %v211_v3 = vmul.f32 %v207_v60, %v162_v42 }
  0xc6   :  { %v228_v59 = vmul.f32 %v224_v54, %v177_v2  ;;  %v213_v6 = vmul.f32 %v209_v1, %v192_v35 }
  0xc7   :  { %v246_v63 = vmul.f32 %v335_v36, %v226_v57  ;;  %v215_v8 = vadd.f32 -0.28449672, %v211_v3 }
  0xc8   :  { %v248_v37 = vmul.f32 %v337_v62, %v228_v59  ;;  %v217_v10 = vadd.f32 -0.28449672, %v213_v6 }
  0xc9   :  { %v250_v5 = vsub.f32 1.0, %v246_v63  ;;  %v219_v11 = vmul.f32 %v215_v8, %v162_v42 }
  0xca   :  { %v252_v7 = vsub.f32 1.0, %v248_v37  ;;  %v221_v12 = vmul.f32 %v217_v10, %v192_v35 }
  0xcb   :  { %v258_v9 = vsub.f32 0.0, %v250_v5  ;;  %v223_v20 = vadd.f32 0.2548296, %v219_v11 }
  0xcc   :  { %v260_v61 = vsub.f32 0.0, %v252_v7  ;;  %v225_v23 = vadd.f32 0.2548296, %v221_v12 }
  0xcd   :  { %v262_v2 = vsel %vm254_vm2, %v250_v5, %v258_v9  ;;  %v227_v25 = vmul.f32 %v223_v20, %v162_v42 }
  0xce   :  { %v266_v14 = vadd.f32 1.0, %v262_v2  ;;  %v264_v15 = vsel %vm256_vm3, %v252_v7, %v260_v61  ;;  %v229_v27 = vmul.f32 %v225_v23, %v192_v35 }
  0xcf   :  { %v268_v22 = vadd.f32 1.0, %v264_v15  ;;  %v247_v34 = vmul.f32 %v339_v26, %v227_v25 }
  0xd0   :  { %v270_v24 = vmul.f32 %v266_v14, %v114_v13  ;;  %v249_v36 = vmul.f32 %v341_v28, %v229_v27 }
  0xd1   :  { %v272_v18 = vmul.f32 %v268_v22, %v116_v21  ;;  %v251_v16 = vsub.f32 1.0, %v247_v34 }
  0xd2   :  { %v274_v29 = vpack.c.bf16 %v270_v24, %v270_v24  ;;  %v253_v17 = vsub.f32 1.0, %v249_v36 }
  0xd3   :  { %v276_v19 = vpack.c.bf16 %v272_v18, %v272_v18  ;;  %v259_v38 = vsub.f32 0.0, %v251_v16 }
  0xd4   :  { %279 = vst.msk [vmem:[%s471_s4] sm:$0xf] %vm278_vm4, %v274_v29  ;;  %v261_v39 = vsub.f32 0.0, %v253_v17 }
  0xd5   :  { %281 = vst.msk [vmem:[%s471_s4 + $0x8] sm:$0xf] %vm278_vm4, %v276_v19  ;;  %v263_v40 = vsel %vm255_vm5, %v251_v16, %v259_v38 }
  0xd6   :  { %v267_v42 = vadd.f32 1.0, %v263_v40  ;;  %v265_v43 = vsel %vm257_vm6, %v253_v17, %v261_v39 }
  0xd7   :  { %v269_v45 = vadd.f32 1.0, %v265_v43 }
  0xd8   :  { %v271_v35 = vmul.f32 %v267_v42, %v115_v41 }
  0xd9   :  { %v273_v46 = vmul.f32 %v269_v45, %v117_v44 }
  0xda   :  { %v275_v47 = vpack.c.bf16 %v271_v35, %v271_v35 }
  0xdb   :  { %v277_v48 = vpack.c.bf16 %v273_v46, %v273_v46 }
  0xdc   :  { %280 = vst.msk [vmem:[%s471_s4 + $0x4] sm:$0xf] %vm278_vm4, %v275_v47 }
  0xdd   :  { %282 = vst.msk [vmem:[%s471_s4 + $0xc] sm:$0xf] %vm278_vm4, %v277_v48 }

// kernel: _lambda_.20
= control target key start
LH: loop header
LB: loop body
LE: loop exit
PB: predicated region body
PF: predicated region fallthrough
CT: control target
= control target key end

     0   :  { %s591_s18 = smov 0   ;;  %s656_s0 = inlined_call_operand.vmem [shape: bf16[2,16,32], index: 0, kind: input, shape index: {}]   ;;  %s657_s1 = inlined_call_operand.vmem [shape: bf16[32,128], index: 1, kind: input, shape index: {}]   ;;  %s658_s2 = inlined_call_operand.vmem [shape: f32[1,128], index: 2, kind: input, shape index: {}]   ;;  %s659_s3 = inlined_call_operand.vmem [shape: bf16[128,32], index: 3, kind: input, shape index: {}]   ;;  %s660_s4 = inlined_call_operand.vmem [shape: f32[1,32], index: 4, kind: input, shape index: {}]   ;;  %s661_s5 = inlined_call_operand.vmem [shape: bf16[2,16,32], index: 5, kind: output, shape index: {}]  }
   0x1 LB: > { %s468_s19 = sadd.s32 4294967295, %s558_s18   ;;  %p472_p0 = scmp.ge.s32.totalorder %s558_s18, 1  ;;  %s558_s18 = sphi %s591_s18, %s15_s18  }
   0x2   : > { %p187_p1 = scmp.lt.s32.totalorder %s558_s18, 3 }
   0x4   : > { %p188_p2 = pnand %p472_p0, %p187_p1 }
   0x5   : > { %p215_p3 = scmp.lt.s32.totalorder (!%p188_p2), %s468_s19, 1 }
   0x6   : > { %191 = sbr.rel (%p188_p2) target bundleno = 593 (0x251), region = 40 }
   0xb   : > { %v528_v0 = vld [vmem:[%s657_s1 + $0x8] sm:$0xff]  ;;  %v536_v1 = vld [vmem:[%s659_s3 + $0x38] sm:$0xff]  ;;  %v527_v2 = vld [vmem:[%s657_s1] sm:$0xff]  ;;  %s663_s19 = smov (!%p215_p3, %s468_s19), 1  ;;  %vm253_vm0 = vcmask 261120   ;;  %v560_v32 = vmov 512.0  }
   0xc   : > { %263 = vmatpush.bf16.msra.mxu0 %v528_v0  ;;  %342 = vmatpush.bf16.msra.mxu1 %v536_v1  ;;  %v535_v3 = vld [vmem:[%s659_s3 + $0x30] sm:$0xff]  ;;  %s524_s28 = sshll.u32 %s663_s19, 3  ;;  %v534_v5 = vld [vmem:[%s659_s3 + $0x28] sm:$0xff]  ;;  %v533_v6 = vld [vmem:[%s659_s3 + $0x20] sm:$0xff]  ;;  %548 = vrcp.f32 %v560_v32  ;;  %vm410_vm5 = vcmask 257024  }
   0xd   : > { %s219_s6 = scalar_lea.vmem %s656_s0, %s524_s28  ;;  %v532_v7 = vld [vmem:[%s659_s3 + $0x18] sm:$0xff]  ;;  %v531_v8 = vld [vmem:[%s659_s3 + $0x10] sm:$0xff]  ;;  %v530_v9 = vld [vmem:[%s659_s3 + $0x8] sm:$0xff]  ;;  %s224_s27 = scalar_lea.vmem %s661_s5, %s524_s28 }
   0xe   : > { %v526_v4 = vld [vmem:[%s219_s6] sm:$0xff] }
   0xf   : > { %v529_v10 = vld [vmem:[%s659_s3] sm:$0xff] }
  0x10   : > { %264 = vmatpush.bf16.msra.mxu0 %v527_v2  ;;  %343 = vmatpush.bf16.msra.mxu1 %v535_v3  ;;  %v546_v12 = vld [vmem:[%s658_s2] ss:$0 sm:$0xff] }
  0x11   : > { %v547_v20 = vld [vmem:[%s660_s4] ss:$0 sm:$0xff] }
  0x12   : > { %v226_v21 = vld [vmem:[%s219_s6] sm:$0xff]   ;;  %v549_v33 = vpop.eup %548 }
  0x13   : > { %489 = vmatmul.msk.bf16.vlgmr.msra.gmra.mxu0 %vm253_vm0, %v526_v4  ;;  %v356_v23 = vunpack.c.l.bf16 %v226_v21  ;;  %v357_v24 = vunpack.c.h.bf16 %v226_v21  ;;  %v372_v34 = vmul.f32 512.0, %v549_v33  ;;  %vm376_vm1 = vweird.f32 %v549_v33 }
  0x14   : > { %344 = vmatpush.bf16.msra.mxu1 %v534_v5 }
  0x15   : > { %v373_v35 = vsub.f32 1.0, %v372_v34 }
  0x17   : > { %v374_v38 = vmul.f32 %v549_v33, %v373_v35 }
  0x18   : > { %345 = vmatpush.bf16.msra.mxu1 %v533_v6 }
  0x19   : > { %v375_v41 = vadd.f32 %v549_v33, %v374_v38 }
  0x1b   : > { %v377_v44 = vsel %vm376_vm1, %v549_v33, %v375_v41 }
  0x1c   : > { %346 = vmatpush.bf16.msra.mxu1 %v532_v7 }
  0x20   : > { %347 = vmatpush.bf16.msra.mxu1 %v531_v8 }
  0x24   : > { %348 = vmatpush.bf16.msra.mxu1 %v530_v9 }
  0x28   : > { %349 = vmatpush.bf16.msra.mxu1 %v529_v10 }
  0x90   : > { %v266_v11 = vpop.f32.mrf.mxu0 }
  0x91   : > { %v267_v13 = vadd.f32 %v546_v12, %v266_v11 }
  0x93   : > { %v271_v16 = vmax.f32 %v267_v13, 0.0 }
  0x98   : > { %v268_v14 = vpop.f32.mrf.mxu0 }
  0x99   : > { %v269_v15 = vadd.f32 %v546_v12, %v268_v14 }
  0x9b   : > { %v272_v17 = vmax.f32 %v269_v15, 0.0 }
  0x9d   : > { %v273_v18 = vpack.c.bf16 %v272_v17, %v271_v16 }
  0x9f   : > { %350 = vmatmul.bf16.vlgmr.msra.gmra.mxu1 %v273_v18 }
 0x11c   : > { %v351_v19 = vpop.f32.mrf.mxu1 }
 0x11d   : > { %v352_v22 = vadd.f32 %v547_v20, %v351_v19 }
 0x11f   : > { %v358_v26 = vadd.f32 %v356_v23, %v352_v22 }
 0x121   : > { %v360_v29 = vsel %vm253_vm0, %v358_v26, 0.0 }
 0x124   : > { %v353_v25 = vpop.f32.mrf.mxu1 }
 0x125   : > { %v354_v27 = vadd.f32 %v547_v20, %v353_v25 }
 0x127   : > { %v359_v28 = vadd.f32 %v357_v24, %v354_v27 }
 0x129   : > { %v361_v30 = vsel %vm253_vm0, %v359_v28, 0.0 }
 0x12a   : > { %v362_v31 = vadd.f32 %v361_v30, %v360_v29 }
 0x12c   : > { %363 = vadd.xlane.f32.xlu0 %v362_v31 }
 0x19f   : > { %v364_v36 = vpop.xlane.xlu0 %363 }
 0x1a0   : > { %v365_v37 = vrot.slane %v364_v36, 4 }
 0x1a2   : > { %v366_v39 = vadd.f32 %v365_v37, %v364_v36 }
 0x1a4   : > { %v367_v40 = vrot.slane %v366_v39, 2 }
 0x1a6   : > { %v368_v42 = vadd.f32 %v367_v40, %v366_v39 }
 0x1a8   : > { %v369_v43 = vrot.slane %v368_v42, 1 }
 0x1aa   : > { %v370_v45 = vadd.f32 %v369_v43, %v368_v42 }
 0x1ac   : > { %v378_v46 = vmul.f32 %v377_v44, %v370_v45 }
 0x1ae   : > { %v379_v47 = vsub.f32 %v358_v26, %v378_v46  ;;  %v380_v48 = vsub.f32 %v359_v28, %v378_v46 }
 0x1b0   : > { %v381_v49 = vmul.f32 %v379_v47, %v379_v47  ;;  %v382_v50 = vmul.f32 %v380_v48, %v380_v48 }
 0x1b2   : > { %v383_v51 = vsel %vm253_vm0, %v381_v49, 0.0  ;;  %v384_v52 = vsel %vm253_vm0, %v382_v50, 0.0 }
 0x1b3   : > { %v385_v53 = vadd.f32 %v384_v52, %v383_v51 }
 0x1b5   : > { %386 = vadd.xlane.f32.xlu0 %v385_v53 }
 0x228   : > { %v387_v54 = vpop.xlane.xlu0 %386 }
 0x229   : > { %v388_v55 = vrot.slane %v387_v54, 4 }
 0x22b   : > { %v389_v56 = vadd.f32 %v388_v55, %v387_v54 }
 0x22d   : > { %v390_v57 = vrot.slane %v389_v56, 2 }
 0x22f   : > { %v391_v58 = vadd.f32 %v390_v57, %v389_v56 }
 0x231   : > { %v392_v59 = vrot.slane %v391_v58, 1 }
 0x233   : > { %v393_v60 = vadd.f32 %v392_v59, %v391_v58 }
 0x235   : > { %v394_v61 = vmul.f32 %v393_v60, %v377_v44 }
 0x237   : > { %v395_v62 = vadd.f32 1e-05, %v394_v61 }
 0x239   : > { %550 = vrsqrt.f32 %v395_v62  ;;  %vm402_vm3 = vweird.f32 %v395_v62 }
 0x23f   : > { %v551_v63 = vpop.eup %550 }
 0x240   : > { %v397_v0 = vmul.f32 %v551_v63, %v395_v62  ;;  %vm403_vm2 = vweird.f32 %v551_v63 }
 0x241   : > { %vm404_vm4 = vmor %vm402_vm3, %vm403_vm2 }
 0x242   : > { %v398_v1 = vmul.f32 %v551_v63, %v397_v0 }
 0x244   : > { %v399_v2 = vmul.f32 0.5, %v398_v1 }
 0x246   : > { %v400_v3 = vsub.f32 1.5, %v399_v2 }
 0x248   : > { %v401_v4 = vmul.f32 %v551_v63, %v400_v3 }
 0x24a   : > { %v405_v5 = vsel %vm404_vm4, %v551_v63, %v401_v4 }
 0x24b   : > { %v406_v6 = vmul.f32 %v405_v5, %v379_v47  ;;  %v407_v7 = vmul.f32 %v405_v5, %v380_v48 }
 0x24d   : > { %v408_v8 = vpack.c.bf16 %v406_v6, %v406_v6  ;;  %v409_v9 = vpack.c.bf16 %v407_v7, %v407_v7 }
 0x24f   : > { %411 = vst.msk [vmem:[%s224_s27] sm:$0xf] %vm410_vm5, %v408_v8 }
 0x250   : > { %412 = vst.msk [vmem:[%s224_s27 + $0x4] sm:$0xf] %vm410_vm5, %v409_v9 }
 0x251 PF: > { %s15_s18 = sadd.s32 1, %s558_s18  }
 0x252   : > { %p12_p4 = scmp.ge.s32.totalorder %s15_s18, 4  }
 0x254   :  { %14 = sbr.rel (!%p12_p4) target bundleno = 1 (0x1), region = 70 }

// kernel: _lambda_.19
= control target key start
LH: loop header
LB: loop body
LE: loop exit
PB: predicated region body
PF: predicated region fallthrough
CT: control target
= control target key end

     0   :  { %s586_s18 = smov 0   ;;  %s635_s0 = inlined_call_operand.vmem [shape: bf16[2,16,32], index: 0, kind: input, shape index: {}]   ;;  %s636_s1 = inlined_call_operand.vmem [shape: bf16[2,16,32], index: 1, kind: input, shape index: {}]   ;;  %s637_s2 = inlined_call_operand.vmem [shape: bf16[2,16,32], index: 2, kind: input, shape index: {}]   ;;  %s638_s3 = inlined_call_operand.vmem [shape: bf16[64,32], index: 3, kind: input, shape index: {}]   ;;  %s639_s4 = inlined_call_operand.vmem [shape: f32[1,32], index: 4, kind: input, shape index: {}]   ;;  %s640_s5 = inlined_call_operand.vmem [shape: bf16[2,16,32], index: 5, kind: output, shape index: {}]  }
   0x1 LB: > { %s477_s19 = sadd.s32 4294967295, %s552_s18   ;;  %p481_p0 = scmp.ge.s32.totalorder %s552_s18, 1  ;;  %s552_s18 = sphi %s586_s18, %s15_s18  }
   0x2   : > { %p207_p1 = scmp.lt.s32.totalorder %s552_s18, 3 }
   0x4   : > { %p208_p2 = pnand %p481_p0, %p207_p1 }
   0x5   : > { %p245_p3 = scmp.lt.s32.totalorder (!%p208_p2), %s477_s19, 1  ;;  %s554_s30 = smov (!%p208_p2), 32  }
   0x6   : > { %211 = sbr.rel (%p208_p2) target bundleno = 565 (0x235), region = 40 }
   0xb   : > { %v526_v0 = vld [vmem:[%s638_s3 + $0x18] sm:$0xff]  ;;  %s642_s19 = smov (!%p245_p3, %s477_s19), 1  ;;  %v525_v1 = vld [vmem:[%s638_s3 + $0x10] sm:$0xff]  ;;  %v524_v3 = vld [vmem:[%s638_s3 + $0x8] sm:$0xff]  ;;  %vm282_vm0 = vcmask 261120   ;;  %vm322_vm1 = vcmask 523264  }
   0xc   : > { %329 = vmatpush.bf16.msra.mxu0 %v526_v0  ;;  %s600_s24 = sshll.u32 %s642_s19, 3  ;;  %v523_v4 = vld [vmem:[%s638_s3] sm:$0xff]  ;;  %v555_v21 = vmov 512.0   ;;  %vm395_vm6 = vcmask 257024  }
   0xd   : > { %s254_s27 = scalar_lea.vmem %s636_s1, %s600_s24  ;;  %s249_s10 = scalar_lea.vmem %s635_s0, %s600_s24  ;;  %v541_v9 = vld [vmem:[%s639_s4] ss:$0 sm:$0xff]  ;;  %542 = vrcp.f32 %v555_v21 }
   0xe   : > { %v522_v2 = vld [vmem:[%s254_s27] sm:$0xff]  ;;  %s259_s13 = scalar_lea.vmem %s637_s2, %s600_s24  ;;  %s264_s19 = scalar_lea.vmem %s640_s5, %s600_s24 }
   0xf   : > { %280 = vrot.lane.b32.xlu0 %v522_v2, %s554_s30  ;;  %v521_v5 = vld [vmem:[%s249_s10] sm:$0xff] }
  0x10   : > { %330 = vmatpush.bf16.msra.mxu0 %v525_v1  ;;  %v528_v10 = vld [vmem:[%s259_s13] sm:$0xff]  }
  0x11   : > { %v529_v12 = vunpack.c.l.bf16 %v528_v10  ;;  %v530_v13 = vunpack.c.h.bf16 %v528_v10 }
  0x13   : > { %v543_v22 = vpop.eup %542 }
  0x14   : > { %331 = vmatpush.bf16.msra.mxu0 %v524_v3  ;;  %v357_v23 = vmul.f32 512.0, %v543_v22  ;;  %vm361_vm2 = vweird.f32 %v543_v22 }
  0x16   : > { %v358_v24 = vsub.f32 1.0, %v357_v23 }
  0x18   : > { %332 = vmatpush.bf16.msra.mxu0 %v523_v4  ;;  %v359_v27 = vmul.f32 %v543_v22, %v358_v24 }
  0x1a   : > { %v360_v30 = vadd.f32 %v543_v22, %v359_v27 }
  0x1c   : > { %v362_v33 = vsel %vm361_vm2, %v543_v22, %v360_v30 }
  0x81   : > { %v281_v6 = vpop.permute.xlu0 %280 }
  0x82   : > { %v285_v7 = vsel %vm282_vm0, %v521_v5, %v281_v6 }
  0x83   : > { %514 = vmatmul.msk.bf16.vlgmr.msra.gmra.mxu0 %vm322_vm1, %v285_v7 }
 0x100   : > { %v334_v8 = vpop.f32.mrf.mxu0 }
 0x101   : > { %v335_v11 = vadd.f32 %v541_v9, %v334_v8 }
 0x103   : > { %v343_v15 = vadd.f32 %v529_v12, %v335_v11 }
 0x105   : > { %v345_v18 = vsel %vm282_vm0, %v343_v15, 0.0 }
 0x108   : > { %v336_v14 = vpop.f32.mrf.mxu0 }
 0x109   : > { %v337_v16 = vadd.f32 %v541_v9, %v336_v14 }
 0x10b   : > { %v344_v17 = vadd.f32 %v530_v13, %v337_v16 }
 0x10d   : > { %v346_v19 = vsel %vm282_vm0, %v344_v17, 0.0 }
 0x10e   : > { %v347_v20 = vadd.f32 %v346_v19, %v345_v18 }
 0x110   : > { %348 = vadd.xlane.f32.xlu0 %v347_v20 }
 0x183   : > { %v349_v25 = vpop.xlane.xlu0 %348 }
 0x184   : > { %v350_v26 = vrot.slane %v349_v25, 4 }
 0x186   : > { %v351_v28 = vadd.f32 %v350_v26, %v349_v25 }
 0x188   : > { %v352_v29 = vrot.slane %v351_v28, 2 }
 0x18a   : > { %v353_v31 = vadd.f32 %v352_v29, %v351_v28 }
 0x18c   : > { %v354_v32 = vrot.slane %v353_v31, 1 }
 0x18e   : > { %v355_v34 = vadd.f32 %v354_v32, %v353_v31 }
 0x190   : > { %v363_v35 = vmul.f32 %v362_v33, %v355_v34 }
 0x192   : > { %v364_v36 = vsub.f32 %v343_v15, %v363_v35  ;;  %v365_v37 = vsub.f32 %v344_v17, %v363_v35 }
 0x194   : > { %v366_v38 = vmul.f32 %v364_v36, %v364_v36  ;;  %v367_v39 = vmul.f32 %v365_v37, %v365_v37 }
 0x196   : > { %v368_v40 = vsel %vm282_vm0, %v366_v38, 0.0  ;;  %v369_v41 = vsel %vm282_vm0, %v367_v39, 0.0 }
 0x197   : > { %v370_v42 = vadd.f32 %v369_v41, %v368_v40 }
 0x199   : > { %371 = vadd.xlane.f32.xlu1 %v370_v42 }
 0x20c   : > { %v372_v43 = vpop.xlane.xlu1 %371 }
 0x20d   : > { %v373_v44 = vrot.slane %v372_v43, 4 }
 0x20f   : > { %v374_v45 = vadd.f32 %v373_v44, %v372_v43 }
 0x211   : > { %v375_v46 = vrot.slane %v374_v45, 2 }
 0x213   : > { %v376_v47 = vadd.f32 %v375_v46, %v374_v45 }
 0x215   : > { %v377_v48 = vrot.slane %v376_v47, 1 }
 0x217   : > { %v378_v49 = vadd.f32 %v377_v48, %v376_v47 }
 0x219   : > { %v379_v50 = vmul.f32 %v378_v49, %v362_v33 }
 0x21b   : > { %v380_v51 = vadd.f32 1e-05, %v379_v50 }
 0x21d   : > { %544 = vrsqrt.f32 %v380_v51  ;;  %vm387_vm4 = vweird.f32 %v380_v51 }
 0x223   : > { %v545_v52 = vpop.eup %544 }
 0x224   : > { %v382_v53 = vmul.f32 %v545_v52, %v380_v51  ;;  %vm388_vm3 = vweird.f32 %v545_v52 }
 0x225   : > { %vm389_vm5 = vmor %vm387_vm4, %vm388_vm3 }
 0x226   : > { %v383_v54 = vmul.f32 %v545_v52, %v382_v53 }
 0x228   : > { %v384_v55 = vmul.f32 0.5, %v383_v54 }
 0x22a   : > { %v385_v56 = vsub.f32 1.5, %v384_v55 }
 0x22c   : > { %v386_v57 = vmul.f32 %v545_v52, %v385_v56 }
 0x22e   : > { %v390_v58 = vsel %vm389_vm5, %v545_v52, %v386_v57 }
 0x22f   : > { %v391_v59 = vmul.f32 %v390_v58, %v364_v36  ;;  %v392_v60 = vmul.f32 %v390_v58, %v365_v37 }
 0x231   : > { %v393_v61 = vpack.c.bf16 %v391_v59, %v391_v59  ;;  %v394_v62 = vpack.c.bf16 %v392_v60, %v392_v60 }
 0x233   : > { %396 = vst.msk [vmem:[%s264_s19] sm:$0xf] %vm395_vm6, %v393_v61 }
 0x234   : > { %397 = vst.msk [vmem:[%s264_s19 + $0x4] sm:$0xf] %vm395_vm6, %v394_v62 }
 0x235 PF: > { %s15_s18 = sadd.s32 1, %s552_s18  }
 0x236   : > { %p12_p4 = scmp.ge.s32.totalorder %s15_s18, 4  }
 0x238   :  { %14 = sbr.rel (!%p12_p4) target bundleno = 1 (0x1), region = 76 }

// kernel: _lambda_.18
= control target key start
LH: loop header
LB: loop body
LE: loop exit
PB: predicated region body
PF: predicated region fallthrough
CT: control target
= control target key end

     0   :  { %s1126_s13 = smov 0   ;;  %s1236_s0 = inlined_call_operand.vmem [shape: bf16[2,16,32], index: 0, kind: input, shape index: {}, may-alias: {0,1}]   ;;  %s1237_s1 = inlined_call_operand.vmem [shape: bf16[2,16,32], index: 1, kind: input, shape index: {}, may-alias: {0,1}]   ;;  %s1238_s2 = inlined_call_operand.vmem [shape: bf16[32,32], index: 2, kind: input, shape index: {}]   ;;  %s1239_s3 = inlined_call_operand.vmem [shape: bf16[32,32], index: 3, kind: input, shape index: {}]   ;;  %s1240_s4 = inlined_call_operand.vmem [shape: bf16[32,32], index: 4, kind: input, shape index: {}]   ;;  %s1241_s5 = inlined_call_operand.vmem [shape: bf16[32,32], index: 5, kind: input, shape index: {}]   ;;  %s1242_s6 = inlined_call_operand.vmem [shape: f32[1,32], index: 6, kind: input, shape index: {}]   ;;  %s1243_s7 = inlined_call_operand.vmem [shape: f32[1,32], index: 7, kind: input, shape index: {}]   ;;  %s1244_s8 = inlined_call_operand.vmem [shape: f32[1,32], index: 8, kind: input, shape index: {}]   ;;  %s1245_s9 = inlined_call_operand.vmem [shape: f32[1,32], index: 9, kind: input, shape index: {}]   ;;  %s1246_s10 = inlined_call_operand.vmem [shape: bf16[2,16,32], index: 10, kind: output, shape index: {}]  }
   0x1 LB: > { %s914_s14 = sadd.s32 4294967295, %s1063_s13   ;;  %p918_p0 = scmp.ge.s32.totalorder %s1063_s13, 1  ;;  %s1063_s13 = sphi %s1126_s13, %s20_s13  }
   0x2   : > { %p322_p1 = scmp.lt.s32.totalorder %s1063_s13, 3 }
   0x4   : > { %p323_p2 = pnand %p918_p0, %p322_p1 }
   0x5   : > { %p365_p3 = scmp.lt.s32.totalorder (!%p323_p2), %s914_s14, 1  ;;  %s1065_s15 = smov (!%p323_p2), 112  }
   0x6   : > { %326 = sbr.rel (%p323_p2) target bundleno = 1103 (0x44f), region = 60  ;;  %s1066_s16 = smov (!%p323_p2), 120  }
   0x7   : > { %s1067_s17 = smov (!%p323_p2), 104   ;;  %s1068_s25 = smov (!%p323_p2), 8  }
   0x8   : > { %s1070_s27 = smov (!%p323_p2), 16  }
   0xb   : > { %v985_v0 = vld [vmem:[%s1238_s2 + $0x8] sm:$0xff]  ;;  %v984_v2 = vld [vmem:[%s1238_s2] sm:$0xff]  ;;  %s1248_s14 = smov (!%p365_p3, %s914_s14), 1  ;;  %vm410_vm0 = vcmask 261120   ;;  %vm507_vm1 = vcmask 64512   ;;  %vm528_vm2 = vcmask 130048  }
   0xc   : > { %v987_v1 = vld [vmem:[%s1239_s3 + $0x8] sm:$0xff]  ;;  %420 = vmatpush.bf16.msra.mxu0 %v985_v0  ;;  %v986_v3 = vld [vmem:[%s1239_s3] sm:$0xff]  ;;  %s1146_s23 = sshll.u32 %s1248_s14, 3  ;;  %vm801_vm3 = vcmask 195584   ;;  %vm844_vm4 = vcmask 257024  }
   0xd   : > { %462 = vmatpush.bf16.msra.mxu1 %v987_v1  ;;  %s369_s26 = scalar_lea.vmem %s1236_s0, %s1146_s23  ;;  %s374_s29 = scalar_lea.vmem %s1237_s1, %s1146_s23  ;;  %v1021_v8 = vld [vmem:[%s1242_s6] ss:$0 sm:$0xff]  ;;  %v989_v32 = vld [vmem:[%s1240_s4 + $0x8] sm:$0xff] }
   0xe   : > { %v982_v4 = vld [vmem:[%s369_s26] sm:$0xff]  ;;  %496 = vmatpush.bf16.msra.mxu2 %v989_v32  ;;  %s1069_s26 = smov 24  }
   0xf   : > { %v983_v5 = vld [vmem:[%s374_s29] sm:$0xff] }
  0x10   : > { %421 = vmatpush.bf16.msra.mxu0 %v984_v2  ;;  %v1022_v9 = vld [vmem:[%s1243_s7] ss:$0 sm:$0xff] }
  0x11   : > { %463 = vmatpush.bf16.msra.mxu1 %v986_v3  ;;  %v988_v33 = vld [vmem:[%s1240_s4] sm:$0xff] }
  0x12   : > { %497 = vmatpush.bf16.msra.mxu2 %v988_v33  ;;  %v1023_v58 = vld [vmem:[%s1244_s8] ss:$0 sm:$0xff] }
  0x13   : > { %937 = vmatmul.msk.bf16.vlgmr.msra.gmra.mxu0 %vm410_vm0, %v982_v4 }
  0x14   : > { %950 = vmatmul.msk.bf16.vlgmr.msra.gmra.mxu1 %vm410_vm0, %v983_v5 }
  0x15   : > { %959 = vmatmul.msk.bf16.vlgmr.msra.gmra.mxu2 %vm410_vm0, %v983_v5 }
  0x90   : > { %v423_v6 = vpop.f32.mrf.mxu0 }
  0x91   : > { %v465_v7 = vpop.f32.mrf.mxu1  ;;  %v424_v10 = vadd.f32 %v1021_v8, %v423_v6 }
  0x92   : > { %v466_v13 = vadd.f32 %v1022_v9, %v465_v7 }
  0x98   : > { %v425_v11 = vpop.f32.mrf.mxu0  ;;  %v499_v56 = vpop.f32.mrf.mxu2 }
  0x99   : > { %v467_v12 = vpop.f32.mrf.mxu1  ;;  %v426_v14 = vadd.f32 %v1021_v8, %v425_v11  ;;  %v500_v61 = vadd.f32 %v1023_v58, %v499_v56 }
  0x9a   : > { %v468_v15 = vadd.f32 %v1022_v9, %v467_v12 }
  0x9b   : > { %v504_v16 = vpack.c.bf16 %v426_v14, %v424_v10 }
  0x9c   : > { %v505_v17 = vpack.c.bf16 %v468_v15, %v466_v13 }
  0x9d   : > { %639 = vrot.lane.b32.xlu2 %v504_v16, %s1065_s15 }
  0x9e   : > { %641 = vrot.lane.b32.xlu1 %v505_v17, %s1065_s15  ;;  %573 = vrot.lane.b32.xlu0 %v505_v17, %s1066_s16  ;;  %v512_v18 = vsel %vm507_vm1, %v505_v17, 0 }
  0x9f   : > { %521 = vmatpush.bf16.xpose.msra.mxu3 %v512_v18 }
  0xa0   : > { %v501_v62 = vpop.f32.mrf.mxu2 }
  0xa1   : > { %v502_v0 = vadd.f32 %v1023_v58, %v501_v62 }
  0xa3   : > { %v506_v3 = vpack.c.bf16 %v502_v0, %v500_v61 }
  0xa5   : > { %706 = vrot.lane.b32.xlu2 %v504_v16, %s1067_s17  ;;  %562 = vmatpush.bf16.msrb.mxu0 %v506_v3 }
  0xa6   : > { %708 = vrot.lane.b32.xlu1 %v505_v17, %s1067_s17  ;;  %570 = vrot.lane.b32.xlu0 %v504_v16, %s1066_s16 }
  0xa7   : > { %960 = vmatmul.msk.bf16.vlgmr.msra.gmra.mxu3 %vm507_vm1, %v504_v16 }
  0xf7   : > { %v640_v23 = vpop.permute.xlu2 %639 }
  0xff   : > { %v707_v27 = vpop.permute.xlu2 %706 }
 0x110   : > { %v642_v19 = vpop.permute.xlu1 %641  ;;  %v574_v20 = vpop.permute.xlu0 %573 }
 0x111   : > { %v579_v21 = vsel %vm507_vm1, %v574_v20, 0  ;;  %v647_v22 = vsel %vm507_vm1, %v642_v19, 0 }
 0x112   : > { %588 = vmatpush.bf16.xpose.msrb.mxu1 %v579_v21  ;;  %656 = vmatpush.bf16.xpose.msrb.mxu3 %v647_v22 }
 0x118   : > { %v709_v24 = vpop.permute.xlu1 %708  ;;  %v571_v25 = vpop.permute.xlu0 %570 }
 0x119   : > { %v714_v26 = vsel %vm507_vm1, %v709_v24, 0  ;;  %962 = vmatmul.msk.bf16.vlgmr.msrb.gmra.mxu1 %vm507_vm1, %v571_v25  ;;  %964 = vmatmul.msk.bf16.vlgmr.msrb.gmra.mxu3 %vm507_vm1, %v640_v23 }
 0x11a   : > { %723 = vmatpush.bf16.xpose.msra.mxu1 %v714_v26 }
 0x129   : > { %966 = vmatmul.msk.bf16.vlgmr.msra.gmra.mxu1 %vm507_vm1, %v707_v27 }
 0x12a   : > { %v523_v28 = vpop.f32.mrf.mxu3 }
 0x12b   : > { %v529_v29 = vsel %vm528_vm2, %v523_v28, -inf }
 0x12c   : > { %530 = vmax.xlane.f32.xlu2 %v529_v29 }
 0x132   : > { %v525_v30 = vpop.f32.mrf.mxu3 }
 0x133   : > { %v532_v31 = vsel %vm528_vm2, %v525_v30, -inf }
 0x134   : > { %533 = vmax.xlane.f32.xlu2 %v532_v31 }
 0x196   : > { %v590_v34 = vpop.f32.mrf.mxu1 }
 0x197   : > { %v595_v35 = vsel %vm528_vm2, %v590_v34, -inf }
 0x198   : > { %596 = vmax.xlane.f32.xlu0 %v595_v35 }
 0x19c   : > { %v658_v36 = vpop.f32.mrf.mxu3 }
 0x19d   : > { %v663_v37 = vsel %vm528_vm2, %v658_v36, -inf }
 0x19e   : > { %v592_v38 = vpop.f32.mrf.mxu1  ;;  %664 = vmax.xlane.f32.xlu2 %v663_v37 }
 0x19f   : > { %v531_v39 = vpop.xlane.xlu2 %530  ;;  %v598_v40 = vsel %vm528_vm2, %v592_v38, -inf }
 0x1a0   : > { %599 = vmax.xlane.f32.xlu1 %v598_v40  ;;  %v535_v41 = vsub.f32 %v523_v28, %v531_v39 }
 0x1a2   : > { %v537_v46 = vmul.f32 1.442695, %v535_v41 }
 0x1a4   : > { %v660_v42 = vpop.f32.mrf.mxu3  ;;  %1025 = vpow2.f32 %v537_v46 }
 0x1a5   : > { %v666_v43 = vsel %vm528_vm2, %v660_v42, -inf }
 0x1a6   : > { %v725_v44 = vpop.f32.mrf.mxu1  ;;  %667 = vmax.xlane.f32.xlu0 %v666_v43 }
 0x1a7   : > { %v534_v45 = vpop.xlane.xlu2 %533  ;;  %v730_v49 = vsel %vm528_vm2, %v725_v44, -inf }
 0x1a8   : > { %v536_v47 = vsub.f32 %v525_v30, %v534_v45 }
 0x1aa   : > { %v539_v48 = vmul.f32 1.442695, %v536_v47  ;;  %v1026_v52 = vpop.eup %1025 }
 0x1ab   : > { %v541_v54 = vsel %vm528_vm2, %v1026_v52, 0.0 }
 0x1ac   : > { %1027 = vpow2.f32 %v539_v48 }
 0x1ae   : > { %v727_v50 = vpop.f32.mrf.mxu1  ;;  %731 = vmax.xlane.f32.xlu0 %v730_v49 }
 0x1af   : > { %v733_v51 = vsel %vm528_vm2, %v727_v50, -inf }
 0x1b0   : > { %734 = vmax.xlane.f32.xlu1 %v733_v51 }
 0x1b2   : > { %v1028_v53 = vpop.eup %1027 }
 0x1b3   : > { %v544_v55 = vsel %vm528_vm2, %v1028_v53, 0.0 }
 0x1b6   : > { %542 = vadd.xlane.f32.xlu0 %v541_v54 }
 0x1b8   : > { %545 = vadd.xlane.f32.xlu1 %v544_v55 }
 0x20b   : > { %v597_v57 = vpop.xlane.xlu0 %596 }
 0x20c   : > { %v601_v59 = vsub.f32 %v590_v34, %v597_v57 }
 0x20e   : > { %v603_v60 = vmul.f32 1.442695, %v601_v59 }
 0x210   : > { %1029 = vpow2.f32 %v603_v60 }
 0x211   : > { %v665_v63 = vpop.xlane.xlu2 %664 }
 0x212   : > { %v669_v1 = vsub.f32 %v658_v36, %v665_v63 }
 0x213   : > { %v600_v2 = vpop.xlane.xlu1 %599 }
 0x214   : > { %v671_v4 = vmul.f32 1.442695, %v669_v1  ;;  %v602_v5 = vsub.f32 %v592_v38, %v600_v2 }
 0x216   : > { %v1030_v6 = vpop.eup %1029  ;;  %1031 = vpow2.f32 %v671_v4  ;;  %v605_v7 = vmul.f32 1.442695, %v602_v5 }
 0x217   : > { %v607_v8 = vsel %vm528_vm2, %v1030_v6, 0.0 }
 0x218   : > { %1033 = vpow2.f32 %v605_v7  ;;  %608 = vadd.xlane.f32.xlu1 %v607_v8  ;;  %v990_v7 = vld [vmem:[%s1241_s5] sm:$0xff] }
 0x219   : > { %v668_v9 = vpop.xlane.xlu0 %667 }
 0x21a   : > { %v670_v10 = vsub.f32 %v660_v42, %v668_v9 }
 0x21c   : > { %v1199_v11 = vpop.eup %1031  ;;  %v673_v12 = vmul.f32 1.442695, %v670_v10 }
 0x21d   : > { %v675_v13 = vsel %vm528_vm2, %v1199_v11, 0.0 }
 0x21e   : > { %v1034_v14 = vpop.eup %1033  ;;  %1035 = vpow2.f32 %v673_v12  ;;  %676 = vadd.xlane.f32.xlu0 %v675_v13 }
 0x21f   : > { %v610_v15 = vsel %vm528_vm2, %v1034_v14, 0.0 }
 0x220   : > { %611 = vadd.xlane.f32.xlu2 %v610_v15 }
 0x221   : > { %v732_v16 = vpop.xlane.xlu0 %731 }
 0x222   : > { %v736_v17 = vsub.f32 %v725_v44, %v732_v16 }
 0x223   : > { %v735_v18 = vpop.xlane.xlu1 %734 }
 0x224   : > { %v1036_v19 = vpop.eup %1035  ;;  %v738_v20 = vmul.f32 1.442695, %v736_v17  ;;  %v737_v21 = vsub.f32 %v727_v50, %v735_v18 }
 0x225   : > { %v678_v22 = vsel %vm528_vm2, %v1036_v19, 0.0 }
 0x226   : > { %1037 = vpow2.f32 %v738_v20  ;;  %v740_v23 = vmul.f32 1.442695, %v737_v21  ;;  %679 = vadd.xlane.f32.xlu1 %v678_v22 }
 0x228   : > { %1039 = vpow2.f32 %v740_v23 }
 0x229   : > { %v543_v24 = vpop.xlane.xlu0 %542 }
 0x22a   : > { %1041 = vrcp.f32 %v543_v24  ;;  %v1024_v24 = vld [vmem:[%s1245_s9] ss:$0 sm:$0xff] }
 0x22b   : > { %v546_v25 = vpop.xlane.xlu1 %545 }
 0x22c   : > { %v1038_v26 = vpop.eup %1037  ;;  %1043 = vrcp.f32 %v546_v25 }
 0x22d   : > { %v742_v27 = vsel %vm528_vm2, %v1038_v26, 0.0 }
 0x22e   : > { %v1040_v28 = vpop.eup %1039  ;;  %743 = vadd.xlane.f32.xlu0 %v742_v27 }
 0x22f   : > { %v745_v29 = vsel %vm528_vm2, %v1040_v28, 0.0 }
 0x230   : > { %v1042_v30 = vpop.eup %1041  ;;  %746 = vadd.xlane.f32.xlu1 %v745_v29 }
 0x231   : > { %v549_v32 = vmul.f32 %v1042_v30, %v1026_v52 }
 0x232   : > { %v1044_v31 = vpop.eup %1043 }
 0x233   : > { %v550_v33 = vmul.f32 %v1044_v31, %v1028_v53 }
 0x235   : > { %v551_v34 = vpack.c.bf16 %v550_v33, %v549_v32 }
 0x237   : > { %961 = vmatmul.msk.bf16.vlgmr.msrb.gmra.mxu0 %vm528_vm2, %v551_v34 }
 0x238   : > { %619 = vrot.lane.b32.xlu2 %v506_v3, %s1066_s16 }
 0x242   : > { %753 = vrot.lane.b32.xlu0 %v506_v3, %s1067_s17  ;;  %s379_s17 = scalar_lea.vmem %s1246_s10, %s1146_s23 }
 0x249   : > { %686 = vrot.lane.b32.xlu1 %v506_v3, %s1065_s15 }
 0x28b   : > { %v609_v35 = vpop.xlane.xlu1 %608 }
 0x28c   : > { %1045 = vrcp.f32 %v609_v35 }
 0x291   : > { %v677_v44 = vpop.xlane.xlu0 %676 }
 0x292   : > { %v1046_v37 = vpop.eup %1045 }
 0x293   : > { %v612_v36 = vpop.xlane.xlu2 %611  ;;  %v615_v39 = vmul.f32 %v1046_v37, %v1030_v6  ;;  %v991_v6 = vld [vmem:[%s1241_s5 + $0x8] sm:$0xff] }
 0x294   : > { %1047 = vrcp.f32 %v612_v36  ;;  %834 = vmatpush.bf16.msra.mxu3 %v991_v6 }
 0x298   : > { %835 = vmatpush.bf16.msra.mxu3 %v990_v7 }
 0x299   : > { %v680_v43 = vpop.xlane.xlu1 %679 }
 0x29a   : > { %v1048_v38 = vpop.eup %1047 }
 0x29b   : > { %v616_v40 = vmul.f32 %v1048_v38, %v1034_v14  ;;  %v620_v41 = vpop.permute.xlu2 %619 }
 0x29c   : > { %632 = vmatpush.bf16.msrb.mxu2 %v620_v41 }
 0x29d   : > { %v617_v42 = vpack.c.bf16 %v616_v40, %v615_v39 }
 0x29f   : > { %963 = vmatmul.msk.bf16.vlgmr.msrb.gmra.mxu2 %vm528_vm2, %v617_v42 }
 0x2a1   : > { %v744_v46 = vpop.xlane.xlu0 %743 }
 0x2a3   : > { %v747_v45 = vpop.xlane.xlu1 %746 }
 0x2a4   : > { %1049 = vrcp.f32 %v747_v45 }
 0x2a5   : > { %1051 = vrcp.f32 %v744_v46 }
 0x2a6   : > { %1053 = vrcp.f32 %v680_v43 }
 0x2a7   : > { %1055 = vrcp.f32 %v677_v44 }
 0x2aa   : > { %v1050_v47 = vpop.eup %1049 }
 0x2ab   : > { %v1052_v48 = vpop.eup %1051  ;;  %v751_v49 = vmul.f32 %v1050_v47, %v1040_v28 }
 0x2ac   : > { %v750_v50 = vmul.f32 %v1052_v48, %v1038_v26  ;;  %v1054_v52 = vpop.eup %1053 }
 0x2ad   : > { %v1056_v54 = vpop.eup %1055  ;;  %v684_v55 = vmul.f32 %v1054_v52, %v1036_v19 }
 0x2ae   : > { %v752_v53 = vpack.c.bf16 %v751_v49, %v750_v50  ;;  %v683_v56 = vmul.f32 %v1056_v54, %v1199_v11 }
 0x2b0   : > { %v685_v58 = vpack.c.bf16 %v684_v55, %v683_v56 }
 0x2b4   : > { %v754_v51 = vpop.permute.xlu0 %753  ;;  %v564_v60 = vpop.f32.mrf.mxu0 }
 0x2b5   : > { %766 = vmatpush.bf16.msra.mxu2 %v754_v51 }
 0x2b8   : > { %967 = vmatmul.msk.bf16.vlgmr.msra.gmra.mxu2 %vm528_vm2, %v752_v53 }
 0x2bb   : > { %v687_v57 = vpop.permute.xlu1 %686 }
 0x2bc   : > { %699 = vmatpush.bf16.msra.mxu0 %v687_v57  ;;  %v566_v63 = vpop.f32.mrf.mxu0 }
 0x2bf   : > { %965 = vmatmul.msk.bf16.vlgmr.msra.gmra.mxu0 %vm528_vm2, %v685_v58 }
 0x322   : > { %v634_v59 = vpop.f32.mrf.mxu2 }
 0x32a   : > { %v636_v61 = vpop.f32.mrf.mxu2 }
 0x32b   : > { %v1006_v62 = vpack.i.bf16 %v636_v61, %v634_v59 }
 0x32d   : > { %1007 = vrot.lane.b32.xlu2 %v1006_v62, %s1068_s25 }
 0x33b   : > { %v768_v0 = vpop.f32.mrf.mxu2 }
 0x33c   : > { %v701_v1 = vpop.f32.mrf.mxu0 }
 0x343   : > { %v770_v2 = vpop.f32.mrf.mxu2 }
 0x344   : > { %v1016_v3 = vpack.i.bf16 %v770_v2, %v768_v0  ;;  %v703_v4 = vpop.f32.mrf.mxu0 }
 0x345   : > { %v1011_v5 = vpack.i.bf16 %v703_v4, %v701_v1 }
 0x346   : > { %1017 = vrot.lane.b32.xlu0 %v1016_v3, %s1069_s26 }
 0x347   : > { %1012 = vrot.lane.b32.xlu2 %v1011_v5, %s1070_s27 }
 0x387   : > { %v1008_v8 = vpop.permute.xlu2 %1007 }
 0x388   : > { %v1010_v10 = vunpack.i.h.bf16 %v1008_v8  ;;  %v1009_v11 = vunpack.i.l.bf16 %v1008_v8 }
 0x38a   : > { %v798_v15 = vsel %vm507_vm1, %v566_v63, %v1010_v10  ;;  %v797_v16 = vsel %vm507_vm1, %v564_v60, %v1009_v11 }
 0x3a1   : > { %v1013_v9 = vpop.permute.xlu2 %1012 }
 0x3a2   : > { %v1015_v12 = vunpack.i.h.bf16 %v1013_v9  ;;  %v1014_v13 = vunpack.i.l.bf16 %v1013_v9 }
 0x3a4   : > { %v799_v19 = vsel %vm528_vm2, %v797_v16, %v1014_v13  ;;  %v800_v20 = vsel %vm528_vm2, %v798_v15, %v1015_v12 }
 0x3b8   : > { %v1018_v14 = vpop.permute.xlu0 %1017 }
 0x3b9   : > { %v1020_v17 = vunpack.i.h.bf16 %v1018_v14  ;;  %v1019_v18 = vunpack.i.l.bf16 %v1018_v14 }
 0x3bb   : > { %v803_v21 = vsel %vm801_vm3, %v800_v20, %v1020_v17  ;;  %v802_v22 = vsel %vm801_vm3, %v799_v19, %v1019_v18 }
 0x3bc   : > { %v804_v23 = vpack.c.bf16 %v803_v21, %v802_v22 }
 0x3be   : > { %976 = vmatmul.msk.bf16.vlgmr.msra.gmra.mxu3 %vm410_vm0, %v804_v23 }
 0x441   : > { %v837_v25 = vpop.f32.mrf.mxu3 }
 0x442   : > { %v838_v26 = vadd.f32 %v1024_v24, %v837_v25 }
 0x444   : > { %v842_v27 = vpack.c.bf16 %v838_v26, %v838_v26 }
 0x446   : > { %845 = vst.msk [vmem:[%s379_s17] sm:$0xf] %vm844_vm4, %v842_v27 }
 0x449   : > { %v839_v28 = vpop.f32.mrf.mxu3 }
 0x44a   : > { %v840_v29 = vadd.f32 %v1024_v24, %v839_v28 }
 0x44c   : > { %v843_v30 = vpack.c.bf16 %v840_v29, %v840_v29 }
 0x44e   : > { %846 = vst.msk [vmem:[%s379_s17 + $0x4] sm:$0xf] %vm844_vm4, %v843_v30 }
 0x44f PF: > { %s20_s13 = sadd.s32 1, %s1063_s13  }
 0x450   : > { %p17_p4 = scmp.ge.s32.totalorder %s20_s13, 4  }
 0x452   :  { %19 = sbr.rel (!%p17_p4) target bundleno = 1 (0x1), region = 93 }

// kernel: _lambda_.17
= control target key start
LH: loop header
LB: loop body
LE: loop exit
PB: predicated region body
PF: predicated region fallthrough
CT: control target
= control target key end

     0   :  { %s1119_s13 = smov 0   ;;  %s1234_s0 = inlined_call_operand.vmem [shape: bf16[2,16,32], index: 0, kind: input, shape index: {}]   ;;  %s1235_s1 = inlined_call_operand.vmem [shape: bf16[2,4,32], index: 1, kind: input, shape index: {}]   ;;  %s1236_s2 = inlined_call_operand.vmem [shape: bf16[32,32], index: 2, kind: input, shape index: {}]   ;;  %s1237_s3 = inlined_call_operand.vmem [shape: bf16[32,32], index: 3, kind: input, shape index: {}]   ;;  %s1238_s4 = inlined_call_operand.vmem [shape: bf16[32,32], index: 4, kind: input, shape index: {}]   ;;  %s1239_s5 = inlined_call_operand.vmem [shape: bf16[32,32], index: 5, kind: input, shape index: {}]   ;;  %s1240_s6 = inlined_call_operand.vmem [shape: f32[1,32], index: 6, kind: input, shape index: {}]   ;;  %s1241_s7 = inlined_call_operand.vmem [shape: f32[1,32], index: 7, kind: input, shape index: {}]   ;;  %s1242_s8 = inlined_call_operand.vmem [shape: f32[1,32], index: 8, kind: input, shape index: {}]   ;;  %s1243_s9 = inlined_call_operand.vmem [shape: f32[1,32], index: 9, kind: input, shape index: {}]   ;;  %s1244_s10 = inlined_call_operand.vmem [shape: bf16[2,16,32], index: 10, kind: output, shape index: {}]  }
   0x1 LB: > { %s914_s14 = sadd.s32 4294967295, %s1056_s13   ;;  %p918_p0 = scmp.ge.s32.totalorder %s1056_s13, 1  ;;  %s1056_s13 = sphi %s1119_s13, %s20_s13  }
   0x2   : > { %p321_p1 = scmp.lt.s32.totalorder %s1056_s13, 3 }
   0x4   : > { %p322_p2 = pnand %p918_p0, %p321_p1 }
   0x5   : > { %p363_p3 = scmp.lt.s32.totalorder (!%p322_p2), %s914_s14, 1  ;;  %s1058_s17 = smov (!%p322_p2), 112  }
   0x6   : > { %325 = sbr.rel (%p322_p2) target bundleno = 1096 (0x448), region = 60  ;;  %s1059_s18 = smov (!%p322_p2), 120  }
   0x7   : > { %s1060_s19 = smov (!%p322_p2), 104   ;;  %s1062_s28 = smov (!%p322_p2), 24  }
   0x8   : > { %s1063_s29 = smov (!%p322_p2), 16  }
   0xb   : > { %v978_v0 = vld [vmem:[%s1236_s2 + $0x8] sm:$0xff]  ;;  %v977_v2 = vld [vmem:[%s1236_s2] sm:$0xff]  ;;  %s1246_s14 = smov (!%p363_p3, %s914_s14), 1  ;;  %vm406_vm0 = vcmask 261120   ;;  %vm496_vm1 = vcmask 64512   ;;  %vm517_vm2 = vcmask 31744  }
   0xc   : > { %v980_v1 = vld [vmem:[%s1237_s3 + $0x8] sm:$0xff]  ;;  %416 = vmatpush.bf16.msra.mxu0 %v978_v0  ;;  %v979_v3 = vld [vmem:[%s1237_s3] sm:$0xff]  ;;  %s974_s23 = sshll.u32 %s1246_s14, 3  ;;  %s921_s24 = sshll.u32 %s1246_s14, 1  ;;  %vm544_vm3 = vcmask 1041408   ;;  %vm798_vm4 = vcmask 130048  }
   0xd   : > { %453 = vmatpush.bf16.msra.mxu1 %v980_v1  ;;  %s367_s27 = scalar_lea.vmem %s1234_s0, %s974_s23  ;;  %s371_s30 = scalar_lea.vmem %s1235_s1, %s921_s24  ;;  %v1015_v6 = vld [vmem:[%s1241_s7] ss:$0 sm:$0xff]  ;;  %v982_v31 = vld [vmem:[%s1238_s4 + $0x8] sm:$0xff]  ;;  %vm801_vm5 = vcmask 195584   ;;  %vm844_vm6 = vcmask 257024  }
   0xe   : > { %v976_v4 = vld [vmem:[%s367_s27] sm:$0xff]  ;;  %486 = vmatpush.bf16.msra.mxu2 %v982_v31  ;;  %s1061_s27 = smov 8   ;;  %s376_s20 = scalar_lea.vmem %s1244_s10, %s974_s23 }
   0xf   : > { %v380_v5 = vld [vmem:[%s371_s30] sm:$0x3] }
  0x10   : > { %417 = vmatpush.bf16.msra.mxu0 %v977_v2  ;;  %v1014_v11 = vld [vmem:[%s1240_s6] ss:$0 sm:$0xff] }
  0x11   : > { %454 = vmatpush.bf16.msra.mxu1 %v979_v3  ;;  %v981_v32 = vld [vmem:[%s1238_s4] sm:$0xff] }
  0x12   : > { %487 = vmatpush.bf16.msra.mxu2 %v981_v32  ;;  %v1016_v57 = vld [vmem:[%s1242_s8] ss:$0 sm:$0xff] }
  0x13   : > { %936 = vmatmul.msk.bf16.vlgmr.msra.gmra.mxu0 %vm406_vm0, %v976_v4 }
  0x14   : > { %945 = vmatmul.msk.bf16.vlgmr.msra.gmra.mxu1 %vm406_vm0, %v380_v5 }
  0x15   : > { %954 = vmatmul.msk.bf16.vlgmr.msra.gmra.mxu2 %vm406_vm0, %v380_v5 }
  0x90   : > { %v419_v7 = vpop.f32.mrf.mxu0 }
  0x91   : > { %v456_v8 = vpop.f32.mrf.mxu1  ;;  %v420_v15 = vadd.f32 %v1014_v11, %v419_v7 }
  0x92   : > { %v457_v9 = vadd.f32 %v1015_v6, %v456_v8 }
  0x94   : > { %v494_v10 = vpack.c.bf16 %v457_v9, %v457_v9 }
  0x96   : > { %636 = vrot.lane.b32.xlu1 %v494_v10, %s1058_s17  ;;  %566 = vrot.lane.b32.xlu0 %v494_v10, %s1059_s18  ;;  %v501_v12 = vsel %vm496_vm1, %v494_v10, 0 }
  0x97   : > { %510 = vmatpush.bf16.xpose.msra.mxu3 %v501_v12 }
  0x98   : > { %v421_v13 = vpop.f32.mrf.mxu0  ;;  %v489_v59 = vpop.f32.mrf.mxu2 }
  0x99   : > { %v458_v14 = vpop.f32.mrf.mxu1  ;;  %v422_v16 = vadd.f32 %v1014_v11, %v421_v13  ;;  %v490_v60 = vadd.f32 %v1016_v57, %v489_v59 }
  0x9b   : > { %v493_v17 = vpack.c.bf16 %v422_v16, %v420_v15  ;;  %v495_v63 = vpack.c.bf16 %v490_v60, %v490_v60 }
  0x9d   : > { %634 = vrot.lane.b32.xlu2 %v493_v17, %s1058_s17  ;;  %v546_v2 = vsel %vm544_vm3, %v495_v63, 0 }
  0x9e   : > { %705 = vrot.lane.b32.xlu1 %v494_v10, %s1060_s19  ;;  %563 = vrot.lane.b32.xlu0 %v493_v17, %s1059_s18 }
  0x9f   : > { %955 = vmatmul.msk.bf16.vlgmr.msra.gmra.mxu3 %vm496_vm1, %v493_v17  ;;  %555 = vmatpush.bf16.msrb.mxu0 %v546_v2 }
  0xa0   : > { %v491_v6 = vpop.f32.mrf.mxu2 }
  0xa5   : > { %703 = vrot.lane.b32.xlu2 %v493_v17, %s1060_s19 }
  0xf7   : > { %v635_v22 = vpop.permute.xlu2 %634 }
  0xff   : > { %v704_v26 = vpop.permute.xlu2 %703 }
 0x108   : > { %v637_v18 = vpop.permute.xlu1 %636  ;;  %v567_v19 = vpop.permute.xlu0 %566 }
 0x109   : > { %v572_v20 = vsel %vm496_vm1, %v567_v19, 0  ;;  %v642_v21 = vsel %vm496_vm1, %v637_v18, 0 }
 0x10a   : > { %581 = vmatpush.bf16.xpose.msrb.mxu1 %v572_v20  ;;  %651 = vmatpush.bf16.xpose.msrb.mxu3 %v642_v21 }
 0x110   : > { %v706_v23 = vpop.permute.xlu1 %705  ;;  %v564_v25 = vpop.permute.xlu0 %563 }
 0x111   : > { %v711_v24 = vsel %vm496_vm1, %v706_v23, 0  ;;  %959 = vmatmul.msk.bf16.vlgmr.msrb.gmra.mxu3 %vm496_vm1, %v635_v22  ;;  %957 = vmatmul.msk.bf16.vlgmr.msrb.gmra.mxu1 %vm496_vm1, %v564_v25 }
 0x112   : > { %720 = vmatpush.bf16.xpose.msra.mxu1 %v711_v24 }
 0x121   : > { %961 = vmatmul.msk.bf16.vlgmr.msra.gmra.mxu1 %vm496_vm1, %v704_v26 }
 0x122   : > { %v512_v27 = vpop.f32.mrf.mxu3 }
 0x123   : > { %v518_v28 = vsel %vm517_vm2, %v512_v27, -inf }
 0x124   : > { %519 = vmax.xlane.f32.xlu2 %v518_v28 }
 0x12a   : > { %v514_v29 = vpop.f32.mrf.mxu3 }
 0x12b   : > { %v521_v30 = vsel %vm517_vm2, %v514_v29, -inf }
 0x12c   : > { %522 = vmax.xlane.f32.xlu2 %v521_v30 }
 0x18e   : > { %v583_v33 = vpop.f32.mrf.mxu1 }
 0x18f   : > { %v588_v34 = vsel %vm517_vm2, %v583_v33, -inf }
 0x190   : > { %589 = vmax.xlane.f32.xlu0 %v588_v34 }
 0x194   : > { %v653_v35 = vpop.f32.mrf.mxu3 }
 0x195   : > { %v658_v36 = vsel %vm517_vm2, %v653_v35, -inf }
 0x196   : > { %659 = vmax.xlane.f32.xlu2 %v658_v36  ;;  %v585_v37 = vpop.f32.mrf.mxu1 }
 0x197   : > { %v520_v38 = vpop.xlane.xlu2 %519  ;;  %v591_v39 = vsel %vm517_vm2, %v585_v37, -inf }
 0x198   : > { %592 = vmax.xlane.f32.xlu1 %v591_v39  ;;  %v524_v40 = vsub.f32 %v512_v27, %v520_v38 }
 0x19a   : > { %v526_v45 = vmul.f32 1.442695, %v524_v40 }
 0x19c   : > { %v655_v41 = vpop.f32.mrf.mxu3  ;;  %1018 = vpow2.f32 %v526_v45 }
 0x19d   : > { %v661_v42 = vsel %vm517_vm2, %v655_v41, -inf }
 0x19e   : > { %662 = vmax.xlane.f32.xlu0 %v661_v42  ;;  %v722_v43 = vpop.f32.mrf.mxu1 }
 0x19f   : > { %v523_v44 = vpop.xlane.xlu2 %522  ;;  %v727_v48 = vsel %vm517_vm2, %v722_v43, -inf }
 0x1a0   : > { %v525_v46 = vsub.f32 %v514_v29, %v523_v44 }
 0x1a2   : > { %v528_v47 = vmul.f32 1.442695, %v525_v46  ;;  %v1019_v51 = vpop.eup %1018 }
 0x1a3   : > { %v530_v53 = vsel %vm517_vm2, %v1019_v51, 0.0 }
 0x1a4   : > { %1020 = vpow2.f32 %v528_v47 }
 0x1a6   : > { %728 = vmax.xlane.f32.xlu0 %v727_v48  ;;  %v724_v49 = vpop.f32.mrf.mxu1 }
 0x1a7   : > { %v730_v50 = vsel %vm517_vm2, %v724_v49, -inf }
 0x1a8   : > { %731 = vmax.xlane.f32.xlu1 %v730_v50 }
 0x1aa   : > { %v1021_v52 = vpop.eup %1020 }
 0x1ab   : > { %v533_v54 = vsel %vm517_vm2, %v1021_v52, 0.0 }
 0x1ae   : > { %531 = vadd.xlane.f32.xlu0 %v530_v53 }
 0x1b0   : > { %534 = vadd.xlane.f32.xlu1 %v533_v54 }
 0x203   : > { %v590_v55 = vpop.xlane.xlu0 %589 }
 0x204   : > { %v594_v56 = vsub.f32 %v583_v33, %v590_v55 }
 0x206   : > { %v596_v58 = vmul.f32 1.442695, %v594_v56 }
 0x208   : > { %1022 = vpow2.f32 %v596_v58 }
 0x209   : > { %v660_v61 = vpop.xlane.xlu2 %659 }
 0x20a   : > { %v664_v62 = vsub.f32 %v653_v35, %v660_v61 }
 0x20b   : > { %v593_v1 = vpop.xlane.xlu1 %592 }
 0x20c   : > { %v666_v0 = vmul.f32 1.442695, %v664_v62  ;;  %v595_v3 = vsub.f32 %v585_v37, %v593_v1 }
 0x20e   : > { %1024 = vpow2.f32 %v666_v0  ;;  %v1023_v4 = vpop.eup %1022  ;;  %v598_v5 = vmul.f32 1.442695, %v595_v3 }
 0x20f   : > { %v600_v7 = vsel %vm517_vm2, %v1023_v4, 0.0 }
 0x210   : > { %1026 = vpow2.f32 %v598_v5  ;;  %601 = vadd.xlane.f32.xlu1 %v600_v7 }
 0x211   : > { %v663_v8 = vpop.xlane.xlu0 %662 }
 0x212   : > { %v665_v9 = vsub.f32 %v655_v41, %v663_v8  ;;  %v984_v8 = vld [vmem:[%s1239_s5 + $0x8] sm:$0xff] }
 0x213   : > { %834 = vmatpush.bf16.msra.mxu3 %v984_v8 }
 0x214   : > { %v1195_v10 = vpop.eup %1024  ;;  %v668_v11 = vmul.f32 1.442695, %v665_v9  ;;  %v983_v9 = vld [vmem:[%s1239_s5] sm:$0xff] }
 0x215   : > { %v670_v12 = vsel %vm517_vm2, %v1195_v10, 0.0 }
 0x216   : > { %1028 = vpow2.f32 %v668_v11  ;;  %671 = vadd.xlane.f32.xlu0 %v670_v12  ;;  %v1027_v13 = vpop.eup %1026 }
 0x217   : > { %v603_v14 = vsel %vm517_vm2, %v1027_v13, 0.0  ;;  %835 = vmatpush.bf16.msra.mxu3 %v983_v9 }
 0x218   : > { %604 = vadd.xlane.f32.xlu2 %v603_v14 }
 0x219   : > { %v729_v15 = vpop.xlane.xlu0 %728 }
 0x21a   : > { %v733_v16 = vsub.f32 %v722_v43, %v729_v15 }
 0x21b   : > { %v732_v19 = vpop.xlane.xlu1 %731 }
 0x21c   : > { %v1029_v17 = vpop.eup %1028  ;;  %v735_v18 = vmul.f32 1.442695, %v733_v16  ;;  %v734_v20 = vsub.f32 %v724_v49, %v732_v19 }
 0x21d   : > { %v673_v21 = vsel %vm517_vm2, %v1029_v17, 0.0 }
 0x21e   : > { %1030 = vpow2.f32 %v735_v18  ;;  %674 = vadd.xlane.f32.xlu1 %v673_v21  ;;  %v737_v22 = vmul.f32 1.442695, %v734_v20 }
 0x220   : > { %1032 = vpow2.f32 %v737_v22 }
 0x221   : > { %v532_v23 = vpop.xlane.xlu0 %531 }
 0x222   : > { %1034 = vrcp.f32 %v532_v23 }
 0x223   : > { %v535_v25 = vpop.xlane.xlu1 %534 }
 0x224   : > { %v1031_v24 = vpop.eup %1030  ;;  %1036 = vrcp.f32 %v535_v25 }
 0x225   : > { %v739_v26 = vsel %vm517_vm2, %v1031_v24, 0.0 }
 0x226   : > { %740 = vadd.xlane.f32.xlu0 %v739_v26  ;;  %v1033_v27 = vpop.eup %1032  ;;  %v1017_v26 = vld [vmem:[%s1243_s9] ss:$0 sm:$0xff] }
 0x227   : > { %v742_v28 = vsel %vm517_vm2, %v1033_v27, 0.0 }
 0x228   : > { %v1035_v29 = vpop.eup %1034  ;;  %743 = vadd.xlane.f32.xlu1 %v742_v28 }
 0x229   : > { %v538_v31 = vmul.f32 %v1035_v29, %v1019_v51 }
 0x22a   : > { %v1037_v30 = vpop.eup %1036 }
 0x22b   : > { %v539_v32 = vmul.f32 %v1037_v30, %v1021_v52 }
 0x22d   : > { %v540_v33 = vpack.c.bf16 %v539_v32, %v538_v31 }
 0x22f   : > { %956 = vmatmul.msk.bf16.vlgmr.msrb.gmra.mxu0 %vm517_vm2, %v540_v33 }
 0x230   : > { %612 = vrot.lane.b32.xlu2 %v495_v63, %s1059_s18 }
 0x23a   : > { %750 = vrot.lane.b32.xlu0 %v495_v63, %s1060_s19 }
 0x241   : > { %681 = vrot.lane.b32.xlu1 %v495_v63, %s1058_s17 }
 0x283   : > { %v602_v34 = vpop.xlane.xlu1 %601 }
 0x284   : > { %1038 = vrcp.f32 %v602_v34 }
 0x289   : > { %v672_v44 = vpop.xlane.xlu0 %671 }
 0x28a   : > { %v1039_v36 = vpop.eup %1038 }
 0x28b   : > { %v605_v35 = vpop.xlane.xlu2 %604  ;;  %v608_v38 = vmul.f32 %v1039_v36, %v1023_v4 }
 0x28c   : > { %1040 = vrcp.f32 %v605_v35 }
 0x291   : > { %v675_v43 = vpop.xlane.xlu1 %674 }
 0x292   : > { %v1041_v37 = vpop.eup %1040 }
 0x293   : > { %v609_v39 = vmul.f32 %v1041_v37, %v1027_v13  ;;  %v613_v40 = vpop.permute.xlu2 %612 }
 0x294   : > { %v618_v41 = vsel %vm544_vm3, %v613_v40, 0 }
 0x295   : > { %627 = vmatpush.bf16.msrb.mxu2 %v618_v41  ;;  %v610_v42 = vpack.c.bf16 %v609_v39, %v608_v38 }
 0x298   : > { %958 = vmatmul.msk.bf16.vlgmr.msrb.gmra.mxu2 %vm517_vm2, %v610_v42 }
 0x299   : > { %v741_v46 = vpop.xlane.xlu0 %740 }
 0x29b   : > { %v744_v45 = vpop.xlane.xlu1 %743 }
 0x29c   : > { %1042 = vrcp.f32 %v744_v45 }
 0x29d   : > { %1044 = vrcp.f32 %v741_v46 }
 0x29e   : > { %1046 = vrcp.f32 %v675_v43 }
 0x29f   : > { %1048 = vrcp.f32 %v672_v44 }
 0x2a2   : > { %v1043_v47 = vpop.eup %1042 }
 0x2a3   : > { %v1045_v48 = vpop.eup %1044  ;;  %v748_v49 = vmul.f32 %v1043_v47, %v1033_v27 }
 0x2a4   : > { %v747_v51 = vmul.f32 %v1045_v48, %v1031_v24  ;;  %v1047_v54 = vpop.eup %1046 }
 0x2a5   : > { %v1049_v55 = vpop.eup %1048  ;;  %v679_v56 = vmul.f32 %v1047_v54, %v1029_v17 }
 0x2a6   : > { %v749_v53 = vpack.c.bf16 %v748_v49, %v747_v51  ;;  %v678_v58 = vmul.f32 %v1049_v55, %v1195_v10 }
 0x2a8   : > { %v680_v60 = vpack.c.bf16 %v679_v56, %v678_v58 }
 0x2ac   : > { %v751_v50 = vpop.permute.xlu0 %750  ;;  %v557_v62 = vpop.f32.mrf.mxu0 }
 0x2ad   : > { %v756_v52 = vsel %vm544_vm3, %v751_v50, 0 }
 0x2ae   : > { %765 = vmatpush.bf16.msra.mxu2 %v756_v52 }
 0x2b1   : > { %962 = vmatmul.msk.bf16.vlgmr.msra.gmra.mxu2 %vm517_vm2, %v749_v53 }
 0x2b3   : > { %v682_v57 = vpop.permute.xlu1 %681 }
 0x2b4   : > { %v687_v59 = vsel %vm544_vm3, %v682_v57, 0  ;;  %v559_v1 = vpop.f32.mrf.mxu0 }
 0x2b5   : > { %696 = vmatpush.bf16.msra.mxu0 %v687_v59 }
 0x2b8   : > { %960 = vmatmul.msk.bf16.vlgmr.msra.gmra.mxu0 %vm517_vm2, %v680_v60 }
 0x31b   : > { %v629_v61 = vpop.f32.mrf.mxu2 }
 0x323   : > { %v631_v63 = vpop.f32.mrf.mxu2 }
 0x324   : > { %v999_v0 = vpack.i.bf16 %v631_v63, %v629_v61 }
 0x326   : > { %1000 = vrot.lane.b32.xlu2 %v999_v0, %s1061_s27 }
 0x334   : > { %v767_v2 = vpop.f32.mrf.mxu2 }
 0x335   : > { %v698_v3 = vpop.f32.mrf.mxu0 }
 0x33c   : > { %v769_v4 = vpop.f32.mrf.mxu2 }
 0x33d   : > { %v1009_v5 = vpack.i.bf16 %v769_v4, %v767_v2  ;;  %v700_v6 = vpop.f32.mrf.mxu0 }
 0x33e   : > { %v1004_v7 = vpack.i.bf16 %v700_v6, %v698_v3 }
 0x33f   : > { %1010 = vrot.lane.b32.xlu0 %v1009_v5, %s1062_s28 }
 0x340   : > { %1005 = vrot.lane.b32.xlu2 %v1004_v7, %s1063_s29 }
 0x380   : > { %v1001_v10 = vpop.permute.xlu2 %1000 }
 0x381   : > { %v1003_v12 = vunpack.i.h.bf16 %v1001_v10  ;;  %v1002_v13 = vunpack.i.l.bf16 %v1001_v10 }
 0x383   : > { %v797_v17 = vsel %vm496_vm1, %v559_v1, %v1003_v12  ;;  %v796_v18 = vsel %vm496_vm1, %v557_v62, %v1002_v13 }
 0x39a   : > { %v1006_v11 = vpop.permute.xlu2 %1005 }
 0x39b   : > { %v1008_v14 = vunpack.i.h.bf16 %v1006_v11  ;;  %v1007_v15 = vunpack.i.l.bf16 %v1006_v11 }
 0x39d   : > { %v799_v21 = vsel %vm798_vm4, %v796_v18, %v1007_v15  ;;  %v800_v22 = vsel %vm798_vm4, %v797_v17, %v1008_v14 }
 0x3b1   : > { %v1011_v16 = vpop.permute.xlu0 %1010 }
 0x3b2   : > { %v1013_v19 = vunpack.i.h.bf16 %v1011_v16  ;;  %v1012_v20 = vunpack.i.l.bf16 %v1011_v16 }
 0x3b4   : > { %v803_v23 = vsel %vm801_vm5, %v800_v22, %v1013_v19  ;;  %v802_v24 = vsel %vm801_vm5, %v799_v21, %v1012_v20 }
 0x3b5   : > { %v804_v25 = vpack.c.bf16 %v803_v23, %v802_v24 }
 0x3b7   : > { %971 = vmatmul.msk.bf16.vlgmr.msra.gmra.mxu3 %vm406_vm0, %v804_v25 }
 0x43a   : > { %v837_v27 = vpop.f32.mrf.mxu3 }
 0x43b   : > { %v838_v28 = vadd.f32 %v1017_v26, %v837_v27 }
 0x43d   : > { %v842_v29 = vpack.c.bf16 %v838_v28, %v838_v28 }
 0x43f   : > { %845 = vst.msk [vmem:[%s376_s20] sm:$0xf] %vm844_vm6, %v842_v29 }
 0x442   : > { %v839_v30 = vpop.f32.mrf.mxu3 }
 0x443   : > { %v840_v31 = vadd.f32 %v1017_v26, %v839_v30 }
 0x445   : > { %v843_v32 = vpack.c.bf16 %v840_v31, %v840_v31 }
 0x447   : > { %846 = vst.msk [vmem:[%s376_s20 + $0x4] sm:$0xf] %vm844_vm6, %v843_v32 }
 0x448 PF: > { %s20_s13 = sadd.s32 1, %s1056_s13  }
 0x449   : > { %p17_p4 = scmp.ge.s32.totalorder %s20_s13, 4  }
 0x44b   :  { %19 = sbr.rel (!%p17_p4) target bundleno = 1 (0x1), region = 93 }

// kernel: _lambda_.25
= control target key start
LH: loop header
LB: loop body
LE: loop exit
PB: predicated region body
PF: predicated region fallthrough
CT: control target
= control target key end

     0   :  { %vm35_vm0 = vcmask 261120   ;;  %s124_s1 = inlined_call_operand.vmem [shape: bf16[32,32], index: 1, kind: input, shape index: {}]   ;;  %s125_s2 = inlined_call_operand.vmem [shape: f32[1,32], index: 2, kind: input, shape index: {}]   ;;  %s126_s3 = inlined_call_operand.vmem [shape: f32[1,32], index: 3, kind: input, shape index: {}]   ;;  %s127_s0 = inlined_call_operand.vmem [shape: bf16[8,32], index: 0, kind: input, shape index: {}]   ;;  %s128_s4 = inlined_call_operand.vmem [shape: f32[8,32], index: 4, kind: output, shape index: {}]  }
   0x1   :  { %v78_v0 = vld [vmem:[%s124_s1 + $0x8] sm:$0xff]  ;;  %v77_v1 = vld [vmem:[%s124_s1] sm:$0xff] }
   0x2   :  { %45 = vmatpush.bf16.msra.mxu0 %v78_v0  ;;  %v18_v2 = vld [vmem:[%s127_s0] sm:$0xf] }
   0x3   :  { %v79_v3 = vld [vmem:[%s125_s2] ss:$0 sm:$0xff] }
   0x4   :  { %v80_v4 = vld [vmem:[%s126_s3] ss:$0 sm:$0xff] }
   0x6   :  { %46 = vmatpush.bf16.msra.mxu0 %v77_v1 }
   0x9   :  { %76 = vmatmul.msk.bf16.vlgmr.msra.gmra.mxu0 %vm35_vm0, %v18_v2 }
  0x86   :  { %v48_v5 = vpop.f32.mrf.mxu0 }
  0x87   :  { %v56_v6 = vmul.f32 %v79_v3, %v48_v5 }
  0x89   :  { %v61_v7 = vadd.f32 %v80_v4, %v56_v6 }
  0x8b   :  { %v62_v8 = vmax.f32 %v61_v7, 0.0 }
  0x8d   :  { %63 = vst.msk [vmem:[%s128_s4] sm:$0xff] %vm35_vm0, %v62_v8 }
  0x8e   :  { %v50_v9 = vpop.f32.mrf.mxu0 }

</bundles_post_ra>
